<compile_context>
chip_gen: v7x
topology: tpu7x:2x2x1
jax: 0.10.0
libtpu: 0.0.40
codegen_flags: <defaults>
</compile_context>

<pallas_src>
import math
import jax
import jax.numpy as jnp
from jax.experimental import pallas as pl
from jax.experimental.pallas import tpu as pltpu

D_IN = 768      # fc1 in / fc2 out
D_HID = 3072    # fc1 out / fc2 in
TILE_M_MAX = 256


def _round_up(x, n):
    return (x + n - 1) // n * n


def resmlp_kernel(x_ref, w1_ref, b1_ref, w2_ref, b2_ref, o_ref):
    """One grid step computes the full MLP for one TILE_M slab of tokens."""
    # fc1: bf16 operands on the MXU, f32 accumulation; bias + ReLU in f32.
    x = x_ref[...].astype(jnp.bfloat16)
    h = jnp.dot(x, w1_ref[...], preferred_element_type=jnp.float32)
    h = jnp.maximum(h + b1_ref[...], 0.0)

    # dropout(p=0.1) in eval/inference mode is the identity (no scaling).
    # TODO(synk): training-mode dropout (stateful PRNG mask) not implemented.

    # fc2: cast hidden to bf16 for the MXU, accumulate in f32, add bias.
    y = jnp.dot(h.astype(jnp.bfloat16), w2_ref[...],
                preferred_element_type=jnp.float32)
    o_ref[...] = (y + b2_ref[...]).astype(o_ref.dtype)


def res_mlp_forward(x, w1, b1, w2, b2):
    """x: (..., 768) float32 -> (..., 768) float32.

    Weights w1 (768, 3072) / w2 (3072, 768) are stored transposed vs. PyTorch
    so the kernel computes plain x @ W + b.
    """
    orig_shape = x.shape
    m = int(math.prod(orig_shape[:-1]))
    x2d = x.reshape(m, D_IN)

    # bf16 weights: native MXU dtype, halves the weight DMA.
    w1_bf = w1.astype(jnp.bfloat16)
    w2_bf = w2.astype(jnp.bfloat16)
    b1_2d = b1.reshape(1, D_HID).astype(jnp.float32)
    b2_2d = b2.reshape(1, D_IN).astype(jnp.float32)

    # Tile M; pad the flattened token count so every tile is full and a
    # multiple of 8 sublanes (zero rows are sliced away afterwards).
    if m <= TILE_M_MAX:
        tile_m = _round_up(max(m, 8), 8)
    else:
        tile_m = TILE_M_MAX
    m_pad = _round_up(m, tile_m)
    if m_pad != m:
        x2d = jnp.pad(x2d, ((0, m_pad - m), (0, 0)))

    grid = (m_pad // tile_m,)

    out = pl.pallas_call(
        resmlp_kernel,
        out_shape=jax.ShapeDtypeStruct((m_pad, D_IN), x.dtype),
        grid_spec=pltpu.PrefetchScalarGridSpec(
            num_scalar_prefetch=0,
            grid=grid,
            in_specs=[
                pl.BlockSpec((tile_m, D_IN), lambda i: (i, 0)),   # x tile
                pl.BlockSpec((D_IN, D_HID), lambda i: (0, 0)),    # W1 (resident)
                pl.BlockSpec((1, D_HID), lambda i: (0, 0)),       # b1
                pl.BlockSpec((D_HID, D_IN), lambda i: (0, 0)),    # W2 (resident)
                pl.BlockSpec((1, D_IN), lambda i: (0, 0)),        # b2
            ],
            out_specs=pl.BlockSpec((tile_m, D_IN), lambda i: (i, 0)),
        ),
        compiler_params=pltpu.CompilerParams(
            dimension_semantics=("parallel",),
            vmem_limit_bytes=48 * 1024 * 1024,   # < v7x 64 MiB physical
        ),
    )(x2d, w1_bf, b1_2d, w2_bf, b2_2d)

    if m_pad != m:
        out = out[:m]
    return out.reshape(orig_shape)


def xavier_uniform(key, fan_in, fan_out, dtype=jnp.float32):
    limit = math.sqrt(6.0 / (fan_in + fan_out))
    return jax.random.uniform(key, (fan_in, fan_out), dtype=dtype,
                              minval=-limit, maxval=limit)


def init_params(key):
    k1, k2, k3, k4 = jax.random.split(key, 4)
    # Stored as (in, out); equivalent to PyTorch's (out, in) weight transposed.
    w1 = xavier_uniform(k1, D_IN, D_HID)
    w2 = xavier_uniform(k2, D_HID, D_IN)
    b1 = 1e-6 * jax.random.normal(k3, (D_HID,))
    b2 = 1e-6 * jax.random.normal(k4, (D_IN,))
    # fc3 / swish / avgpool are unused in ResMlp.forward, so not instantiated.
    return w1, b1, w2, b2


if __name__ == "__main__":
    key = jax.random.PRNGKey(0)
    kp, kx = jax.random.split(key)
    w1, b1, w2, b2 = init_params(kp)

    # Small input consistent with the forward: batch=2, seq=8, features=768.
    x = jax.random.normal(kx, (2, 8, D_IN), dtype=jnp.float32)

    out = res_mlp_forward(x, w1, b1, w2, b2)
    out = jax.block_until_ready(out)

    # Reference that mirrors the kernel's numerics (bf16 operands, f32 acc).
    x2d_bf = x.reshape(-1, D_IN).astype(jnp.bfloat16)
    w1_bf = w1.astype(jnp.bfloat16)
    w2_bf = w2.astype(jnp.bfloat16)
    h_ref = jnp.maximum(
        jnp.dot(x2d_bf, w1_bf, preferred_element_type=jnp.float32)
        + b1.reshape(1, -1), 0.0)
    ref = (jnp.dot(h_ref.astype(jnp.bfloat16), w2_bf,
                   preferred_element_type=jnp.float32)
           + b2.reshape(1, -1)).reshape(x.shape)

    assert out.shape == x.shape
    assert jnp.allclose(out, ref, atol=1e-2, rtol=1e-2)

    print("KERNEL_OK")
</pallas_src>

<mosaic_0001>
module attributes {stable_mosaic.version = 11 : i64} {
  func.func @resmlp_kernel(%arg0: i32, %arg1: memref<16x768xf32, #tpu.memory_space<vmem>>, %arg2: memref<768x3072xbf16, #tpu.memory_space<vmem>>, %arg3: memref<1x3072xf32, #tpu.memory_space<vmem>>, %arg4: memref<3072x768xbf16, #tpu.memory_space<vmem>>, %arg5: memref<1x768xf32, #tpu.memory_space<vmem>>, %arg6: memref<16x768xf32, #tpu.memory_space<vmem>>) attributes {dimension_semantics = [#tpu.dimension_semantics<parallel>], iteration_bounds = array<i64: 1>, scalar_prefetch = 0 : i64, scratch_operands = 0 : i64, tpu.core_type = #tpu.core_type<tc>, window_params = [{transform_indices = @transform_0, window_bounds = array<i64: 16, 768>}, {pipeline_mode = #tpu.pipeline_mode<synchronous>, transform_indices = @transform_1, window_bounds = array<i64: 768, 3072>}, {pipeline_mode = #tpu.pipeline_mode<synchronous>, transform_indices = @transform_2, window_bounds = array<i64: 1, 3072>}, {pipeline_mode = #tpu.pipeline_mode<synchronous>, transform_indices = @transform_3, window_bounds = array<i64: 3072, 768>}, {pipeline_mode = #tpu.pipeline_mode<synchronous>, transform_indices = @transform_4, window_bounds = array<i64: 1, 768>}, {transform_indices = @transform_5, window_bounds = array<i64: 16, 768>}]} {
    %c0 = arith.constant 0 : index
    %c0_0 = arith.constant 0 : index
    %0 = vector.load %arg1[%c0, %c0_0] : memref<16x768xf32, #tpu.memory_space<vmem>>, vector<16x768xf32>
    %1 = arith.truncf %0 : vector<16x768xf32> to vector<16x768xbf16>
    %c0_1 = arith.constant 0 : index
    %c0_2 = arith.constant 0 : index
    %2 = vector.load %arg2[%c0_1, %c0_2] : memref<768x3072xbf16, #tpu.memory_space<vmem>>, vector<768x3072xbf16>
    %cst = arith.constant dense<0.000000e+00> : vector<16x3072xf32>
    %3 = tpu.matmul %1, %2, %cst {dimension_numbers = #tpu.dot_dimension_numbers<[1], [0], [0], [1], [0, 0, 1, 1], [], []>} : vector<16x768xbf16>, vector<768x3072xbf16>, vector<16x3072xf32> -> vector<16x3072xf32>
    %c0_3 = arith.constant 0 : index
    %c0_4 = arith.constant 0 : index
    %4 = vector.load %arg3[%c0_3, %c0_4] : memref<1x3072xf32, #tpu.memory_space<vmem>>, vector<1x3072xf32>
    %5 = vector.broadcast %4 : vector<1x3072xf32> to vector<16x3072xf32>
    %6 = arith.addf %3, %5 : vector<16x3072xf32>
    %cst_5 = arith.constant 0.000000e+00 : f32
    %7 = vector.broadcast %cst_5 : f32 to vector<16x3072xf32>
    %8 = arith.maximumf %6, %7 : vector<16x3072xf32>
    %9 = arith.truncf %8 : vector<16x3072xf32> to vector<16x3072xbf16>
    %c0_6 = arith.constant 0 : index
    %c0_7 = arith.constant 0 : index
    %10 = vector.load %arg4[%c0_6, %c0_7] : memref<3072x768xbf16, #tpu.memory_space<vmem>>, vector<3072x768xbf16>
    %cst_8 = arith.constant dense<0.000000e+00> : vector<16x768xf32>
    %11 = tpu.matmul %9, %10, %cst_8 {dimension_numbers = #tpu.dot_dimension_numbers<[1], [0], [0], [1], [0, 0, 1, 1], [], []>} : vector<16x3072xbf16>, vector<3072x768xbf16>, vector<16x768xf32> -> vector<16x768xf32>
    %c0_9 = arith.constant 0 : index
    %c0_10 = arith.constant 0 : index
    %12 = vector.load %arg5[%c0_9, %c0_10] : memref<1x768xf32, #tpu.memory_space<vmem>>, vector<1x768xf32>
    %13 = vector.broadcast %12 : vector<1x768xf32> to vector<16x768xf32>
    %14 = arith.addf %11, %13 : vector<16x768xf32>
    %c0_11 = arith.constant 0 : index
    %c0_12 = arith.constant 0 : index
    %15 = vector.load %arg6[%c0_11, %c0_12] : memref<16x768xf32, #tpu.memory_space<vmem>>, vector<16x768xf32>
    tpu.vector_store %arg6[%c0_11, %c0_12], %14 {strides = array<i32>} : memref<16x768xf32, #tpu.memory_space<vmem>>, vector<16x768xf32>,
    return
  }
  func.func @transform_0(%arg0: i32) -> (i32, i32) {
    %c0_i32 = arith.constant 0 : i32
    %c0_i32_0 = arith.constant 0 : i32
    return %arg0, %c0_i32 : i32, i32
  }
  func.func @transform_1(%arg0: i32) -> (i32, i32) {
    %c0_i32 = arith.constant 0 : i32
    %c0_i32_0 = arith.constant 0 : i32
    %c0_i32_1 = arith.constant 0 : i32
    return %c0_i32, %c0_i32_0 : i32, i32
  }
  func.func @transform_2(%arg0: i32) -> (i32, i32) {
    %c0_i32 = arith.constant 0 : i32
    %c0_i32_0 = arith.constant 0 : i32
    %c0_i32_1 = arith.constant 0 : i32
    return %c0_i32, %c0_i32_0 : i32, i32
  }
  func.func @transform_3(%arg0: i32) -> (i32, i32) {
    %c0_i32 = arith.constant 0 : i32
    %c0_i32_0 = arith.constant 0 : i32
    %c0_i32_1 = arith.constant 0 : i32
    return %c0_i32, %c0_i32_0 : i32, i32
  }
  func.func @transform_4(%arg0: i32) -> (i32, i32) {
    %c0_i32 = arith.constant 0 : i32
    %c0_i32_0 = arith.constant 0 : i32
    %c0_i32_1 = arith.constant 0 : i32
    return %c0_i32, %c0_i32_0 : i32, i32
  }
  func.func @transform_5(%arg0: i32) -> (i32, i32) {
    %c0_i32 = arith.constant 0 : i32
    %c0_i32_0 = arith.constant 0 : i32
    return %arg0, %c0_i32 : i32, i32
  }
}

</mosaic_0001>

<bundles_post_ra>
// kernel: tpu_custom_call.1
= control target key start
LH: loop header
LB: loop body
LE: loop exit
PB: predicated region body
PF: predicated region fallthrough
CT: control target
= control target key end

     0   :  { %10 = vsyncpa [#allocation3], 0  ;;  %s22156_s0 = inlined_call_operand.hbm [shape: f32[16,768], index: 0, kind: input, shape index: {}]   ;;  %s22157_s1 = inlined_call_operand.hbm [shape: bf16[768,3072], index: 1, kind: input, shape index: {}]   ;;  %s22158_s2 = inlined_call_operand.hbm [shape: f32[1,3072], index: 2, kind: input, shape index: {}]   ;;  %s22159_s3 = inlined_call_operand.hbm [shape: bf16[3072,768], index: 3, kind: input, shape index: {}]   ;;  %s22160_s4 = inlined_call_operand.hbm [shape: f32[1,768], index: 4, kind: input, shape index: {}]   ;;  %s22161_s5 = inlined_call_operand.hbm [shape: f32[16,768], index: 5, kind: output, shape index: {}]  }
   0x1   :  { %11 = vsyncpa [#allocation6], 0 }
   0x2   :  { %12 = vsyncpa [#allocation9], 0 }
   0x3   :  { %13 = vsyncpa [#allocation4], 0  ;;  %s21764_s18 = smov [#allocation5]   ;;  %s21624_s22 = scalar_lea.hbm %s22157_s1, 147456 }
   0x4   :  { %s31_s19 = sshll.u32 %s21764_s18, 4  ;;  %p21625_p0 = scmp.ne.s32.totalorder %s22157_s1, %s21624_s22  ;;  %s32_s19 = int_to_ptr.vmem [resolvable:$true] %s31_s19 }
   0x5   :  { %p21628_p1 = scmp.lt.u32.totalorder %s21624_s22, %s22157_s1 }
   0x7   :  { %p21630_p2 = pnand %p21628_p1, %p21625_p0 }
   0x9   :  { %21633 = shalt.err (!%p21630_p2)
}
   0xa   :  { %s21634_s27 = scalar_lea.vmem %s32_s19, 147456  ;;  %p21639_p4 = scmp.lt.s32.totalorder %s32_s19, %s32_s19 }
   0xb   :  { %p21635_p3 = scmp.ne.s32.totalorder %s32_s19, %s21634_s27  ;;  %p21640_p5 = scmp.lt.s32.totalorder %s21634_s27, %s21634_s27 }
   0xd   :  { %p21641_p6 = por %p21640_p5, %p21639_p4 }
   0xf   :  { %p21642_p7 = pnand %p21641_p6, %p21635_p3 }
  0x11   :  { %21645 = shalt.err (!%p21642_p7)
}
  0x12   :  { %s21765_s28 = smov 1536   ;;  %s21766_s29 = smov 96  }
  0x13   :  { %37 = dma.hbm_to_vmem [thread:$0]  %s22157_s1, 147456, %s32_s19, [#allocation6], %s21765_s28, %s21765_s28, %s21766_s29  }
  0x14   :  { %s21767_s7 = smov [#allocation8]   ;;  %s21646_s11 = scalar_lea.hbm %s22159_s3, 147456 }
  0x15   :  { %s53_s8 = sshll.u32 %s21767_s7, 4  ;;  %p21647_p8 = scmp.ne.s32.totalorder %s22159_s3, %s21646_s11  ;;  %s54_s8 = int_to_ptr.vmem [resolvable:$true] %s53_s8 }
  0x16   :  { %p21650_p9 = scmp.lt.u32.totalorder %s21646_s11, %s22159_s3 }
  0x18   :  { %p21652_p10 = pnand %p21650_p9, %p21647_p8 }
  0x1a   :  { %21655 = shalt.err (!%p21652_p10)
}
  0x1b   :  { %s21656_s16 = scalar_lea.vmem %s54_s8, 147456  ;;  %p21661_p12 = scmp.lt.s32.totalorder %s54_s8, %s54_s8 }
  0x1c   :  { %p21657_p11 = scmp.ne.s32.totalorder %s54_s8, %s21656_s16  ;;  %p21662_p13 = scmp.lt.s32.totalorder %s21656_s16, %s21656_s16 }
  0x1e   :  { %p21663_p0 = por %p21662_p13, %p21661_p12 }
  0x20   :  { %p21664_p1 = pnand %p21663_p0, %p21657_p11 }
  0x22   :  { %21667 = shalt.err (!%p21664_p1)
}
  0x23   :  { %s21768_s1 = smov 384   ;;  %s21769_s17 = smov 24  }
  0x24   :  { %59 = dma.hbm_to_vmem [thread:$0]  %s22159_s3, 147456, %s54_s8, [#allocation9], %s21768_s1, %s21768_s1, %s21769_s17  }
  0x25   :  { %s21770_s20 = smov [#allocation2]   ;;  %s21668_s24 = scalar_lea.hbm %s22156_s0, 1536 }
  0x26   :  { %s19_s21 = sshll.u32 %s21770_s20, 4  ;;  %p21669_p2 = scmp.ne.s32.totalorder %s22156_s0, %s21668_s24  ;;  %s20_s21 = int_to_ptr.vmem [resolvable:$true] %s19_s21 }
  0x27   :  { %p21672_p3 = scmp.lt.u32.totalorder %s21668_s24, %s22156_s0 }
  0x29   :  { %p21674_p4 = pnand %p21672_p3, %p21669_p2 }
  0x2b   :  { %21677 = shalt.err (!%p21674_p4)
}
  0x2c   :  { %s21678_s29 = scalar_lea.vmem %s20_s21, 1536  ;;  %p21683_p6 = scmp.lt.s32.totalorder %s20_s21, %s20_s21 }
  0x2d   :  { %p21679_p5 = scmp.ne.s32.totalorder %s20_s21, %s21678_s29  ;;  %p21684_p7 = scmp.lt.s32.totalorder %s21678_s29, %s21678_s29 }
  0x2f   :  { %p21685_p8 = por %p21684_p7, %p21683_p6 }
  0x31   :  { %p21686_p9 = pnand %p21685_p8, %p21679_p5 }
  0x33   :  { %21689 = shalt.err (!%p21686_p9)
}
  0x34   :  { %s21771_s3 = smov 768   ;;  %s21772_s30 = smov 48  }
  0x35   :  { %25 = dma.hbm_to_vmem [thread:$0]  %s22156_s0, 1536, %s20_s21, [#allocation3], %s21771_s3, %s21771_s3, %s21772_s30  }
  0x36   :  { %s21773_s8 = smov [#allocation7]   ;;  %s21774_s10 = smov [#allocation10]  }
  0x37   :  { %s44_s9 = sshll.u32 %s21773_s8, 4  ;;  %s66_s11 = sshll.u32 %s21774_s10, 4  ;;  %s45_s9 = int_to_ptr.vmem [resolvable:$true] %s44_s9  ;;  %s67_s11 = int_to_ptr.vmem [resolvable:$true] %s66_s11 }
  0x38   :  { %s21690_s14 = scalar_lea.hbm %s22158_s2, 384 }
  0x39   :  { %p21691_p10 = scmp.ne.s32.totalorder %s22158_s2, %s21690_s14  ;;  %p21694_p11 = scmp.lt.u32.totalorder %s21690_s14, %s22158_s2 }
  0x3b   :  { %p21696_p12 = pnand %p21694_p11, %p21691_p10 }
  0x3d   :  { %21699 = shalt.err (!%p21696_p12)
}
  0x3e   :  { %s21700_s0 = scalar_lea.vmem %s45_s9, 384  ;;  %p21705_p0 = scmp.lt.s32.totalorder %s45_s9, %s45_s9 }
  0x3f   :  { %p21701_p13 = scmp.ne.s32.totalorder %s45_s9, %s21700_s0  ;;  %p21706_p1 = scmp.lt.s32.totalorder %s21700_s0, %s21700_s0 }
  0x41   :  { %p21707_p2 = por %p21706_p1, %p21705_p0 }
  0x43   :  { %p21708_p3 = pnand %p21707_p2, %p21701_p13 }
  0x45   :  { %21711 = shalt.err (!%p21708_p3)
}
  0x46   :  { %47 = dma.hbm_to_vmem [thread:$0]  %s22158_s2, 384, %s45_s9, [#allocation6]  }
  0x47   :  { %s21712_s22 = scalar_lea.hbm %s22160_s4, 96 }
  0x48   :  { %p21713_p4 = scmp.ne.s32.totalorder %s22160_s4, %s21712_s22  ;;  %p21716_p5 = scmp.lt.u32.totalorder %s21712_s22, %s22160_s4 }
  0x4a   :  { %p21718_p6 = pnand %p21716_p5, %p21713_p4 }
  0x4c   :  { %21721 = shalt.err (!%p21718_p6)
}
  0x4d   :  { %s21722_s27 = scalar_lea.vmem %s67_s11, 96  ;;  %p21727_p8 = scmp.lt.s32.totalorder %s67_s11, %s67_s11 }
  0x4e   :  { %p21723_p7 = scmp.ne.s32.totalorder %s67_s11, %s21722_s27  ;;  %p21728_p9 = scmp.lt.s32.totalorder %s21722_s27, %s21722_s27 }
  0x50   :  { %p21729_p10 = por %p21728_p9, %p21727_p8 }
  0x52   :  { %p21730_p11 = pnand %p21729_p10, %p21723_p7 }
  0x54   :  { %21733 = shalt.err (!%p21730_p11)
}
  0x55   :  { %69 = dma.hbm_to_vmem [thread:$0]  %s22160_s4, 96, %s67_s11, [#allocation9]  }
  0x56   :  { %21756 = dma.done.wait [#allocation3], 1536  }
  0x57   :  { %21757 = vsyncadd [#allocation3], 4294965760 }
  0x58   :  { %21758 = dma.done.wait [#allocation6], 147840  }
  0x59   :  { %21759 = vsyncadd [#allocation6], 4294819456 }
  0x5a   :  { %21760 = dma.done.wait [#allocation9], 147552  }
  0x5b   :  { %21761 = vsyncadd [#allocation9], 4294819744  ;;  %v103_v0 = vld [vmem:[#allocation5] sm:$0xff]  ;;  %v86_v53 = vld [vmem:[#allocation2 + $0x8] sm:$0xff]  ;;  %s21775_s4 = smov [#allocation11]  }
  0x5c   :  { %v115_v1 = vld [vmem:[#allocation5 + $0x60] sm:$0xff]  ;;  %v92_v54 = vld [vmem:[#allocation2 + $0x38] sm:$0xff]  ;;  %s17270_s29 = sshll.u32 %s21775_s4, 4  ;;  %s17271_s29 = int_to_ptr.vmem [resolvable:$true] %s17270_s29 }
  0x5d   :  { %v107_v2 = vld [vmem:[#allocation5 + $0x20] sm:$0xff]  ;;  %v17285_v3 = vcombine.high %v103_v0, %v115_v1  ;;  %v17284_v5 = vcombine.low %v103_v0, %v115_v1  ;;  %v21869_v58 = vpack.c.bf16 %v92_v54, %v86_v53  ;;  %s21734_s6 = scalar_lea.vmem %s17271_s29, 1536  ;;  %p21739_p13 = scmp.lt.s32.totalorder %s17271_s29, %s17271_s29 }
  0x5e   :  { %v119_v4 = vld [vmem:[#allocation5 + $0x80] sm:$0xff]  ;;  %p21735_p12 = scmp.ne.s32.totalorder %s17271_s29, %s21734_s6  ;;  %p21740_p0 = scmp.lt.s32.totalorder %s21734_s6, %s21734_s6 }
  0x5f   :  { %v127_v6 = vld [vmem:[#allocation5 + $0xc0] sm:$0xff]  ;;  %v17293_v8 = vcombine.high %v107_v2, %v119_v4  ;;  %v17292_v9 = vcombine.low %v107_v2, %v119_v4  ;;  %7141 = vmatprep.subr.bf16.mxu1 %v17285_v3  ;;  %7173 = vmatprep.mubr.bf16.mxu1 %v21869_v58 }
  0x60   :  { %v139_v7 = vld [vmem:[#allocation5 + $0x120] sm:$0xff]  ;;  %7142 = vmatpush1.bf16.msra.mxu1 %v17284_v5  ;;  %7689 = vmatprep.mubr.bf16.mxu0 %v21869_v58  ;;  %p21741_p1 = por %p21740_p0, %p21739_p13 }
  0x61   :  { %v17309_v10 = vcombine.high %v127_v6, %v139_v7  ;;  %v131_v11 = vld [vmem:[#allocation5 + $0xe0] sm:$0xff]  ;;  %7657 = vmatprep.subr.bf16.mxu0 %v17293_v8  ;;  %v17308_v18 = vcombine.low %v127_v6, %v139_v7 }
  0x62   :  { %v143_v12 = vld [vmem:[#allocation5 + $0x140] sm:$0xff]  ;;  %7658 = vmatpush1.bf16.msra.mxu0 %v17292_v9  ;;  %p21742_p2 = pnand %p21741_p1, %p21735_p12 }
  0x63   :  { %v151_v13 = vld [vmem:[#allocation5 + $0x180] sm:$0xff]  ;;  %v17317_v14 = vcombine.high %v131_v11, %v143_v12  ;;  %7143 = vmatprep.subr.bf16.mxu1 %v17309_v10  ;;  %v17316_v19 = vcombine.low %v131_v11, %v143_v12 }
  0x64   :  { %v163_v15 = vld [vmem:[#allocation5 + $0x1e0] sm:$0xff]  ;;  %7144 = vmatpush1.bf16.msra.mxu1 %v17308_v18 }
  0x65   :  { %v155_v16 = vld [vmem:[#allocation5 + $0x1a0] sm:$0xff]  ;;  %v17333_v20 = vcombine.high %v151_v13, %v163_v15  ;;  %7659 = vmatprep.subr.bf16.mxu0 %v17317_v14  ;;  %v17332_v26 = vcombine.low %v151_v13, %v163_v15 }
  0x66   :  { %v167_v17 = vld [vmem:[#allocation5 + $0x200] sm:$0xff]  ;;  %7660 = vmatpush1.bf16.msra.mxu0 %v17316_v19 }
  0x67   :  { %v17341_v21 = vcombine.high %v155_v16, %v167_v17  ;;  %v175_v22 = vld [vmem:[#allocation5 + $0x240] sm:$0xff]  ;;  %7145 = vmatprep.subr.bf16.mxu1 %v17333_v20  ;;  %v17340_v27 = vcombine.low %v155_v16, %v167_v17 }
  0x68   :  { %v187_v23 = vld [vmem:[#allocation5 + $0x2a0] sm:$0xff]  ;;  %7146 = vmatpush1.bf16.msra.mxu1 %v17332_v26 }
  0x69   :  { %v179_v24 = vld [vmem:[#allocation5 + $0x260] sm:$0xff]  ;;  %v17357_v28 = vcombine.high %v175_v22, %v187_v23  ;;  %7661 = vmatprep.subr.bf16.mxu0 %v17341_v21  ;;  %v17356_v34 = vcombine.low %v175_v22, %v187_v23 }
  0x6a   :  { %v191_v25 = vld [vmem:[#allocation5 + $0x2c0] sm:$0xff]  ;;  %7662 = vmatpush1.bf16.msra.mxu0 %v17340_v27 }
  0x6b   :  { %v17365_v29 = vcombine.high %v179_v24, %v191_v25  ;;  %v199_v30 = vld [vmem:[#allocation5 + $0x300] sm:$0xff]  ;;  %7147 = vmatprep.subr.bf16.mxu1 %v17357_v28  ;;  %v17364_v35 = vcombine.low %v179_v24, %v191_v25 }
  0x6c   :  { %v211_v31 = vld [vmem:[#allocation5 + $0x360] sm:$0xff]  ;;  %7148 = vmatpush1.bf16.msra.mxu1 %v17356_v34 }
  0x6d   :  { %v203_v32 = vld [vmem:[#allocation5 + $0x320] sm:$0xff]  ;;  %v17381_v36 = vcombine.high %v199_v30, %v211_v31  ;;  %7663 = vmatprep.subr.bf16.mxu0 %v17365_v29  ;;  %v17380_v42 = vcombine.low %v199_v30, %v211_v31 }
  0x6e   :  { %v215_v33 = vld [vmem:[#allocation5 + $0x380] sm:$0xff]  ;;  %7664 = vmatpush1.bf16.msra.mxu0 %v17364_v35 }
  0x6f   :  { %v17389_v37 = vcombine.high %v203_v32, %v215_v33  ;;  %v223_v38 = vld [vmem:[#allocation5 + $0x3c0] sm:$0xff]  ;;  %7149 = vmatprep.subr.bf16.mxu1 %v17381_v36  ;;  %v17388_v43 = vcombine.low %v203_v32, %v215_v33 }
  0x70   :  { %v235_v39 = vld [vmem:[#allocation5 + $0x420] sm:$0xff]  ;;  %7150 = vmatpush1.bf16.msra.mxu1 %v17380_v42 }
  0x71   :  { %v227_v40 = vld [vmem:[#allocation5 + $0x3e0] sm:$0xff]  ;;  %v17405_v44 = vcombine.high %v223_v38, %v235_v39  ;;  %7665 = vmatprep.subr.bf16.mxu0 %v17389_v37  ;;  %v17404_v50 = vcombine.low %v223_v38, %v235_v39 }
  0x72   :  { %v239_v41 = vld [vmem:[#allocation5 + $0x440] sm:$0xff]  ;;  %7666 = vmatpush1.bf16.msra.mxu0 %v17388_v43 }
  0x73   :  { %v17413_v45 = vcombine.high %v227_v40, %v239_v41  ;;  %v247_v46 = vld [vmem:[#allocation5 + $0x480] sm:$0xff]  ;;  %7151 = vmatprep.subr.bf16.mxu1 %v17405_v44  ;;  %v17412_v51 = vcombine.low %v227_v40, %v239_v41 }
  0x74   :  { %v259_v47 = vld [vmem:[#allocation5 + $0x4e0] sm:$0xff]  ;;  %7152 = vmatpush1.bf16.msra.mxu1 %v17404_v50 }
  0x75   :  { %v251_v48 = vld [vmem:[#allocation5 + $0x4a0] sm:$0xff]  ;;  %v17429_v52 = vcombine.high %v247_v46, %v259_v47  ;;  %7667 = vmatprep.subr.bf16.mxu0 %v17413_v45  ;;  %v17428_v61 = vcombine.low %v247_v46, %v259_v47 }
  0x76   :  { %v263_v49 = vld [vmem:[#allocation5 + $0x500] sm:$0xff]  ;;  %7668 = vmatpush1.bf16.msra.mxu0 %v17412_v51 }
  0x77   :  { %v17437_v55 = vcombine.high %v251_v48, %v263_v49  ;;  %v271_v56 = vld [vmem:[#allocation5 + $0x540] sm:$0xff]  ;;  %7153 = vmatprep.subr.bf16.mxu1 %v17429_v52  ;;  %v17436_v62 = vcombine.low %v251_v48, %v263_v49 }
  0x78   :  { %v283_v57 = vld [vmem:[#allocation5 + $0x5a0] sm:$0xff]  ;;  %7154 = vmatpush1.bf16.msra.mxu1 %v17428_v61 }
  0x79   :  { %v275_v59 = vld [vmem:[#allocation5 + $0x560] sm:$0xff]  ;;  %v17453_v63 = vcombine.high %v271_v56, %v283_v57  ;;  %7669 = vmatprep.subr.bf16.mxu0 %v17437_v55  ;;  %v17452_v5 = vcombine.low %v271_v56, %v283_v57 }
  0x7a   :  { %v287_v60 = vld [vmem:[#allocation5 + $0x5c0] sm:$0xff]  ;;  %7670 = vmatpush1.bf16.msra.mxu0 %v17436_v62 }
  0x7b   :  { %v17461_v0 = vcombine.high %v275_v59, %v287_v60  ;;  %v295_v1 = vld [vmem:[#allocation5 + $0x600] sm:$0xff]  ;;  %7155 = vmatprep.subr.bf16.mxu1 %v17453_v63  ;;  %v17460_v6 = vcombine.low %v275_v59, %v287_v60 }
  0x7c   :  { %v307_v2 = vld [vmem:[#allocation5 + $0x660] sm:$0xff]  ;;  %7156 = vmatpush1.bf16.msra.mxu1 %v17452_v5 }
  0x7d   :  { %v299_v3 = vld [vmem:[#allocation5 + $0x620] sm:$0xff]  ;;  %v17477_v7 = vcombine.high %v295_v1, %v307_v2  ;;  %7671 = vmatprep.subr.bf16.mxu0 %v17461_v0  ;;  %v17476_v13 = vcombine.low %v295_v1, %v307_v2 }
  0x7e   :  { %v311_v4 = vld [vmem:[#allocation5 + $0x680] sm:$0xff]  ;;  %7672 = vmatpush1.bf16.msra.mxu0 %v17460_v6 }
  0x7f   :  { %v17485_v8 = vcombine.high %v299_v3, %v311_v4  ;;  %v319_v9 = vld [vmem:[#allocation5 + $0x6c0] sm:$0xff]  ;;  %7157 = vmatprep.subr.bf16.mxu1 %v17477_v7  ;;  %v17484_v14 = vcombine.low %v299_v3, %v311_v4 }
  0x80   :  { %v331_v10 = vld [vmem:[#allocation5 + $0x720] sm:$0xff]  ;;  %7158 = vmatpush1.bf16.msra.mxu1 %v17476_v13 }
  0x81   :  { %v323_v11 = vld [vmem:[#allocation5 + $0x6e0] sm:$0xff]  ;;  %v17501_v15 = vcombine.high %v319_v9, %v331_v10  ;;  %7673 = vmatprep.subr.bf16.mxu0 %v17485_v8  ;;  %v17500_v21 = vcombine.low %v319_v9, %v331_v10  ;;  %v91_v8 = vld [vmem:[#allocation2 + $0x30] sm:$0xff] }
  0x82   :  { %v335_v12 = vld [vmem:[#allocation5 + $0x740] sm:$0xff]  ;;  %7674 = vmatpush1.bf16.msra.mxu0 %v17484_v14 }
  0x83   :  { %v17509_v16 = vcombine.high %v323_v11, %v335_v12  ;;  %v343_v17 = vld [vmem:[#allocation5 + $0x780] sm:$0xff]  ;;  %7159 = vmatprep.subr.bf16.mxu1 %v17501_v15  ;;  %v17508_v22 = vcombine.low %v323_v11, %v335_v12 }
  0x84   :  { %v355_v18 = vld [vmem:[#allocation5 + $0x7e0] sm:$0xff]  ;;  %7160 = vmatpush1.bf16.msra.mxu1 %v17500_v21 }
  0x85   :  { %v347_v19 = vld [vmem:[#allocation5 + $0x7a0] sm:$0xff]  ;;  %v17525_v23 = vcombine.high %v343_v17, %v355_v18  ;;  %7675 = vmatprep.subr.bf16.mxu0 %v17509_v16  ;;  %v17524_v29 = vcombine.low %v343_v17, %v355_v18  ;;  %v88_v17 = vld [vmem:[#allocation2 + $0x18] sm:$0xff]  ;;  %v94_v18 = vld [vmem:[#allocation2 + $0x48] sm:$0xff] }
  0x86   :  { %v359_v20 = vld [vmem:[#allocation5 + $0x800] sm:$0xff]  ;;  %7676 = vmatpush1.bf16.msra.mxu0 %v17508_v22 }
  0x87   :  { %v17533_v24 = vcombine.high %v347_v19, %v359_v20  ;;  %v367_v25 = vld [vmem:[#allocation5 + $0x840] sm:$0xff]  ;;  %7161 = vmatprep.subr.bf16.mxu1 %v17525_v23  ;;  %v17532_v30 = vcombine.low %v347_v19, %v359_v20 }
  0x88   :  { %v379_v26 = vld [vmem:[#allocation5 + $0x8a0] sm:$0xff]  ;;  %7162 = vmatpush1.bf16.msra.mxu1 %v17524_v29 }
  0x89   :  { %v371_v27 = vld [vmem:[#allocation5 + $0x860] sm:$0xff]  ;;  %v17549_v31 = vcombine.high %v367_v25, %v379_v26  ;;  %7677 = vmatprep.subr.bf16.mxu0 %v17533_v24  ;;  %v17548_v37 = vcombine.low %v367_v25, %v379_v26  ;;  %v21875_v25 = vpack.c.bf16 %v94_v18, %v88_v17 }
  0x8a   :  { %v383_v28 = vld [vmem:[#allocation5 + $0x8c0] sm:$0xff]  ;;  %7678 = vmatpush1.bf16.msra.mxu0 %v17532_v30 }
  0x8b   :  { %v17557_v32 = vcombine.high %v371_v27, %v383_v28  ;;  %v391_v33 = vld [vmem:[#allocation5 + $0x900] sm:$0xff]  ;;  %7163 = vmatprep.subr.bf16.mxu1 %v17549_v31  ;;  %v17556_v38 = vcombine.low %v371_v27, %v383_v28 }
  0x8c   :  { %v403_v34 = vld [vmem:[#allocation5 + $0x960] sm:$0xff]  ;;  %7164 = vmatpush1.bf16.msra.mxu1 %v17548_v37 }
  0x8d   :  { %v395_v35 = vld [vmem:[#allocation5 + $0x920] sm:$0xff]  ;;  %v17573_v39 = vcombine.high %v391_v33, %v403_v34  ;;  %7679 = vmatprep.subr.bf16.mxu0 %v17557_v32  ;;  %v17572_v45 = vcombine.low %v391_v33, %v403_v34 }
  0x8e   :  { %v407_v36 = vld [vmem:[#allocation5 + $0x980] sm:$0xff]  ;;  %7680 = vmatpush1.bf16.msra.mxu0 %v17556_v38 }
  0x8f   :  { %v17581_v40 = vcombine.high %v395_v35, %v407_v36  ;;  %v415_v41 = vld [vmem:[#allocation5 + $0x9c0] sm:$0xff]  ;;  %7165 = vmatprep.subr.bf16.mxu1 %v17573_v39  ;;  %v17580_v46 = vcombine.low %v395_v35, %v407_v36 }
  0x90   :  { %v427_v42 = vld [vmem:[#allocation5 + $0xa20] sm:$0xff]  ;;  %7166 = vmatpush1.bf16.msra.mxu1 %v17572_v45 }
  0x91   :  { %v419_v43 = vld [vmem:[#allocation5 + $0x9e0] sm:$0xff]  ;;  %v17597_v47 = vcombine.high %v415_v41, %v427_v42  ;;  %7681 = vmatprep.subr.bf16.mxu0 %v17581_v40  ;;  %v17596_v53 = vcombine.low %v415_v41, %v427_v42 }
  0x92   :  { %v431_v44 = vld [vmem:[#allocation5 + $0xa40] sm:$0xff]  ;;  %7682 = vmatpush1.bf16.msra.mxu0 %v17580_v46 }
  0x93   :  { %v17605_v48 = vcombine.high %v419_v43, %v431_v44  ;;  %v439_v49 = vld [vmem:[#allocation5 + $0xa80] sm:$0xff]  ;;  %7167 = vmatprep.subr.bf16.mxu1 %v17597_v47  ;;  %v17604_v54 = vcombine.low %v419_v43, %v431_v44 }
  0x94   :  { %v451_v50 = vld [vmem:[#allocation5 + $0xae0] sm:$0xff]  ;;  %7168 = vmatpush1.bf16.msra.mxu1 %v17596_v53 }
  0x95   :  { %v443_v51 = vld [vmem:[#allocation5 + $0xaa0] sm:$0xff]  ;;  %v17621_v55 = vcombine.high %v439_v49, %v451_v50  ;;  %7683 = vmatprep.subr.bf16.mxu0 %v17605_v48  ;;  %v17620_v62 = vcombine.low %v439_v49, %v451_v50 }
  0x96   :  { %v455_v52 = vld [vmem:[#allocation5 + $0xb00] sm:$0xff]  ;;  %7684 = vmatpush1.bf16.msra.mxu0 %v17604_v54 }
  0x97   :  { %v17629_v56 = vcombine.high %v443_v51, %v455_v52  ;;  %v463_v57 = vld [vmem:[#allocation5 + $0xb40] sm:$0xff]  ;;  %7169 = vmatprep.subr.bf16.mxu1 %v17621_v55  ;;  %v17628_v63 = vcombine.low %v443_v51, %v455_v52 }
  0x98   :  { %v475_v59 = vld [vmem:[#allocation5 + $0xba0] sm:$0xff]  ;;  %7170 = vmatpush1.bf16.msra.mxu1 %v17620_v62 }
  0x99   :  { %v467_v60 = vld [vmem:[#allocation5 + $0xb60] sm:$0xff]  ;;  %v17645_v0 = vcombine.high %v463_v57, %v475_v59  ;;  %7685 = vmatprep.subr.bf16.mxu0 %v17629_v56  ;;  %v17644_v6 = vcombine.low %v463_v57, %v475_v59 }
  0x9a   :  { %v479_v61 = vld [vmem:[#allocation5 + $0xbc0] sm:$0xff]  ;;  %7686 = vmatpush1.bf16.msra.mxu0 %v17628_v63 }
  0x9b   :  { %v17653_v1 = vcombine.high %v467_v60, %v479_v61  ;;  %v487_v2 = vld [vmem:[#allocation5 + $0xc00] sm:$0xff]  ;;  %7171 = vmatprep.subr.bf16.mxu1 %v17645_v0  ;;  %v17652_v9 = vcombine.low %v467_v60, %v479_v61 }
  0x9c   :  { %v499_v3 = vld [vmem:[#allocation5 + $0xc60] sm:$0xff]  ;;  %7172 = vmatpush1.bf16.msra.mxu1 %v17644_v6 }
  0x9d   :  { %v491_v4 = vld [vmem:[#allocation5 + $0xc20] sm:$0xff]  ;;  %v17669_v10 = vcombine.high %v487_v2, %v499_v3  ;;  %7687 = vmatprep.subr.bf16.mxu0 %v17653_v1  ;;  %v17668_v19 = vcombine.low %v487_v2, %v499_v3 }
  0x9e   :  { %v503_v5 = vld [vmem:[#allocation5 + $0xc80] sm:$0xff]  ;;  %7688 = vmatpush1.bf16.msra.mxu0 %v17652_v9 }
  0x9f   :  { %v85_v7 = vld [vmem:[#allocation2] sm:$0xff]  ;;  %v17677_v11 = vcombine.high %v491_v4, %v503_v5  ;;  %7184 = vmatprep.subr.bf16.mxu1 %v17669_v10  ;;  %v17676_v20 = vcombine.low %v491_v4, %v503_v5 }
  0xa0   :  { %v511_v12 = vld [vmem:[#allocation5 + $0xcc0] sm:$0xff]  ;;  %v21873_v15 = vpack.c.bf16 %v91_v8, %v85_v7 }
  0xa1   :  { %v523_v13 = vld [vmem:[#allocation5 + $0xd20] sm:$0xff]  ;;  %7700 = vmatprep.subr.bf16.mxu0 %v17677_v11 }
  0xa2   :  { %v515_v14 = vld [vmem:[#allocation5 + $0xce0] sm:$0xff]  ;;  %v17693_v21 = vcombine.high %v511_v12, %v523_v13  ;;  %7174 = vmatmul.mubr.bf16.vlgmr.msra.gmra.mrb[0].mxu1 %v21873_v15  ;;  %7690 = vmatmul.mubr.bf16.vlgmr.msra.gmra.mrb[0].mxu0 %v21873_v15  ;;  %v17692_v28 = vcombine.low %v511_v12, %v523_v13 }
  0xa3   :  { %v527_v16 = vld [vmem:[#allocation5 + $0xd40] sm:$0xff]  ;;  %7185 = vmatpush1.bf16.msra.mxu1 %v17668_v19  ;;  %7701 = vmatpush1.bf16.msra.mxu0 %v17676_v20 }
  0xa4   :  { %v17701_v22 = vcombine.high %v515_v14, %v527_v16  ;;  %v535_v23 = vld [vmem:[#allocation5 + $0xd80] sm:$0xff]  ;;  %7186 = vmatprep.subr.bf16.mxu1 %v17693_v21  ;;  %v17700_v29 = vcombine.low %v515_v14, %v527_v16  ;;  %7216 = vmatprep.mubr.bf16.mxu1 %v21875_v25 }
  0xa5   :  { %v547_v24 = vld [vmem:[#allocation5 + $0xde0] sm:$0xff]  ;;  %7732 = vmatprep.mubr.bf16.mxu0 %v21875_v25 }
  0xa6   :  { %v539_v26 = vld [vmem:[#allocation5 + $0xda0] sm:$0xff]  ;;  %v17717_v30 = vcombine.high %v535_v23, %v547_v24  ;;  %7702 = vmatprep.subr.bf16.mxu0 %v17701_v22  ;;  %v17716_v36 = vcombine.low %v535_v23, %v547_v24 }
  0xa7   :  { %v551_v27 = vld [vmem:[#allocation5 + $0xe00] sm:$0xff]  ;;  %7187 = vmatpush1.bf16.msra.mxu1 %v17692_v28  ;;  %7703 = vmatpush1.bf16.msra.mxu0 %v17700_v29 }
  0xa8   :  { %v559_v31 = vld [vmem:[#allocation5 + $0xe40] sm:$0xff]  ;;  %v17725_v33 = vcombine.high %v539_v26, %v551_v27  ;;  %7188 = vmatprep.subr.bf16.mxu1 %v17717_v30  ;;  %v17724_v37 = vcombine.low %v539_v26, %v551_v27 }
  0xa9   :  { %v571_v32 = vld [vmem:[#allocation5 + $0xea0] sm:$0xff] }
  0xaa   :  { %v563_v34 = vld [vmem:[#allocation5 + $0xe60] sm:$0xff]  ;;  %v17741_v38 = vcombine.high %v559_v31, %v571_v32  ;;  %7704 = vmatprep.subr.bf16.mxu0 %v17725_v33  ;;  %v17740_v44 = vcombine.low %v559_v31, %v571_v32 }
  0xab   :  { %v575_v35 = vld [vmem:[#allocation5 + $0xec0] sm:$0xff]  ;;  %7189 = vmatpush1.bf16.msra.mxu1 %v17716_v36  ;;  %7705 = vmatpush1.bf16.msra.mxu0 %v17724_v37 }
  0xac   :  { %v583_v39 = vld [vmem:[#allocation5 + $0xf00] sm:$0xff]  ;;  %v17749_v42 = vcombine.high %v563_v34, %v575_v35  ;;  %7190 = vmatprep.subr.bf16.mxu1 %v17741_v38  ;;  %v17748_v45 = vcombine.low %v563_v34, %v575_v35 }
  0xad   :  { %v595_v40 = vld [vmem:[#allocation5 + $0xf60] sm:$0xff] }
  0xae   :  { %v587_v41 = vld [vmem:[#allocation5 + $0xf20] sm:$0xff]  ;;  %v17765_v46 = vcombine.high %v583_v39, %v595_v40  ;;  %7706 = vmatprep.subr.bf16.mxu0 %v17749_v42  ;;  %v17764_v52 = vcombine.low %v583_v39, %v595_v40 }
  0xaf   :  { %v599_v43 = vld [vmem:[#allocation5 + $0xf80] sm:$0xff]  ;;  %7191 = vmatpush1.bf16.msra.mxu1 %v17740_v44  ;;  %7707 = vmatpush1.bf16.msra.mxu0 %v17748_v45 }
  0xb0   :  { %v607_v47 = vld [vmem:[#allocation5 + $0xfc0] sm:$0xff]  ;;  %v17773_v50 = vcombine.high %v587_v41, %v599_v43  ;;  %7192 = vmatprep.subr.bf16.mxu1 %v17765_v46  ;;  %v17772_v53 = vcombine.low %v587_v41, %v599_v43 }
  0xb1   :  { %v619_v48 = vld [vmem:[#allocation5 + $0x1020] sm:$0xff] }
  0xb2   :  { %v611_v49 = vld [vmem:[#allocation5 + $0xfe0] sm:$0xff]  ;;  %v17789_v54 = vcombine.high %v607_v47, %v619_v48  ;;  %7708 = vmatprep.subr.bf16.mxu0 %v17773_v50  ;;  %v17788_v61 = vcombine.low %v607_v47, %v619_v48 }
  0xb3   :  { %v623_v51 = vld [vmem:[#allocation5 + $0x1040] sm:$0xff]  ;;  %7193 = vmatpush1.bf16.msra.mxu1 %v17764_v52  ;;  %7709 = vmatpush1.bf16.msra.mxu0 %v17772_v53 }
  0xb4   :  { %v631_v55 = vld [vmem:[#allocation5 + $0x1080] sm:$0xff]  ;;  %v17797_v59 = vcombine.high %v611_v49, %v623_v51  ;;  %7194 = vmatprep.subr.bf16.mxu1 %v17789_v54  ;;  %v17796_v62 = vcombine.low %v611_v49, %v623_v51 }
  0xb5   :  { %v643_v56 = vld [vmem:[#allocation5 + $0x10e0] sm:$0xff] }
  0xb6   :  { %v635_v57 = vld [vmem:[#allocation5 + $0x10a0] sm:$0xff]  ;;  %v17813_v63 = vcombine.high %v631_v55, %v643_v56  ;;  %7710 = vmatprep.subr.bf16.mxu0 %v17797_v59  ;;  %v17812_v5 = vcombine.low %v631_v55, %v643_v56 }
  0xb7   :  { %v647_v60 = vld [vmem:[#allocation5 + $0x1100] sm:$0xff]  ;;  %7195 = vmatpush1.bf16.msra.mxu1 %v17788_v61  ;;  %7711 = vmatpush1.bf16.msra.mxu0 %v17796_v62 }
  0xb8   :  { %v655_v0 = vld [vmem:[#allocation5 + $0x1140] sm:$0xff]  ;;  %v17821_v3 = vcombine.high %v635_v57, %v647_v60  ;;  %7196 = vmatprep.subr.bf16.mxu1 %v17813_v63  ;;  %v17820_v6 = vcombine.low %v635_v57, %v647_v60 }
  0xb9   :  { %v667_v1 = vld [vmem:[#allocation5 + $0x11a0] sm:$0xff] }
  0xba   :  { %v659_v2 = vld [vmem:[#allocation5 + $0x1160] sm:$0xff]  ;;  %v17837_v7 = vcombine.high %v655_v0, %v667_v1  ;;  %7712 = vmatprep.subr.bf16.mxu0 %v17821_v3  ;;  %v17836_v13 = vcombine.low %v655_v0, %v667_v1 }
  0xbb   :  { %v671_v4 = vld [vmem:[#allocation5 + $0x11c0] sm:$0xff]  ;;  %7197 = vmatpush1.bf16.msra.mxu1 %v17812_v5  ;;  %7713 = vmatpush1.bf16.msra.mxu0 %v17820_v6 }
  0xbc   :  { %v679_v8 = vld [vmem:[#allocation5 + $0x1200] sm:$0xff]  ;;  %v17845_v11 = vcombine.high %v659_v2, %v671_v4  ;;  %7198 = vmatprep.subr.bf16.mxu1 %v17837_v7  ;;  %v17844_v14 = vcombine.low %v659_v2, %v671_v4 }
  0xbd   :  { %v691_v9 = vld [vmem:[#allocation5 + $0x1260] sm:$0xff] }
  0xbe   :  { %v683_v10 = vld [vmem:[#allocation5 + $0x1220] sm:$0xff]  ;;  %v17861_v16 = vcombine.high %v679_v8, %v691_v9  ;;  %7714 = vmatprep.subr.bf16.mxu0 %v17845_v11  ;;  %v17860_v22 = vcombine.low %v679_v8, %v691_v9 }
  0xbf   :  { %v695_v12 = vld [vmem:[#allocation5 + $0x1280] sm:$0xff]  ;;  %7199 = vmatpush1.bf16.msra.mxu1 %v17836_v13  ;;  %7715 = vmatpush1.bf16.msra.mxu0 %v17844_v14 }
  0xc0   :  { %v703_v17 = vld [vmem:[#allocation5 + $0x12c0] sm:$0xff]  ;;  %v17869_v20 = vcombine.high %v683_v10, %v695_v12  ;;  %7200 = vmatprep.subr.bf16.mxu1 %v17861_v16  ;;  %v17868_v23 = vcombine.low %v683_v10, %v695_v12 }
  0xc1   :  { %v715_v18 = vld [vmem:[#allocation5 + $0x1320] sm:$0xff] }
  0xc2   :  { %v707_v19 = vld [vmem:[#allocation5 + $0x12e0] sm:$0xff]  ;;  %v17885_v24 = vcombine.high %v703_v17, %v715_v18  ;;  %7716 = vmatprep.subr.bf16.mxu0 %v17869_v20  ;;  %v17884_v31 = vcombine.low %v703_v17, %v715_v18  ;;  %v87_v17 = vld [vmem:[#allocation2 + $0x10] sm:$0xff] }
  0xc3   :  { %v719_v21 = vld [vmem:[#allocation5 + $0x1340] sm:$0xff]  ;;  %7201 = vmatpush1.bf16.msra.mxu1 %v17860_v22  ;;  %7717 = vmatpush1.bf16.msra.mxu0 %v17868_v23 }
  0xc4   :  { %v727_v26 = vld [vmem:[#allocation5 + $0x1380] sm:$0xff]  ;;  %v17893_v29 = vcombine.high %v707_v19, %v719_v21  ;;  %7202 = vmatprep.subr.bf16.mxu1 %v17885_v24  ;;  %v17892_v32 = vcombine.low %v707_v19, %v719_v21 }
  0xc5   :  { %v739_v27 = vld [vmem:[#allocation5 + $0x13e0] sm:$0xff] }
  0xc6   :  { %v731_v28 = vld [vmem:[#allocation5 + $0x13a0] sm:$0xff]  ;;  %v17909_v33 = vcombine.high %v727_v26, %v739_v27  ;;  %7718 = vmatprep.subr.bf16.mxu0 %v17893_v29  ;;  %v17908_v39 = vcombine.low %v727_v26, %v739_v27  ;;  %v90_v27 = vld [vmem:[#allocation2 + $0x28] sm:$0xff]  ;;  %v96_v29 = vld [vmem:[#allocation2 + $0x58] sm:$0xff] }
  0xc7   :  { %v743_v30 = vld [vmem:[#allocation5 + $0x1400] sm:$0xff]  ;;  %7203 = vmatpush1.bf16.msra.mxu1 %v17884_v31  ;;  %7719 = vmatpush1.bf16.msra.mxu0 %v17892_v32 }
  0xc8   :  { %v751_v34 = vld [vmem:[#allocation5 + $0x1440] sm:$0xff]  ;;  %v17917_v37 = vcombine.high %v731_v28, %v743_v30  ;;  %7204 = vmatprep.subr.bf16.mxu1 %v17909_v33  ;;  %v17916_v40 = vcombine.low %v731_v28, %v743_v30 }
  0xc9   :  { %v763_v35 = vld [vmem:[#allocation5 + $0x14a0] sm:$0xff] }
  0xca   :  { %v755_v36 = vld [vmem:[#allocation5 + $0x1460] sm:$0xff]  ;;  %v17933_v41 = vcombine.high %v751_v34, %v763_v35  ;;  %7720 = vmatprep.subr.bf16.mxu0 %v17917_v37  ;;  %v17932_v47 = vcombine.low %v751_v34, %v763_v35 }
  0xcb   :  { %v767_v38 = vld [vmem:[#allocation5 + $0x14c0] sm:$0xff]  ;;  %7205 = vmatpush1.bf16.msra.mxu1 %v17908_v39  ;;  %7721 = vmatpush1.bf16.msra.mxu0 %v17916_v40  ;;  %v21883_v39 = vpack.c.bf16 %v96_v29, %v90_v27 }
  0xcc   :  { %v775_v42 = vld [vmem:[#allocation5 + $0x1500] sm:$0xff]  ;;  %v17941_v45 = vcombine.high %v755_v36, %v767_v38  ;;  %7206 = vmatprep.subr.bf16.mxu1 %v17933_v41  ;;  %v17940_v48 = vcombine.low %v755_v36, %v767_v38 }
  0xcd   :  { %v787_v43 = vld [vmem:[#allocation5 + $0x1560] sm:$0xff] }
  0xce   :  { %v779_v44 = vld [vmem:[#allocation5 + $0x1520] sm:$0xff]  ;;  %v17957_v49 = vcombine.high %v775_v42, %v787_v43  ;;  %7722 = vmatprep.subr.bf16.mxu0 %v17941_v45  ;;  %v17956_v55 = vcombine.low %v775_v42, %v787_v43 }
  0xcf   :  { %v791_v46 = vld [vmem:[#allocation5 + $0x1580] sm:$0xff]  ;;  %7207 = vmatpush1.bf16.msra.mxu1 %v17932_v47  ;;  %7723 = vmatpush1.bf16.msra.mxu0 %v17940_v48 }
  0xd0   :  { %v799_v50 = vld [vmem:[#allocation5 + $0x15c0] sm:$0xff]  ;;  %v17965_v53 = vcombine.high %v779_v44, %v791_v46  ;;  %7208 = vmatprep.subr.bf16.mxu1 %v17957_v49  ;;  %v17964_v56 = vcombine.low %v779_v44, %v791_v46 }
  0xd1   :  { %v811_v51 = vld [vmem:[#allocation5 + $0x1620] sm:$0xff] }
  0xd2   :  { %v803_v52 = vld [vmem:[#allocation5 + $0x15e0] sm:$0xff]  ;;  %v17981_v57 = vcombine.high %v799_v50, %v811_v51  ;;  %7724 = vmatprep.subr.bf16.mxu0 %v17965_v53  ;;  %v17980_v0 = vcombine.low %v799_v50, %v811_v51 }
  0xd3   :  { %v815_v54 = vld [vmem:[#allocation5 + $0x1640] sm:$0xff]  ;;  %7209 = vmatpush1.bf16.msra.mxu1 %v17956_v55  ;;  %7725 = vmatpush1.bf16.msra.mxu0 %v17964_v56 }
  0xd4   :  { %v823_v59 = vld [vmem:[#allocation5 + $0x1680] sm:$0xff]  ;;  %v17989_v62 = vcombine.high %v803_v52, %v815_v54  ;;  %7210 = vmatprep.subr.bf16.mxu1 %v17981_v57  ;;  %v17988_v1 = vcombine.low %v803_v52, %v815_v54 }
  0xd5   :  { %v835_v60 = vld [vmem:[#allocation5 + $0x16e0] sm:$0xff] }
  0xd6   :  { %v827_v61 = vld [vmem:[#allocation5 + $0x16a0] sm:$0xff]  ;;  %v18005_v2 = vcombine.high %v823_v59, %v835_v60  ;;  %7726 = vmatprep.subr.bf16.mxu0 %v17989_v62  ;;  %v18004_v8 = vcombine.low %v823_v59, %v835_v60 }
  0xd7   :  { %v839_v63 = vld [vmem:[#allocation5 + $0x1700] sm:$0xff]  ;;  %7211 = vmatpush1.bf16.msra.mxu1 %v17980_v0  ;;  %7727 = vmatpush1.bf16.msra.mxu0 %v17988_v1 }
  0xd8   :  { %v847_v3 = vld [vmem:[#allocation5 + $0x1740] sm:$0xff]  ;;  %v18013_v6 = vcombine.high %v827_v61, %v839_v63  ;;  %7212 = vmatprep.subr.bf16.mxu1 %v18005_v2  ;;  %v18012_v10 = vcombine.low %v827_v61, %v839_v63 }
  0xd9   :  { %v859_v4 = vld [vmem:[#allocation5 + $0x17a0] sm:$0xff] }
  0xda   :  { %v851_v5 = vld [vmem:[#allocation5 + $0x1760] sm:$0xff]  ;;  %v18029_v11 = vcombine.high %v847_v3, %v859_v4  ;;  %7728 = vmatprep.subr.bf16.mxu0 %v18013_v6  ;;  %v18028_v19 = vcombine.low %v847_v3, %v859_v4 }
  0xdb   :  { %v863_v7 = vld [vmem:[#allocation5 + $0x17c0] sm:$0xff]  ;;  %7213 = vmatpush1.bf16.msra.mxu1 %v18004_v8  ;;  %7729 = vmatpush1.bf16.msra.mxu0 %v18012_v10 }
  0xdc   :  { %v871_v9 = vld [vmem:[#allocation5 + $0x1800] sm:$0xff]  ;;  %v18037_v16 = vcombine.high %v851_v5, %v863_v7  ;;  %7214 = vmatprep.subr.bf16.mxu1 %v18029_v11  ;;  %v18036_v22 = vcombine.low %v851_v5, %v863_v7 }
  0xdd   :  { %v883_v12 = vld [vmem:[#allocation5 + $0x1860] sm:$0xff] }
  0xde   :  { %v875_v13 = vld [vmem:[#allocation5 + $0x1820] sm:$0xff]  ;;  %v18053_v23 = vcombine.high %v871_v9, %v883_v12  ;;  %7730 = vmatprep.subr.bf16.mxu0 %v18037_v16  ;;  %v18052_v31 = vcombine.low %v871_v9, %v883_v12 }
  0xdf   :  { %v887_v14 = vld [vmem:[#allocation5 + $0x1880] sm:$0xff]  ;;  %7215 = vmatpush1.bf16.msra.mxu1 %v18028_v19  ;;  %7731 = vmatpush1.bf16.msra.mxu0 %v18036_v22 }
  0xe0   :  { %v93_v18 = vld [vmem:[#allocation2 + $0x40] sm:$0xff]  ;;  %v18061_v28 = vcombine.high %v875_v13, %v887_v14  ;;  %7227 = vmatprep.subr.bf16.mxu1 %v18053_v23  ;;  %v18060_v32 = vcombine.low %v875_v13, %v887_v14 }
  0xe1   :  { %v895_v20 = vld [vmem:[#allocation5 + $0x18c0] sm:$0xff]  ;;  %v21881_v30 = vpack.c.bf16 %v93_v18, %v87_v17 }
  0xe2   :  { %v907_v21 = vld [vmem:[#allocation5 + $0x1920] sm:$0xff]  ;;  %7743 = vmatprep.subr.bf16.mxu0 %v18061_v28 }
  0xe3   :  { %v899_v24 = vld [vmem:[#allocation5 + $0x18e0] sm:$0xff]  ;;  %v18077_v33 = vcombine.high %v895_v20, %v907_v21  ;;  %7217 = vmatmul.mubr.bf16.vlgmr.msra.gmra.mrb[0].mxu1 %v21881_v30  ;;  %7733 = vmatmul.mubr.bf16.vlgmr.msra.gmra.mrb[0].mxu0 %v21881_v30  ;;  %v18076_v40 = vcombine.low %v895_v20, %v907_v21 }
  0xe4   :  { %v911_v26 = vld [vmem:[#allocation5 + $0x1940] sm:$0xff]  ;;  %7228 = vmatpush1.bf16.msra.mxu1 %v18052_v31  ;;  %7744 = vmatpush1.bf16.msra.mxu0 %v18060_v32 }
  0xe5   :  { %v919_v34 = vld [vmem:[#allocation5 + $0x1980] sm:$0xff]  ;;  %v18085_v37 = vcombine.high %v899_v24, %v911_v26  ;;  %7229 = vmatprep.subr.bf16.mxu1 %v18077_v33  ;;  %v18084_v41 = vcombine.low %v899_v24, %v911_v26  ;;  %7259 = vmatprep.mubr.bf16.mxu1 %v21883_v39 }
  0xe6   :  { %v931_v35 = vld [vmem:[#allocation5 + $0x19e0] sm:$0xff]  ;;  %7775 = vmatprep.mubr.bf16.mxu0 %v21883_v39 }
  0xe7   :  { %v923_v36 = vld [vmem:[#allocation5 + $0x19a0] sm:$0xff]  ;;  %v18101_v42 = vcombine.high %v919_v34, %v931_v35  ;;  %7745 = vmatprep.subr.bf16.mxu0 %v18085_v37  ;;  %v18100_v48 = vcombine.low %v919_v34, %v931_v35 }
  0xe8   :  { %v935_v38 = vld [vmem:[#allocation5 + $0x1a00] sm:$0xff]  ;;  %7230 = vmatpush1.bf16.msra.mxu1 %v18076_v40  ;;  %7746 = vmatpush1.bf16.msra.mxu0 %v18084_v41 }
  0xe9   :  { %v943_v43 = vld [vmem:[#allocation5 + $0x1a40] sm:$0xff]  ;;  %v18109_v46 = vcombine.high %v923_v36, %v935_v38  ;;  %7231 = vmatprep.subr.bf16.mxu1 %v18101_v42  ;;  %v18108_v49 = vcombine.low %v923_v36, %v935_v38 }
  0xea   :  { %v955_v44 = vld [vmem:[#allocation5 + $0x1aa0] sm:$0xff] }
  0xeb   :  { %v947_v45 = vld [vmem:[#allocation5 + $0x1a60] sm:$0xff]  ;;  %v18125_v50 = vcombine.high %v943_v43, %v955_v44  ;;  %7747 = vmatprep.subr.bf16.mxu0 %v18109_v46  ;;  %v18124_v56 = vcombine.low %v943_v43, %v955_v44 }
  0xec   :  { %v959_v47 = vld [vmem:[#allocation5 + $0x1ac0] sm:$0xff]  ;;  %7232 = vmatpush1.bf16.msra.mxu1 %v18100_v48  ;;  %7748 = vmatpush1.bf16.msra.mxu0 %v18108_v49 }
  0xed   :  { %v967_v51 = vld [vmem:[#allocation5 + $0x1b00] sm:$0xff]  ;;  %v18133_v54 = vcombine.high %v947_v45, %v959_v47  ;;  %7233 = vmatprep.subr.bf16.mxu1 %v18125_v50  ;;  %v18132_v57 = vcombine.low %v947_v45, %v959_v47 }
  0xee   :  { %v979_v52 = vld [vmem:[#allocation5 + $0x1b60] sm:$0xff] }
  0xef   :  { %v971_v53 = vld [vmem:[#allocation5 + $0x1b20] sm:$0xff]  ;;  %v18149_v59 = vcombine.high %v967_v51, %v979_v52  ;;  %7749 = vmatprep.subr.bf16.mxu0 %v18133_v54  ;;  %v18148_v1 = vcombine.low %v967_v51, %v979_v52 }
  0xf0   :  { %v983_v55 = vld [vmem:[#allocation5 + $0x1b80] sm:$0xff]  ;;  %7234 = vmatpush1.bf16.msra.mxu1 %v18124_v56  ;;  %7750 = vmatpush1.bf16.msra.mxu0 %v18132_v57 }
  0xf1   :  { %v991_v60 = vld [vmem:[#allocation5 + $0x1bc0] sm:$0xff]  ;;  %v18157_v63 = vcombine.high %v971_v53, %v983_v55  ;;  %7235 = vmatprep.subr.bf16.mxu1 %v18149_v59  ;;  %v18156_v2 = vcombine.low %v971_v53, %v983_v55 }
  0xf2   :  { %v1003_v61 = vld [vmem:[#allocation5 + $0x1c20] sm:$0xff] }
  0xf3   :  { %v995_v62 = vld [vmem:[#allocation5 + $0x1be0] sm:$0xff]  ;;  %v18173_v3 = vcombine.high %v991_v60, %v1003_v61  ;;  %7751 = vmatprep.subr.bf16.mxu0 %v18157_v63  ;;  %v18172_v9 = vcombine.low %v991_v60, %v1003_v61 }
  0xf4   :  { %v1007_v0 = vld [vmem:[#allocation5 + $0x1c40] sm:$0xff]  ;;  %7236 = vmatpush1.bf16.msra.mxu1 %v18148_v1  ;;  %7752 = vmatpush1.bf16.msra.mxu0 %v18156_v2 }
  0xf5   :  { %v1015_v4 = vld [vmem:[#allocation5 + $0x1c80] sm:$0xff]  ;;  %v18181_v7 = vcombine.high %v995_v62, %v1007_v0  ;;  %7237 = vmatprep.subr.bf16.mxu1 %v18173_v3  ;;  %v18180_v10 = vcombine.low %v995_v62, %v1007_v0 }
  0xf6   :  { %v1027_v5 = vld [vmem:[#allocation5 + $0x1ce0] sm:$0xff] }
  0xf7   :  { %v1019_v6 = vld [vmem:[#allocation5 + $0x1ca0] sm:$0xff]  ;;  %v18197_v11 = vcombine.high %v1015_v4, %v1027_v5  ;;  %7753 = vmatprep.subr.bf16.mxu0 %v18181_v7  ;;  %v18196_v18 = vcombine.low %v1015_v4, %v1027_v5 }
  0xf8   :  { %v1031_v8 = vld [vmem:[#allocation5 + $0x1d00] sm:$0xff]  ;;  %7238 = vmatpush1.bf16.msra.mxu1 %v18172_v9  ;;  %7754 = vmatpush1.bf16.msra.mxu0 %v18180_v10 }
  0xf9   :  { %v1039_v12 = vld [vmem:[#allocation5 + $0x1d40] sm:$0xff]  ;;  %v18205_v16 = vcombine.high %v1019_v6, %v1031_v8  ;;  %7239 = vmatprep.subr.bf16.mxu1 %v18197_v11  ;;  %v18204_v19 = vcombine.low %v1019_v6, %v1031_v8 }
  0xfa   :  { %v1051_v13 = vld [vmem:[#allocation5 + $0x1da0] sm:$0xff] }
  0xfb   :  { %v1043_v14 = vld [vmem:[#allocation5 + $0x1d60] sm:$0xff]  ;;  %v18221_v20 = vcombine.high %v1039_v12, %v1051_v13  ;;  %7755 = vmatprep.subr.bf16.mxu0 %v18205_v16  ;;  %v18220_v27 = vcombine.low %v1039_v12, %v1051_v13 }
  0xfc   :  { %v1055_v17 = vld [vmem:[#allocation5 + $0x1dc0] sm:$0xff]  ;;  %7240 = vmatpush1.bf16.msra.mxu1 %v18196_v18  ;;  %7756 = vmatpush1.bf16.msra.mxu0 %v18204_v19 }
  0xfd   :  { %v1063_v21 = vld [vmem:[#allocation5 + $0x1e00] sm:$0xff]  ;;  %v18229_v24 = vcombine.high %v1043_v14, %v1055_v17  ;;  %7241 = vmatprep.subr.bf16.mxu1 %v18221_v20  ;;  %v18228_v28 = vcombine.low %v1043_v14, %v1055_v17 }
  0xfe   :  { %v1075_v22 = vld [vmem:[#allocation5 + $0x1e60] sm:$0xff] }
  0xff   :  { %v1067_v23 = vld [vmem:[#allocation5 + $0x1e20] sm:$0xff]  ;;  %v18245_v29 = vcombine.high %v1063_v21, %v1075_v22  ;;  %7757 = vmatprep.subr.bf16.mxu0 %v18229_v24  ;;  %v18244_v36 = vcombine.low %v1063_v21, %v1075_v22 }
 0x100   :  { %v1079_v26 = vld [vmem:[#allocation5 + $0x1e80] sm:$0xff]  ;;  %7242 = vmatpush1.bf16.msra.mxu1 %v18220_v27  ;;  %7758 = vmatpush1.bf16.msra.mxu0 %v18228_v28  ;;  %v104_v27 = vld [vmem:[#allocation5 + $0x8] sm:$0xff] }
 0x101   :  { %v1087_v31 = vld [vmem:[#allocation5 + $0x1ec0] sm:$0xff]  ;;  %v18253_v34 = vcombine.high %v1067_v23, %v1079_v26  ;;  %7243 = vmatprep.subr.bf16.mxu1 %v18245_v29  ;;  %v18252_v37 = vcombine.low %v1067_v23, %v1079_v26  ;;  %v116_v28 = vld [vmem:[#allocation5 + $0x68] sm:$0xff]  ;;  %v109_v29 = vld [vmem:[#allocation5 + $0x30] sm:$0xff] }
 0x102   :  { %v1099_v32 = vld [vmem:[#allocation5 + $0x1f20] sm:$0xff] }
 0x103   :  { %v1091_v33 = vld [vmem:[#allocation5 + $0x1ee0] sm:$0xff]  ;;  %v18269_v38 = vcombine.high %v1087_v31, %v1099_v32  ;;  %7759 = vmatprep.subr.bf16.mxu0 %v18253_v34  ;;  %v18268_v45 = vcombine.low %v1087_v31, %v1099_v32  ;;  %v121_v34 = vld [vmem:[#allocation5 + $0x90] sm:$0xff] }
 0x104   :  { %v1103_v35 = vld [vmem:[#allocation5 + $0x1f40] sm:$0xff]  ;;  %7244 = vmatpush1.bf16.msra.mxu1 %v18244_v36  ;;  %7760 = vmatpush1.bf16.msra.mxu0 %v18252_v37  ;;  %v17287_v37 = vcombine.high %v104_v27, %v116_v28 }
 0x105   :  { %v1111_v40 = vld [vmem:[#allocation5 + $0x1f80] sm:$0xff]  ;;  %v18277_v43 = vcombine.high %v1091_v33, %v1103_v35  ;;  %7245 = vmatprep.subr.bf16.mxu1 %v18269_v38  ;;  %v18276_v46 = vcombine.low %v1091_v33, %v1103_v35  ;;  %v95_v33 = vld [vmem:[#allocation2 + $0x50] sm:$0xff]  ;;  %v128_v38 = vld [vmem:[#allocation5 + $0xc8] sm:$0xff] }
 0x106   :  { %v1123_v41 = vld [vmem:[#allocation5 + $0x1fe0] sm:$0xff] }
 0x107   :  { %v1115_v42 = vld [vmem:[#allocation5 + $0x1fa0] sm:$0xff]  ;;  %v18293_v47 = vcombine.high %v1111_v40, %v1123_v41  ;;  %7761 = vmatprep.subr.bf16.mxu0 %v18277_v43  ;;  %v18292_v53 = vcombine.low %v1111_v40, %v1123_v41  ;;  %v140_v40 = vld [vmem:[#allocation5 + $0x128] sm:$0xff]  ;;  %v133_v41 = vld [vmem:[#allocation5 + $0xf0] sm:$0xff] }
 0x108   :  { %v1127_v44 = vld [vmem:[#allocation5 + $0x2000] sm:$0xff]  ;;  %7246 = vmatpush1.bf16.msra.mxu1 %v18268_v45  ;;  %7762 = vmatpush1.bf16.msra.mxu0 %v18276_v46  ;;  %v145_v43 = vld [vmem:[#allocation5 + $0x150] sm:$0xff]  ;;  %v17286_v45 = vcombine.low %v104_v27, %v116_v28  ;;  %v17296_v46 = vcombine.low %v109_v29, %v121_v34  ;;  %v272_v27 = vld [vmem:[#allocation5 + $0x548] sm:$0xff] }
 0x109   :  { %v1135_v48 = vld [vmem:[#allocation5 + $0x2040] sm:$0xff]  ;;  %v18301_v51 = vcombine.high %v1115_v42, %v1127_v44  ;;  %7247 = vmatprep.subr.bf16.mxu1 %v18293_v47  ;;  %v18300_v54 = vcombine.low %v1115_v42, %v1127_v44  ;;  %v17297_v42 = vcombine.high %v109_v29, %v121_v34  ;;  %v17311_v47 = vcombine.high %v128_v38, %v140_v40  ;;  %v284_v28 = vld [vmem:[#allocation5 + $0x5a8] sm:$0xff]  ;;  %v277_v29 = vld [vmem:[#allocation5 + $0x570] sm:$0xff] }
 0x10a   :  { %v1147_v49 = vld [vmem:[#allocation5 + $0x20a0] sm:$0xff] }
 0x10b   :  { %v1139_v50 = vld [vmem:[#allocation5 + $0x2060] sm:$0xff]  ;;  %v18317_v55 = vcombine.high %v1135_v48, %v1147_v49  ;;  %7763 = vmatprep.subr.bf16.mxu0 %v18301_v51  ;;  %v18316_v62 = vcombine.low %v1135_v48, %v1147_v49  ;;  %v152_v48 = vld [vmem:[#allocation5 + $0x188] sm:$0xff]  ;;  %v17321_v51 = vcombine.high %v133_v41, %v145_v43 }
 0x10c   :  { %v1151_v52 = vld [vmem:[#allocation5 + $0x20c0] sm:$0xff]  ;;  %7248 = vmatpush1.bf16.msra.mxu1 %v18292_v53  ;;  %7764 = vmatpush1.bf16.msra.mxu0 %v18300_v54  ;;  %v164_v49 = vld [vmem:[#allocation5 + $0x1e8] sm:$0xff]  ;;  %v17310_v53 = vcombine.low %v128_v38, %v140_v40  ;;  %v17320_v54 = vcombine.low %v133_v41, %v145_v43  ;;  %v301_v38 = vld [vmem:[#allocation5 + $0x630] sm:$0xff] }
 0x10d   :  { %v1159_v56 = vld [vmem:[#allocation5 + $0x2100] sm:$0xff]  ;;  %v18325_v60 = vcombine.high %v1139_v50, %v1151_v52  ;;  %7249 = vmatprep.subr.bf16.mxu1 %v18317_v55  ;;  %v18324_v63 = vcombine.low %v1139_v50, %v1151_v52  ;;  %v157_v50 = vld [vmem:[#allocation5 + $0x1b0] sm:$0xff]  ;;  %v17335_v55 = vcombine.high %v152_v48, %v164_v49 }
 0x10e   :  { %v1171_v57 = vld [vmem:[#allocation5 + $0x2160] sm:$0xff]  ;;  %v169_v52 = vld [vmem:[#allocation5 + $0x210] sm:$0xff] }
 0x10f   :  { %v1163_v59 = vld [vmem:[#allocation5 + $0x2120] sm:$0xff]  ;;  %v18341_v0 = vcombine.high %v1159_v56, %v1171_v57  ;;  %7765 = vmatprep.subr.bf16.mxu0 %v18325_v60  ;;  %v18340_v6 = vcombine.low %v1159_v56, %v1171_v57  ;;  %v176_v56 = vld [vmem:[#allocation5 + $0x248] sm:$0xff]  ;;  %v17345_v60 = vcombine.high %v157_v50, %v169_v52  ;;  %v313_v41 = vld [vmem:[#allocation5 + $0x690] sm:$0xff] }
 0x110   :  { %v1175_v61 = vld [vmem:[#allocation5 + $0x2180] sm:$0xff]  ;;  %7250 = vmatpush1.bf16.msra.mxu1 %v18316_v62  ;;  %7766 = vmatpush1.bf16.msra.mxu0 %v18324_v63  ;;  %v188_v57 = vld [vmem:[#allocation5 + $0x2a8] sm:$0xff]  ;;  %v17334_v62 = vcombine.low %v152_v48, %v164_v49  ;;  %v17344_v63 = vcombine.low %v157_v50, %v169_v52  ;;  %v325_v48 = vld [vmem:[#allocation5 + $0x6f0] sm:$0xff]  ;;  %v17489_v49 = vcombine.high %v301_v38, %v313_v41 }
 0x111   :  { %v1183_v1 = vld [vmem:[#allocation5 + $0x21c0] sm:$0xff]  ;;  %v18349_v4 = vcombine.high %v1163_v59, %v1175_v61  ;;  %7251 = vmatprep.subr.bf16.mxu1 %v18341_v0  ;;  %v18348_v7 = vcombine.low %v1163_v59, %v1175_v61  ;;  %v181_v59 = vld [vmem:[#allocation5 + $0x270] sm:$0xff]  ;;  %v17359_v0 = vcombine.high %v176_v56, %v188_v57  ;;  %v17488_v52 = vcombine.low %v301_v38, %v313_v41 }
 0x112   :  { %v1195_v2 = vld [vmem:[#allocation5 + $0x2220] sm:$0xff]  ;;  %v193_v61 = vld [vmem:[#allocation5 + $0x2d0] sm:$0xff] }
 0x113   :  { %v1187_v3 = vld [vmem:[#allocation5 + $0x21e0] sm:$0xff]  ;;  %v18365_v8 = vcombine.high %v1183_v1, %v1195_v2  ;;  %7767 = vmatprep.subr.bf16.mxu0 %v18349_v4  ;;  %v18364_v14 = vcombine.low %v1183_v1, %v1195_v2  ;;  %v200_v1 = vld [vmem:[#allocation5 + $0x308] sm:$0xff]  ;;  %v17369_v4 = vcombine.high %v181_v59, %v193_v61  ;;  %v337_v50 = vld [vmem:[#allocation5 + $0x750] sm:$0xff] }
 0x114   :  { %v1199_v5 = vld [vmem:[#allocation5 + $0x2240] sm:$0xff]  ;;  %7252 = vmatpush1.bf16.msra.mxu1 %v18340_v6  ;;  %7768 = vmatpush1.bf16.msra.mxu0 %v18348_v7  ;;  %v212_v2 = vld [vmem:[#allocation5 + $0x368] sm:$0xff]  ;;  %v17358_v6 = vcombine.low %v176_v56, %v188_v57  ;;  %v17368_v7 = vcombine.low %v181_v59, %v193_v61  ;;  %v349_v56 = vld [vmem:[#allocation5 + $0x7b0] sm:$0xff]  ;;  %v17513_v57 = vcombine.high %v325_v48, %v337_v50 }
 0x115   :  { %v1207_v9 = vld [vmem:[#allocation5 + $0x2280] sm:$0xff]  ;;  %v18373_v12 = vcombine.high %v1187_v3, %v1199_v5  ;;  %7253 = vmatprep.subr.bf16.mxu1 %v18365_v8  ;;  %v18372_v16 = vcombine.low %v1187_v3, %v1199_v5  ;;  %v205_v3 = vld [vmem:[#allocation5 + $0x330] sm:$0xff]  ;;  %v17383_v8 = vcombine.high %v200_v1, %v212_v2  ;;  %v17512_v61 = vcombine.low %v325_v48, %v337_v50 }
 0x116   :  { %v1219_v10 = vld [vmem:[#allocation5 + $0x22e0] sm:$0xff]  ;;  %v217_v5 = vld [vmem:[#allocation5 + $0x390] sm:$0xff] }
 0x117   :  { %v1211_v11 = vld [vmem:[#allocation5 + $0x22a0] sm:$0xff]  ;;  %v18389_v17 = vcombine.high %v1207_v9, %v1219_v10  ;;  %7769 = vmatprep.subr.bf16.mxu0 %v18373_v12  ;;  %v18388_v23 = vcombine.low %v1207_v9, %v1219_v10  ;;  %v224_v9 = vld [vmem:[#allocation5 + $0x3c8] sm:$0xff]  ;;  %v17393_v12 = vcombine.high %v205_v3, %v217_v5  ;;  %v361_v59 = vld [vmem:[#allocation5 + $0x810] sm:$0xff] }
 0x118   :  { %v1223_v13 = vld [vmem:[#allocation5 + $0x2300] sm:$0xff]  ;;  %7254 = vmatpush1.bf16.msra.mxu1 %v18364_v14  ;;  %7770 = vmatpush1.bf16.msra.mxu0 %v18372_v16  ;;  %v236_v10 = vld [vmem:[#allocation5 + $0x428] sm:$0xff]  ;;  %v17382_v14 = vcombine.low %v200_v1, %v212_v2  ;;  %v17392_v16 = vcombine.low %v205_v3, %v217_v5  ;;  %v373_v1 = vld [vmem:[#allocation5 + $0x870] sm:$0xff]  ;;  %v17537_v2 = vcombine.high %v349_v56, %v361_v59 }
 0x119   :  { %v1231_v18 = vld [vmem:[#allocation5 + $0x2340] sm:$0xff]  ;;  %v18397_v21 = vcombine.high %v1211_v11, %v1223_v13  ;;  %7255 = vmatprep.subr.bf16.mxu1 %v18389_v17  ;;  %v18396_v24 = vcombine.low %v1211_v11, %v1223_v13  ;;  %v229_v11 = vld [vmem:[#allocation5 + $0x3f0] sm:$0xff]  ;;  %v17407_v17 = vcombine.high %v224_v9, %v236_v10  ;;  %v17536_v5 = vcombine.low %v349_v56, %v361_v59 }
 0x11a   :  { %v1243_v19 = vld [vmem:[#allocation5 + $0x23a0] sm:$0xff]  ;;  %v241_v13 = vld [vmem:[#allocation5 + $0x450] sm:$0xff] }
 0x11b   :  { %v1235_v20 = vld [vmem:[#allocation5 + $0x2360] sm:$0xff]  ;;  %v18413_v26 = vcombine.high %v1231_v18, %v1243_v19  ;;  %7771 = vmatprep.subr.bf16.mxu0 %v18397_v21  ;;  %v18412_v35 = vcombine.low %v1231_v18, %v1243_v19  ;;  %v248_v18 = vld [vmem:[#allocation5 + $0x488] sm:$0xff]  ;;  %v17417_v21 = vcombine.high %v229_v11, %v241_v13  ;;  %v385_v3 = vld [vmem:[#allocation5 + $0x8d0] sm:$0xff] }
 0x11c   :  { %v1247_v22 = vld [vmem:[#allocation5 + $0x23c0] sm:$0xff]  ;;  %7256 = vmatpush1.bf16.msra.mxu1 %v18388_v23  ;;  %7772 = vmatpush1.bf16.msra.mxu0 %v18396_v24  ;;  %v260_v19 = vld [vmem:[#allocation5 + $0x4e8] sm:$0xff]  ;;  %v17406_v23 = vcombine.low %v224_v9, %v236_v10  ;;  %v17416_v24 = vcombine.low %v229_v11, %v241_v13  ;;  %v397_v9 = vld [vmem:[#allocation5 + $0x930] sm:$0xff]  ;;  %v17561_v10 = vcombine.high %v373_v1, %v385_v3 }
 0x11d   :  { %v18421_v31 = vcombine.high %v1235_v20, %v1247_v22  ;;  %v89_v32 = vld [vmem:[#allocation2 + $0x20] sm:$0xff]  ;;  %7257 = vmatprep.subr.bf16.mxu1 %v18413_v26  ;;  %v18420_v36 = vcombine.low %v1235_v20, %v1247_v22  ;;  %v253_v20 = vld [vmem:[#allocation5 + $0x4b0] sm:$0xff]  ;;  %v17431_v26 = vcombine.high %v248_v18, %v260_v19  ;;  %v17560_v13 = vcombine.low %v373_v1, %v385_v3 }
 0x11e   :  { %v21889_v44 = vpack.c.bf16 %v95_v33, %v89_v32  ;;  %v265_v22 = vld [vmem:[#allocation5 + $0x510] sm:$0xff]  ;;  %v17430_v33 = vcombine.low %v248_v18, %v260_v19 }
 0x11f   :  { %7773 = vmatprep.subr.bf16.mxu0 %v18421_v31  ;;  %v17441_v31 = vcombine.high %v253_v20, %v265_v22  ;;  %v289_v32 = vld [vmem:[#allocation5 + $0x5d0] sm:$0xff]  ;;  %v17440_v34 = vcombine.low %v253_v20, %v265_v22 }
 0x120   :  { %7258 = vmatpush1.bf16.msra.mxu1 %v18412_v35  ;;  %7774 = vmatpush1.bf16.msra.mxu0 %v18420_v36  ;;  %v17455_v35 = vcombine.high %v272_v27, %v284_v28  ;;  %v296_v36 = vld [vmem:[#allocation5 + $0x608] sm:$0xff]  ;;  %v17465_v40 = vcombine.high %v277_v29, %v289_v32  ;;  %v17464_v43 = vcombine.low %v277_v29, %v289_v32  ;;  %v409_v11 = vld [vmem:[#allocation5 + $0x990] sm:$0xff] }
 0x121   :  { %7270 = vmatprep.subr.bf16.mxu1 %v17287_v37  ;;  %7915 = vmatprep.subr.bf16.mxu0 %v17297_v42  ;;  %v308_v37 = vld [vmem:[#allocation5 + $0x668] sm:$0xff]  ;;  %v17454_v42 = vcombine.low %v272_v27, %v284_v28  ;;  %v421_v18 = vld [vmem:[#allocation5 + $0x9f0] sm:$0xff]  ;;  %v17585_v19 = vcombine.high %v397_v9, %v409_v11  ;;  %v17584_v22 = vcombine.low %v397_v9, %v409_v11 }
 0x122   :  { %v433_v20 = vld [vmem:[#allocation5 + $0xa50] sm:$0xff] }
 0x123   :  { %7260 = vmatmul.mubr.bf16.vlgmr.msra.gmra.mrb[0].mxu1 %v21889_v44  ;;  %7776 = vmatmul.mubr.bf16.vlgmr.msra.gmra.mrb[0].mxu0 %v21889_v44  ;;  %v445_v27 = vld [vmem:[#allocation5 + $0xab0] sm:$0xff]  ;;  %v17609_v28 = vcombine.high %v421_v18, %v433_v20  ;;  %v17608_v32 = vcombine.low %v421_v18, %v433_v20 }
 0x124   :  { %7271 = vmatpush1.bf16.msra.mxu1 %v17286_v45  ;;  %7916 = vmatpush1.bf16.msra.mxu0 %v17296_v46  ;;  %v17479_v45 = vcombine.high %v296_v36, %v308_v37  ;;  %v320_v46 = vld [vmem:[#allocation5 + $0x6c8] sm:$0xff]  ;;  %v457_v29 = vld [vmem:[#allocation5 + $0xb10] sm:$0xff] }
 0x125   :  { %7272 = vmatprep.subr.bf16.mxu1 %v17311_v47  ;;  %7917 = vmatprep.subr.bf16.mxu0 %v17321_v51  ;;  %v332_v47 = vld [vmem:[#allocation5 + $0x728] sm:$0xff]  ;;  %v17478_v51 = vcombine.low %v296_v36, %v308_v37  ;;  %v469_v36 = vld [vmem:[#allocation5 + $0xb70] sm:$0xff]  ;;  %v17633_v37 = vcombine.high %v445_v27, %v457_v29  ;;  %v17632_v41 = vcombine.low %v445_v27, %v457_v29 }
 0x126   :  { %7302 = vmatprep.mubr.bf16.mxu1 %v21869_v58  ;;  %7947 = vmatprep.mubr.bf16.mxu0 %v21869_v58  ;;  %v481_v38 = vld [vmem:[#allocation5 + $0xbd0] sm:$0xff] }
 0x127   :  { %v505_v48 = vld [vmem:[#allocation5 + $0xc90] sm:$0xff]  ;;  %v17656_v50 = vcombine.low %v469_v36, %v481_v38 }
 0x128   :  { %7273 = vmatpush1.bf16.msra.mxu1 %v17310_v53  ;;  %7918 = vmatpush1.bf16.msra.mxu0 %v17320_v54  ;;  %v17503_v53 = vcombine.high %v320_v46, %v332_v47  ;;  %v344_v54 = vld [vmem:[#allocation5 + $0x788] sm:$0xff]  ;;  %v529_v56 = vld [vmem:[#allocation5 + $0xd50] sm:$0xff] }
 0x129   :  { %7274 = vmatprep.subr.bf16.mxu1 %v17335_v55  ;;  %7919 = vmatprep.subr.bf16.mxu0 %v17345_v60  ;;  %v356_v55 = vld [vmem:[#allocation5 + $0x7e8] sm:$0xff]  ;;  %v17502_v60 = vcombine.low %v320_v46, %v332_v47  ;;  %v493_v46 = vld [vmem:[#allocation5 + $0xc30] sm:$0xff]  ;;  %v17657_v47 = vcombine.high %v469_v36, %v481_v38 }
 0x12a   :  { %v17680_v59 = vcombine.low %v493_v46, %v505_v48  ;;  %v553_v1 = vld [vmem:[#allocation5 + $0xe10] sm:$0xff] }
 0x12b   :  { %v577_v9 = vld [vmem:[#allocation5 + $0xed0] sm:$0xff] }
 0x12c   :  { %7275 = vmatpush1.bf16.msra.mxu1 %v17334_v62  ;;  %7920 = vmatpush1.bf16.msra.mxu0 %v17344_v63  ;;  %v17527_v62 = vcombine.high %v344_v54, %v356_v55  ;;  %v368_v63 = vld [vmem:[#allocation5 + $0x848] sm:$0xff]  ;;  %v601_v18 = vld [vmem:[#allocation5 + $0xf90] sm:$0xff] }
 0x12d   :  { %7276 = vmatprep.subr.bf16.mxu1 %v17359_v0  ;;  %7921 = vmatprep.subr.bf16.mxu0 %v17369_v4  ;;  %v380_v0 = vld [vmem:[#allocation5 + $0x8a8] sm:$0xff]  ;;  %v17526_v4 = vcombine.low %v344_v54, %v356_v55  ;;  %v517_v54 = vld [vmem:[#allocation5 + $0xcf0] sm:$0xff]  ;;  %v17681_v55 = vcombine.high %v493_v46, %v505_v48 }
 0x12e   :  { %v17704_v3 = vcombine.low %v517_v54, %v529_v56  ;;  %v625_v27 = vld [vmem:[#allocation5 + $0x1050] sm:$0xff] }
 0x12f   :  { %v649_v36 = vld [vmem:[#allocation5 + $0x1110] sm:$0xff] }
 0x130   :  { %7277 = vmatpush1.bf16.msra.mxu1 %v17358_v6  ;;  %7922 = vmatpush1.bf16.msra.mxu0 %v17368_v7  ;;  %v17551_v6 = vcombine.high %v368_v63, %v380_v0  ;;  %v392_v7 = vld [vmem:[#allocation5 + $0x908] sm:$0xff]  ;;  %v673_v46 = vld [vmem:[#allocation5 + $0x11d0] sm:$0xff] }
 0x131   :  { %7278 = vmatprep.subr.bf16.mxu1 %v17383_v8  ;;  %7923 = vmatprep.subr.bf16.mxu0 %v17393_v12  ;;  %v404_v8 = vld [vmem:[#allocation5 + $0x968] sm:$0xff]  ;;  %v17550_v12 = vcombine.low %v368_v63, %v380_v0  ;;  %v541_v63 = vld [vmem:[#allocation5 + $0xdb0] sm:$0xff]  ;;  %v17705_v0 = vcombine.high %v517_v54, %v529_v56 }
 0x132   :  { %v17728_v11 = vcombine.low %v541_v63, %v553_v1  ;;  %v697_v54 = vld [vmem:[#allocation5 + $0x1290] sm:$0xff] }
 0x134   :  { %7279 = vmatpush1.bf16.msra.mxu1 %v17382_v14  ;;  %7924 = vmatpush1.bf16.msra.mxu0 %v17392_v16  ;;  %v17575_v14 = vcombine.high %v392_v7, %v404_v8  ;;  %v416_v16 = vld [vmem:[#allocation5 + $0x9c8] sm:$0xff] }
 0x135   :  { %7280 = vmatprep.subr.bf16.mxu1 %v17407_v17  ;;  %7925 = vmatprep.subr.bf16.mxu0 %v17417_v21  ;;  %v428_v17 = vld [vmem:[#allocation5 + $0xa28] sm:$0xff]  ;;  %v17574_v21 = vcombine.low %v392_v7, %v404_v8  ;;  %v565_v7 = vld [vmem:[#allocation5 + $0xe70] sm:$0xff]  ;;  %v17729_v8 = vcombine.high %v541_v63, %v553_v1 }
 0x136   :  { %v17752_v20 = vcombine.low %v565_v7, %v577_v9  ;;  %v721_v63 = vld [vmem:[#allocation5 + $0x1350] sm:$0xff] }
 0x138   :  { %7281 = vmatpush1.bf16.msra.mxu1 %v17406_v23  ;;  %7926 = vmatpush1.bf16.msra.mxu0 %v17416_v24  ;;  %v17599_v23 = vcombine.high %v416_v16, %v428_v17  ;;  %v440_v24 = vld [vmem:[#allocation5 + $0xa88] sm:$0xff] }
 0x139   :  { %7282 = vmatprep.subr.bf16.mxu1 %v17431_v26  ;;  %7927 = vmatprep.subr.bf16.mxu0 %v17441_v31  ;;  %v452_v26 = vld [vmem:[#allocation5 + $0xae8] sm:$0xff]  ;;  %v17598_v31 = vcombine.low %v416_v16, %v428_v17  ;;  %v589_v16 = vld [vmem:[#allocation5 + $0xf30] sm:$0xff]  ;;  %v17753_v17 = vcombine.high %v565_v7, %v577_v9 }
 0x13a   :  { %v17776_v29 = vcombine.low %v589_v16, %v601_v18  ;;  %v745_v7 = vld [vmem:[#allocation5 + $0x1410] sm:$0xff] }
 0x13c   :  { %7283 = vmatpush1.bf16.msra.mxu1 %v17430_v33  ;;  %7928 = vmatpush1.bf16.msra.mxu0 %v17440_v34  ;;  %v17623_v33 = vcombine.high %v440_v24, %v452_v26  ;;  %v464_v34 = vld [vmem:[#allocation5 + $0xb48] sm:$0xff] }
 0x13d   :  { %7284 = vmatprep.subr.bf16.mxu1 %v17455_v35  ;;  %7929 = vmatprep.subr.bf16.mxu0 %v17465_v40  ;;  %v476_v35 = vld [vmem:[#allocation5 + $0xba8] sm:$0xff]  ;;  %v17622_v40 = vcombine.low %v440_v24, %v452_v26  ;;  %v613_v24 = vld [vmem:[#allocation5 + $0xff0] sm:$0xff]  ;;  %v17777_v26 = vcombine.high %v589_v16, %v601_v18 }
 0x13e   :  { %v17800_v38 = vcombine.low %v613_v24, %v625_v27  ;;  %v769_v16 = vld [vmem:[#allocation5 + $0x14d0] sm:$0xff] }
 0x140   :  { %7285 = vmatpush1.bf16.msra.mxu1 %v17454_v42  ;;  %7930 = vmatpush1.bf16.msra.mxu0 %v17464_v43  ;;  %v17647_v42 = vcombine.high %v464_v34, %v476_v35  ;;  %v488_v43 = vld [vmem:[#allocation5 + $0xc08] sm:$0xff] }
 0x141   :  { %7286 = vmatprep.subr.bf16.mxu1 %v17479_v45  ;;  %7931 = vmatprep.subr.bf16.mxu0 %v17489_v49  ;;  %v500_v45 = vld [vmem:[#allocation5 + $0xc68] sm:$0xff]  ;;  %v17646_v49 = vcombine.low %v464_v34, %v476_v35  ;;  %v637_v34 = vld [vmem:[#allocation5 + $0x10b0] sm:$0xff]  ;;  %v17801_v35 = vcombine.high %v613_v24, %v625_v27 }
 0x142   :  { %v17824_v48 = vcombine.low %v637_v34, %v649_v36  ;;  %v793_v24 = vld [vmem:[#allocation5 + $0x1590] sm:$0xff] }
 0x144   :  { %7287 = vmatpush1.bf16.msra.mxu1 %v17478_v51  ;;  %7932 = vmatpush1.bf16.msra.mxu0 %v17488_v52  ;;  %v17671_v51 = vcombine.high %v488_v43, %v500_v45  ;;  %v512_v52 = vld [vmem:[#allocation5 + $0xcc8] sm:$0xff] }
 0x145   :  { %7288 = vmatprep.subr.bf16.mxu1 %v17503_v53  ;;  %7933 = vmatprep.subr.bf16.mxu0 %v17513_v57  ;;  %v524_v53 = vld [vmem:[#allocation5 + $0xd28] sm:$0xff]  ;;  %v17670_v57 = vcombine.low %v488_v43, %v500_v45  ;;  %v17825_v43 = vcombine.high %v637_v34, %v649_v36  ;;  %v661_v45 = vld [vmem:[#allocation5 + $0x1170] sm:$0xff] }
 0x146   :  { %v17848_v56 = vcombine.low %v661_v45, %v673_v46  ;;  %v817_v34 = vld [vmem:[#allocation5 + $0x1650] sm:$0xff] }
 0x148   :  { %7289 = vmatpush1.bf16.msra.mxu1 %v17502_v60  ;;  %7934 = vmatpush1.bf16.msra.mxu0 %v17512_v61  ;;  %v17695_v60 = vcombine.high %v512_v52, %v524_v53  ;;  %v536_v61 = vld [vmem:[#allocation5 + $0xd88] sm:$0xff] }
 0x149   :  { %7290 = vmatprep.subr.bf16.mxu1 %v17527_v62  ;;  %7935 = vmatprep.subr.bf16.mxu0 %v17537_v2  ;;  %v548_v62 = vld [vmem:[#allocation5 + $0xde8] sm:$0xff]  ;;  %v17694_v2 = vcombine.low %v512_v52, %v524_v53  ;;  %v685_v52 = vld [vmem:[#allocation5 + $0x1230] sm:$0xff]  ;;  %v17849_v53 = vcombine.high %v661_v45, %v673_v46 }
 0x14a   :  { %v17872_v1 = vcombine.low %v685_v52, %v697_v54 }
 0x14c   :  { %7291 = vmatpush1.bf16.msra.mxu1 %v17526_v4  ;;  %7936 = vmatpush1.bf16.msra.mxu0 %v17536_v5  ;;  %v17719_v4 = vcombine.high %v536_v61, %v548_v62  ;;  %v560_v5 = vld [vmem:[#allocation5 + $0xe48] sm:$0xff] }
 0x14d   :  { %7292 = vmatprep.subr.bf16.mxu1 %v17551_v6  ;;  %7937 = vmatprep.subr.bf16.mxu0 %v17561_v10  ;;  %v572_v6 = vld [vmem:[#allocation5 + $0xea8] sm:$0xff]  ;;  %v17718_v10 = vcombine.low %v536_v61, %v548_v62  ;;  %v709_v61 = vld [vmem:[#allocation5 + $0x12f0] sm:$0xff]  ;;  %v17873_v62 = vcombine.high %v685_v52, %v697_v54 }
 0x14e   :  { %v17896_v9 = vcombine.low %v709_v61, %v721_v63  ;;  %v865_v52 = vld [vmem:[#allocation5 + $0x17d0] sm:$0xff] }
 0x150   :  { %7293 = vmatpush1.bf16.msra.mxu1 %v17550_v12  ;;  %7938 = vmatpush1.bf16.msra.mxu0 %v17560_v13  ;;  %v17743_v12 = vcombine.high %v560_v5, %v572_v6  ;;  %v584_v13 = vld [vmem:[#allocation5 + $0xf08] sm:$0xff] }
 0x151   :  { %7294 = vmatprep.subr.bf16.mxu1 %v17575_v14  ;;  %7939 = vmatprep.subr.bf16.mxu0 %v17585_v19  ;;  %v596_v14 = vld [vmem:[#allocation5 + $0xf68] sm:$0xff]  ;;  %v17742_v19 = vcombine.low %v560_v5, %v572_v6  ;;  %v733_v5 = vld [vmem:[#allocation5 + $0x13b0] sm:$0xff]  ;;  %v17897_v6 = vcombine.high %v709_v61, %v721_v63 }
 0x152   :  { %v17920_v18 = vcombine.low %v733_v5, %v745_v7  ;;  %v889_v61 = vld [vmem:[#allocation5 + $0x1890] sm:$0xff] }
 0x154   :  { %7295 = vmatpush1.bf16.msra.mxu1 %v17574_v21  ;;  %7940 = vmatpush1.bf16.msra.mxu0 %v17584_v22  ;;  %v17767_v21 = vcombine.high %v584_v13, %v596_v14  ;;  %v608_v22 = vld [vmem:[#allocation5 + $0xfc8] sm:$0xff] }
 0x155   :  { %7296 = vmatprep.subr.bf16.mxu1 %v17599_v23  ;;  %7941 = vmatprep.subr.bf16.mxu0 %v17609_v28  ;;  %v620_v23 = vld [vmem:[#allocation5 + $0x1028] sm:$0xff]  ;;  %v17766_v28 = vcombine.low %v584_v13, %v596_v14  ;;  %v757_v13 = vld [vmem:[#allocation5 + $0x1470] sm:$0xff]  ;;  %v17921_v14 = vcombine.high %v733_v5, %v745_v7 }
 0x156   :  { %v17944_v27 = vcombine.low %v757_v13, %v769_v16  ;;  %v913_v5 = vld [vmem:[#allocation5 + $0x1950] sm:$0xff] }
 0x158   :  { %7297 = vmatpush1.bf16.msra.mxu1 %v17598_v31  ;;  %7942 = vmatpush1.bf16.msra.mxu0 %v17608_v32  ;;  %v17791_v31 = vcombine.high %v608_v22, %v620_v23  ;;  %v632_v32 = vld [vmem:[#allocation5 + $0x1088] sm:$0xff] }
 0x159   :  { %7298 = vmatprep.subr.bf16.mxu1 %v17623_v33  ;;  %7943 = vmatprep.subr.bf16.mxu0 %v17633_v37  ;;  %v644_v33 = vld [vmem:[#allocation5 + $0x10e8] sm:$0xff]  ;;  %v17790_v37 = vcombine.low %v608_v22, %v620_v23  ;;  %v781_v22 = vld [vmem:[#allocation5 + $0x1530] sm:$0xff]  ;;  %v17945_v23 = vcombine.high %v757_v13, %v769_v16 }
 0x15a   :  { %v17968_v36 = vcombine.low %v781_v22, %v793_v24  ;;  %v937_v13 = vld [vmem:[#allocation5 + $0x1a10] sm:$0xff] }
 0x15c   :  { %7299 = vmatpush1.bf16.msra.mxu1 %v17622_v40  ;;  %7944 = vmatpush1.bf16.msra.mxu0 %v17632_v41  ;;  %v17815_v40 = vcombine.high %v632_v32, %v644_v33  ;;  %v656_v41 = vld [vmem:[#allocation5 + $0x1148] sm:$0xff] }
 0x15d   :  { %7300 = vmatprep.subr.bf16.mxu1 %v17647_v42  ;;  %7945 = vmatprep.subr.bf16.mxu0 %v17657_v47  ;;  %v668_v42 = vld [vmem:[#allocation5 + $0x11a8] sm:$0xff]  ;;  %v17814_v47 = vcombine.low %v632_v32, %v644_v33  ;;  %v805_v32 = vld [vmem:[#allocation5 + $0x15f0] sm:$0xff]  ;;  %v17969_v33 = vcombine.high %v781_v22, %v793_v24 }
 0x15e   :  { %v17992_v46 = vcombine.low %v805_v32, %v817_v34  ;;  %v961_v22 = vld [vmem:[#allocation5 + $0x1ad0] sm:$0xff] }
 0x160   :  { %7301 = vmatpush1.bf16.msra.mxu1 %v17646_v49  ;;  %7946 = vmatpush1.bf16.msra.mxu0 %v17656_v50  ;;  %v17839_v49 = vcombine.high %v656_v41, %v668_v42  ;;  %v680_v50 = vld [vmem:[#allocation5 + $0x1208] sm:$0xff] }
 0x161   :  { %7313 = vmatprep.subr.bf16.mxu1 %v17671_v51  ;;  %7958 = vmatprep.subr.bf16.mxu0 %v17681_v55  ;;  %v692_v51 = vld [vmem:[#allocation5 + $0x1268] sm:$0xff]  ;;  %v17838_v55 = vcombine.low %v656_v41, %v668_v42  ;;  %v829_v41 = vld [vmem:[#allocation5 + $0x16b0] sm:$0xff]  ;;  %v17993_v42 = vcombine.high %v805_v32, %v817_v34 }
 0x162   :  { %v985_v32 = vld [vmem:[#allocation5 + $0x1b90] sm:$0xff] }
 0x163   :  { %7303 = vmatmul.mubr.bf16.vlgmr.msra.gmra.mrb[4].mxu1 %v21873_v15  ;;  %7948 = vmatmul.mubr.bf16.vlgmr.msra.gmra.mrb[4].mxu0 %v21873_v15 }
 0x164   :  { %7314 = vmatpush1.bf16.msra.mxu1 %v17670_v57  ;;  %7959 = vmatpush1.bf16.msra.mxu0 %v17680_v59  ;;  %v17863_v57 = vcombine.high %v680_v50, %v692_v51  ;;  %v704_v59 = vld [vmem:[#allocation5 + $0x12c8] sm:$0xff] }
 0x165   :  { %7315 = vmatprep.subr.bf16.mxu1 %v17695_v60  ;;  %7960 = vmatprep.subr.bf16.mxu0 %v17705_v0  ;;  %v716_v60 = vld [vmem:[#allocation5 + $0x1328] sm:$0xff]  ;;  %v17862_v0 = vcombine.low %v680_v50, %v692_v51  ;;  %v853_v50 = vld [vmem:[#allocation5 + $0x1770] sm:$0xff] }
 0x166   :  { %7345 = vmatprep.mubr.bf16.mxu1 %v21875_v25  ;;  %7990 = vmatprep.mubr.bf16.mxu0 %v21875_v25  ;;  %v18040_v63 = vcombine.low %v853_v50, %v865_v52 }
 0x168   :  { %7316 = vmatpush1.bf16.msra.mxu1 %v17694_v2  ;;  %7961 = vmatpush1.bf16.msra.mxu0 %v17704_v3  ;;  %v17887_v2 = vcombine.high %v704_v59, %v716_v60  ;;  %v728_v3 = vld [vmem:[#allocation5 + $0x1388] sm:$0xff] }
 0x169   :  { %7317 = vmatprep.subr.bf16.mxu1 %v17719_v4  ;;  %7962 = vmatprep.subr.bf16.mxu0 %v17729_v8  ;;  %v740_v4 = vld [vmem:[#allocation5 + $0x13e8] sm:$0xff]  ;;  %v17886_v8 = vcombine.low %v704_v59, %v716_v60  ;;  %v877_v59 = vld [vmem:[#allocation5 + $0x1830] sm:$0xff]  ;;  %v18041_v60 = vcombine.high %v853_v50, %v865_v52 }
 0x16a   :  { %v18064_v7 = vcombine.low %v877_v59, %v889_v61  ;;  %v1033_v50 = vld [vmem:[#allocation5 + $0x1d10] sm:$0xff] }
 0x16c   :  { %7318 = vmatpush1.bf16.msra.mxu1 %v17718_v10  ;;  %7963 = vmatpush1.bf16.msra.mxu0 %v17728_v11  ;;  %v17911_v10 = vcombine.high %v728_v3, %v740_v4  ;;  %v752_v11 = vld [vmem:[#allocation5 + $0x1448] sm:$0xff] }
 0x16d   :  { %7319 = vmatprep.subr.bf16.mxu1 %v17743_v12  ;;  %7964 = vmatprep.subr.bf16.mxu0 %v17753_v17  ;;  %v764_v12 = vld [vmem:[#allocation5 + $0x14a8] sm:$0xff]  ;;  %v17910_v17 = vcombine.low %v728_v3, %v740_v4  ;;  %v901_v3 = vld [vmem:[#allocation5 + $0x18f0] sm:$0xff]  ;;  %v18065_v4 = vcombine.high %v877_v59, %v889_v61 }
 0x16e   :  { %v18088_v16 = vcombine.low %v901_v3, %v913_v5  ;;  %v1057_v59 = vld [vmem:[#allocation5 + $0x1dd0] sm:$0xff] }
 0x170   :  { %7320 = vmatpush1.bf16.msra.mxu1 %v17742_v19  ;;  %7965 = vmatpush1.bf16.msra.mxu0 %v17752_v20  ;;  %v17935_v19 = vcombine.high %v752_v11, %v764_v12  ;;  %v776_v20 = vld [vmem:[#allocation5 + $0x1508] sm:$0xff] }
 0x171   :  { %7321 = vmatprep.subr.bf16.mxu1 %v17767_v21  ;;  %7966 = vmatprep.subr.bf16.mxu0 %v17777_v26  ;;  %v788_v21 = vld [vmem:[#allocation5 + $0x1568] sm:$0xff]  ;;  %v17934_v26 = vcombine.low %v752_v11, %v764_v12  ;;  %v925_v11 = vld [vmem:[#allocation5 + $0x19b0] sm:$0xff]  ;;  %v18089_v12 = vcombine.high %v901_v3, %v913_v5 }
 0x172   :  { %v18112_v24 = vcombine.low %v925_v11, %v937_v13  ;;  %v1081_v3 = vld [vmem:[#allocation5 + $0x1e90] sm:$0xff] }
 0x174   :  { %7322 = vmatpush1.bf16.msra.mxu1 %v17766_v28  ;;  %7967 = vmatpush1.bf16.msra.mxu0 %v17776_v29  ;;  %v17959_v28 = vcombine.high %v776_v20, %v788_v21  ;;  %v800_v29 = vld [vmem:[#allocation5 + $0x15c8] sm:$0xff] }
 0x175   :  { %7323 = vmatprep.subr.bf16.mxu1 %v17791_v31  ;;  %7968 = vmatprep.subr.bf16.mxu0 %v17801_v35  ;;  %v812_v31 = vld [vmem:[#allocation5 + $0x1628] sm:$0xff]  ;;  %v17958_v35 = vcombine.low %v776_v20, %v788_v21  ;;  %v949_v20 = vld [vmem:[#allocation5 + $0x1a70] sm:$0xff]  ;;  %v18113_v21 = vcombine.high %v925_v11, %v937_v13 }
 0x176   :  { %v17982_v45 = vcombine.low %v800_v29, %v812_v31  ;;  %v18136_v34 = vcombine.low %v949_v20, %v961_v22  ;;  %v1105_v11 = vld [vmem:[#allocation5 + $0x1f50] sm:$0xff] }
 0x178   :  { %7324 = vmatpush1.bf16.msra.mxu1 %v17790_v37  ;;  %7969 = vmatpush1.bf16.msra.mxu0 %v17800_v38  ;;  %v17983_v37 = vcombine.high %v800_v29, %v812_v31  ;;  %v824_v38 = vld [vmem:[#allocation5 + $0x1688] sm:$0xff]  ;;  %v973_v29 = vld [vmem:[#allocation5 + $0x1b30] sm:$0xff]  ;;  %v18137_v31 = vcombine.high %v949_v20, %v961_v22 }
 0x179   :  { %7325 = vmatprep.subr.bf16.mxu1 %v17815_v40  ;;  %7970 = vmatprep.subr.bf16.mxu0 %v17825_v43  ;;  %v836_v40 = vld [vmem:[#allocation5 + $0x16e8] sm:$0xff]  ;;  %v841_v43 = vld [vmem:[#allocation5 + $0x1710] sm:$0xff] }
 0x17a   :  { %v18017_v51 = vcombine.high %v829_v41, %v841_v43  ;;  %v18016_v54 = vcombine.low %v829_v41, %v841_v43  ;;  %v1009_v41 = vld [vmem:[#allocation5 + $0x1c50] sm:$0xff]  ;;  %v18160_v43 = vcombine.low %v973_v29, %v985_v32 }
 0x17b   :  { %v1129_v20 = vld [vmem:[#allocation5 + $0x2010] sm:$0xff] }
 0x17c   :  { %7326 = vmatpush1.bf16.msra.mxu1 %v17814_v47  ;;  %7971 = vmatpush1.bf16.msra.mxu0 %v17824_v48  ;;  %v18007_v47 = vcombine.high %v824_v38, %v836_v40  ;;  %v848_v48 = vld [vmem:[#allocation5 + $0x1748] sm:$0xff] }
 0x17d   :  { %7327 = vmatprep.subr.bf16.mxu1 %v17839_v49  ;;  %7972 = vmatprep.subr.bf16.mxu0 %v17849_v53  ;;  %v860_v49 = vld [vmem:[#allocation5 + $0x17a8] sm:$0xff]  ;;  %v18006_v53 = vcombine.low %v824_v38, %v836_v40  ;;  %v997_v38 = vld [vmem:[#allocation5 + $0x1bf0] sm:$0xff]  ;;  %v18161_v40 = vcombine.high %v973_v29, %v985_v32 }
 0x17e   :  { %v18184_v52 = vcombine.low %v997_v38, %v1009_v41  ;;  %v1153_v29 = vld [vmem:[#allocation5 + $0x20d0] sm:$0xff] }
 0x180   :  { %7328 = vmatpush1.bf16.msra.mxu1 %v17838_v55  ;;  %7973 = vmatpush1.bf16.msra.mxu0 %v17848_v56  ;;  %v18031_v55 = vcombine.high %v848_v48, %v860_v49  ;;  %v872_v56 = vld [vmem:[#allocation5 + $0x1808] sm:$0xff] }
 0x181   :  { %7329 = vmatprep.subr.bf16.mxu1 %v17863_v57  ;;  %7974 = vmatprep.subr.bf16.mxu0 %v17873_v62  ;;  %v884_v57 = vld [vmem:[#allocation5 + $0x1868] sm:$0xff]  ;;  %v18030_v62 = vcombine.low %v848_v48, %v860_v49  ;;  %v1021_v48 = vld [vmem:[#allocation5 + $0x1cb0] sm:$0xff]  ;;  %v18185_v49 = vcombine.high %v997_v38, %v1009_v41 }
 0x182   :  { %v18208_v61 = vcombine.low %v1021_v48, %v1033_v50  ;;  %v1177_v38 = vld [vmem:[#allocation5 + $0x2190] sm:$0xff] }
 0x184   :  { %7330 = vmatpush1.bf16.msra.mxu1 %v17862_v0  ;;  %7975 = vmatpush1.bf16.msra.mxu0 %v17872_v1  ;;  %v18055_v0 = vcombine.high %v872_v56, %v884_v57  ;;  %v896_v1 = vld [vmem:[#allocation5 + $0x18c8] sm:$0xff] }
 0x185   :  { %7331 = vmatprep.subr.bf16.mxu1 %v17887_v2  ;;  %7976 = vmatprep.subr.bf16.mxu0 %v17897_v6  ;;  %v908_v2 = vld [vmem:[#allocation5 + $0x1928] sm:$0xff]  ;;  %v18054_v6 = vcombine.low %v872_v56, %v884_v57  ;;  %v1045_v56 = vld [vmem:[#allocation5 + $0x1d70] sm:$0xff]  ;;  %v18209_v57 = vcombine.high %v1021_v48, %v1033_v50 }
 0x186   :  { %v18232_v5 = vcombine.low %v1045_v56, %v1057_v59  ;;  %v1201_v48 = vld [vmem:[#allocation5 + $0x2250] sm:$0xff] }
 0x188   :  { %7332 = vmatpush1.bf16.msra.mxu1 %v17886_v8  ;;  %7977 = vmatpush1.bf16.msra.mxu0 %v17896_v9  ;;  %v18079_v8 = vcombine.high %v896_v1, %v908_v2  ;;  %v920_v9 = vld [vmem:[#allocation5 + $0x1988] sm:$0xff] }
 0x189   :  { %7333 = vmatprep.subr.bf16.mxu1 %v17911_v10  ;;  %7978 = vmatprep.subr.bf16.mxu0 %v17921_v14  ;;  %v932_v10 = vld [vmem:[#allocation5 + $0x19e8] sm:$0xff]  ;;  %v18078_v14 = vcombine.low %v896_v1, %v908_v2  ;;  %v1069_v1 = vld [vmem:[#allocation5 + $0x1e30] sm:$0xff]  ;;  %v18233_v2 = vcombine.high %v1045_v56, %v1057_v59 }
 0x18a   :  { %v18256_v13 = vcombine.low %v1069_v1, %v1081_v3  ;;  %v1225_v56 = vld [vmem:[#allocation5 + $0x2310] sm:$0xff] }
 0x18c   :  { %7334 = vmatpush1.bf16.msra.mxu1 %v17910_v17  ;;  %7979 = vmatpush1.bf16.msra.mxu0 %v17920_v18  ;;  %v18103_v17 = vcombine.high %v920_v9, %v932_v10  ;;  %v944_v18 = vld [vmem:[#allocation5 + $0x1a48] sm:$0xff] }
 0x18d   :  { %7335 = vmatprep.subr.bf16.mxu1 %v17935_v19  ;;  %7980 = vmatprep.subr.bf16.mxu0 %v17945_v23  ;;  %v956_v19 = vld [vmem:[#allocation5 + $0x1aa8] sm:$0xff]  ;;  %v18102_v23 = vcombine.low %v920_v9, %v932_v10  ;;  %v1093_v9 = vld [vmem:[#allocation5 + $0x1ef0] sm:$0xff]  ;;  %v18257_v10 = vcombine.high %v1069_v1, %v1081_v3 }
 0x18e   :  { %v18280_v22 = vcombine.low %v1093_v9, %v1105_v11  ;;  %v1249_v1 = vld [vmem:[#allocation5 + $0x23d0] sm:$0xff] }
 0x190   :  { %7336 = vmatpush1.bf16.msra.mxu1 %v17934_v26  ;;  %7981 = vmatpush1.bf16.msra.mxu0 %v17944_v27  ;;  %v18127_v26 = vcombine.high %v944_v18, %v956_v19  ;;  %v968_v27 = vld [vmem:[#allocation5 + $0x1b08] sm:$0xff] }
 0x191   :  { %7337 = vmatprep.subr.bf16.mxu1 %v17959_v28  ;;  %7982 = vmatprep.subr.bf16.mxu0 %v17969_v33  ;;  %v980_v28 = vld [vmem:[#allocation5 + $0x1b68] sm:$0xff]  ;;  %v18126_v33 = vcombine.low %v944_v18, %v956_v19  ;;  %v1117_v18 = vld [vmem:[#allocation5 + $0x1fb0] sm:$0xff]  ;;  %v18281_v19 = vcombine.high %v1093_v9, %v1105_v11  ;;  %v123_v9 = vld [vmem:[#allocation5 + $0xa0] sm:$0xff] }
 0x192   :  { %v18304_v32 = vcombine.low %v1117_v18, %v1129_v20 }
 0x194   :  { %7338 = vmatpush1.bf16.msra.mxu1 %v17958_v35  ;;  %7983 = vmatpush1.bf16.msra.mxu0 %v17968_v36  ;;  %v18151_v35 = vcombine.high %v968_v27, %v980_v28  ;;  %v992_v36 = vld [vmem:[#allocation5 + $0x1bc8] sm:$0xff] }
 0x195   :  { %7339 = vmatprep.subr.bf16.mxu1 %v17983_v37  ;;  %7984 = vmatprep.subr.bf16.mxu0 %v17993_v42  ;;  %v1004_v37 = vld [vmem:[#allocation5 + $0x1c28] sm:$0xff]  ;;  %v18150_v42 = vcombine.low %v968_v27, %v980_v28  ;;  %v1141_v27 = vld [vmem:[#allocation5 + $0x2070] sm:$0xff]  ;;  %v18305_v28 = vcombine.high %v1117_v18, %v1129_v20  ;;  %v147_v18 = vld [vmem:[#allocation5 + $0x160] sm:$0xff] }
 0x196   :  { %v18328_v41 = vcombine.low %v1141_v27, %v1153_v29 }
 0x198   :  { %7340 = vmatpush1.bf16.msra.mxu1 %v17982_v45  ;;  %7985 = vmatpush1.bf16.msra.mxu0 %v17992_v46  ;;  %v18175_v45 = vcombine.high %v992_v36, %v1004_v37  ;;  %v1016_v46 = vld [vmem:[#allocation5 + $0x1c88] sm:$0xff] }
 0x199   :  { %7341 = vmatprep.subr.bf16.mxu1 %v18007_v47  ;;  %7986 = vmatprep.subr.bf16.mxu0 %v18017_v51  ;;  %v1028_v47 = vld [vmem:[#allocation5 + $0x1ce8] sm:$0xff]  ;;  %v18174_v51 = vcombine.low %v992_v36, %v1004_v37  ;;  %v1165_v36 = vld [vmem:[#allocation5 + $0x2130] sm:$0xff]  ;;  %v18329_v37 = vcombine.high %v1141_v27, %v1153_v29  ;;  %v171_v27 = vld [vmem:[#allocation5 + $0x220] sm:$0xff] }
 0x19a   :  { %v18352_v50 = vcombine.low %v1165_v36, %v1177_v38 }
 0x19c   :  { %7342 = vmatpush1.bf16.msra.mxu1 %v18006_v53  ;;  %7987 = vmatpush1.bf16.msra.mxu0 %v18016_v54  ;;  %v18199_v53 = vcombine.high %v1016_v46, %v1028_v47  ;;  %v1040_v54 = vld [vmem:[#allocation5 + $0x1d48] sm:$0xff] }
 0x19d   :  { %7343 = vmatprep.subr.bf16.mxu1 %v18031_v55  ;;  %7988 = vmatprep.subr.bf16.mxu0 %v18041_v60  ;;  %v1052_v55 = vld [vmem:[#allocation5 + $0x1da8] sm:$0xff]  ;;  %v18198_v60 = vcombine.low %v1016_v46, %v1028_v47  ;;  %v1189_v46 = vld [vmem:[#allocation5 + $0x21f0] sm:$0xff]  ;;  %v18353_v47 = vcombine.high %v1165_v36, %v1177_v38  ;;  %v195_v36 = vld [vmem:[#allocation5 + $0x2e0] sm:$0xff] }
 0x19e   :  { %v18376_v59 = vcombine.low %v1189_v46, %v1201_v48 }
 0x1a0   :  { %7344 = vmatpush1.bf16.msra.mxu1 %v18030_v62  ;;  %7989 = vmatpush1.bf16.msra.mxu0 %v18040_v63  ;;  %v18223_v62 = vcombine.high %v1040_v54, %v1052_v55  ;;  %v1064_v63 = vld [vmem:[#allocation5 + $0x1e08] sm:$0xff] }
 0x1a1   :  { %7356 = vmatprep.subr.bf16.mxu1 %v18055_v0  ;;  %8001 = vmatprep.subr.bf16.mxu0 %v18065_v4  ;;  %v1076_v0 = vld [vmem:[#allocation5 + $0x1e68] sm:$0xff]  ;;  %v18222_v4 = vcombine.low %v1040_v54, %v1052_v55  ;;  %v18377_v54 = vcombine.high %v1189_v46, %v1201_v48  ;;  %v1213_v55 = vld [vmem:[#allocation5 + $0x22b0] sm:$0xff] }
 0x1a2   :  { %v18400_v3 = vcombine.low %v1213_v55, %v1225_v56 }
 0x1a3   :  { %7346 = vmatmul.mubr.bf16.vlgmr.msra.gmra.mrb[4].mxu1 %v21881_v30  ;;  %7991 = vmatmul.mubr.bf16.vlgmr.msra.gmra.mrb[4].mxu0 %v21881_v30 }
 0x1a4   :  { %7357 = vmatpush1.bf16.msra.mxu1 %v18054_v6  ;;  %8002 = vmatpush1.bf16.msra.mxu0 %v18064_v7  ;;  %v18247_v6 = vcombine.high %v1064_v63, %v1076_v0  ;;  %v1088_v7 = vld [vmem:[#allocation5 + $0x1ec8] sm:$0xff] }
 0x1a5   :  { %7358 = vmatprep.subr.bf16.mxu1 %v18079_v8  ;;  %8003 = vmatprep.subr.bf16.mxu0 %v18089_v12  ;;  %v1100_v8 = vld [vmem:[#allocation5 + $0x1f28] sm:$0xff]  ;;  %v18246_v12 = vcombine.low %v1064_v63, %v1076_v0  ;;  %v1237_v63 = vld [vmem:[#allocation5 + $0x2370] sm:$0xff]  ;;  %v18401_v0 = vcombine.high %v1213_v55, %v1225_v56  ;;  %v1255_v56 = vld [vmem:[#allocation7] sm:$0xff] }
 0x1a6   :  { %7388 = vmatprep.mubr.bf16.mxu1 %v21883_v39  ;;  %8033 = vmatprep.mubr.bf16.mxu0 %v21883_v39  ;;  %v18424_v11 = vcombine.low %v1237_v63, %v1249_v1 }
 0x1a8   :  { %7359 = vmatpush1.bf16.msra.mxu1 %v18078_v14  ;;  %8004 = vmatpush1.bf16.msra.mxu0 %v18088_v16  ;;  %v18271_v14 = vcombine.high %v1088_v7, %v1100_v8  ;;  %v1112_v16 = vld [vmem:[#allocation5 + $0x1f88] sm:$0xff] }
 0x1a9   :  { %7360 = vmatprep.subr.bf16.mxu1 %v18103_v17  ;;  %8005 = vmatprep.subr.bf16.mxu0 %v18113_v21  ;;  %v1124_v17 = vld [vmem:[#allocation5 + $0x1fe8] sm:$0xff]  ;;  %v18270_v21 = vcombine.low %v1088_v7, %v1100_v8  ;;  %v111_v7 = vld [vmem:[#allocation5 + $0x40] sm:$0xff]  ;;  %v18425_v8 = vcombine.high %v1237_v63, %v1249_v1  ;;  %v261_v1 = vld [vmem:[#allocation5 + $0x4f0] sm:$0xff] }
 0x1aa   :  { %v17300_v20 = vcombine.low %v111_v7, %v123_v9 }
 0x1ac   :  { %7361 = vmatpush1.bf16.msra.mxu1 %v18102_v23  ;;  %8006 = vmatpush1.bf16.msra.mxu0 %v18112_v24  ;;  %v18295_v23 = vcombine.high %v1112_v16, %v1124_v17  ;;  %v1136_v24 = vld [vmem:[#allocation5 + $0x2048] sm:$0xff] }
 0x1ad   :  { %7362 = vmatprep.subr.bf16.mxu1 %v18127_v26  ;;  %8007 = vmatprep.subr.bf16.mxu0 %v18137_v31  ;;  %v1148_v26 = vld [vmem:[#allocation5 + $0x20a8] sm:$0xff]  ;;  %v18294_v31 = vcombine.low %v1112_v16, %v1124_v17  ;;  %v135_v16 = vld [vmem:[#allocation5 + $0x100] sm:$0xff]  ;;  %v17301_v17 = vcombine.high %v111_v7, %v123_v9 }
 0x1ae   :  { %v17324_v29 = vcombine.low %v135_v16, %v147_v18 }
 0x1b0   :  { %7363 = vmatpush1.bf16.msra.mxu1 %v18126_v33  ;;  %8008 = vmatpush1.bf16.msra.mxu0 %v18136_v34  ;;  %v18319_v33 = vcombine.high %v1136_v24, %v1148_v26  ;;  %v1160_v34 = vld [vmem:[#allocation5 + $0x2108] sm:$0xff] }
 0x1b1   :  { %7364 = vmatprep.subr.bf16.mxu1 %v18151_v35  ;;  %8009 = vmatprep.subr.bf16.mxu0 %v18161_v40  ;;  %v1172_v35 = vld [vmem:[#allocation5 + $0x2168] sm:$0xff]  ;;  %v18318_v40 = vcombine.low %v1136_v24, %v1148_v26  ;;  %v159_v24 = vld [vmem:[#allocation5 + $0x1c0] sm:$0xff]  ;;  %v17325_v26 = vcombine.high %v135_v16, %v147_v18 }
 0x1b4   :  { %7365 = vmatpush1.bf16.msra.mxu1 %v18150_v42  ;;  %8010 = vmatpush1.bf16.msra.mxu0 %v18160_v43  ;;  %v18343_v42 = vcombine.high %v1160_v34, %v1172_v35  ;;  %v1184_v43 = vld [vmem:[#allocation5 + $0x21c8] sm:$0xff] }
 0x1b5   :  { %7366 = vmatprep.subr.bf16.mxu1 %v18175_v45  ;;  %8011 = vmatprep.subr.bf16.mxu0 %v18185_v49  ;;  %v1196_v45 = vld [vmem:[#allocation5 + $0x2228] sm:$0xff]  ;;  %v18342_v49 = vcombine.low %v1160_v34, %v1172_v35  ;;  %v183_v34 = vld [vmem:[#allocation5 + $0x280] sm:$0xff]  ;;  %v17349_v35 = vcombine.high %v159_v24, %v171_v27 }
 0x1b6   :  { %v17373_v46 = vcombine.high %v183_v34, %v195_v36 }
 0x1b8   :  { %7367 = vmatpush1.bf16.msra.mxu1 %v18174_v51  ;;  %8012 = vmatpush1.bf16.msra.mxu0 %v18184_v52  ;;  %v18367_v51 = vcombine.high %v1184_v43, %v1196_v45  ;;  %v1208_v52 = vld [vmem:[#allocation5 + $0x2288] sm:$0xff] }
 0x1b9   :  { %7368 = vmatprep.subr.bf16.mxu1 %v18199_v53  ;;  %8013 = vmatprep.subr.bf16.mxu0 %v18209_v57  ;;  %v1220_v53 = vld [vmem:[#allocation5 + $0x22e8] sm:$0xff]  ;;  %v18366_v57 = vcombine.low %v1184_v43, %v1196_v45  ;;  %v213_v43 = vld [vmem:[#allocation5 + $0x370] sm:$0xff]  ;;  %v207_v45 = vld [vmem:[#allocation5 + $0x340] sm:$0xff] }
 0x1bc   :  { %7369 = vmatpush1.bf16.msra.mxu1 %v18198_v60  ;;  %8014 = vmatpush1.bf16.msra.mxu0 %v18208_v61  ;;  %v18391_v60 = vcombine.high %v1208_v52, %v1220_v53  ;;  %v1232_v61 = vld [vmem:[#allocation5 + $0x2348] sm:$0xff] }
 0x1bd   :  { %7370 = vmatprep.subr.bf16.mxu1 %v18223_v62  ;;  %8015 = vmatprep.subr.bf16.mxu0 %v18233_v2  ;;  %v1244_v62 = vld [vmem:[#allocation5 + $0x23a8] sm:$0xff]  ;;  %v18390_v2 = vcombine.low %v1208_v52, %v1220_v53  ;;  %v225_v52 = vld [vmem:[#allocation5 + $0x3d0] sm:$0xff] }
 0x1be   :  { %v237_v53 = vld [vmem:[#allocation5 + $0x430] sm:$0xff] }
 0x1c0   :  { %7371 = vmatpush1.bf16.msra.mxu1 %v18222_v4  ;;  %8016 = vmatpush1.bf16.msra.mxu0 %v18232_v5  ;;  %v18415_v4 = vcombine.high %v1232_v61, %v1244_v62  ;;  %v105_v5 = vld [vmem:[#allocation5 + $0x10] sm:$0xff] }
 0x1c1   :  { %7372 = vmatprep.subr.bf16.mxu1 %v18247_v6  ;;  %8017 = vmatprep.subr.bf16.mxu0 %v18257_v10  ;;  %v117_v6 = vld [vmem:[#allocation5 + $0x70] sm:$0xff]  ;;  %v18414_v10 = vcombine.low %v1232_v61, %v1244_v62 }
 0x1c2   :  { %v249_v62 = vld [vmem:[#allocation5 + $0x490] sm:$0xff] }
 0x1c4   :  { %7373 = vmatpush1.bf16.msra.mxu1 %v18246_v12  ;;  %8018 = vmatpush1.bf16.msra.mxu0 %v18256_v13  ;;  %v17289_v12 = vcombine.high %v105_v5, %v117_v6  ;;  %v129_v13 = vld [vmem:[#allocation5 + $0xd0] sm:$0xff] }
 0x1c5   :  { %7374 = vmatprep.subr.bf16.mxu1 %v18271_v14  ;;  %8019 = vmatprep.subr.bf16.mxu0 %v18281_v19  ;;  %v141_v14 = vld [vmem:[#allocation5 + $0x130] sm:$0xff]  ;;  %v17288_v19 = vcombine.low %v105_v5, %v117_v6  ;;  %v267_v5 = vld [vmem:[#allocation5 + $0x520] sm:$0xff] }
 0x1c8   :  { %7375 = vmatpush1.bf16.msra.mxu1 %v18270_v21  ;;  %8020 = vmatpush1.bf16.msra.mxu0 %v18280_v22  ;;  %v17313_v21 = vcombine.high %v129_v13, %v141_v14  ;;  %v153_v22 = vld [vmem:[#allocation5 + $0x190] sm:$0xff] }
 0x1c9   :  { %7376 = vmatprep.subr.bf16.mxu1 %v18295_v23  ;;  %8021 = vmatprep.subr.bf16.mxu0 %v18305_v28  ;;  %v165_v23 = vld [vmem:[#allocation5 + $0x1f0] sm:$0xff]  ;;  %v17312_v28 = vcombine.low %v129_v13, %v141_v14  ;;  %v279_v14 = vld [vmem:[#allocation5 + $0x580] sm:$0xff] }
 0x1ca   :  { %v17336_v38 = vcombine.low %v153_v22, %v165_v23  ;;  %v285_v13 = vld [vmem:[#allocation5 + $0x5b0] sm:$0xff] }
 0x1cc   :  { %7377 = vmatpush1.bf16.msra.mxu1 %v18294_v31  ;;  %8022 = vmatpush1.bf16.msra.mxu0 %v18304_v32  ;;  %v17337_v31 = vcombine.high %v153_v22, %v165_v23  ;;  %v177_v32 = vld [vmem:[#allocation5 + $0x250] sm:$0xff] }
 0x1cd   :  { %7378 = vmatprep.subr.bf16.mxu1 %v18319_v33  ;;  %8023 = vmatprep.subr.bf16.mxu0 %v18329_v37  ;;  %v189_v33 = vld [vmem:[#allocation5 + $0x2b0] sm:$0xff]  ;;  %v1261_v37 = vlaneseq }
 0x1cf   :  { %v21907_v48 = vshrl.u32 %v1261_v37, 7 }
 0x1d0   :  { %7379 = vmatpush1.bf16.msra.mxu1 %v18318_v40  ;;  %8024 = vmatpush1.bf16.msra.mxu0 %v18328_v41  ;;  %v17348_v40 = vcombine.low %v159_v24, %v171_v27  ;;  %v17361_v41 = vcombine.high %v177_v32, %v189_v33 }
 0x1d1   :  { %7380 = vmatprep.subr.bf16.mxu1 %v18343_v42  ;;  %8025 = vmatprep.subr.bf16.mxu0 %v18353_v47  ;;  %v201_v42 = vld [vmem:[#allocation5 + $0x310] sm:$0xff]  ;;  %v219_v47 = vld [vmem:[#allocation5 + $0x3a0] sm:$0xff]  ;;  %v21913_v61 = vsub.s32 1, %v21907_v48 }
 0x1d2   :  { %v17397_v55 = vcombine.high %v207_v45, %v219_v47  ;;  %v17396_v63 = vcombine.low %v207_v45, %v219_v47 }
 0x1d3   :  { %v1268_v7 = vrot.slane %v1255_v56, %v21913_v61 }
 0x1d4   :  { %7381 = vmatpush1.bf16.msra.mxu1 %v18342_v49  ;;  %8026 = vmatpush1.bf16.msra.mxu0 %v18352_v50  ;;  %v17360_v49 = vcombine.low %v177_v32, %v189_v33  ;;  %v17372_v50 = vcombine.low %v183_v34, %v195_v36  ;;  %v297_v34 = vld [vmem:[#allocation5 + $0x610] sm:$0xff]  ;;  %v303_v36 = vld [vmem:[#allocation5 + $0x640] sm:$0xff] }
 0x1d5   :  { %7382 = vmatprep.subr.bf16.mxu1 %v18367_v51  ;;  %8027 = vmatprep.subr.bf16.mxu0 %v18377_v54  ;;  %v17385_v51 = vcombine.high %v201_v42, %v213_v43  ;;  %v231_v54 = vld [vmem:[#allocation5 + $0x400] sm:$0xff] }
 0x1d8   :  { %7383 = vmatpush1.bf16.msra.mxu1 %v18366_v57  ;;  %8028 = vmatpush1.bf16.msra.mxu0 %v18376_v59  ;;  %v243_v57 = vld [vmem:[#allocation5 + $0x460] sm:$0xff]  ;;  %v21910_v59 = vsub.s32 0, %v21907_v48 }
 0x1d9   :  { %7384 = vmatprep.subr.bf16.mxu1 %v18391_v60  ;;  %8029 = vmatprep.subr.bf16.mxu0 %v18401_v0  ;;  %v17384_v60 = vcombine.low %v201_v42, %v213_v43  ;;  %v17409_v0 = vcombine.high %v225_v52, %v237_v53  ;;  %v315_v42 = vld [vmem:[#allocation5 + $0x6a0] sm:$0xff] }
 0x1da   :  { %v1264_v6 = vrot.slane %v1255_v56, %v21910_v59 }
 0x1dc   :  { %7385 = vmatpush1.bf16.msra.mxu1 %v18390_v2  ;;  %8030 = vmatpush1.bf16.msra.mxu0 %v18400_v3  ;;  %v255_v2 = vld [vmem:[#allocation5 + $0x4c0] sm:$0xff]  ;;  %v1256_v3 = vld [vmem:[#allocation7 + $0x8] sm:$0xff] }
 0x1dd   :  { %7386 = vmatprep.subr.bf16.mxu1 %v18415_v4  ;;  %8031 = vmatprep.subr.bf16.mxu0 %v18425_v8  ;;  %v17421_v4 = vcombine.high %v231_v54, %v243_v57  ;;  %v17408_v8 = vcombine.low %v225_v52, %v237_v53  ;;  %v1296_v9 = vrot.slane %v1256_v3, %v21910_v59 }
 0x1de   :  { %v1300_v16 = vrot.slane %v1256_v3, %v21913_v61  ;;  %v17445_v18 = vcombine.high %v255_v2, %v267_v5  ;;  %v17444_v27 = vcombine.low %v255_v2, %v267_v5  ;;  %v17493_v3 = vcombine.high %v303_v36, %v315_v42 }
 0x1e0   :  { %7387 = vmatpush1.bf16.msra.mxu1 %v18414_v10  ;;  %8032 = vmatpush1.bf16.msra.mxu0 %v18424_v11  ;;  %v17420_v10 = vcombine.low %v231_v54, %v243_v57  ;;  %v17433_v11 = vcombine.high %v249_v62, %v261_v1 }
 0x1e1   :  { %7399 = vmatprep.subr.bf16.mxu1 %v17289_v12  ;;  %8173 = vmatprep.subr.bf16.mxu0 %v17301_v17  ;;  %v273_v12 = vld [vmem:[#allocation5 + $0x550] sm:$0xff] }
 0x1e2   :  { %v17457_v33 = vcombine.high %v273_v12, %v285_v13  ;;  %v17456_v54 = vcombine.low %v273_v12, %v285_v13  ;;  %v351_v12 = vld [vmem:[#allocation5 + $0x7c0] sm:$0xff] }
 0x1e3   :  { %7389 = vmatmul.mubr.bf16.vlgmr.msra.gmra.mrb[4].mxu1 %v21889_v44  ;;  %8034 = vmatmul.mubr.bf16.vlgmr.msra.gmra.mrb[4].mxu0 %v21889_v44 }
 0x1e4   :  { %7400 = vmatpush1.bf16.msra.mxu1 %v17288_v19  ;;  %8174 = vmatpush1.bf16.msra.mxu0 %v17300_v20  ;;  %v291_v19 = vld [vmem:[#allocation5 + $0x5e0] sm:$0xff] }
 0x1e5   :  { %7401 = vmatprep.subr.bf16.mxu1 %v17313_v21  ;;  %8175 = vmatprep.subr.bf16.mxu0 %v17325_v26  ;;  %v17432_v26 = vcombine.low %v249_v62, %v261_v1  ;;  %v17468_v57 = vcombine.low %v279_v14, %v291_v19  ;;  %v321_v62 = vld [vmem:[#allocation5 + $0x6d0] sm:$0xff] }
 0x1e6   :  { %7431 = vmatprep.mubr.bf16.mxu1 %v21869_v58  ;;  %8205 = vmatprep.mubr.bf16.mxu0 %v21869_v58 }
 0x1e8   :  { %7402 = vmatpush1.bf16.msra.mxu1 %v17312_v28  ;;  %8176 = vmatpush1.bf16.msra.mxu0 %v17324_v29 }
 0x1e9   :  { %7403 = vmatprep.subr.bf16.mxu1 %v17337_v31  ;;  %8177 = vmatprep.subr.bf16.mxu0 %v17349_v35  ;;  %v309_v35 = vld [vmem:[#allocation5 + $0x670] sm:$0xff] }
 0x1ec   :  { %7404 = vmatpush1.bf16.msra.mxu1 %v17336_v38  ;;  %8178 = vmatpush1.bf16.msra.mxu0 %v17348_v40 }
 0x1ed   :  { %7405 = vmatprep.subr.bf16.mxu1 %v17361_v41  ;;  %8179 = vmatprep.subr.bf16.mxu0 %v17373_v46  ;;  %v17469_v41 = vcombine.high %v279_v14, %v291_v19  ;;  %v363_v14 = vld [vmem:[#allocation5 + $0x820] sm:$0xff]  ;;  %v369_v19 = vld [vmem:[#allocation5 + $0x850] sm:$0xff] }
 0x1f0   :  { %7406 = vmatpush1.bf16.msra.mxu1 %v17360_v49  ;;  %8180 = vmatpush1.bf16.msra.mxu0 %v17372_v50 }
 0x1f1   :  { %7407 = vmatprep.subr.bf16.mxu1 %v17385_v51  ;;  %8181 = vmatprep.subr.bf16.mxu0 %v17397_v55 }
 0x1f4   :  { %7408 = vmatpush1.bf16.msra.mxu1 %v17384_v60  ;;  %8182 = vmatpush1.bf16.msra.mxu0 %v17396_v63  ;;  %v17481_v60 = vcombine.high %v297_v34, %v309_v35  ;;  %v333_v63 = vld [vmem:[#allocation5 + $0x730] sm:$0xff] }
 0x1f5   :  { %7409 = vmatprep.subr.bf16.mxu1 %v17409_v0  ;;  %8183 = vmatprep.subr.bf16.mxu0 %v17421_v4  ;;  %v327_v0 = vld [vmem:[#allocation5 + $0x700] sm:$0xff] }
 0x1f6   :  { %v7261_v17 = vpop.f32.mrb[0].mxu1  ;;  %v7777_v22 = vpop.f32.mrb[0].mxu0  ;;  %v339_v4 = vld [vmem:[#allocation5 + $0x760] sm:$0xff] }
 0x1f7   :  { %v19588_v20 = vadd.f32 %v7261_v17, %v1264_v6  ;;  %v7263_v21 = vpop.f32.mrb[1].mxu1  ;;  %v19604_v28 = vadd.f32 %v7777_v22, %v1296_v9  ;;  %v7779_v29 = vpop.f32.mrb[1].mxu0  ;;  %v17517_v13 = vcombine.high %v327_v0, %v339_v4  ;;  %v17516_v17 = vcombine.low %v327_v0, %v339_v4  ;;  %v483_v0 = vld [vmem:[#allocation5 + $0xbe0] sm:$0xff] }
 0x1f8   :  { %v19589_v23 = vadd.f32 %v7263_v21, %v1268_v7  ;;  %v7265_v24 = vpop.f32.mrb[2].mxu1  ;;  %7410 = vmatpush1.bf16.msra.mxu1 %v17408_v8  ;;  %8184 = vmatpush1.bf16.msra.mxu0 %v17420_v10  ;;  %v19605_v37 = vadd.f32 %v7779_v29, %v1300_v16  ;;  %v7781_v38 = vpop.f32.mrb[2].mxu0  ;;  %v17492_v8 = vcombine.low %v303_v36, %v315_v42  ;;  %v345_v10 = vld [vmem:[#allocation5 + $0x790] sm:$0xff]  ;;  %v375_v21 = vld [vmem:[#allocation5 + $0x880] sm:$0xff] }
 0x1f9   :  { %v19590_v31 = vadd.f32 %v7265_v24, %v1264_v6  ;;  %v7267_v32 = vpop.f32.mrb[3].mxu1  ;;  %7411 = vmatprep.subr.bf16.mxu1 %v17433_v11  ;;  %8185 = vmatprep.subr.bf16.mxu0 %v17445_v18  ;;  %v8697_v43 = vmax.f32 %v19604_v28, 0.0  ;;  %v19606_v45 = vadd.f32 %v7781_v38, %v1296_v9  ;;  %v7783_v46 = vpop.f32.mrb[3].mxu0  ;;  %v8689_v47 = vmax.f32 %v19588_v20, 0.0  ;;  %v357_v11 = vld [vmem:[#allocation5 + $0x7f0] sm:$0xff]  ;;  %v435_v42 = vld [vmem:[#allocation5 + $0xa60] sm:$0xff] }
 0x1fa   :  { %v19591_v40 = vadd.f32 %v7267_v32, %v1268_v7  ;;  %v8698_v50 = vmax.f32 %v19605_v37, 0.0  ;;  %v19607_v51 = vadd.f32 %v7783_v46, %v1300_v16  ;;  %v8690_v52 = vmax.f32 %v19589_v23, 0.0  ;;  %v381_v20 = vld [vmem:[#allocation5 + $0x8b0] sm:$0xff]  ;;  %v387_v23 = vld [vmem:[#allocation5 + $0x8e0] sm:$0xff] }
 0x1fb   :  { %v8713_v49 = vmax.f32 %v19590_v31, 0.0  ;;  %v8721_v55 = vmax.f32 %v19606_v45, 0.0  ;;  %v17480_v7 = vcombine.low %v297_v34, %v309_v35  ;;  %v17505_v9 = vcombine.high %v321_v62, %v333_v63  ;;  %v393_v28 = vld [vmem:[#allocation5 + $0x910] sm:$0xff]  ;;  %v399_v31 = vld [vmem:[#allocation5 + $0x940] sm:$0xff] }
 0x1fc   :  { %v8714_v53 = vmax.f32 %v19591_v40, 0.0  ;;  %7412 = vmatpush1.bf16.msra.mxu1 %v17432_v26  ;;  %8186 = vmatpush1.bf16.msra.mxu0 %v17444_v27  ;;  %v8722_v1 = vmax.f32 %v19607_v51, 0.0  ;;  %v17504_v16 = vcombine.low %v321_v62, %v333_v63  ;;  %v17529_v18 = vcombine.high %v345_v10, %v357_v11  ;;  %v405_v29 = vld [vmem:[#allocation5 + $0x970] sm:$0xff]  ;;  %v423_v40 = vld [vmem:[#allocation5 + $0xa00] sm:$0xff] }
 0x1fd   :  { %v21919_v56 = vpack.c.bf16 %v8713_v49, %v8689_v47  ;;  %7413 = vmatprep.subr.bf16.mxu1 %v17457_v33  ;;  %8187 = vmatprep.subr.bf16.mxu0 %v17469_v41  ;;  %v21923_v5 = vpack.c.bf16 %v8721_v55, %v8697_v43  ;;  %v17541_v22 = vcombine.high %v351_v12, %v363_v14  ;;  %v411_v33 = vld [vmem:[#allocation5 + $0x9a0] sm:$0xff]  ;;  %v417_v37 = vld [vmem:[#allocation5 + $0x9d0] sm:$0xff] }
 0x1fe   :  { %v21921_v2 = vpack.c.bf16 %v8714_v53, %v8690_v52  ;;  %v21925_v6 = vpack.c.bf16 %v8722_v1, %v8698_v50  ;;  %v17528_v24 = vcombine.low %v345_v10, %v357_v11  ;;  %v17540_v26 = vcombine.low %v351_v12, %v363_v14  ;;  %v429_v38 = vld [vmem:[#allocation5 + $0xa30] sm:$0xff]  ;;  %v447_v50 = vld [vmem:[#allocation5 + $0xac0] sm:$0xff] }
 0x1ff   :  { %v17553_v27 = vcombine.high %v369_v19, %v381_v20  ;;  %v17565_v32 = vcombine.high %v375_v21, %v387_v23  ;;  %v17552_v34 = vcombine.low %v369_v19, %v381_v20  ;;  %v17564_v35 = vcombine.low %v375_v21, %v387_v23  ;;  %v441_v47 = vld [vmem:[#allocation5 + $0xa90] sm:$0xff]  ;;  %v459_v52 = vld [vmem:[#allocation5 + $0xb20] sm:$0xff] }
 0x200   :  { %7414 = vmatpush1.bf16.msra.mxu1 %v17456_v54  ;;  %8188 = vmatpush1.bf16.msra.mxu0 %v17468_v57  ;;  %v17577_v36 = vcombine.high %v393_v28, %v405_v29  ;;  %v17589_v41 = vcombine.high %v399_v31, %v411_v33  ;;  %v17576_v43 = vcombine.low %v393_v28, %v405_v29  ;;  %v453_v49 = vld [vmem:[#allocation5 + $0xaf0] sm:$0xff]  ;;  %v471_v62 = vld [vmem:[#allocation5 + $0xb80] sm:$0xff] }
 0x201   :  { %7415 = vmatprep.subr.bf16.mxu1 %v17481_v60  ;;  %8189 = vmatprep.subr.bf16.mxu0 %v17493_v3  ;;  %v17588_v45 = vcombine.low %v399_v31, %v411_v33  ;;  %v17601_v46 = vcombine.high %v417_v37, %v429_v38  ;;  %v17613_v51 = vcombine.high %v423_v40, %v435_v42  ;;  %v465_v57 = vld [vmem:[#allocation5 + $0xb50] sm:$0xff]  ;;  %v507_v11 = vld [vmem:[#allocation5 + $0xca0] sm:$0xff] }
 0x202   :  { %v17600_v53 = vcombine.low %v417_v37, %v429_v38  ;;  %v17612_v54 = vcombine.low %v423_v40, %v435_v42  ;;  %v17625_v55 = vcombine.high %v441_v47, %v453_v49  ;;  %v477_v60 = vld [vmem:[#allocation5 + $0xbb0] sm:$0xff]  ;;  %v17637_v63 = vcombine.high %v447_v50, %v459_v52  ;;  %v531_v20 = vld [vmem:[#allocation5 + $0xd60] sm:$0xff] }
 0x203   :  { %v17624_v1 = vcombine.low %v441_v47, %v453_v49  ;;  %v17636_v3 = vcombine.low %v447_v50, %v459_v52  ;;  %v17649_v4 = vcombine.high %v465_v57, %v477_v60  ;;  %v17661_v10 = vcombine.high %v471_v62, %v483_v0  ;;  %v555_v29 = vld [vmem:[#allocation5 + $0xe20] sm:$0xff] }
 0x204   :  { %7416 = vmatpush1.bf16.msra.mxu1 %v17480_v7  ;;  %8190 = vmatpush1.bf16.msra.mxu0 %v17492_v8  ;;  %v489_v7 = vld [vmem:[#allocation5 + $0xc10] sm:$0xff]  ;;  %v17648_v12 = vcombine.low %v465_v57, %v477_v60  ;;  %v579_v38 = vld [vmem:[#allocation5 + $0xee0] sm:$0xff] }
 0x205   :  { %7417 = vmatprep.subr.bf16.mxu1 %v17505_v9  ;;  %8191 = vmatprep.subr.bf16.mxu0 %v17517_v13  ;;  %v501_v8 = vld [vmem:[#allocation5 + $0xc70] sm:$0xff]  ;;  %v495_v9 = vld [vmem:[#allocation5 + $0xc40] sm:$0xff]  ;;  %v17660_v13 = vcombine.low %v471_v62, %v483_v0 }
 0x206   :  { %v17673_v14 = vcombine.high %v489_v7, %v501_v8  ;;  %v17685_v19 = vcombine.high %v495_v9, %v507_v11  ;;  %v17672_v21 = vcombine.low %v489_v7, %v501_v8  ;;  %v603_v49 = vld [vmem:[#allocation5 + $0xfa0] sm:$0xff] }
 0x207   :  { %v627_v60 = vld [vmem:[#allocation5 + $0x1060] sm:$0xff] }
 0x208   :  { %7418 = vmatpush1.bf16.msra.mxu1 %v17504_v16  ;;  %8192 = vmatpush1.bf16.msra.mxu0 %v17516_v17  ;;  %v513_v16 = vld [vmem:[#allocation5 + $0xcd0] sm:$0xff]  ;;  %v651_v8 = vld [vmem:[#allocation5 + $0x1120] sm:$0xff] }
 0x209   :  { %7419 = vmatprep.subr.bf16.mxu1 %v17529_v18  ;;  %8193 = vmatprep.subr.bf16.mxu0 %v17541_v22  ;;  %v525_v17 = vld [vmem:[#allocation5 + $0xd30] sm:$0xff]  ;;  %v519_v18 = vld [vmem:[#allocation5 + $0xd00] sm:$0xff]  ;;  %v17684_v22 = vcombine.low %v495_v9, %v507_v11 }
 0x20a   :  { %v17697_v23 = vcombine.high %v513_v16, %v525_v17  ;;  %v17709_v28 = vcombine.high %v519_v18, %v531_v20  ;;  %v17696_v31 = vcombine.low %v513_v16, %v525_v17  ;;  %v675_v17 = vld [vmem:[#allocation5 + $0x11e0] sm:$0xff] }
 0x20c   :  { %7420 = vmatpush1.bf16.msra.mxu1 %v17528_v24  ;;  %8194 = vmatpush1.bf16.msra.mxu0 %v17540_v26  ;;  %v537_v24 = vld [vmem:[#allocation5 + $0xd90] sm:$0xff] }
 0x20d   :  { %7421 = vmatprep.subr.bf16.mxu1 %v17553_v27  ;;  %8195 = vmatprep.subr.bf16.mxu0 %v17565_v32  ;;  %v549_v26 = vld [vmem:[#allocation5 + $0xdf0] sm:$0xff]  ;;  %v543_v27 = vld [vmem:[#allocation5 + $0xdc0] sm:$0xff]  ;;  %v17708_v32 = vcombine.low %v519_v18, %v531_v20 }
 0x20e   :  { %v17721_v33 = vcombine.high %v537_v24, %v549_v26  ;;  %v17733_v37 = vcombine.high %v543_v27, %v555_v29  ;;  %v17720_v40 = vcombine.low %v537_v24, %v549_v26  ;;  %v699_v26 = vld [vmem:[#allocation5 + $0x12a0] sm:$0xff] }
 0x210   :  { %7422 = vmatpush1.bf16.msra.mxu1 %v17552_v34  ;;  %8196 = vmatpush1.bf16.msra.mxu0 %v17564_v35  ;;  %v561_v34 = vld [vmem:[#allocation5 + $0xe50] sm:$0xff] }
 0x211   :  { %7423 = vmatprep.subr.bf16.mxu1 %v17577_v36  ;;  %8197 = vmatprep.subr.bf16.mxu0 %v17589_v41  ;;  %v573_v35 = vld [vmem:[#allocation5 + $0xeb0] sm:$0xff]  ;;  %v567_v36 = vld [vmem:[#allocation5 + $0xe80] sm:$0xff]  ;;  %v17732_v41 = vcombine.low %v543_v27, %v555_v29 }
 0x212   :  { %v17745_v42 = vcombine.high %v561_v34, %v573_v35  ;;  %v17757_v47 = vcombine.high %v567_v36, %v579_v38  ;;  %v17744_v50 = vcombine.low %v561_v34, %v573_v35  ;;  %v723_v35 = vld [vmem:[#allocation5 + $0x1360] sm:$0xff] }
 0x214   :  { %7424 = vmatpush1.bf16.msra.mxu1 %v17576_v43  ;;  %8198 = vmatpush1.bf16.msra.mxu0 %v17588_v45  ;;  %v585_v43 = vld [vmem:[#allocation5 + $0xf10] sm:$0xff] }
 0x215   :  { %7425 = vmatprep.subr.bf16.mxu1 %v17601_v46  ;;  %8199 = vmatprep.subr.bf16.mxu0 %v17613_v51  ;;  %v597_v45 = vld [vmem:[#allocation5 + $0xf70] sm:$0xff]  ;;  %v591_v46 = vld [vmem:[#allocation5 + $0xf40] sm:$0xff]  ;;  %v17756_v51 = vcombine.low %v567_v36, %v579_v38 }
 0x216   :  { %v17769_v52 = vcombine.high %v585_v43, %v597_v45  ;;  %v17781_v57 = vcombine.high %v591_v46, %v603_v49  ;;  %v17768_v62 = vcombine.low %v585_v43, %v597_v45  ;;  %v747_v45 = vld [vmem:[#allocation5 + $0x1420] sm:$0xff] }
 0x218   :  { %7426 = vmatpush1.bf16.msra.mxu1 %v17600_v53  ;;  %8200 = vmatpush1.bf16.msra.mxu0 %v17612_v54  ;;  %v609_v53 = vld [vmem:[#allocation5 + $0xfd0] sm:$0xff] }
 0x219   :  { %7427 = vmatprep.subr.bf16.mxu1 %v17625_v55  ;;  %8201 = vmatprep.subr.bf16.mxu0 %v17637_v63  ;;  %v621_v54 = vld [vmem:[#allocation5 + $0x1030] sm:$0xff]  ;;  %v615_v55 = vld [vmem:[#allocation5 + $0x1000] sm:$0xff]  ;;  %v17780_v63 = vcombine.low %v591_v46, %v603_v49 }
 0x21a   :  { %v17793_v0 = vcombine.high %v609_v53, %v621_v54  ;;  %v17805_v7 = vcombine.high %v615_v55, %v627_v60  ;;  %v17792_v9 = vcombine.low %v609_v53, %v621_v54  ;;  %v771_v54 = vld [vmem:[#allocation5 + $0x14e0] sm:$0xff] }
 0x21c   :  { %7428 = vmatpush1.bf16.msra.mxu1 %v17624_v1  ;;  %8202 = vmatpush1.bf16.msra.mxu0 %v17636_v3  ;;  %v633_v1 = vld [vmem:[#allocation5 + $0x1090] sm:$0xff] }
 0x21d   :  { %7429 = vmatprep.subr.bf16.mxu1 %v17649_v4  ;;  %8203 = vmatprep.subr.bf16.mxu0 %v17661_v10  ;;  %v645_v3 = vld [vmem:[#allocation5 + $0x10f0] sm:$0xff]  ;;  %v639_v4 = vld [vmem:[#allocation5 + $0x10c0] sm:$0xff]  ;;  %v17804_v10 = vcombine.low %v615_v55, %v627_v60 }
 0x21e   :  { %v17817_v11 = vcombine.high %v633_v1, %v645_v3  ;;  %v17829_v16 = vcombine.high %v639_v4, %v651_v8  ;;  %v17816_v18 = vcombine.low %v633_v1, %v645_v3  ;;  %v795_v3 = vld [vmem:[#allocation5 + $0x15a0] sm:$0xff] }
 0x220   :  { %7430 = vmatpush1.bf16.msra.mxu1 %v17648_v12  ;;  %8204 = vmatpush1.bf16.msra.mxu0 %v17660_v13  ;;  %v657_v12 = vld [vmem:[#allocation5 + $0x1150] sm:$0xff] }
 0x221   :  { %7442 = vmatprep.subr.bf16.mxu1 %v17673_v14  ;;  %8216 = vmatprep.subr.bf16.mxu0 %v17685_v19  ;;  %v669_v13 = vld [vmem:[#allocation5 + $0x11b0] sm:$0xff]  ;;  %v663_v14 = vld [vmem:[#allocation5 + $0x1180] sm:$0xff]  ;;  %v17828_v19 = vcombine.low %v639_v4, %v651_v8 }
 0x222   :  { %v17841_v20 = vcombine.high %v657_v12, %v669_v13  ;;  %v17853_v24 = vcombine.high %v663_v14, %v675_v17  ;;  %v17840_v27 = vcombine.low %v657_v12, %v669_v13  ;;  %v819_v13 = vld [vmem:[#allocation5 + $0x1660] sm:$0xff] }
 0x223   :  { %7432 = vmatmul.mubr.bf16.vlgmr.msra.gmra.mrb[8].mxu1 %v21873_v15  ;;  %8206 = vmatmul.mubr.bf16.vlgmr.msra.gmra.mrb[8].mxu0 %v21873_v15 }
 0x224   :  { %7443 = vmatpush1.bf16.msra.mxu1 %v17672_v21  ;;  %8217 = vmatpush1.bf16.msra.mxu0 %v17684_v22  ;;  %v681_v21 = vld [vmem:[#allocation5 + $0x1210] sm:$0xff] }
 0x225   :  { %7444 = vmatprep.subr.bf16.mxu1 %v17697_v23  ;;  %8218 = vmatprep.subr.bf16.mxu0 %v17709_v28  ;;  %v693_v22 = vld [vmem:[#allocation5 + $0x1270] sm:$0xff]  ;;  %v687_v23 = vld [vmem:[#allocation5 + $0x1240] sm:$0xff]  ;;  %v17852_v28 = vcombine.low %v663_v14, %v675_v17 }
 0x226   :  { %7474 = vmatprep.mubr.bf16.mxu1 %v21875_v25  ;;  %8248 = vmatprep.mubr.bf16.mxu0 %v21875_v25  ;;  %v17865_v29 = vcombine.high %v681_v21, %v693_v22  ;;  %v17877_v34 = vcombine.high %v687_v23, %v699_v26  ;;  %v17864_v36 = vcombine.low %v681_v21, %v693_v22  ;;  %v843_v22 = vld [vmem:[#allocation5 + $0x1720] sm:$0xff] }
 0x228   :  { %7445 = vmatpush1.bf16.msra.mxu1 %v17696_v31  ;;  %8219 = vmatpush1.bf16.msra.mxu0 %v17708_v32  ;;  %v705_v31 = vld [vmem:[#allocation5 + $0x12d0] sm:$0xff] }
 0x229   :  { %7446 = vmatprep.subr.bf16.mxu1 %v17721_v33  ;;  %8220 = vmatprep.subr.bf16.mxu0 %v17733_v37  ;;  %v717_v32 = vld [vmem:[#allocation5 + $0x1330] sm:$0xff]  ;;  %v711_v33 = vld [vmem:[#allocation5 + $0x1300] sm:$0xff]  ;;  %v17876_v37 = vcombine.low %v687_v23, %v699_v26 }
 0x22a   :  { %v17889_v38 = vcombine.high %v705_v31, %v717_v32  ;;  %v17901_v43 = vcombine.high %v711_v33, %v723_v35  ;;  %v17888_v46 = vcombine.low %v705_v31, %v717_v32  ;;  %v867_v32 = vld [vmem:[#allocation5 + $0x17e0] sm:$0xff] }
 0x22c   :  { %7447 = vmatpush1.bf16.msra.mxu1 %v17720_v40  ;;  %8221 = vmatpush1.bf16.msra.mxu0 %v17732_v41  ;;  %v729_v40 = vld [vmem:[#allocation5 + $0x1390] sm:$0xff] }
 0x22d   :  { %7448 = vmatprep.subr.bf16.mxu1 %v17745_v42  ;;  %8222 = vmatprep.subr.bf16.mxu0 %v17757_v47  ;;  %v741_v41 = vld [vmem:[#allocation5 + $0x13f0] sm:$0xff]  ;;  %v735_v42 = vld [vmem:[#allocation5 + $0x13c0] sm:$0xff]  ;;  %v17900_v47 = vcombine.low %v711_v33, %v723_v35 }
 0x22e   :  { %v17913_v49 = vcombine.high %v729_v40, %v741_v41  ;;  %v17925_v53 = vcombine.high %v735_v42, %v747_v45  ;;  %v17912_v55 = vcombine.low %v729_v40, %v741_v41  ;;  %v891_v41 = vld [vmem:[#allocation5 + $0x18a0] sm:$0xff] }
 0x230   :  { %7449 = vmatpush1.bf16.msra.mxu1 %v17744_v50  ;;  %8223 = vmatpush1.bf16.msra.mxu0 %v17756_v51  ;;  %v753_v50 = vld [vmem:[#allocation5 + $0x1450] sm:$0xff] }
 0x231   :  { %7450 = vmatprep.subr.bf16.mxu1 %v17769_v52  ;;  %8224 = vmatprep.subr.bf16.mxu0 %v17781_v57  ;;  %v765_v51 = vld [vmem:[#allocation5 + $0x14b0] sm:$0xff]  ;;  %v759_v52 = vld [vmem:[#allocation5 + $0x1480] sm:$0xff]  ;;  %v17924_v57 = vcombine.low %v735_v42, %v747_v45 }
 0x232   :  { %v17937_v60 = vcombine.high %v753_v50, %v765_v51  ;;  %v17949_v1 = vcombine.high %v759_v52, %v771_v54  ;;  %v17936_v4 = vcombine.low %v753_v50, %v765_v51  ;;  %v915_v51 = vld [vmem:[#allocation5 + $0x1960] sm:$0xff] }
 0x234   :  { %7451 = vmatpush1.bf16.msra.mxu1 %v17768_v62  ;;  %8225 = vmatpush1.bf16.msra.mxu0 %v17780_v63  ;;  %v777_v62 = vld [vmem:[#allocation5 + $0x1510] sm:$0xff] }
 0x235   :  { %7452 = vmatprep.subr.bf16.mxu1 %v17793_v0  ;;  %8226 = vmatprep.subr.bf16.mxu0 %v17805_v7  ;;  %v789_v63 = vld [vmem:[#allocation5 + $0x1570] sm:$0xff]  ;;  %v783_v0 = vld [vmem:[#allocation5 + $0x1540] sm:$0xff]  ;;  %v17948_v7 = vcombine.low %v759_v52, %v771_v54 }
 0x236   :  { %v17961_v8 = vcombine.high %v777_v62, %v789_v63  ;;  %v17973_v12 = vcombine.high %v783_v0, %v795_v3  ;;  %v17960_v14 = vcombine.low %v777_v62, %v789_v63  ;;  %v939_v63 = vld [vmem:[#allocation5 + $0x1a20] sm:$0xff] }
 0x238   :  { %7453 = vmatpush1.bf16.msra.mxu1 %v17792_v9  ;;  %8227 = vmatpush1.bf16.msra.mxu0 %v17804_v10  ;;  %v801_v9 = vld [vmem:[#allocation5 + $0x15d0] sm:$0xff] }
 0x239   :  { %7454 = vmatprep.subr.bf16.mxu1 %v17817_v11  ;;  %8228 = vmatprep.subr.bf16.mxu0 %v17829_v16  ;;  %v813_v10 = vld [vmem:[#allocation5 + $0x1630] sm:$0xff]  ;;  %v807_v11 = vld [vmem:[#allocation5 + $0x1600] sm:$0xff]  ;;  %v17972_v16 = vcombine.low %v783_v0, %v795_v3 }
 0x23a   :  { %v17985_v17 = vcombine.high %v801_v9, %v813_v10  ;;  %v17997_v21 = vcombine.high %v807_v11, %v819_v13  ;;  %v17984_v23 = vcombine.low %v801_v9, %v813_v10  ;;  %v963_v10 = vld [vmem:[#allocation5 + $0x1ae0] sm:$0xff] }
 0x23c   :  { %7455 = vmatpush1.bf16.msra.mxu1 %v17816_v18  ;;  %8229 = vmatpush1.bf16.msra.mxu0 %v17828_v19  ;;  %v825_v18 = vld [vmem:[#allocation5 + $0x1690] sm:$0xff] }
 0x23d   :  { %7456 = vmatprep.subr.bf16.mxu1 %v17841_v20  ;;  %8230 = vmatprep.subr.bf16.mxu0 %v17853_v24  ;;  %v837_v19 = vld [vmem:[#allocation5 + $0x16f0] sm:$0xff]  ;;  %v831_v20 = vld [vmem:[#allocation5 + $0x16c0] sm:$0xff]  ;;  %v17996_v24 = vcombine.low %v807_v11, %v819_v13 }
 0x23e   :  { %v18009_v26 = vcombine.high %v825_v18, %v837_v19  ;;  %v18021_v31 = vcombine.high %v831_v20, %v843_v22  ;;  %v18008_v33 = vcombine.low %v825_v18, %v837_v19  ;;  %v987_v19 = vld [vmem:[#allocation5 + $0x1ba0] sm:$0xff] }
 0x240   :  { %7457 = vmatpush1.bf16.msra.mxu1 %v17840_v27  ;;  %8231 = vmatpush1.bf16.msra.mxu0 %v17852_v28  ;;  %v849_v27 = vld [vmem:[#allocation5 + $0x1750] sm:$0xff] }
 0x241   :  { %7458 = vmatprep.subr.bf16.mxu1 %v17865_v29  ;;  %8232 = vmatprep.subr.bf16.mxu0 %v17877_v34  ;;  %v861_v28 = vld [vmem:[#allocation5 + $0x17b0] sm:$0xff]  ;;  %v855_v29 = vld [vmem:[#allocation5 + $0x1780] sm:$0xff]  ;;  %v18020_v34 = vcombine.low %v831_v20, %v843_v22 }
 0x242   :  { %v18033_v35 = vcombine.high %v849_v27, %v861_v28  ;;  %v18045_v40 = vcombine.high %v855_v29, %v867_v32  ;;  %v18032_v42 = vcombine.low %v849_v27, %v861_v28  ;;  %v1011_v28 = vld [vmem:[#allocation5 + $0x1c60] sm:$0xff] }
 0x244   :  { %7459 = vmatpush1.bf16.msra.mxu1 %v17864_v36  ;;  %8233 = vmatpush1.bf16.msra.mxu0 %v17876_v37  ;;  %v873_v36 = vld [vmem:[#allocation5 + $0x1810] sm:$0xff] }
 0x245   :  { %7460 = vmatprep.subr.bf16.mxu1 %v17889_v38  ;;  %8234 = vmatprep.subr.bf16.mxu0 %v17901_v43  ;;  %v885_v37 = vld [vmem:[#allocation5 + $0x1870] sm:$0xff]  ;;  %v879_v38 = vld [vmem:[#allocation5 + $0x1840] sm:$0xff]  ;;  %v18044_v43 = vcombine.low %v855_v29, %v867_v32 }
 0x246   :  { %v18057_v45 = vcombine.high %v873_v36, %v885_v37  ;;  %v18069_v50 = vcombine.high %v879_v38, %v891_v41  ;;  %v18056_v52 = vcombine.low %v873_v36, %v885_v37  ;;  %v1035_v37 = vld [vmem:[#allocation5 + $0x1d20] sm:$0xff] }
 0x248   :  { %7461 = vmatpush1.bf16.msra.mxu1 %v17888_v46  ;;  %8235 = vmatpush1.bf16.msra.mxu0 %v17900_v47  ;;  %v897_v46 = vld [vmem:[#allocation5 + $0x18d0] sm:$0xff] }
 0x249   :  { %7462 = vmatprep.subr.bf16.mxu1 %v17913_v49  ;;  %8236 = vmatprep.subr.bf16.mxu0 %v17925_v53  ;;  %v909_v47 = vld [vmem:[#allocation5 + $0x1930] sm:$0xff]  ;;  %v903_v49 = vld [vmem:[#allocation5 + $0x1900] sm:$0xff]  ;;  %v18068_v53 = vcombine.low %v879_v38, %v891_v41 }
 0x24a   :  { %v18081_v54 = vcombine.high %v897_v46, %v909_v47  ;;  %v18093_v62 = vcombine.high %v903_v49, %v915_v51  ;;  %v18080_v0 = vcombine.low %v897_v46, %v909_v47  ;;  %v1059_v47 = vld [vmem:[#allocation5 + $0x1de0] sm:$0xff] }
 0x24c   :  { %7463 = vmatpush1.bf16.msra.mxu1 %v17912_v55  ;;  %8237 = vmatpush1.bf16.msra.mxu0 %v17924_v57  ;;  %v921_v55 = vld [vmem:[#allocation5 + $0x1990] sm:$0xff] }
 0x24d   :  { %7464 = vmatprep.subr.bf16.mxu1 %v17937_v60  ;;  %8238 = vmatprep.subr.bf16.mxu0 %v17949_v1  ;;  %v933_v57 = vld [vmem:[#allocation5 + $0x19f0] sm:$0xff]  ;;  %v927_v60 = vld [vmem:[#allocation5 + $0x19c0] sm:$0xff]  ;;  %v18092_v1 = vcombine.low %v903_v49, %v915_v51 }
 0x24e   :  { %v18105_v3 = vcombine.high %v921_v55, %v933_v57  ;;  %v18117_v9 = vcombine.high %v927_v60, %v939_v63  ;;  %v18104_v11 = vcombine.low %v921_v55, %v933_v57  ;;  %v1083_v57 = vld [vmem:[#allocation5 + $0x1ea0] sm:$0xff] }
 0x250   :  { %7465 = vmatpush1.bf16.msra.mxu1 %v17936_v4  ;;  %8239 = vmatpush1.bf16.msra.mxu0 %v17948_v7  ;;  %v945_v4 = vld [vmem:[#allocation5 + $0x1a50] sm:$0xff] }
 0x251   :  { %7466 = vmatprep.subr.bf16.mxu1 %v17961_v8  ;;  %8240 = vmatprep.subr.bf16.mxu0 %v17973_v12  ;;  %v957_v7 = vld [vmem:[#allocation5 + $0x1ab0] sm:$0xff]  ;;  %v951_v8 = vld [vmem:[#allocation5 + $0x1a80] sm:$0xff]  ;;  %v18116_v12 = vcombine.low %v927_v60, %v939_v63 }
 0x252   :  { %v18129_v13 = vcombine.high %v945_v4, %v957_v7  ;;  %v18141_v18 = vcombine.high %v951_v8, %v963_v10  ;;  %v18128_v20 = vcombine.low %v945_v4, %v957_v7  ;;  %v1107_v7 = vld [vmem:[#allocation5 + $0x1f60] sm:$0xff] }
 0x254   :  { %7467 = vmatpush1.bf16.msra.mxu1 %v17960_v14  ;;  %8241 = vmatpush1.bf16.msra.mxu0 %v17972_v16  ;;  %v969_v14 = vld [vmem:[#allocation5 + $0x1b10] sm:$0xff] }
 0x255   :  { %7468 = vmatprep.subr.bf16.mxu1 %v17985_v17  ;;  %8242 = vmatprep.subr.bf16.mxu0 %v17997_v21  ;;  %v981_v16 = vld [vmem:[#allocation5 + $0x1b70] sm:$0xff]  ;;  %v975_v17 = vld [vmem:[#allocation5 + $0x1b40] sm:$0xff]  ;;  %v18140_v21 = vcombine.low %v951_v8, %v963_v10 }
 0x256   :  { %v18153_v22 = vcombine.high %v969_v14, %v981_v16  ;;  %v18165_v27 = vcombine.high %v975_v17, %v987_v19  ;;  %v18152_v29 = vcombine.low %v969_v14, %v981_v16  ;;  %v1131_v16 = vld [vmem:[#allocation5 + $0x2020] sm:$0xff] }
 0x258   :  { %7469 = vmatpush1.bf16.msra.mxu1 %v17984_v23  ;;  %8243 = vmatpush1.bf16.msra.mxu0 %v17996_v24  ;;  %v993_v23 = vld [vmem:[#allocation5 + $0x1bd0] sm:$0xff] }
 0x259   :  { %7470 = vmatprep.subr.bf16.mxu1 %v18009_v26  ;;  %8244 = vmatprep.subr.bf16.mxu0 %v18021_v31  ;;  %v1005_v24 = vld [vmem:[#allocation5 + $0x1c30] sm:$0xff]  ;;  %v999_v26 = vld [vmem:[#allocation5 + $0x1c00] sm:$0xff]  ;;  %v18164_v31 = vcombine.low %v975_v17, %v987_v19 }
 0x25a   :  { %v18177_v32 = vcombine.high %v993_v23, %v1005_v24  ;;  %v18189_v36 = vcombine.high %v999_v26, %v1011_v28  ;;  %v18176_v38 = vcombine.low %v993_v23, %v1005_v24  ;;  %v1155_v24 = vld [vmem:[#allocation5 + $0x20e0] sm:$0xff] }
 0x25c   :  { %7471 = vmatpush1.bf16.msra.mxu1 %v18008_v33  ;;  %8245 = vmatpush1.bf16.msra.mxu0 %v18020_v34  ;;  %v1017_v33 = vld [vmem:[#allocation5 + $0x1c90] sm:$0xff] }
 0x25d   :  { %7472 = vmatprep.subr.bf16.mxu1 %v18033_v35  ;;  %8246 = vmatprep.subr.bf16.mxu0 %v18045_v40  ;;  %v1029_v34 = vld [vmem:[#allocation5 + $0x1cf0] sm:$0xff]  ;;  %v1023_v35 = vld [vmem:[#allocation5 + $0x1cc0] sm:$0xff]  ;;  %v18188_v40 = vcombine.low %v999_v26, %v1011_v28 }
 0x25e   :  { %v18201_v41 = vcombine.high %v1017_v33, %v1029_v34  ;;  %v18213_v46 = vcombine.high %v1023_v35, %v1035_v37  ;;  %v18200_v49 = vcombine.low %v1017_v33, %v1029_v34  ;;  %v1179_v34 = vld [vmem:[#allocation5 + $0x21a0] sm:$0xff] }
 0x260   :  { %7473 = vmatpush1.bf16.msra.mxu1 %v18032_v42  ;;  %8247 = vmatpush1.bf16.msra.mxu0 %v18044_v43  ;;  %v1041_v42 = vld [vmem:[#allocation5 + $0x1d50] sm:$0xff] }
 0x261   :  { %7485 = vmatprep.subr.bf16.mxu1 %v18057_v45  ;;  %8259 = vmatprep.subr.bf16.mxu0 %v18069_v50  ;;  %v1053_v43 = vld [vmem:[#allocation5 + $0x1db0] sm:$0xff]  ;;  %v1047_v45 = vld [vmem:[#allocation5 + $0x1d80] sm:$0xff]  ;;  %v18212_v50 = vcombine.low %v1023_v35, %v1035_v37 }
 0x262   :  { %v18225_v51 = vcombine.high %v1041_v42, %v1053_v43  ;;  %v18237_v55 = vcombine.high %v1047_v45, %v1059_v47  ;;  %v18224_v60 = vcombine.low %v1041_v42, %v1053_v43  ;;  %v1203_v43 = vld [vmem:[#allocation5 + $0x2260] sm:$0xff] }
 0x263   :  { %7475 = vmatmul.mubr.bf16.vlgmr.msra.gmra.mrb[8].mxu1 %v21881_v30  ;;  %8249 = vmatmul.mubr.bf16.vlgmr.msra.gmra.mrb[8].mxu0 %v21881_v30 }
 0x264   :  { %7486 = vmatpush1.bf16.msra.mxu1 %v18056_v52  ;;  %8260 = vmatpush1.bf16.msra.mxu0 %v18068_v53  ;;  %v1065_v52 = vld [vmem:[#allocation5 + $0x1e10] sm:$0xff] }
 0x265   :  { %7487 = vmatprep.subr.bf16.mxu1 %v18081_v54  ;;  %8261 = vmatprep.subr.bf16.mxu0 %v18093_v62  ;;  %v1077_v53 = vld [vmem:[#allocation5 + $0x1e70] sm:$0xff]  ;;  %v1071_v54 = vld [vmem:[#allocation5 + $0x1e40] sm:$0xff]  ;;  %v18236_v62 = vcombine.low %v1047_v45, %v1059_v47 }
 0x266   :  { %7517 = vmatprep.mubr.bf16.mxu1 %v21883_v39  ;;  %8291 = vmatprep.mubr.bf16.mxu0 %v21883_v39  ;;  %v18249_v63 = vcombine.high %v1065_v52, %v1077_v53  ;;  %v18261_v4 = vcombine.high %v1071_v54, %v1083_v57  ;;  %v18248_v8 = vcombine.low %v1065_v52, %v1077_v53  ;;  %v1227_v53 = vld [vmem:[#allocation5 + $0x2320] sm:$0xff] }
 0x268   :  { %7488 = vmatpush1.bf16.msra.mxu1 %v18080_v0  ;;  %8262 = vmatpush1.bf16.msra.mxu0 %v18092_v1  ;;  %v1089_v0 = vld [vmem:[#allocation5 + $0x1ed0] sm:$0xff] }
 0x269   :  { %7489 = vmatprep.subr.bf16.mxu1 %v18105_v3  ;;  %8263 = vmatprep.subr.bf16.mxu0 %v18117_v9  ;;  %v1101_v1 = vld [vmem:[#allocation5 + $0x1f30] sm:$0xff]  ;;  %v1095_v3 = vld [vmem:[#allocation5 + $0x1f00] sm:$0xff]  ;;  %v18260_v9 = vcombine.low %v1071_v54, %v1083_v57 }
 0x26a   :  { %v18273_v10 = vcombine.high %v1089_v0, %v1101_v1  ;;  %v18285_v14 = vcombine.high %v1095_v3, %v1107_v7  ;;  %v18272_v17 = vcombine.low %v1089_v0, %v1101_v1  ;;  %v1251_v1 = vld [vmem:[#allocation5 + $0x23e0] sm:$0xff] }
 0x26c   :  { %7490 = vmatpush1.bf16.msra.mxu1 %v18104_v11  ;;  %8264 = vmatpush1.bf16.msra.mxu0 %v18116_v12  ;;  %v1113_v11 = vld [vmem:[#allocation5 + $0x1f90] sm:$0xff] }
 0x26d   :  { %7491 = vmatprep.subr.bf16.mxu1 %v18129_v13  ;;  %8265 = vmatprep.subr.bf16.mxu0 %v18141_v18  ;;  %v1125_v12 = vld [vmem:[#allocation5 + $0x1ff0] sm:$0xff]  ;;  %v1119_v13 = vld [vmem:[#allocation5 + $0x1fc0] sm:$0xff]  ;;  %v18284_v18 = vcombine.low %v1095_v3, %v1107_v7 }
 0x26e   :  { %v18297_v19 = vcombine.high %v1113_v11, %v1125_v12  ;;  %v18309_v23 = vcombine.high %v1119_v13, %v1131_v16  ;;  %v18296_v26 = vcombine.low %v1113_v11, %v1125_v12  ;;  %v125_v12 = vld [vmem:[#allocation5 + $0xb0] sm:$0xff] }
 0x270   :  { %7492 = vmatpush1.bf16.msra.mxu1 %v18128_v20  ;;  %8266 = vmatpush1.bf16.msra.mxu0 %v18140_v21  ;;  %v1137_v20 = vld [vmem:[#allocation5 + $0x2050] sm:$0xff] }
 0x271   :  { %7493 = vmatprep.subr.bf16.mxu1 %v18153_v22  ;;  %8267 = vmatprep.subr.bf16.mxu0 %v18165_v27  ;;  %v1149_v21 = vld [vmem:[#allocation5 + $0x20b0] sm:$0xff]  ;;  %v1143_v22 = vld [vmem:[#allocation5 + $0x2080] sm:$0xff]  ;;  %v18308_v27 = vcombine.low %v1119_v13, %v1131_v16 }
 0x272   :  { %v18321_v28 = vcombine.high %v1137_v20, %v1149_v21  ;;  %v18333_v33 = vcombine.high %v1143_v22, %v1155_v24  ;;  %v18320_v35 = vcombine.low %v1137_v20, %v1149_v21  ;;  %v149_v21 = vld [vmem:[#allocation5 + $0x170] sm:$0xff] }
 0x274   :  { %7494 = vmatpush1.bf16.msra.mxu1 %v18152_v29  ;;  %8268 = vmatpush1.bf16.msra.mxu0 %v18164_v31  ;;  %v1161_v29 = vld [vmem:[#allocation5 + $0x2110] sm:$0xff] }
 0x275   :  { %7495 = vmatprep.subr.bf16.mxu1 %v18177_v32  ;;  %8269 = vmatprep.subr.bf16.mxu0 %v18189_v36  ;;  %v1173_v31 = vld [vmem:[#allocation5 + $0x2170] sm:$0xff]  ;;  %v1167_v32 = vld [vmem:[#allocation5 + $0x2140] sm:$0xff]  ;;  %v18332_v36 = vcombine.low %v1143_v22, %v1155_v24 }
 0x276   :  { %v18345_v37 = vcombine.high %v1161_v29, %v1173_v31  ;;  %v18357_v42 = vcombine.high %v1167_v32, %v1179_v34  ;;  %v18344_v45 = vcombine.low %v1161_v29, %v1173_v31  ;;  %v173_v31 = vld [vmem:[#allocation5 + $0x230] sm:$0xff] }
 0x278   :  { %7496 = vmatpush1.bf16.msra.mxu1 %v18176_v38  ;;  %8270 = vmatpush1.bf16.msra.mxu0 %v18188_v40  ;;  %v1185_v38 = vld [vmem:[#allocation5 + $0x21d0] sm:$0xff] }
 0x279   :  { %7497 = vmatprep.subr.bf16.mxu1 %v18201_v41  ;;  %8271 = vmatprep.subr.bf16.mxu0 %v18213_v46  ;;  %v1197_v40 = vld [vmem:[#allocation5 + $0x2230] sm:$0xff]  ;;  %v1191_v41 = vld [vmem:[#allocation5 + $0x2200] sm:$0xff]  ;;  %v18356_v46 = vcombine.low %v1167_v32, %v1179_v34 }
 0x27a   :  { %v18369_v47 = vcombine.high %v1185_v38, %v1197_v40  ;;  %v18381_v52 = vcombine.high %v1191_v41, %v1203_v43  ;;  %v18368_v54 = vcombine.low %v1185_v38, %v1197_v40  ;;  %v197_v40 = vld [vmem:[#allocation5 + $0x2f0] sm:$0xff] }
 0x27c   :  { %7498 = vmatpush1.bf16.msra.mxu1 %v18200_v49  ;;  %8272 = vmatpush1.bf16.msra.mxu0 %v18212_v50  ;;  %v1209_v49 = vld [vmem:[#allocation5 + $0x2290] sm:$0xff] }
 0x27d   :  { %7499 = vmatprep.subr.bf16.mxu1 %v18225_v51  ;;  %8273 = vmatprep.subr.bf16.mxu0 %v18237_v55  ;;  %v1221_v50 = vld [vmem:[#allocation5 + $0x22f0] sm:$0xff]  ;;  %v1215_v51 = vld [vmem:[#allocation5 + $0x22c0] sm:$0xff]  ;;  %v18380_v55 = vcombine.low %v1191_v41, %v1203_v43 }
 0x27e   :  { %v18393_v57 = vcombine.high %v1209_v49, %v1221_v50  ;;  %v18405_v0 = vcombine.high %v1215_v51, %v1227_v53  ;;  %v18392_v3 = vcombine.low %v1209_v49, %v1221_v50  ;;  %v221_v50 = vld [vmem:[#allocation5 + $0x3b0] sm:$0xff] }
 0x280   :  { %7500 = vmatpush1.bf16.msra.mxu1 %v18224_v60  ;;  %8274 = vmatpush1.bf16.msra.mxu0 %v18236_v62  ;;  %v1233_v60 = vld [vmem:[#allocation5 + $0x2350] sm:$0xff] }
 0x281   :  { %7501 = vmatprep.subr.bf16.mxu1 %v18249_v63  ;;  %8275 = vmatprep.subr.bf16.mxu0 %v18261_v4  ;;  %v1245_v62 = vld [vmem:[#allocation5 + $0x23b0] sm:$0xff]  ;;  %v1239_v63 = vld [vmem:[#allocation5 + $0x2380] sm:$0xff]  ;;  %v18404_v4 = vcombine.low %v1215_v51, %v1227_v53 }
 0x282   :  { %v18417_v7 = vcombine.high %v1233_v60, %v1245_v62  ;;  %v18429_v11 = vcombine.high %v1239_v63, %v1251_v1  ;;  %v18416_v13 = vcombine.low %v1233_v60, %v1245_v62  ;;  %v245_v62 = vld [vmem:[#allocation5 + $0x470] sm:$0xff] }
 0x284   :  { %7502 = vmatpush1.bf16.msra.mxu1 %v18248_v8  ;;  %8276 = vmatpush1.bf16.msra.mxu0 %v18260_v9  ;;  %v106_v8 = vld [vmem:[#allocation5 + $0x18] sm:$0xff] }
 0x285   :  { %7503 = vmatprep.subr.bf16.mxu1 %v18273_v10  ;;  %8277 = vmatprep.subr.bf16.mxu0 %v18285_v14  ;;  %v118_v9 = vld [vmem:[#allocation5 + $0x78] sm:$0xff]  ;;  %v113_v10 = vld [vmem:[#allocation5 + $0x50] sm:$0xff]  ;;  %v18428_v14 = vcombine.low %v1239_v63, %v1251_v1  ;;  %v21940_v63 = vsub.s32 2, %v21907_v48  ;;  %v21943_v1 = vsub.s32 3, %v21907_v48 }
 0x286   :  { %v17291_v16 = vcombine.high %v106_v8, %v118_v9  ;;  %v17305_v20 = vcombine.high %v113_v10, %v125_v12  ;;  %v17290_v22 = vcombine.low %v106_v8, %v118_v9  ;;  %v250_v8 = vld [vmem:[#allocation5 + $0x498] sm:$0xff] }
 0x287   :  { %v262_v9 = vld [vmem:[#allocation5 + $0x4f8] sm:$0xff] }
 0x288   :  { %7504 = vmatpush1.bf16.msra.mxu1 %v18272_v17  ;;  %8278 = vmatpush1.bf16.msra.mxu0 %v18284_v18  ;;  %v130_v17 = vld [vmem:[#allocation5 + $0xd8] sm:$0xff] }
 0x289   :  { %7505 = vmatprep.subr.bf16.mxu1 %v18297_v19  ;;  %8279 = vmatprep.subr.bf16.mxu0 %v18309_v23  ;;  %v142_v18 = vld [vmem:[#allocation5 + $0x138] sm:$0xff]  ;;  %v137_v19 = vld [vmem:[#allocation5 + $0x110] sm:$0xff]  ;;  %v17304_v23 = vcombine.low %v113_v10, %v125_v12 }
 0x28a   :  { %v17315_v24 = vcombine.high %v130_v17, %v142_v18  ;;  %v17329_v29 = vcombine.high %v137_v19, %v149_v21  ;;  %v17314_v32 = vcombine.low %v130_v17, %v142_v18  ;;  %v257_v10 = vld [vmem:[#allocation5 + $0x4d0] sm:$0xff] }
 0x28c   :  { %7506 = vmatpush1.bf16.msra.mxu1 %v18296_v26  ;;  %8280 = vmatpush1.bf16.msra.mxu0 %v18308_v27  ;;  %v154_v26 = vld [vmem:[#allocation5 + $0x198] sm:$0xff] }
 0x28d   :  { %7507 = vmatprep.subr.bf16.mxu1 %v18321_v28  ;;  %8281 = vmatprep.subr.bf16.mxu0 %v18333_v33  ;;  %v166_v27 = vld [vmem:[#allocation5 + $0x1f8] sm:$0xff]  ;;  %v161_v28 = vld [vmem:[#allocation5 + $0x1d0] sm:$0xff]  ;;  %v17328_v33 = vcombine.low %v137_v19, %v149_v21  ;;  %v21617_v19 = vld [vmem:[#allocation7 + $0x8] sm:$0xff] }
 0x28e   :  { %v17339_v34 = vcombine.high %v154_v26, %v166_v27  ;;  %v17353_v38 = vcombine.high %v161_v28, %v173_v31  ;;  %v17338_v41 = vcombine.low %v154_v26, %v166_v27  ;;  %v281_v26 = vld [vmem:[#allocation5 + $0x590] sm:$0xff] }
 0x290   :  { %7508 = vmatpush1.bf16.msra.mxu1 %v18320_v35  ;;  %8282 = vmatpush1.bf16.msra.mxu0 %v18332_v36  ;;  %v178_v35 = vld [vmem:[#allocation5 + $0x258] sm:$0xff] }
 0x291   :  { %7509 = vmatprep.subr.bf16.mxu1 %v18345_v37  ;;  %8283 = vmatprep.subr.bf16.mxu0 %v18357_v42  ;;  %v190_v36 = vld [vmem:[#allocation5 + $0x2b8] sm:$0xff]  ;;  %v185_v37 = vld [vmem:[#allocation5 + $0x290] sm:$0xff]  ;;  %v17352_v42 = vcombine.low %v161_v28, %v173_v31 }
 0x292   :  { %v17363_v43 = vcombine.high %v178_v35, %v190_v36  ;;  %v17377_v49 = vcombine.high %v185_v37, %v197_v40  ;;  %v17362_v51 = vcombine.low %v178_v35, %v190_v36  ;;  %v293_v31 = vld [vmem:[#allocation5 + $0x5f0] sm:$0xff] }
 0x294   :  { %7510 = vmatpush1.bf16.msra.mxu1 %v18344_v45  ;;  %8284 = vmatpush1.bf16.msra.mxu0 %v18356_v46  ;;  %v202_v45 = vld [vmem:[#allocation5 + $0x318] sm:$0xff] }
 0x295   :  { %7511 = vmatprep.subr.bf16.mxu1 %v18369_v47  ;;  %8285 = vmatprep.subr.bf16.mxu0 %v18381_v52  ;;  %v214_v46 = vld [vmem:[#allocation5 + $0x378] sm:$0xff]  ;;  %v209_v47 = vld [vmem:[#allocation5 + $0x350] sm:$0xff]  ;;  %v17376_v52 = vcombine.low %v185_v37, %v197_v40  ;;  %v17434_v37 = vcombine.low %v250_v8, %v262_v9 }
 0x296   :  { %v17387_v53 = vcombine.high %v202_v45, %v214_v46  ;;  %v17401_v60 = vcombine.high %v209_v47, %v221_v50 }
 0x298   :  { %7512 = vmatpush1.bf16.msra.mxu1 %v18368_v54  ;;  %8286 = vmatpush1.bf16.msra.mxu0 %v18380_v55  ;;  %v226_v54 = vld [vmem:[#allocation5 + $0x3d8] sm:$0xff] }
 0x299   :  { %7513 = vmatprep.subr.bf16.mxu1 %v18393_v57  ;;  %8287 = vmatprep.subr.bf16.mxu0 %v18405_v0  ;;  %v238_v55 = vld [vmem:[#allocation5 + $0x438] sm:$0xff]  ;;  %v233_v57 = vld [vmem:[#allocation5 + $0x410] sm:$0xff]  ;;  %v17386_v0 = vcombine.low %v202_v45, %v214_v46 }
 0x29a   :  { %v17425_v12 = vcombine.high %v233_v57, %v245_v62  ;;  %v17410_v18 = vcombine.low %v226_v54, %v238_v55  ;;  %v17424_v21 = vcombine.low %v233_v57, %v245_v62  ;;  %v298_v46 = vld [vmem:[#allocation5 + $0x618] sm:$0xff] }
 0x29c   :  { %7514 = vmatpush1.bf16.msra.mxu1 %v18392_v3  ;;  %8288 = vmatpush1.bf16.msra.mxu0 %v18404_v4  ;;  %v21946_v3 = vsub.s32 4, %v21907_v48  ;;  %v17400_v4 = vcombine.low %v209_v47, %v221_v50  ;;  %v310_v47 = vld [vmem:[#allocation5 + $0x678] sm:$0xff] }
 0x29d   :  { %7515 = vmatprep.subr.bf16.mxu1 %v18417_v7  ;;  %8289 = vmatprep.subr.bf16.mxu0 %v18429_v11  ;;  %v17411_v7 = vcombine.high %v226_v54, %v238_v55  ;;  %v21949_v11 = vsub.s32 5, %v21907_v48  ;;  %v317_v54 = vld [vmem:[#allocation5 + $0x6b0] sm:$0xff] }
 0x29f   :  { %v1316_v27 = vrot.slane %v21617_v19, %v21949_v11 }
 0x2a0   :  { %7516 = vmatpush1.bf16.msra.mxu1 %v18416_v13  ;;  %8290 = vmatpush1.bf16.msra.mxu0 %v18428_v14  ;;  %v269_v13 = vld [vmem:[#allocation5 + $0x530] sm:$0xff]  ;;  %v21616_v14 = vld [vmem:[#allocation7] sm:$0xff] }
 0x2a1   :  { %7528 = vmatprep.subr.bf16.mxu1 %v17291_v16  ;;  %8431 = vmatprep.subr.bf16.mxu0 %v17305_v20  ;;  %v1272_v16 = vrot.slane %v21616_v14, %v21940_v63  ;;  %v1276_v17 = vrot.slane %v21616_v14, %v21943_v1  ;;  %v1312_v20 = vrot.slane %v21617_v19, %v21946_v3  ;;  %v329_v19 = vld [vmem:[#allocation5 + $0x710] sm:$0xff] }
 0x2a2   :  { %v17472_v14 = vcombine.low %v281_v26, %v293_v31 }
 0x2a3   :  { %7518 = vmatmul.mubr.bf16.vlgmr.msra.gmra.mrb[8].mxu1 %v21889_v44  ;;  %8292 = vmatmul.mubr.bf16.vlgmr.msra.gmra.mrb[8].mxu0 %v21889_v44 }
 0x2a4   :  { %7529 = vmatpush1.bf16.msra.mxu1 %v17290_v22  ;;  %8432 = vmatpush1.bf16.msra.mxu0 %v17304_v23  ;;  %v17435_v22 = vcombine.high %v250_v8, %v262_v9  ;;  %v274_v23 = vld [vmem:[#allocation5 + $0x558] sm:$0xff] }
 0x2a5   :  { %7530 = vmatprep.subr.bf16.mxu1 %v17315_v24  ;;  %8433 = vmatprep.subr.bf16.mxu0 %v17329_v29  ;;  %v286_v24 = vld [vmem:[#allocation5 + $0x5b8] sm:$0xff]  ;;  %v17449_v29 = vcombine.high %v257_v10, %v269_v13 }
 0x2a6   :  { %7560 = vmatprep.mubr.bf16.mxu1 %v21869_v58  ;;  %8463 = vmatprep.mubr.bf16.mxu0 %v21869_v58  ;;  %v17459_v45 = vcombine.high %v274_v23, %v286_v24 }
 0x2a8   :  { %7531 = vmatpush1.bf16.msra.mxu1 %v17314_v32  ;;  %8434 = vmatpush1.bf16.msra.mxu0 %v17328_v33 }
 0x2a9   :  { %7532 = vmatprep.subr.bf16.mxu1 %v17339_v34  ;;  %8435 = vmatprep.subr.bf16.mxu0 %v17353_v38  ;;  %v17448_v38 = vcombine.low %v257_v10, %v269_v13  ;;  %v17458_v10 = vcombine.low %v274_v23, %v286_v24  ;;  %v17482_v23 = vcombine.low %v298_v46, %v310_v47 }
 0x2ac   :  { %7533 = vmatpush1.bf16.msra.mxu1 %v17338_v41  ;;  %8436 = vmatpush1.bf16.msra.mxu0 %v17352_v42 }
 0x2ad   :  { %7534 = vmatprep.subr.bf16.mxu1 %v17363_v43  ;;  %8437 = vmatprep.subr.bf16.mxu0 %v17377_v49  ;;  %v305_v49 = vld [vmem:[#allocation5 + $0x650] sm:$0xff] }
 0x2ae   :  { %v17496_v24 = vcombine.low %v305_v49, %v317_v54 }
 0x2b0   :  { %7535 = vmatpush1.bf16.msra.mxu1 %v17362_v51  ;;  %8438 = vmatpush1.bf16.msra.mxu0 %v17376_v52 }
 0x2b1   :  { %7536 = vmatprep.subr.bf16.mxu1 %v17387_v53  ;;  %8439 = vmatprep.subr.bf16.mxu0 %v17401_v60  ;;  %v17473_v53 = vcombine.high %v281_v26, %v293_v31  ;;  %v346_v31 = vld [vmem:[#allocation5 + $0x798] sm:$0xff] }
 0x2b4   :  { %7537 = vmatpush1.bf16.msra.mxu1 %v17386_v0  ;;  %8440 = vmatpush1.bf16.msra.mxu0 %v17400_v4 }
 0x2b5   :  { %7538 = vmatprep.subr.bf16.mxu1 %v17411_v7  ;;  %8441 = vmatprep.subr.bf16.mxu0 %v17425_v12 }
 0x2b6   :  { %v7390_v28 = vpop.f32.mrb[4].mxu1  ;;  %v8035_v34 = vpop.f32.mrb[4].mxu0 }
 0x2b7   :  { %v19592_v32 = vadd.f32 %v7390_v28, %v1272_v16  ;;  %v7392_v33 = vpop.f32.mrb[5].mxu1  ;;  %v19612_v40 = vadd.f32 %v8035_v34, %v1312_v20  ;;  %v8037_v41 = vpop.f32.mrb[5].mxu0 }
 0x2b8   :  { %v19593_v35 = vadd.f32 %v7392_v33, %v1276_v17  ;;  %v7394_v36 = vpop.f32.mrb[6].mxu1  ;;  %7539 = vmatpush1.bf16.msra.mxu1 %v17410_v18  ;;  %8442 = vmatpush1.bf16.msra.mxu0 %v17424_v21  ;;  %v19613_v50 = vadd.f32 %v8037_v41, %v1316_v27  ;;  %v8039_v51 = vpop.f32.mrb[6].mxu0  ;;  %v334_v18 = vld [vmem:[#allocation5 + $0x738] sm:$0xff]  ;;  %v353_v33 = vld [vmem:[#allocation5 + $0x7d0] sm:$0xff] }
 0x2b9   :  { %v19594_v42 = vadd.f32 %v7394_v36, %v1272_v16  ;;  %v7396_v43 = vpop.f32.mrb[7].mxu1  ;;  %7540 = vmatprep.subr.bf16.mxu1 %v17435_v22  ;;  %8443 = vmatprep.subr.bf16.mxu0 %v17449_v29  ;;  %v8701_v55 = vmax.f32 %v19612_v40, 0.0  ;;  %v19614_v57 = vadd.f32 %v8039_v51, %v1312_v20  ;;  %v8041_v60 = vpop.f32.mrb[7].mxu0  ;;  %v8691_v62 = vmax.f32 %v19592_v32, 0.0  ;;  %v358_v32 = vld [vmem:[#allocation5 + $0x7f8] sm:$0xff] }
 0x2ba   :  { %v19595_v52 = vadd.f32 %v7396_v43, %v1276_v17  ;;  %v8702_v4 = vmax.f32 %v19613_v50, 0.0  ;;  %v19615_v7 = vadd.f32 %v8041_v60, %v1316_v27  ;;  %v8692_v8 = vmax.f32 %v19593_v35, 0.0  ;;  %v322_v17 = vld [vmem:[#allocation5 + $0x6d8] sm:$0xff]  ;;  %v341_v27 = vld [vmem:[#allocation5 + $0x770] sm:$0xff] }
 0x2bb   :  { %v8715_v0 = vmax.f32 %v19594_v42, 0.0  ;;  %v8725_v12 = vmax.f32 %v19614_v57, 0.0  ;;  %v17483_v16 = vcombine.high %v298_v46, %v310_v47  ;;  %v17497_v22 = vcombine.high %v305_v49, %v317_v54  ;;  %v365_v35 = vld [vmem:[#allocation5 + $0x830] sm:$0xff]  ;;  %v370_v40 = vld [vmem:[#allocation5 + $0x858] sm:$0xff] }
 0x2bc   :  { %v8716_v9 = vmax.f32 %v19595_v52, 0.0  ;;  %7541 = vmatpush1.bf16.msra.mxu1 %v17434_v37  ;;  %8444 = vmatpush1.bf16.msra.mxu0 %v17448_v38  ;;  %v8726_v20 = vmax.f32 %v19615_v7, 0.0  ;;  %v17507_v26 = vcombine.high %v322_v17, %v334_v18  ;;  %v17521_v34 = vcombine.high %v329_v19, %v341_v27  ;;  %v382_v41 = vld [vmem:[#allocation5 + $0x8b8] sm:$0xff]  ;;  %v377_v42 = vld [vmem:[#allocation5 + $0x890] sm:$0xff] }
 0x2bd   :  { %v21955_v13 = vpack.c.bf16 %v8715_v0, %v8691_v62  ;;  %7542 = vmatprep.subr.bf16.mxu1 %v17459_v45  ;;  %8445 = vmatprep.subr.bf16.mxu0 %v17473_v53  ;;  %v21959_v28 = vpack.c.bf16 %v8725_v12, %v8701_v55  ;;  %v17506_v36 = vcombine.low %v322_v17, %v334_v18  ;;  %v389_v45 = vld [vmem:[#allocation5 + $0x8f0] sm:$0xff]  ;;  %v394_v50 = vld [vmem:[#allocation5 + $0x918] sm:$0xff] }
 0x2be   :  { %v21957_v21 = vpack.c.bf16 %v8716_v9, %v8692_v8  ;;  %v21961_v29 = vpack.c.bf16 %v8726_v20, %v8702_v4  ;;  %v17520_v37 = vcombine.low %v329_v19, %v341_v27  ;;  %v17531_v38 = vcombine.high %v346_v31, %v358_v32  ;;  %v406_v51 = vld [vmem:[#allocation5 + $0x978] sm:$0xff]  ;;  %v401_v52 = vld [vmem:[#allocation5 + $0x950] sm:$0xff] }
 0x2bf   :  { %v17545_v43 = vcombine.high %v353_v33, %v365_v35  ;;  %v17530_v46 = vcombine.low %v346_v31, %v358_v32  ;;  %v17544_v47 = vcombine.low %v353_v33, %v365_v35  ;;  %v17555_v49 = vcombine.high %v370_v40, %v382_v41  ;;  %v413_v54 = vld [vmem:[#allocation5 + $0x9b0] sm:$0xff]  ;;  %v418_v62 = vld [vmem:[#allocation5 + $0x9d8] sm:$0xff] }
 0x2c0   :  { %7543 = vmatpush1.bf16.msra.mxu1 %v17458_v10  ;;  %8446 = vmatpush1.bf16.msra.mxu0 %v17472_v14  ;;  %v17569_v53 = vcombine.high %v377_v42, %v389_v45  ;;  %v17554_v55 = vcombine.low %v370_v40, %v382_v41  ;;  %v17568_v57 = vcombine.low %v377_v42, %v389_v45  ;;  %v430_v0 = vld [vmem:[#allocation5 + $0xa38] sm:$0xff]  ;;  %v425_v4 = vld [vmem:[#allocation5 + $0xa10] sm:$0xff] }
 0x2c1   :  { %7544 = vmatprep.subr.bf16.mxu1 %v17483_v16  ;;  %8447 = vmatprep.subr.bf16.mxu0 %v17497_v22  ;;  %v17579_v60 = vcombine.high %v394_v50, %v406_v51  ;;  %v17593_v7 = vcombine.high %v401_v52, %v413_v54  ;;  %v437_v8 = vld [vmem:[#allocation5 + $0xa70] sm:$0xff]  ;;  %v17578_v9 = vcombine.low %v394_v50, %v406_v51  ;;  %v442_v14 = vld [vmem:[#allocation5 + $0xa98] sm:$0xff] }
 0x2c2   :  { %v17592_v10 = vcombine.low %v401_v52, %v413_v54  ;;  %v17603_v12 = vcombine.high %v418_v62, %v430_v0  ;;  %v454_v16 = vld [vmem:[#allocation5 + $0xaf8] sm:$0xff]  ;;  %v449_v17 = vld [vmem:[#allocation5 + $0xad0] sm:$0xff]  ;;  %v17617_v18 = vcombine.high %v425_v4, %v437_v8  ;;  %v17602_v20 = vcombine.low %v418_v62, %v430_v0 }
 0x2c3   :  { %v461_v19 = vld [vmem:[#allocation5 + $0xb30] sm:$0xff]  ;;  %v17616_v22 = vcombine.low %v425_v4, %v437_v8  ;;  %v17627_v27 = vcombine.high %v442_v14, %v454_v16  ;;  %v17626_v33 = vcombine.low %v442_v14, %v454_v16 }
 0x2c4   :  { %7545 = vmatpush1.bf16.msra.mxu1 %v17482_v23  ;;  %8448 = vmatpush1.bf16.msra.mxu0 %v17496_v24  ;;  %v466_v23 = vld [vmem:[#allocation5 + $0xb58] sm:$0xff]  ;;  %v17641_v31 = vcombine.high %v449_v17, %v461_v19  ;;  %v485_v32 = vld [vmem:[#allocation5 + $0xbf0] sm:$0xff] }
 0x2c5   :  { %7546 = vmatprep.subr.bf16.mxu1 %v17507_v26  ;;  %8449 = vmatprep.subr.bf16.mxu0 %v17521_v34  ;;  %v478_v24 = vld [vmem:[#allocation5 + $0xbb8] sm:$0xff]  ;;  %v473_v26 = vld [vmem:[#allocation5 + $0xb90] sm:$0xff]  ;;  %v17640_v34 = vcombine.low %v449_v17, %v461_v19 }
 0x2c6   :  { %v17651_v35 = vcombine.high %v466_v23, %v478_v24  ;;  %v17665_v40 = vcombine.high %v473_v26, %v485_v32  ;;  %v509_v41 = vld [vmem:[#allocation5 + $0xcb0] sm:$0xff]  ;;  %v17650_v42 = vcombine.low %v466_v23, %v478_v24 }
 0x2c7   :  { %v533_v51 = vld [vmem:[#allocation5 + $0xd70] sm:$0xff] }
 0x2c8   :  { %7547 = vmatpush1.bf16.msra.mxu1 %v17506_v36  ;;  %8450 = vmatpush1.bf16.msra.mxu0 %v17520_v37  ;;  %v490_v36 = vld [vmem:[#allocation5 + $0xc18] sm:$0xff]  ;;  %v545_v62 = vld [vmem:[#allocation5 + $0xdd0] sm:$0xff] }
 0x2c9   :  { %7548 = vmatprep.subr.bf16.mxu1 %v17531_v38  ;;  %8451 = vmatprep.subr.bf16.mxu0 %v17545_v43  ;;  %v502_v37 = vld [vmem:[#allocation5 + $0xc78] sm:$0xff]  ;;  %v497_v38 = vld [vmem:[#allocation5 + $0xc50] sm:$0xff]  ;;  %v17664_v43 = vcombine.low %v473_v26, %v485_v32 }
 0x2ca   :  { %v17675_v45 = vcombine.high %v490_v36, %v502_v37  ;;  %v17689_v50 = vcombine.high %v497_v38, %v509_v41  ;;  %v17674_v52 = vcombine.low %v490_v36, %v502_v37  ;;  %v557_v0 = vld [vmem:[#allocation5 + $0xe30] sm:$0xff] }
 0x2cb   :  { %v569_v14 = vld [vmem:[#allocation5 + $0xe90] sm:$0xff] }
 0x2cc   :  { %7549 = vmatpush1.bf16.msra.mxu1 %v17530_v46  ;;  %8452 = vmatpush1.bf16.msra.mxu0 %v17544_v47  ;;  %v514_v46 = vld [vmem:[#allocation5 + $0xcd8] sm:$0xff]  ;;  %v581_v16 = vld [vmem:[#allocation5 + $0xef0] sm:$0xff] }
 0x2cd   :  { %7550 = vmatprep.subr.bf16.mxu1 %v17555_v49  ;;  %8453 = vmatprep.subr.bf16.mxu0 %v17569_v53  ;;  %v526_v47 = vld [vmem:[#allocation5 + $0xd38] sm:$0xff]  ;;  %v521_v49 = vld [vmem:[#allocation5 + $0xd10] sm:$0xff]  ;;  %v17688_v53 = vcombine.low %v497_v38, %v509_v41 }
 0x2ce   :  { %v17699_v54 = vcombine.high %v514_v46, %v526_v47  ;;  %v17698_v4 = vcombine.low %v514_v46, %v526_v47  ;;  %v593_v23 = vld [vmem:[#allocation5 + $0xf50] sm:$0xff] }
 0x2cf   :  { %v605_v24 = vld [vmem:[#allocation5 + $0xfb0] sm:$0xff] }
 0x2d0   :  { %7551 = vmatpush1.bf16.msra.mxu1 %v17554_v55  ;;  %8454 = vmatpush1.bf16.msra.mxu0 %v17568_v57  ;;  %v538_v55 = vld [vmem:[#allocation5 + $0xd98] sm:$0xff]  ;;  %v617_v36 = vld [vmem:[#allocation5 + $0x1010] sm:$0xff] }
 0x2d1   :  { %7552 = vmatprep.subr.bf16.mxu1 %v17579_v60  ;;  %8455 = vmatprep.subr.bf16.mxu0 %v17593_v7  ;;  %v550_v57 = vld [vmem:[#allocation5 + $0xdf8] sm:$0xff]  ;;  %v17713_v60 = vcombine.high %v521_v49, %v533_v51  ;;  %v17712_v7 = vcombine.low %v521_v49, %v533_v51  ;;  %v629_v37 = vld [vmem:[#allocation5 + $0x1070] sm:$0xff] }
 0x2d2   :  { %v17723_v8 = vcombine.high %v538_v55, %v550_v57  ;;  %v17722_v17 = vcombine.low %v538_v55, %v550_v57  ;;  %v641_v46 = vld [vmem:[#allocation5 + $0x10d0] sm:$0xff] }
 0x2d3   :  { %v653_v47 = vld [vmem:[#allocation5 + $0x1130] sm:$0xff] }
 0x2d4   :  { %7553 = vmatpush1.bf16.msra.mxu1 %v17578_v9  ;;  %8456 = vmatpush1.bf16.msra.mxu0 %v17592_v10  ;;  %v17737_v9 = vcombine.high %v545_v62, %v557_v0  ;;  %v562_v10 = vld [vmem:[#allocation5 + $0xe58] sm:$0xff]  ;;  %v665_v55 = vld [vmem:[#allocation5 + $0x1190] sm:$0xff] }
 0x2d5   :  { %7554 = vmatprep.subr.bf16.mxu1 %v17603_v12  ;;  %8457 = vmatprep.subr.bf16.mxu0 %v17617_v18  ;;  %v574_v12 = vld [vmem:[#allocation5 + $0xeb8] sm:$0xff]  ;;  %v17736_v18 = vcombine.low %v545_v62, %v557_v0  ;;  %v677_v57 = vld [vmem:[#allocation5 + $0x11f0] sm:$0xff]  ;;  %v17832_v62 = vcombine.low %v641_v46, %v653_v47 }
 0x2d6   :  { %v17747_v19 = vcombine.high %v562_v10, %v574_v12  ;;  %v17746_v26 = vcombine.low %v562_v10, %v574_v12  ;;  %v701_v10 = vld [vmem:[#allocation5 + $0x12b0] sm:$0xff] }
 0x2d8   :  { %7555 = vmatpush1.bf16.msra.mxu1 %v17602_v20  ;;  %8458 = vmatpush1.bf16.msra.mxu0 %v17616_v22  ;;  %v17761_v20 = vcombine.high %v569_v14, %v581_v16  ;;  %v586_v22 = vld [vmem:[#allocation5 + $0xf18] sm:$0xff] }
 0x2d9   :  { %7556 = vmatprep.subr.bf16.mxu1 %v17627_v27  ;;  %8459 = vmatprep.subr.bf16.mxu0 %v17641_v31  ;;  %v598_v27 = vld [vmem:[#allocation5 + $0xf78] sm:$0xff]  ;;  %v17760_v31 = vcombine.low %v569_v14, %v581_v16  ;;  %v17856_v14 = vcombine.low %v665_v55, %v677_v57 }
 0x2da   :  { %v17771_v32 = vcombine.high %v586_v22, %v598_v27  ;;  %v17770_v38 = vcombine.low %v586_v22, %v598_v27  ;;  %v725_v22 = vld [vmem:[#allocation5 + $0x1370] sm:$0xff] }
 0x2dc   :  { %7557 = vmatpush1.bf16.msra.mxu1 %v17626_v33  ;;  %8460 = vmatpush1.bf16.msra.mxu0 %v17640_v34  ;;  %v17785_v33 = vcombine.high %v593_v23, %v605_v24  ;;  %v610_v34 = vld [vmem:[#allocation5 + $0xfd8] sm:$0xff] }
 0x2dd   :  { %7558 = vmatprep.subr.bf16.mxu1 %v17651_v35  ;;  %8461 = vmatprep.subr.bf16.mxu0 %v17665_v40  ;;  %v622_v35 = vld [vmem:[#allocation5 + $0x1038] sm:$0xff]  ;;  %v17784_v40 = vcombine.low %v593_v23, %v605_v24 }
 0x2de   :  { %v17795_v41 = vcombine.high %v610_v34, %v622_v35  ;;  %v17794_v49 = vcombine.low %v610_v34, %v622_v35  ;;  %v749_v34 = vld [vmem:[#allocation5 + $0x1430] sm:$0xff] }
 0x2e0   :  { %7559 = vmatpush1.bf16.msra.mxu1 %v17650_v42  ;;  %8462 = vmatpush1.bf16.msra.mxu0 %v17664_v43  ;;  %v17809_v42 = vcombine.high %v617_v36, %v629_v37  ;;  %v634_v43 = vld [vmem:[#allocation5 + $0x1098] sm:$0xff] }
 0x2e1   :  { %7571 = vmatprep.subr.bf16.mxu1 %v17675_v45  ;;  %8474 = vmatprep.subr.bf16.mxu0 %v17689_v50  ;;  %v646_v45 = vld [vmem:[#allocation5 + $0x10f8] sm:$0xff]  ;;  %v17808_v50 = vcombine.low %v617_v36, %v629_v37 }
 0x2e2   :  { %v17819_v51 = vcombine.high %v634_v43, %v646_v45 }
 0x2e3   :  { %7561 = vmatmul.mubr.bf16.vlgmr.msra.gmra.mrb[12].mxu1 %v21873_v15  ;;  %8464 = vmatmul.mubr.bf16.vlgmr.msra.gmra.mrb[12].mxu0 %v21873_v15 }
 0x2e4   :  { %7572 = vmatpush1.bf16.msra.mxu1 %v17674_v52  ;;  %8475 = vmatpush1.bf16.msra.mxu0 %v17688_v53  ;;  %v17833_v52 = vcombine.high %v641_v46, %v653_v47  ;;  %v658_v53 = vld [vmem:[#allocation5 + $0x1158] sm:$0xff] }
 0x2e5   :  { %7573 = vmatprep.subr.bf16.mxu1 %v17699_v54  ;;  %8476 = vmatprep.subr.bf16.mxu0 %v17713_v60  ;;  %v670_v54 = vld [vmem:[#allocation5 + $0x11b8] sm:$0xff]  ;;  %v17818_v60 = vcombine.low %v634_v43, %v646_v45  ;;  %v773_v43 = vld [vmem:[#allocation5 + $0x14f0] sm:$0xff] }
 0x2e6   :  { %7603 = vmatprep.mubr.bf16.mxu1 %v21875_v25  ;;  %8506 = vmatprep.mubr.bf16.mxu0 %v21875_v25  ;;  %v17843_v0 = vcombine.high %v658_v53, %v670_v54  ;;  %v17842_v12 = vcombine.low %v658_v53, %v670_v54  ;;  %v797_v53 = vld [vmem:[#allocation5 + $0x15b0] sm:$0xff] }
 0x2e8   :  { %7574 = vmatpush1.bf16.msra.mxu1 %v17698_v4  ;;  %8477 = vmatpush1.bf16.msra.mxu0 %v17712_v7  ;;  %v17857_v4 = vcombine.high %v665_v55, %v677_v57  ;;  %v682_v7 = vld [vmem:[#allocation5 + $0x1218] sm:$0xff] }
 0x2e9   :  { %7575 = vmatprep.subr.bf16.mxu1 %v17723_v8  ;;  %8478 = vmatprep.subr.bf16.mxu0 %v17737_v9  ;;  %v694_v8 = vld [vmem:[#allocation5 + $0x1278] sm:$0xff]  ;;  %v689_v9 = vld [vmem:[#allocation5 + $0x1250] sm:$0xff] }
 0x2ea   :  { %v17867_v16 = vcombine.high %v682_v7, %v694_v8  ;;  %v17866_v27 = vcombine.low %v682_v7, %v694_v8  ;;  %v17880_v23 = vcombine.low %v689_v9, %v701_v10  ;;  %v821_v7 = vld [vmem:[#allocation5 + $0x1670] sm:$0xff] }
 0x2ec   :  { %7576 = vmatpush1.bf16.msra.mxu1 %v17722_v17  ;;  %8479 = vmatpush1.bf16.msra.mxu0 %v17736_v18  ;;  %v17881_v17 = vcombine.high %v689_v9, %v701_v10  ;;  %v706_v18 = vld [vmem:[#allocation5 + $0x12d8] sm:$0xff] }
 0x2ed   :  { %7577 = vmatprep.subr.bf16.mxu1 %v17747_v19  ;;  %8480 = vmatprep.subr.bf16.mxu0 %v17761_v20  ;;  %v718_v19 = vld [vmem:[#allocation5 + $0x1338] sm:$0xff]  ;;  %v713_v20 = vld [vmem:[#allocation5 + $0x1310] sm:$0xff] }
 0x2ee   :  { %v17891_v24 = vcombine.high %v706_v18, %v718_v19  ;;  %v17890_v35 = vcombine.low %v706_v18, %v718_v19  ;;  %v17904_v36 = vcombine.low %v713_v20, %v725_v22  ;;  %v845_v18 = vld [vmem:[#allocation5 + $0x1730] sm:$0xff] }
 0x2f0   :  { %7578 = vmatpush1.bf16.msra.mxu1 %v17746_v26  ;;  %8481 = vmatpush1.bf16.msra.mxu0 %v17760_v31  ;;  %v17905_v26 = vcombine.high %v713_v20, %v725_v22  ;;  %v730_v31 = vld [vmem:[#allocation5 + $0x1398] sm:$0xff] }
 0x2f1   :  { %7579 = vmatprep.subr.bf16.mxu1 %v17771_v32  ;;  %8482 = vmatprep.subr.bf16.mxu0 %v17785_v33  ;;  %v742_v32 = vld [vmem:[#allocation5 + $0x13f8] sm:$0xff]  ;;  %v737_v33 = vld [vmem:[#allocation5 + $0x13d0] sm:$0xff] }
 0x2f2   :  { %v17915_v37 = vcombine.high %v730_v31, %v742_v32  ;;  %v17914_v45 = vcombine.low %v730_v31, %v742_v32  ;;  %v17928_v46 = vcombine.low %v737_v33, %v749_v34  ;;  %v869_v31 = vld [vmem:[#allocation5 + $0x17f0] sm:$0xff] }
 0x2f4   :  { %7580 = vmatpush1.bf16.msra.mxu1 %v17770_v38  ;;  %8483 = vmatpush1.bf16.msra.mxu0 %v17784_v40  ;;  %v17929_v38 = vcombine.high %v737_v33, %v749_v34  ;;  %v754_v40 = vld [vmem:[#allocation5 + $0x1458] sm:$0xff] }
 0x2f5   :  { %7581 = vmatprep.subr.bf16.mxu1 %v17795_v41  ;;  %8484 = vmatprep.subr.bf16.mxu0 %v17809_v42  ;;  %v766_v41 = vld [vmem:[#allocation5 + $0x14b8] sm:$0xff]  ;;  %v761_v42 = vld [vmem:[#allocation5 + $0x1490] sm:$0xff] }
 0x2f6   :  { %v17939_v47 = vcombine.high %v754_v40, %v766_v41  ;;  %v17938_v54 = vcombine.low %v754_v40, %v766_v41  ;;  %v17952_v55 = vcombine.low %v761_v42, %v773_v43  ;;  %v893_v40 = vld [vmem:[#allocation5 + $0x18b0] sm:$0xff] }
 0x2f8   :  { %7582 = vmatpush1.bf16.msra.mxu1 %v17794_v49  ;;  %8485 = vmatpush1.bf16.msra.mxu0 %v17808_v50  ;;  %v17953_v49 = vcombine.high %v761_v42, %v773_v43  ;;  %v778_v50 = vld [vmem:[#allocation5 + $0x1518] sm:$0xff] }
 0x2f9   :  { %7583 = vmatprep.subr.bf16.mxu1 %v17819_v51  ;;  %8486 = vmatprep.subr.bf16.mxu0 %v17833_v52  ;;  %v790_v51 = vld [vmem:[#allocation5 + $0x1578] sm:$0xff]  ;;  %v785_v52 = vld [vmem:[#allocation5 + $0x1550] sm:$0xff] }
 0x2fa   :  { %v17963_v57 = vcombine.high %v778_v50, %v790_v51  ;;  %v17962_v8 = vcombine.low %v778_v50, %v790_v51  ;;  %v17976_v9 = vcombine.low %v785_v52, %v797_v53  ;;  %v917_v50 = vld [vmem:[#allocation5 + $0x1970] sm:$0xff] }
 0x2fc   :  { %7584 = vmatpush1.bf16.msra.mxu1 %v17818_v60  ;;  %8487 = vmatpush1.bf16.msra.mxu0 %v17832_v62  ;;  %v17977_v60 = vcombine.high %v785_v52, %v797_v53  ;;  %v802_v62 = vld [vmem:[#allocation5 + $0x15d8] sm:$0xff] }
 0x2fd   :  { %7585 = vmatprep.subr.bf16.mxu1 %v17843_v0  ;;  %8488 = vmatprep.subr.bf16.mxu0 %v17857_v4  ;;  %v814_v0 = vld [vmem:[#allocation5 + $0x1638] sm:$0xff]  ;;  %v809_v4 = vld [vmem:[#allocation5 + $0x1610] sm:$0xff] }
 0x2fe   :  { %v17987_v10 = vcombine.high %v802_v62, %v814_v0  ;;  %v17986_v19 = vcombine.low %v802_v62, %v814_v0  ;;  %v18000_v20 = vcombine.low %v809_v4, %v821_v7  ;;  %v941_v62 = vld [vmem:[#allocation5 + $0x1a30] sm:$0xff] }
 0x300   :  { %7586 = vmatpush1.bf16.msra.mxu1 %v17842_v12  ;;  %8489 = vmatpush1.bf16.msra.mxu0 %v17856_v14  ;;  %v18001_v12 = vcombine.high %v809_v4, %v821_v7  ;;  %v826_v14 = vld [vmem:[#allocation5 + $0x1698] sm:$0xff] }
 0x301   :  { %7587 = vmatprep.subr.bf16.mxu1 %v17867_v16  ;;  %8490 = vmatprep.subr.bf16.mxu0 %v17881_v17  ;;  %v838_v16 = vld [vmem:[#allocation5 + $0x16f8] sm:$0xff]  ;;  %v833_v17 = vld [vmem:[#allocation5 + $0x16d0] sm:$0xff] }
 0x302   :  { %v18011_v22 = vcombine.high %v826_v14, %v838_v16  ;;  %v18010_v32 = vcombine.low %v826_v14, %v838_v16  ;;  %v18024_v33 = vcombine.low %v833_v17, %v845_v18  ;;  %v965_v14 = vld [vmem:[#allocation5 + $0x1af0] sm:$0xff] }
 0x304   :  { %7588 = vmatpush1.bf16.msra.mxu1 %v17866_v27  ;;  %8491 = vmatpush1.bf16.msra.mxu0 %v17880_v23  ;;  %v18025_v27 = vcombine.high %v833_v17, %v845_v18  ;;  %v850_v23 = vld [vmem:[#allocation5 + $0x1758] sm:$0xff] }
 0x305   :  { %7589 = vmatprep.subr.bf16.mxu1 %v17891_v24  ;;  %8492 = vmatprep.subr.bf16.mxu0 %v17905_v26  ;;  %v862_v24 = vld [vmem:[#allocation5 + $0x17b8] sm:$0xff]  ;;  %v857_v26 = vld [vmem:[#allocation5 + $0x1790] sm:$0xff] }
 0x306   :  { %v18035_v34 = vcombine.high %v850_v23, %v862_v24  ;;  %v18034_v41 = vcombine.low %v850_v23, %v862_v24  ;;  %v18048_v42 = vcombine.low %v857_v26, %v869_v31  ;;  %v989_v23 = vld [vmem:[#allocation5 + $0x1bb0] sm:$0xff] }
 0x308   :  { %7590 = vmatpush1.bf16.msra.mxu1 %v17890_v35  ;;  %8493 = vmatpush1.bf16.msra.mxu0 %v17904_v36  ;;  %v18049_v35 = vcombine.high %v857_v26, %v869_v31  ;;  %v874_v36 = vld [vmem:[#allocation5 + $0x1818] sm:$0xff] }
 0x309   :  { %7591 = vmatprep.subr.bf16.mxu1 %v17915_v37  ;;  %8494 = vmatprep.subr.bf16.mxu0 %v17929_v38  ;;  %v886_v37 = vld [vmem:[#allocation5 + $0x1878] sm:$0xff]  ;;  %v881_v38 = vld [vmem:[#allocation5 + $0x1850] sm:$0xff] }
 0x30a   :  { %v18059_v43 = vcombine.high %v874_v36, %v886_v37  ;;  %v18058_v51 = vcombine.low %v874_v36, %v886_v37  ;;  %v18072_v52 = vcombine.low %v881_v38, %v893_v40  ;;  %v1013_v36 = vld [vmem:[#allocation5 + $0x1c70] sm:$0xff] }
 0x30c   :  { %7592 = vmatpush1.bf16.msra.mxu1 %v17914_v45  ;;  %8495 = vmatpush1.bf16.msra.mxu0 %v17928_v46  ;;  %v18073_v45 = vcombine.high %v881_v38, %v893_v40  ;;  %v898_v46 = vld [vmem:[#allocation5 + $0x18d8] sm:$0xff] }
 0x30d   :  { %7593 = vmatprep.subr.bf16.mxu1 %v17939_v47  ;;  %8496 = vmatprep.subr.bf16.mxu0 %v17953_v49  ;;  %v910_v47 = vld [vmem:[#allocation5 + $0x1938] sm:$0xff]  ;;  %v905_v49 = vld [vmem:[#allocation5 + $0x1910] sm:$0xff] }
 0x30e   :  { %v18083_v53 = vcombine.high %v898_v46, %v910_v47  ;;  %v18082_v0 = vcombine.low %v898_v46, %v910_v47  ;;  %v18096_v4 = vcombine.low %v905_v49, %v917_v50  ;;  %v1037_v46 = vld [vmem:[#allocation5 + $0x1d30] sm:$0xff] }
 0x310   :  { %7594 = vmatpush1.bf16.msra.mxu1 %v17938_v54  ;;  %8497 = vmatpush1.bf16.msra.mxu0 %v17952_v55  ;;  %v18097_v54 = vcombine.high %v905_v49, %v917_v50  ;;  %v922_v55 = vld [vmem:[#allocation5 + $0x1998] sm:$0xff] }
 0x311   :  { %7595 = vmatprep.subr.bf16.mxu1 %v17963_v57  ;;  %8498 = vmatprep.subr.bf16.mxu0 %v17977_v60  ;;  %v934_v57 = vld [vmem:[#allocation5 + $0x19f8] sm:$0xff]  ;;  %v929_v60 = vld [vmem:[#allocation5 + $0x19d0] sm:$0xff] }
 0x312   :  { %v18107_v7 = vcombine.high %v922_v55, %v934_v57  ;;  %v18106_v16 = vcombine.low %v922_v55, %v934_v57  ;;  %v18120_v17 = vcombine.low %v929_v60, %v941_v62  ;;  %v1061_v55 = vld [vmem:[#allocation5 + $0x1df0] sm:$0xff] }
 0x314   :  { %7596 = vmatpush1.bf16.msra.mxu1 %v17962_v8  ;;  %8499 = vmatpush1.bf16.msra.mxu0 %v17976_v9  ;;  %v18121_v8 = vcombine.high %v929_v60, %v941_v62  ;;  %v946_v9 = vld [vmem:[#allocation5 + $0x1a58] sm:$0xff] }
 0x315   :  { %7597 = vmatprep.subr.bf16.mxu1 %v17987_v10  ;;  %8500 = vmatprep.subr.bf16.mxu0 %v18001_v12  ;;  %v958_v10 = vld [vmem:[#allocation5 + $0x1ab8] sm:$0xff]  ;;  %v953_v12 = vld [vmem:[#allocation5 + $0x1a90] sm:$0xff] }
 0x316   :  { %v18131_v18 = vcombine.high %v946_v9, %v958_v10  ;;  %v18130_v24 = vcombine.low %v946_v9, %v958_v10  ;;  %v18144_v26 = vcombine.low %v953_v12, %v965_v14  ;;  %v1085_v9 = vld [vmem:[#allocation5 + $0x1eb0] sm:$0xff] }
 0x318   :  { %7598 = vmatpush1.bf16.msra.mxu1 %v17986_v19  ;;  %8501 = vmatpush1.bf16.msra.mxu0 %v18000_v20  ;;  %v18145_v19 = vcombine.high %v953_v12, %v965_v14  ;;  %v970_v20 = vld [vmem:[#allocation5 + $0x1b18] sm:$0xff] }
 0x319   :  { %7599 = vmatprep.subr.bf16.mxu1 %v18011_v22  ;;  %8502 = vmatprep.subr.bf16.mxu0 %v18025_v27  ;;  %v982_v22 = vld [vmem:[#allocation5 + $0x1b78] sm:$0xff]  ;;  %v977_v27 = vld [vmem:[#allocation5 + $0x1b50] sm:$0xff] }
 0x31a   :  { %v18155_v31 = vcombine.high %v970_v20, %v982_v22  ;;  %v18154_v37 = vcombine.low %v970_v20, %v982_v22  ;;  %v18168_v38 = vcombine.low %v977_v27, %v989_v23  ;;  %v1109_v20 = vld [vmem:[#allocation5 + $0x1f70] sm:$0xff] }
 0x31c   :  { %7600 = vmatpush1.bf16.msra.mxu1 %v18010_v32  ;;  %8503 = vmatpush1.bf16.msra.mxu0 %v18024_v33  ;;  %v18169_v32 = vcombine.high %v977_v27, %v989_v23  ;;  %v994_v33 = vld [vmem:[#allocation5 + $0x1bd8] sm:$0xff] }
 0x31d   :  { %7601 = vmatprep.subr.bf16.mxu1 %v18035_v34  ;;  %8504 = vmatprep.subr.bf16.mxu0 %v18049_v35  ;;  %v1006_v34 = vld [vmem:[#allocation5 + $0x1c38] sm:$0xff]  ;;  %v1001_v35 = vld [vmem:[#allocation5 + $0x1c10] sm:$0xff] }
 0x31e   :  { %v18179_v40 = vcombine.high %v994_v33, %v1006_v34  ;;  %v18178_v47 = vcombine.low %v994_v33, %v1006_v34  ;;  %v18192_v49 = vcombine.low %v1001_v35, %v1013_v36  ;;  %v1133_v33 = vld [vmem:[#allocation5 + $0x2030] sm:$0xff] }
 0x320   :  { %7602 = vmatpush1.bf16.msra.mxu1 %v18034_v41  ;;  %8505 = vmatpush1.bf16.msra.mxu0 %v18048_v42  ;;  %v18193_v41 = vcombine.high %v1001_v35, %v1013_v36  ;;  %v1018_v42 = vld [vmem:[#allocation5 + $0x1c98] sm:$0xff] }
 0x321   :  { %7614 = vmatprep.subr.bf16.mxu1 %v18059_v43  ;;  %8517 = vmatprep.subr.bf16.mxu0 %v18073_v45  ;;  %v1030_v43 = vld [vmem:[#allocation5 + $0x1cf8] sm:$0xff]  ;;  %v1025_v45 = vld [vmem:[#allocation5 + $0x1cd0] sm:$0xff] }
 0x322   :  { %v18203_v50 = vcombine.high %v1018_v42, %v1030_v43  ;;  %v18202_v57 = vcombine.low %v1018_v42, %v1030_v43  ;;  %v18216_v60 = vcombine.low %v1025_v45, %v1037_v46  ;;  %v1157_v42 = vld [vmem:[#allocation5 + $0x20f0] sm:$0xff] }
 0x323   :  { %7604 = vmatmul.mubr.bf16.vlgmr.msra.gmra.mrb[12].mxu1 %v21881_v30  ;;  %8507 = vmatmul.mubr.bf16.vlgmr.msra.gmra.mrb[12].mxu0 %v21881_v30 }
 0x324   :  { %7615 = vmatpush1.bf16.msra.mxu1 %v18058_v51  ;;  %8518 = vmatpush1.bf16.msra.mxu0 %v18072_v52  ;;  %v18217_v51 = vcombine.high %v1025_v45, %v1037_v46  ;;  %v1042_v52 = vld [vmem:[#allocation5 + $0x1d58] sm:$0xff] }
 0x325   :  { %7616 = vmatprep.subr.bf16.mxu1 %v18083_v53  ;;  %8519 = vmatprep.subr.bf16.mxu0 %v18097_v54  ;;  %v1054_v53 = vld [vmem:[#allocation5 + $0x1db8] sm:$0xff]  ;;  %v1049_v54 = vld [vmem:[#allocation5 + $0x1d90] sm:$0xff] }
 0x326   :  { %7646 = vmatprep.mubr.bf16.mxu1 %v21883_v39  ;;  %8549 = vmatprep.mubr.bf16.mxu0 %v21883_v39  ;;  %v18227_v62 = vcombine.high %v1042_v52, %v1054_v53  ;;  %v18226_v10 = vcombine.low %v1042_v52, %v1054_v53  ;;  %v18240_v12 = vcombine.low %v1049_v54, %v1061_v55  ;;  %v1181_v52 = vld [vmem:[#allocation5 + $0x21b0] sm:$0xff] }
 0x328   :  { %7617 = vmatpush1.bf16.msra.mxu1 %v18082_v0  ;;  %8520 = vmatpush1.bf16.msra.mxu0 %v18096_v4  ;;  %v18241_v0 = vcombine.high %v1049_v54, %v1061_v55  ;;  %v1066_v4 = vld [vmem:[#allocation5 + $0x1e18] sm:$0xff] }
 0x329   :  { %7618 = vmatprep.subr.bf16.mxu1 %v18107_v7  ;;  %8521 = vmatprep.subr.bf16.mxu0 %v18121_v8  ;;  %v1078_v7 = vld [vmem:[#allocation5 + $0x1e78] sm:$0xff]  ;;  %v1073_v8 = vld [vmem:[#allocation5 + $0x1e50] sm:$0xff] }
 0x32a   :  { %v18251_v14 = vcombine.high %v1066_v4, %v1078_v7  ;;  %v18250_v22 = vcombine.low %v1066_v4, %v1078_v7  ;;  %v18264_v27 = vcombine.low %v1073_v8, %v1085_v9  ;;  %v1205_v4 = vld [vmem:[#allocation5 + $0x2270] sm:$0xff] }
 0x32c   :  { %7619 = vmatpush1.bf16.msra.mxu1 %v18106_v16  ;;  %8522 = vmatpush1.bf16.msra.mxu0 %v18120_v17  ;;  %v18265_v16 = vcombine.high %v1073_v8, %v1085_v9  ;;  %v1090_v17 = vld [vmem:[#allocation5 + $0x1ed8] sm:$0xff] }
 0x32d   :  { %7620 = vmatprep.subr.bf16.mxu1 %v18131_v18  ;;  %8523 = vmatprep.subr.bf16.mxu0 %v18145_v19  ;;  %v1102_v18 = vld [vmem:[#allocation5 + $0x1f38] sm:$0xff]  ;;  %v1097_v19 = vld [vmem:[#allocation5 + $0x1f10] sm:$0xff] }
 0x32e   :  { %v18275_v23 = vcombine.high %v1090_v17, %v1102_v18  ;;  %v18274_v34 = vcombine.low %v1090_v17, %v1102_v18  ;;  %v18288_v35 = vcombine.low %v1097_v19, %v1109_v20  ;;  %v1229_v17 = vld [vmem:[#allocation5 + $0x2330] sm:$0xff] }
 0x330   :  { %7621 = vmatpush1.bf16.msra.mxu1 %v18130_v24  ;;  %8524 = vmatpush1.bf16.msra.mxu0 %v18144_v26  ;;  %v18289_v24 = vcombine.high %v1097_v19, %v1109_v20  ;;  %v1114_v26 = vld [vmem:[#allocation5 + $0x1f98] sm:$0xff] }
 0x331   :  { %7622 = vmatprep.subr.bf16.mxu1 %v18155_v31  ;;  %8525 = vmatprep.subr.bf16.mxu0 %v18169_v32  ;;  %v1126_v31 = vld [vmem:[#allocation5 + $0x1ff8] sm:$0xff]  ;;  %v1121_v32 = vld [vmem:[#allocation5 + $0x1fd0] sm:$0xff] }
 0x332   :  { %v18299_v36 = vcombine.high %v1114_v26, %v1126_v31  ;;  %v18298_v43 = vcombine.low %v1114_v26, %v1126_v31  ;;  %v18312_v45 = vcombine.low %v1121_v32, %v1133_v33  ;;  %v1253_v26 = vld [vmem:[#allocation5 + $0x23f0] sm:$0xff] }
 0x334   :  { %7623 = vmatpush1.bf16.msra.mxu1 %v18154_v37  ;;  %8526 = vmatpush1.bf16.msra.mxu0 %v18168_v38  ;;  %v18313_v37 = vcombine.high %v1121_v32, %v1133_v33  ;;  %v1138_v38 = vld [vmem:[#allocation5 + $0x2058] sm:$0xff] }
 0x335   :  { %7624 = vmatprep.subr.bf16.mxu1 %v18179_v40  ;;  %8527 = vmatprep.subr.bf16.mxu0 %v18193_v41  ;;  %v1150_v40 = vld [vmem:[#allocation5 + $0x20b8] sm:$0xff]  ;;  %v1145_v41 = vld [vmem:[#allocation5 + $0x2090] sm:$0xff] }
 0x336   :  { %v18323_v46 = vcombine.high %v1138_v38, %v1150_v40  ;;  %v18322_v53 = vcombine.low %v1138_v38, %v1150_v40  ;;  %v18336_v54 = vcombine.low %v1145_v41, %v1157_v42 }
 0x338   :  { %7625 = vmatpush1.bf16.msra.mxu1 %v18178_v47  ;;  %8528 = vmatpush1.bf16.msra.mxu0 %v18192_v49  ;;  %v18337_v47 = vcombine.high %v1145_v41, %v1157_v42  ;;  %v1162_v49 = vld [vmem:[#allocation5 + $0x2118] sm:$0xff]  ;;  %v132_v42 = vld [vmem:[#allocation5 + $0xe8] sm:$0xff] }
 0x339   :  { %7626 = vmatprep.subr.bf16.mxu1 %v18203_v50  ;;  %8529 = vmatprep.subr.bf16.mxu0 %v18217_v51  ;;  %v1174_v50 = vld [vmem:[#allocation5 + $0x2178] sm:$0xff]  ;;  %v1169_v51 = vld [vmem:[#allocation5 + $0x2150] sm:$0xff] }
 0x33a   :  { %v18347_v55 = vcombine.high %v1162_v49, %v1174_v50  ;;  %v18346_v7 = vcombine.low %v1162_v49, %v1174_v50  ;;  %v18360_v8 = vcombine.low %v1169_v51, %v1181_v52  ;;  %v19890_v41 = vld [vmem:[#allocation8 + $0x4] ss:$24 sps:$4 sm:$0xff]   ;;  %v19893_v49 = vld [vmem:[#allocation8 + $0x34] ss:$24 sps:$4 sm:$0xff]  }
 0x33b   :  { %v156_v50 = vld [vmem:[#allocation5 + $0x1a8] sm:$0xff] }
 0x33c   :  { %7627 = vmatpush1.bf16.msra.mxu1 %v18202_v57  ;;  %8530 = vmatpush1.bf16.msra.mxu0 %v18216_v60  ;;  %v18361_v57 = vcombine.high %v1169_v51, %v1181_v52  ;;  %v1186_v60 = vld [vmem:[#allocation5 + $0x21d8] sm:$0xff]  ;;  %v168_v51 = vld [vmem:[#allocation5 + $0x208] sm:$0xff] }
 0x33d   :  { %7628 = vmatprep.subr.bf16.mxu1 %v18227_v62  ;;  %8531 = vmatprep.subr.bf16.mxu0 %v18241_v0  ;;  %v1198_v62 = vld [vmem:[#allocation5 + $0x2238] sm:$0xff]  ;;  %v1193_v0 = vld [vmem:[#allocation5 + $0x2210] sm:$0xff] }
 0x33e   :  { %v18371_v9 = vcombine.high %v1186_v60, %v1198_v62  ;;  %v18370_v18 = vcombine.low %v1186_v60, %v1198_v62  ;;  %v18384_v19 = vcombine.low %v1193_v0, %v1205_v4  ;;  %v192_v60 = vld [vmem:[#allocation5 + $0x2c8] sm:$0xff]  ;;  %v17342_v62 = vcombine.low %v156_v50, %v168_v51 }
 0x340   :  { %7629 = vmatpush1.bf16.msra.mxu1 %v18226_v10  ;;  %8532 = vmatpush1.bf16.msra.mxu0 %v18240_v12  ;;  %v18385_v10 = vcombine.high %v1193_v0, %v1205_v4  ;;  %v1210_v12 = vld [vmem:[#allocation5 + $0x2298] sm:$0xff] }
 0x341   :  { %7630 = vmatprep.subr.bf16.mxu1 %v18251_v14  ;;  %8533 = vmatprep.subr.bf16.mxu0 %v18265_v16  ;;  %v1222_v14 = vld [vmem:[#allocation5 + $0x22f8] sm:$0xff]  ;;  %v1217_v16 = vld [vmem:[#allocation5 + $0x22d0] sm:$0xff] }
 0x342   :  { %v18395_v20 = vcombine.high %v1210_v12, %v1222_v14  ;;  %v18394_v31 = vcombine.low %v1210_v12, %v1222_v14  ;;  %v18408_v32 = vcombine.low %v1217_v16, %v1229_v17  ;;  %v19894_v0 = vld [vmem:[#allocation8 + $0x60] ss:$24 sps:$4 sm:$0xff]   ;;  %v19897_v12 = vld [vmem:[#allocation8 + $0x90] ss:$24 sps:$4 sm:$0xff]  }
 0x344   :  { %7631 = vmatpush1.bf16.msra.mxu1 %v18250_v22  ;;  %8534 = vmatpush1.bf16.msra.mxu0 %v18264_v27  ;;  %v18409_v22 = vcombine.high %v1217_v16, %v1229_v17  ;;  %v1234_v27 = vld [vmem:[#allocation5 + $0x2358] sm:$0xff]  ;;  %v228_v17 = vld [vmem:[#allocation5 + $0x3e8] sm:$0xff] }
 0x345   :  { %7632 = vmatprep.subr.bf16.mxu1 %v18275_v23  ;;  %8535 = vmatprep.subr.bf16.mxu0 %v18289_v24  ;;  %v1246_v23 = vld [vmem:[#allocation5 + $0x23b8] sm:$0xff]  ;;  %v1241_v24 = vld [vmem:[#allocation5 + $0x2390] sm:$0xff] }
 0x346   :  { %v18419_v33 = vcombine.high %v1234_v27, %v1246_v23  ;;  %v18432_v38 = vcombine.low %v1241_v24, %v1253_v26  ;;  %v19902_v16 = vld [vmem:[#allocation8 + $0xc4] ss:$24 sps:$4 sm:$0xff]  }
 0x348   :  { %7633 = vmatpush1.bf16.msra.mxu1 %v18274_v34  ;;  %8536 = vmatpush1.bf16.msra.mxu0 %v18288_v35  ;;  %v18433_v34 = vcombine.high %v1241_v24, %v1253_v26  ;;  %v108_v35 = vld [vmem:[#allocation5 + $0x28] sm:$0xff] }
 0x349   :  { %7634 = vmatprep.subr.bf16.mxu1 %v18299_v36  ;;  %8537 = vmatprep.subr.bf16.mxu0 %v18313_v37  ;;  %v120_v36 = vld [vmem:[#allocation5 + $0x88] sm:$0xff]  ;;  %v18418_v37 = vcombine.low %v1234_v27, %v1246_v23  ;;  %v1257_v27 = vld [vmem:[#allocation7 + $0x10] sm:$0xff] }
 0x34a   :  { %v17295_v40 = vcombine.high %v108_v35, %v120_v36  ;;  %v19905_v23 = vld [vmem:[#allocation8 + $0xf4] ss:$24 sps:$4 sm:$0xff]  }
 0x34b   :  { %v252_v24 = vld [vmem:[#allocation5 + $0x4a8] sm:$0xff] }
 0x34c   :  { %7635 = vmatpush1.bf16.msra.mxu1 %v18298_v43  ;;  %8538 = vmatpush1.bf16.msra.mxu0 %v18312_v45  ;;  %v144_v43 = vld [vmem:[#allocation5 + $0x148] sm:$0xff]  ;;  %v17294_v45 = vcombine.low %v108_v35, %v120_v36  ;;  %v1328_v35 = vrot.slane %v1257_v27, %v21910_v59 }
 0x34d   :  { %7636 = vmatprep.subr.bf16.mxu1 %v18323_v46  ;;  %8539 = vmatprep.subr.bf16.mxu0 %v18337_v47  ;;  %v19888_v46 = vld [vmem:[#allocation8] ss:$24 sps:$4 sm:$0xff]   ;;  %v17319_v47 = vcombine.high %v132_v42, %v144_v43  ;;  %v17318_v52 = vcombine.low %v132_v42, %v144_v43  ;;  %v264_v26 = vld [vmem:[#allocation5 + $0x508] sm:$0xff] }
 0x34e   :  { %v19903_v36 = vld [vmem:[#allocation8 + $0xf0] ss:$24 sps:$4 sm:$0xff]  }
 0x34f   :  { %v276_v42 = vld [vmem:[#allocation5 + $0x568] sm:$0xff] }
 0x350   :  { %7637 = vmatpush1.bf16.msra.mxu1 %v18322_v53  ;;  %8540 = vmatpush1.bf16.msra.mxu0 %v18336_v54  ;;  %v19891_v53 = vld [vmem:[#allocation8 + $0x30] ss:$24 sps:$4 sm:$0xff]   ;;  %v17343_v54 = vcombine.high %v156_v50, %v168_v51  ;;  %v17438_v51 = vcombine.low %v252_v24, %v264_v26 }
 0x351   :  { %7638 = vmatprep.subr.bf16.mxu1 %v18347_v55  ;;  %8541 = vmatprep.subr.bf16.mxu0 %v18361_v57  ;;  %v19896_v55 = vld [vmem:[#allocation8 + $0x64] ss:$24 sps:$4 sm:$0xff]   ;;  %v180_v57 = vld [vmem:[#allocation5 + $0x268] sm:$0xff] }
 0x352   :  { %v17367_v4 = vcombine.high %v180_v57, %v192_v60  ;;  %v288_v43 = vld [vmem:[#allocation5 + $0x5c8] sm:$0xff] }
 0x354   :  { %7639 = vmatpush1.bf16.msra.mxu1 %v18346_v7  ;;  %8542 = vmatpush1.bf16.msra.mxu0 %v18360_v8  ;;  %v19899_v7 = vld [vmem:[#allocation8 + $0x94] ss:$24 sps:$4 sm:$0xff]  }
 0x355   :  { %7640 = vmatprep.subr.bf16.mxu1 %v18371_v9  ;;  %8543 = vmatprep.subr.bf16.mxu0 %v18385_v10  ;;  %v204_v8 = vld [vmem:[#allocation5 + $0x328] sm:$0xff]  ;;  %v17366_v10 = vcombine.low %v180_v57, %v192_v60  ;;  %v19906_v57 = vld [vmem:[#allocation8 + $0x120] ss:$24 sps:$4 sm:$0xff]   ;;  %v17463_v60 = vcombine.high %v276_v42, %v288_v43 }
 0x356   :  { %v216_v9 = vld [vmem:[#allocation5 + $0x388] sm:$0xff] }
 0x357   :  { %v17391_v14 = vcombine.high %v204_v8, %v216_v9 }
 0x358   :  { %7641 = vmatpush1.bf16.msra.mxu1 %v18370_v18  ;;  %8544 = vmatpush1.bf16.msra.mxu0 %v18384_v19  ;;  %v240_v18 = vld [vmem:[#allocation5 + $0x448] sm:$0xff]  ;;  %v17390_v19 = vcombine.low %v204_v8, %v216_v9 }
 0x359   :  { %7642 = vmatprep.subr.bf16.mxu1 %v18395_v20  ;;  %8545 = vmatprep.subr.bf16.mxu0 %v18409_v22  ;;  %v19900_v20 = vld [vmem:[#allocation8 + $0xc0] ss:$24 sps:$4 sm:$0xff]   ;;  %v17415_v22 = vcombine.high %v228_v17, %v240_v18  ;;  %v300_v8 = vld [vmem:[#allocation5 + $0x628] sm:$0xff] }
 0x35a   :  { %v312_v9 = vld [vmem:[#allocation5 + $0x688] sm:$0xff] }
 0x35c   :  { %7643 = vmatpush1.bf16.msra.mxu1 %v18394_v31  ;;  %8546 = vmatpush1.bf16.msra.mxu0 %v18408_v32  ;;  %v21618_v31 = vld [vmem:[#allocation7] sm:$0xff] }
 0x35d   :  { %7644 = vmatprep.subr.bf16.mxu1 %v18419_v33  ;;  %8547 = vmatprep.subr.bf16.mxu0 %v18433_v34  ;;  %v1280_v32 = vrot.slane %v21618_v31, %v21946_v3  ;;  %v1284_v33 = vrot.slane %v21618_v31, %v21949_v11  ;;  %v17414_v34 = vcombine.low %v228_v17, %v240_v18 }
 0x35e   :  { %v17487_v31 = vcombine.high %v300_v8, %v312_v9 }
 0x360   :  { %7645 = vmatpush1.bf16.msra.mxu1 %v18418_v37  ;;  %8548 = vmatpush1.bf16.msra.mxu0 %v18432_v38  ;;  %v17439_v37 = vcombine.high %v252_v24, %v264_v26  ;;  %v1332_v38 = vrot.slane %v1257_v27, %v21913_v61  ;;  %v17462_v27 = vcombine.low %v276_v42, %v288_v43  ;;  %v19909_v26 = vld [vmem:[#allocation8 + $0x150] ss:$24 sps:$4 sm:$0xff]   ;;  %v19917_v43 = vld [vmem:[#allocation8 + $0x1b4] ss:$24 sps:$4 sm:$0xff]  }
 0x361   :  { %7786 = vmatprep.subr.bf16.mxu1 %v17295_v40  ;;  %15705 = vmatprep.subr.bf16.mxu0 %v19890_v41  ;;  %v19908_v41 = vld [vmem:[#allocation8 + $0x124] ss:$24 sps:$4 sm:$0xff]  }
 0x363   :  { %7647 = vmatmul.mubr.bf16.vlgmr.msra.gmra.mrb[12].mxu1 %v21889_v44  ;;  %8550 = vmatmul.mubr.bf16.vlgmr.msra.gmra.mrb[12].mxu0 %v21889_v44 }
 0x364   :  { %7787 = vmatpush1.bf16.msra.mxu1 %v17294_v45  ;;  %15706 = vmatpush1.bf16.msra.mxu0 %v19888_v46 }
 0x365   :  { %15737 = vmatprep.mubr.bf16.mxu0 %v21921_v2  ;;  %7788 = vmatprep.subr.bf16.mxu1 %v17319_v47 }
 0x366   :  { %15707 = vmatprep.subr.bf16.mxu0 %v19893_v49  ;;  %7818 = vmatprep.mubr.bf16.mxu1 %v21869_v58 }
 0x368   :  { %7789 = vmatpush1.bf16.msra.mxu1 %v17318_v52  ;;  %15708 = vmatpush1.bf16.msra.mxu0 %v19891_v53 }
 0x369   :  { %7790 = vmatprep.subr.bf16.mxu1 %v17343_v54  ;;  %15709 = vmatprep.subr.bf16.mxu0 %v19896_v55 }
 0x36c   :  { %7791 = vmatpush1.bf16.msra.mxu1 %v17342_v62  ;;  %15710 = vmatpush1.bf16.msra.mxu0 %v19894_v0 }
 0x36d   :  { %7792 = vmatprep.subr.bf16.mxu1 %v17367_v4  ;;  %15711 = vmatprep.subr.bf16.mxu0 %v19899_v7  ;;  %v19911_v7 = vld [vmem:[#allocation8 + $0x154] ss:$24 sps:$4 sm:$0xff]  }
 0x370   :  { %7793 = vmatpush1.bf16.msra.mxu1 %v17366_v10  ;;  %15712 = vmatpush1.bf16.msra.mxu0 %v19897_v12 }
 0x371   :  { %7794 = vmatprep.subr.bf16.mxu1 %v17391_v14  ;;  %15713 = vmatprep.subr.bf16.mxu0 %v19902_v16 }
 0x374   :  { %7795 = vmatpush1.bf16.msra.mxu1 %v17390_v19  ;;  %15714 = vmatpush1.bf16.msra.mxu0 %v19900_v20 }
 0x375   :  { %7796 = vmatprep.subr.bf16.mxu1 %v17415_v22  ;;  %15715 = vmatprep.subr.bf16.mxu0 %v19905_v23 }
 0x376   :  { %v7519_v40 = vpop.f32.mrb[8].mxu1  ;;  %v8293_v47 = vpop.f32.mrb[8].mxu0 }
 0x377   :  { %v19596_v45 = vadd.f32 %v7519_v40, %v1280_v32  ;;  %v7521_v46 = vpop.f32.mrb[9].mxu1  ;;  %v19620_v52 = vadd.f32 %v8293_v47, %v1328_v35  ;;  %v8295_v53 = vpop.f32.mrb[9].mxu0  ;;  %v17486_v40 = vcombine.low %v300_v8, %v312_v9  ;;  %v19926_v9 = vld [vmem:[#allocation8 + $0x244] ss:$24 sps:$4 sm:$0xff]  }
 0x378   :  { %v19597_v49 = vadd.f32 %v7521_v46, %v1284_v33  ;;  %v7523_v50 = vpop.f32.mrb[10].mxu1  ;;  %7797 = vmatpush1.bf16.msra.mxu1 %v17414_v34  ;;  %15716 = vmatpush1.bf16.msra.mxu0 %v19903_v36  ;;  %v19621_v62 = vadd.f32 %v8295_v53, %v1332_v38  ;;  %v8297_v0 = vpop.f32.mrb[10].mxu0  ;;  %v19914_v34 = vld [vmem:[#allocation8 + $0x184] ss:$24 sps:$4 sm:$0xff]   ;;  %v336_v36 = vld [vmem:[#allocation5 + $0x748] sm:$0xff] }
 0x379   :  { %v19598_v54 = vadd.f32 %v7523_v50, %v1280_v32  ;;  %v7525_v55 = vpop.f32.mrb[11].mxu1  ;;  %7798 = vmatprep.subr.bf16.mxu1 %v17439_v37  ;;  %15717 = vmatprep.subr.bf16.mxu0 %v19908_v41  ;;  %v8705_v10 = vmax.f32 %v19620_v52, 0.0  ;;  %v19622_v12 = vadd.f32 %v8297_v0, %v1328_v35  ;;  %v8299_v14 = vpop.f32.mrb[11].mxu0  ;;  %v8693_v16 = vmax.f32 %v19596_v45, 0.0  ;;  %v324_v35 = vld [vmem:[#allocation5 + $0x6e8] sm:$0xff] }
 0x37a   :  { %v19599_v4 = vadd.f32 %v7525_v55, %v1284_v33  ;;  %v8706_v18 = vmax.f32 %v19621_v62, 0.0  ;;  %v19623_v19 = vadd.f32 %v8299_v14, %v1332_v38  ;;  %v8694_v20 = vmax.f32 %v19597_v49, 0.0  ;;  %v19912_v41 = vld [vmem:[#allocation8 + $0x180] ss:$24 sps:$4 sm:$0xff]   ;;  %v348_v45 = vld [vmem:[#allocation5 + $0x7a8] sm:$0xff] }
 0x37b   :  { %v8717_v17 = vmax.f32 %v19598_v54, 0.0  ;;  %v8729_v23 = vmax.f32 %v19622_v12, 0.0  ;;  %v17511_v42 = vcombine.high %v324_v35, %v336_v36  ;;  %v360_v46 = vld [vmem:[#allocation5 + $0x808] sm:$0xff]  ;;  %v17510_v47 = vcombine.low %v324_v35, %v336_v36  ;;  %v19918_v55 = vld [vmem:[#allocation8 + $0x1e0] ss:$24 sps:$4 sm:$0xff]  }
 0x37c   :  { %v8718_v22 = vmax.f32 %v19599_v4, 0.0  ;;  %7799 = vmatpush1.bf16.msra.mxu1 %v17438_v51  ;;  %15718 = vmatpush1.bf16.msra.mxu0 %v19906_v57  ;;  %v8730_v32 = vmax.f32 %v19623_v19, 0.0  ;;  %v19915_v49 = vld [vmem:[#allocation8 + $0x1b0] ss:$24 sps:$4 sm:$0xff]   ;;  %v17535_v50 = vcombine.high %v348_v45, %v360_v46  ;;  %v19920_v51 = vld [vmem:[#allocation8 + $0x1e4] ss:$24 sps:$4 sm:$0xff]   ;;  %v17534_v54 = vcombine.low %v348_v45, %v360_v46 }
 0x37d   :  { %v21979_v24 = vpack.c.bf16 %v8717_v17, %v8693_v16  ;;  %7800 = vmatprep.subr.bf16.mxu1 %v17463_v60  ;;  %15719 = vmatprep.subr.bf16.mxu0 %v19911_v7  ;;  %v21983_v37 = vpack.c.bf16 %v8729_v23, %v8705_v10  ;;  %v372_v52 = vld [vmem:[#allocation5 + $0x868] sm:$0xff]  ;;  %v19924_v16 = vld [vmem:[#allocation8 + $0x240] ss:$24 sps:$4 sm:$0xff]  }
 0x37e   :  { %v21981_v33 = vpack.c.bf16 %v8718_v22, %v8694_v20  ;;  %v21985_v38 = vpack.c.bf16 %v8730_v32, %v8706_v18  ;;  %v384_v53 = vld [vmem:[#allocation5 + $0x8c8] sm:$0xff]  ;;  %v19930_v35 = vld [vmem:[#allocation8 + $0x2a0] ss:$24 sps:$4 sm:$0xff]  }
 0x37f   :  { %v17559_v57 = vcombine.high %v372_v52, %v384_v53  ;;  %v19923_v60 = vld [vmem:[#allocation8 + $0x214] ss:$24 sps:$4 sm:$0xff]   ;;  %v17558_v4 = vcombine.low %v372_v52, %v384_v53  ;;  %v19921_v7 = vld [vmem:[#allocation8 + $0x210] ss:$24 sps:$4 sm:$0xff]   ;;  %v19936_v52 = vld [vmem:[#allocation8 + $0x300] ss:$24 sps:$4 sm:$0xff]  }
 0x380   :  { %7801 = vmatpush1.bf16.msra.mxu1 %v17462_v27  ;;  %15720 = vmatpush1.bf16.msra.mxu0 %v19909_v26  ;;  %v396_v62 = vld [vmem:[#allocation5 + $0x928] sm:$0xff]  ;;  %v19932_v26 = vld [vmem:[#allocation8 + $0x2a4] ss:$24 sps:$4 sm:$0xff]  }
 0x381   :  { %7802 = vmatprep.subr.bf16.mxu1 %v17487_v31  ;;  %15721 = vmatprep.subr.bf16.mxu0 %v19914_v34  ;;  %v408_v0 = vld [vmem:[#allocation5 + $0x988] sm:$0xff] }
 0x382   :  { %v17583_v8 = vcombine.high %v396_v62, %v408_v0  ;;  %v420_v10 = vld [vmem:[#allocation5 + $0x9e8] sm:$0xff]  ;;  %v17582_v14 = vcombine.low %v396_v62, %v408_v0 }
 0x383   :  { %v432_v12 = vld [vmem:[#allocation5 + $0xa48] sm:$0xff] }
 0x384   :  { %7803 = vmatpush1.bf16.msra.mxu1 %v17486_v40  ;;  %15722 = vmatpush1.bf16.msra.mxu0 %v19912_v41  ;;  %v17607_v17 = vcombine.high %v420_v10, %v432_v12  ;;  %v19929_v18 = vld [vmem:[#allocation8 + $0x274] ss:$24 sps:$4 sm:$0xff]   ;;  %v17606_v22 = vcombine.low %v420_v10, %v432_v12  ;;  %v19927_v27 = vld [vmem:[#allocation8 + $0x270] ss:$24 sps:$4 sm:$0xff]   ;;  %v19942_v10 = vld [vmem:[#allocation8 + $0x360] ss:$24 sps:$4 sm:$0xff]  }
 0x385   :  { %7804 = vmatprep.subr.bf16.mxu1 %v17511_v42  ;;  %15723 = vmatprep.subr.bf16.mxu0 %v19917_v43  ;;  %v444_v19 = vld [vmem:[#allocation5 + $0xaa8] sm:$0xff] }
 0x386   :  { %v456_v20 = vld [vmem:[#allocation5 + $0xb08] sm:$0xff] }
 0x387   :  { %v17631_v23 = vcombine.high %v444_v19, %v456_v20  ;;  %v468_v31 = vld [vmem:[#allocation5 + $0xb68] sm:$0xff]  ;;  %v17630_v34 = vcombine.low %v444_v19, %v456_v20 }
 0x388   :  { %7805 = vmatpush1.bf16.msra.mxu1 %v17510_v47  ;;  %15724 = vmatpush1.bf16.msra.mxu0 %v19915_v49  ;;  %v480_v32 = vld [vmem:[#allocation5 + $0xbc8] sm:$0xff]  ;;  %v19938_v47 = vld [vmem:[#allocation8 + $0x304] ss:$24 sps:$4 sm:$0xff]  }
 0x389   :  { %7806 = vmatprep.subr.bf16.mxu1 %v17535_v50  ;;  %15725 = vmatprep.subr.bf16.mxu0 %v19920_v51  ;;  %v17655_v36 = vcombine.high %v468_v31, %v480_v32  ;;  %v19935_v40 = vld [vmem:[#allocation8 + $0x2d4] ss:$24 sps:$4 sm:$0xff]   ;;  %v17654_v43 = vcombine.low %v468_v31, %v480_v32  ;;  %v19933_v45 = vld [vmem:[#allocation8 + $0x2d0] ss:$24 sps:$4 sm:$0xff]   ;;  %v19948_v31 = vld [vmem:[#allocation8 + $0x3c0] ss:$24 sps:$4 sm:$0xff]  }
 0x38a   :  { %v492_v41 = vld [vmem:[#allocation5 + $0xc28] sm:$0xff] }
 0x38b   :  { %v504_v42 = vld [vmem:[#allocation5 + $0xc88] sm:$0xff] }
 0x38c   :  { %7807 = vmatpush1.bf16.msra.mxu1 %v17534_v54  ;;  %15726 = vmatpush1.bf16.msra.mxu0 %v19918_v55  ;;  %v17679_v46 = vcombine.high %v492_v41, %v504_v42  ;;  %v516_v49 = vld [vmem:[#allocation5 + $0xce8] sm:$0xff]  ;;  %v17678_v51 = vcombine.low %v492_v41, %v504_v42 }
 0x38d   :  { %7808 = vmatprep.subr.bf16.mxu1 %v17559_v57  ;;  %15727 = vmatprep.subr.bf16.mxu0 %v19923_v60  ;;  %v528_v50 = vld [vmem:[#allocation5 + $0xd48] sm:$0xff] }
 0x38e   :  { %v17703_v53 = vcombine.high %v516_v49, %v528_v50  ;;  %v19941_v54 = vld [vmem:[#allocation8 + $0x334] ss:$24 sps:$4 sm:$0xff]   ;;  %v17702_v60 = vcombine.low %v516_v49, %v528_v50  ;;  %v19939_v62 = vld [vmem:[#allocation8 + $0x330] ss:$24 sps:$4 sm:$0xff]   ;;  %v19954_v49 = vld [vmem:[#allocation8 + $0x420] ss:$24 sps:$4 sm:$0xff]  }
 0x38f   :  { %v540_v55 = vld [vmem:[#allocation5 + $0xda8] sm:$0xff] }
 0x390   :  { %7809 = vmatpush1.bf16.msra.mxu1 %v17558_v4  ;;  %15728 = vmatpush1.bf16.msra.mxu0 %v19921_v7  ;;  %v552_v57 = vld [vmem:[#allocation5 + $0xe08] sm:$0xff]  ;;  %v19944_v4 = vld [vmem:[#allocation8 + $0x364] ss:$24 sps:$4 sm:$0xff]  }
 0x391   :  { %7810 = vmatprep.subr.bf16.mxu1 %v17583_v8  ;;  %15729 = vmatprep.subr.bf16.mxu0 %v19926_v9  ;;  %v17727_v0 = vcombine.high %v540_v55, %v552_v57  ;;  %v564_v7 = vld [vmem:[#allocation5 + $0xe68] sm:$0xff]  ;;  %v17726_v9 = vcombine.low %v540_v55, %v552_v57 }
 0x392   :  { %v576_v8 = vld [vmem:[#allocation5 + $0xec8] sm:$0xff] }
 0x393   :  { %v17751_v12 = vcombine.high %v564_v7, %v576_v8  ;;  %v19945_v19 = vld [vmem:[#allocation8 + $0x390] ss:$24 sps:$4 sm:$0xff]  }
 0x394   :  { %7811 = vmatpush1.bf16.msra.mxu1 %v17582_v14  ;;  %15730 = vmatpush1.bf16.msra.mxu0 %v19924_v16  ;;  %v19947_v14 = vld [vmem:[#allocation8 + $0x394] ss:$24 sps:$4 sm:$0xff]   ;;  %v19951_v41 = vld [vmem:[#allocation8 + $0x3f0] ss:$24 sps:$4 sm:$0xff]  }
 0x395   :  { %7812 = vmatprep.subr.bf16.mxu1 %v17607_v17  ;;  %15731 = vmatprep.subr.bf16.mxu0 %v19929_v18  ;;  %v588_v16 = vld [vmem:[#allocation5 + $0xf28] sm:$0xff]  ;;  %v17750_v18 = vcombine.low %v564_v7, %v576_v8  ;;  %v19960_v7 = vld [vmem:[#allocation8 + $0x480] ss:$24 sps:$4 sm:$0xff]  }
 0x396   :  { %v600_v17 = vld [vmem:[#allocation5 + $0xf88] sm:$0xff] }
 0x397   :  { %v17775_v20 = vcombine.high %v588_v16, %v600_v17  ;;  %v19957_v55 = vld [vmem:[#allocation8 + $0x450] ss:$24 sps:$4 sm:$0xff]  }
 0x398   :  { %7813 = vmatpush1.bf16.msra.mxu1 %v17606_v22  ;;  %15732 = vmatpush1.bf16.msra.mxu0 %v19927_v27  ;;  %v19950_v22 = vld [vmem:[#allocation8 + $0x3c4] ss:$24 sps:$4 sm:$0xff]   ;;  %v612_v27 = vld [vmem:[#allocation5 + $0xfe8] sm:$0xff] }
 0x399   :  { %7814 = vmatprep.subr.bf16.mxu1 %v17631_v23  ;;  %15733 = vmatprep.subr.bf16.mxu0 %v19932_v26  ;;  %v624_v23 = vld [vmem:[#allocation5 + $0x1048] sm:$0xff]  ;;  %v17774_v26 = vcombine.low %v588_v16, %v600_v17 }
 0x39a   :  { %v17799_v32 = vcombine.high %v612_v27, %v624_v23  ;;  %v19963_v16 = vld [vmem:[#allocation8 + $0x4b0] ss:$24 sps:$4 sm:$0xff]  }
 0x39c   :  { %7815 = vmatpush1.bf16.msra.mxu1 %v17630_v34  ;;  %15734 = vmatpush1.bf16.msra.mxu0 %v19930_v35  ;;  %v19953_v34 = vld [vmem:[#allocation8 + $0x3f4] ss:$24 sps:$4 sm:$0xff]  }
 0x39d   :  { %7816 = vmatprep.subr.bf16.mxu1 %v17655_v36  ;;  %15735 = vmatprep.subr.bf16.mxu0 %v19935_v40  ;;  %v636_v35 = vld [vmem:[#allocation5 + $0x10a8] sm:$0xff]  ;;  %v17798_v40 = vcombine.low %v612_v27, %v624_v23  ;;  %v19966_v27 = vld [vmem:[#allocation8 + $0x4e0] ss:$24 sps:$4 sm:$0xff]  }
 0x39e   :  { %v648_v36 = vld [vmem:[#allocation5 + $0x1108] sm:$0xff] }
 0x39f   :  { %v17823_v42 = vcombine.high %v636_v35, %v648_v36 }
 0x3a0   :  { %7817 = vmatpush1.bf16.msra.mxu1 %v17654_v43  ;;  %15736 = vmatpush1.bf16.msra.mxu0 %v19933_v45  ;;  %v19956_v43 = vld [vmem:[#allocation8 + $0x424] ss:$24 sps:$4 sm:$0xff]   ;;  %v660_v45 = vld [vmem:[#allocation5 + $0x1168] sm:$0xff] }
 0x3a1   :  { %7829 = vmatprep.subr.bf16.mxu1 %v17679_v46  ;;  %15748 = vmatprep.subr.bf16.mxu0 %v19938_v47  ;;  %v672_v46 = vld [vmem:[#allocation5 + $0x11c8] sm:$0xff]  ;;  %v17822_v47 = vcombine.low %v636_v35, %v648_v36 }
 0x3a2   :  { %v17847_v50 = vcombine.high %v660_v45, %v672_v46  ;;  %v19969_v35 = vld [vmem:[#allocation8 + $0x510] ss:$24 sps:$4 sm:$0xff]  }
 0x3a3   :  { %7819 = vmatmul.mubr.bf16.vlgmr.msra.gmra.mrb[16].mxu1 %v21873_v15  ;;  %15738 = vmatmul.mubr.bf16.vlgmr.msra.gmra.mrb[16].mxu0 %v21919_v56 }
 0x3a4   :  { %7830 = vmatpush1.bf16.msra.mxu1 %v17678_v51  ;;  %15749 = vmatpush1.bf16.msra.mxu0 %v19936_v52  ;;  %v19959_v51 = vld [vmem:[#allocation8 + $0x454] ss:$24 sps:$4 sm:$0xff]  }
 0x3a5   :  { %15780 = vmatprep.mubr.bf16.mxu0 %v21957_v21  ;;  %7831 = vmatprep.subr.bf16.mxu1 %v17703_v53  ;;  %v684_v52 = vld [vmem:[#allocation5 + $0x1228] sm:$0xff] }
 0x3a6   :  { %15750 = vmatprep.subr.bf16.mxu0 %v19941_v54  ;;  %7861 = vmatprep.mubr.bf16.mxu1 %v21875_v25  ;;  %v696_v53 = vld [vmem:[#allocation5 + $0x1288] sm:$0xff]  ;;  %v17846_v54 = vcombine.low %v660_v45, %v672_v46  ;;  %v19972_v45 = vld [vmem:[#allocation8 + $0x540] ss:$24 sps:$4 sm:$0xff]  }
 0x3a7   :  { %v17871_v57 = vcombine.high %v684_v52, %v696_v53 }
 0x3a8   :  { %7832 = vmatpush1.bf16.msra.mxu1 %v17702_v60  ;;  %15751 = vmatpush1.bf16.msra.mxu0 %v19939_v62  ;;  %v19962_v60 = vld [vmem:[#allocation8 + $0x484] ss:$24 sps:$4 sm:$0xff]   ;;  %v708_v62 = vld [vmem:[#allocation5 + $0x12e8] sm:$0xff] }
 0x3a9   :  { %7833 = vmatprep.subr.bf16.mxu1 %v17727_v0  ;;  %15752 = vmatprep.subr.bf16.mxu0 %v19944_v4  ;;  %v720_v0 = vld [vmem:[#allocation5 + $0x1348] sm:$0xff]  ;;  %v17870_v4 = vcombine.low %v684_v52, %v696_v53 }
 0x3aa   :  { %v17895_v8 = vcombine.high %v708_v62, %v720_v0  ;;  %v19975_v52 = vld [vmem:[#allocation8 + $0x570] ss:$24 sps:$4 sm:$0xff]  }
 0x3ac   :  { %7834 = vmatpush1.bf16.msra.mxu1 %v17726_v9  ;;  %15753 = vmatpush1.bf16.msra.mxu0 %v19942_v10  ;;  %v19965_v9 = vld [vmem:[#allocation8 + $0x4b4] ss:$24 sps:$4 sm:$0xff]  }
 0x3ad   :  { %7835 = vmatprep.subr.bf16.mxu1 %v17751_v12  ;;  %15754 = vmatprep.subr.bf16.mxu0 %v19947_v14  ;;  %v732_v10 = vld [vmem:[#allocation5 + $0x13a8] sm:$0xff]  ;;  %v17894_v14 = vcombine.low %v708_v62, %v720_v0  ;;  %v19978_v62 = vld [vmem:[#allocation8 + $0x5a0] ss:$24 sps:$4 sm:$0xff]  }
 0x3ae   :  { %v744_v12 = vld [vmem:[#allocation5 + $0x1408] sm:$0xff] }
 0x3af   :  { %v17919_v17 = vcombine.high %v732_v10, %v744_v12 }
 0x3b0   :  { %7836 = vmatpush1.bf16.msra.mxu1 %v17750_v18  ;;  %15755 = vmatpush1.bf16.msra.mxu0 %v19945_v19  ;;  %v19968_v18 = vld [vmem:[#allocation8 + $0x4e4] ss:$24 sps:$4 sm:$0xff]   ;;  %v756_v19 = vld [vmem:[#allocation5 + $0x1468] sm:$0xff] }
 0x3b1   :  { %7837 = vmatprep.subr.bf16.mxu1 %v17775_v20  ;;  %15756 = vmatprep.subr.bf16.mxu0 %v19950_v22  ;;  %v768_v20 = vld [vmem:[#allocation5 + $0x14c8] sm:$0xff]  ;;  %v17918_v22 = vcombine.low %v732_v10, %v744_v12 }
 0x3b2   :  { %v17943_v23 = vcombine.high %v756_v19, %v768_v20  ;;  %v19981_v10 = vld [vmem:[#allocation8 + $0x5d0] ss:$24 sps:$4 sm:$0xff]  }
 0x3b4   :  { %7838 = vmatpush1.bf16.msra.mxu1 %v17774_v26  ;;  %15757 = vmatpush1.bf16.msra.mxu0 %v19948_v31  ;;  %v19971_v26 = vld [vmem:[#allocation8 + $0x514] ss:$24 sps:$4 sm:$0xff]  }
 0x3b5   :  { %7839 = vmatprep.subr.bf16.mxu1 %v17799_v32  ;;  %15758 = vmatprep.subr.bf16.mxu0 %v19953_v34  ;;  %v780_v31 = vld [vmem:[#allocation5 + $0x1528] sm:$0xff]  ;;  %v17942_v34 = vcombine.low %v756_v19, %v768_v20  ;;  %v19984_v19 = vld [vmem:[#allocation8 + $0x600] ss:$24 sps:$4 sm:$0xff]  }
 0x3b6   :  { %v792_v32 = vld [vmem:[#allocation5 + $0x1588] sm:$0xff] }
 0x3b7   :  { %v17967_v36 = vcombine.high %v780_v31, %v792_v32 }
 0x3b8   :  { %7840 = vmatpush1.bf16.msra.mxu1 %v17798_v40  ;;  %15759 = vmatpush1.bf16.msra.mxu0 %v19951_v41  ;;  %v19974_v40 = vld [vmem:[#allocation8 + $0x544] ss:$24 sps:$4 sm:$0xff]   ;;  %v804_v41 = vld [vmem:[#allocation5 + $0x15e8] sm:$0xff] }
 0x3b9   :  { %7841 = vmatprep.subr.bf16.mxu1 %v17823_v42  ;;  %15760 = vmatprep.subr.bf16.mxu0 %v19956_v43  ;;  %v816_v42 = vld [vmem:[#allocation5 + $0x1648] sm:$0xff]  ;;  %v17966_v43 = vcombine.low %v780_v31, %v792_v32 }
 0x3ba   :  { %v17991_v46 = vcombine.high %v804_v41, %v816_v42  ;;  %v19987_v31 = vld [vmem:[#allocation8 + $0x630] ss:$24 sps:$4 sm:$0xff]  }
 0x3bc   :  { %7842 = vmatpush1.bf16.msra.mxu1 %v17822_v47  ;;  %15761 = vmatpush1.bf16.msra.mxu0 %v19954_v49  ;;  %v19977_v47 = vld [vmem:[#allocation8 + $0x574] ss:$24 sps:$4 sm:$0xff]  }
 0x3bd   :  { %7843 = vmatprep.subr.bf16.mxu1 %v17847_v50  ;;  %15762 = vmatprep.subr.bf16.mxu0 %v19959_v51  ;;  %v828_v49 = vld [vmem:[#allocation5 + $0x16a8] sm:$0xff]  ;;  %v17990_v51 = vcombine.low %v804_v41, %v816_v42  ;;  %v19990_v41 = vld [vmem:[#allocation8 + $0x660] ss:$24 sps:$4 sm:$0xff]  }
 0x3be   :  { %v840_v50 = vld [vmem:[#allocation5 + $0x1708] sm:$0xff] }
 0x3bf   :  { %v18015_v53 = vcombine.high %v828_v49, %v840_v50 }
 0x3c0   :  { %7844 = vmatpush1.bf16.msra.mxu1 %v17846_v54  ;;  %15763 = vmatpush1.bf16.msra.mxu0 %v19957_v55  ;;  %v19980_v54 = vld [vmem:[#allocation8 + $0x5a4] ss:$24 sps:$4 sm:$0xff]   ;;  %v852_v55 = vld [vmem:[#allocation5 + $0x1768] sm:$0xff] }
 0x3c1   :  { %7845 = vmatprep.subr.bf16.mxu1 %v17871_v57  ;;  %15764 = vmatprep.subr.bf16.mxu0 %v19962_v60  ;;  %v864_v57 = vld [vmem:[#allocation5 + $0x17c8] sm:$0xff]  ;;  %v18014_v60 = vcombine.low %v828_v49, %v840_v50 }
 0x3c2   :  { %v18039_v0 = vcombine.high %v852_v55, %v864_v57  ;;  %v19993_v49 = vld [vmem:[#allocation8 + $0x690] ss:$24 sps:$4 sm:$0xff]  }
 0x3c4   :  { %7846 = vmatpush1.bf16.msra.mxu1 %v17870_v4  ;;  %15765 = vmatpush1.bf16.msra.mxu0 %v19960_v7  ;;  %v19983_v4 = vld [vmem:[#allocation8 + $0x5d4] ss:$24 sps:$4 sm:$0xff]  }
 0x3c5   :  { %7847 = vmatprep.subr.bf16.mxu1 %v17895_v8  ;;  %15766 = vmatprep.subr.bf16.mxu0 %v19965_v9  ;;  %v876_v7 = vld [vmem:[#allocation5 + $0x1828] sm:$0xff]  ;;  %v18038_v9 = vcombine.low %v852_v55, %v864_v57  ;;  %v19996_v55 = vld [vmem:[#allocation8 + $0x6c0] ss:$24 sps:$4 sm:$0xff]  }
 0x3c6   :  { %v888_v8 = vld [vmem:[#allocation5 + $0x1888] sm:$0xff] }
 0x3c7   :  { %v18063_v12 = vcombine.high %v876_v7, %v888_v8 }
 0x3c8   :  { %7848 = vmatpush1.bf16.msra.mxu1 %v17894_v14  ;;  %15767 = vmatpush1.bf16.msra.mxu0 %v19963_v16  ;;  %v19986_v14 = vld [vmem:[#allocation8 + $0x604] ss:$24 sps:$4 sm:$0xff]   ;;  %v900_v16 = vld [vmem:[#allocation5 + $0x18e8] sm:$0xff] }
 0x3c9   :  { %7849 = vmatprep.subr.bf16.mxu1 %v17919_v17  ;;  %15768 = vmatprep.subr.bf16.mxu0 %v19968_v18  ;;  %v912_v17 = vld [vmem:[#allocation5 + $0x1948] sm:$0xff]  ;;  %v18062_v18 = vcombine.low %v876_v7, %v888_v8 }
 0x3ca   :  { %v18087_v20 = vcombine.high %v900_v16, %v912_v17  ;;  %v19999_v7 = vld [vmem:[#allocation8 + $0x6f0] ss:$24 sps:$4 sm:$0xff]  }
 0x3cc   :  { %7850 = vmatpush1.bf16.msra.mxu1 %v17918_v22  ;;  %15769 = vmatpush1.bf16.msra.mxu0 %v19966_v27  ;;  %v19989_v22 = vld [vmem:[#allocation8 + $0x634] ss:$24 sps:$4 sm:$0xff]  }
 0x3cd   :  { %7851 = vmatprep.subr.bf16.mxu1 %v17943_v23  ;;  %15770 = vmatprep.subr.bf16.mxu0 %v19971_v26  ;;  %v924_v27 = vld [vmem:[#allocation5 + $0x19a8] sm:$0xff]  ;;  %v18086_v26 = vcombine.low %v900_v16, %v912_v17  ;;  %v20002_v16 = vld [vmem:[#allocation8 + $0x720] ss:$24 sps:$4 sm:$0xff]  }
 0x3ce   :  { %v936_v23 = vld [vmem:[#allocation5 + $0x1a08] sm:$0xff] }
 0x3cf   :  { %v18111_v32 = vcombine.high %v924_v27, %v936_v23 }
 0x3d0   :  { %7852 = vmatpush1.bf16.msra.mxu1 %v17942_v34  ;;  %15771 = vmatpush1.bf16.msra.mxu0 %v19969_v35  ;;  %v19992_v34 = vld [vmem:[#allocation8 + $0x664] ss:$24 sps:$4 sm:$0xff]   ;;  %v948_v35 = vld [vmem:[#allocation5 + $0x1a68] sm:$0xff] }
 0x3d1   :  { %7853 = vmatprep.subr.bf16.mxu1 %v17967_v36  ;;  %15772 = vmatprep.subr.bf16.mxu0 %v19974_v40  ;;  %v960_v36 = vld [vmem:[#allocation5 + $0x1ac8] sm:$0xff]  ;;  %v18110_v40 = vcombine.low %v924_v27, %v936_v23 }
 0x3d2   :  { %v18135_v42 = vcombine.high %v948_v35, %v960_v36  ;;  %v20005_v27 = vld [vmem:[#allocation8 + $0x750] ss:$24 sps:$4 sm:$0xff]  }
 0x3d4   :  { %7854 = vmatpush1.bf16.msra.mxu1 %v17966_v43  ;;  %15773 = vmatpush1.bf16.msra.mxu0 %v19972_v45  ;;  %v19995_v43 = vld [vmem:[#allocation8 + $0x694] ss:$24 sps:$4 sm:$0xff]  }
 0x3d5   :  { %7855 = vmatprep.subr.bf16.mxu1 %v17991_v46  ;;  %15774 = vmatprep.subr.bf16.mxu0 %v19977_v47  ;;  %v972_v45 = vld [vmem:[#allocation5 + $0x1b28] sm:$0xff]  ;;  %v18134_v47 = vcombine.low %v948_v35, %v960_v36  ;;  %v20008_v35 = vld [vmem:[#allocation8 + $0x780] ss:$24 sps:$4 sm:$0xff]  }
 0x3d6   :  { %v984_v46 = vld [vmem:[#allocation5 + $0x1b88] sm:$0xff] }
 0x3d7   :  { %v18159_v50 = vcombine.high %v972_v45, %v984_v46 }
 0x3d8   :  { %7856 = vmatpush1.bf16.msra.mxu1 %v17990_v51  ;;  %15775 = vmatpush1.bf16.msra.mxu0 %v19975_v52  ;;  %v19998_v51 = vld [vmem:[#allocation8 + $0x6c4] ss:$24 sps:$4 sm:$0xff]   ;;  %v996_v52 = vld [vmem:[#allocation5 + $0x1be8] sm:$0xff] }
 0x3d9   :  { %7857 = vmatprep.subr.bf16.mxu1 %v18015_v53  ;;  %15776 = vmatprep.subr.bf16.mxu0 %v19980_v54  ;;  %v1008_v53 = vld [vmem:[#allocation5 + $0x1c48] sm:$0xff]  ;;  %v18158_v54 = vcombine.low %v972_v45, %v984_v46 }
 0x3da   :  { %v18183_v57 = vcombine.high %v996_v52, %v1008_v53  ;;  %v20011_v45 = vld [vmem:[#allocation8 + $0x7b0] ss:$24 sps:$4 sm:$0xff]  }
 0x3dc   :  { %7858 = vmatpush1.bf16.msra.mxu1 %v18014_v60  ;;  %15777 = vmatpush1.bf16.msra.mxu0 %v19978_v62  ;;  %v20001_v60 = vld [vmem:[#allocation8 + $0x6f4] ss:$24 sps:$4 sm:$0xff]  }
 0x3dd   :  { %7859 = vmatprep.subr.bf16.mxu1 %v18039_v0  ;;  %15778 = vmatprep.subr.bf16.mxu0 %v19983_v4  ;;  %v1020_v62 = vld [vmem:[#allocation5 + $0x1ca8] sm:$0xff]  ;;  %v18182_v4 = vcombine.low %v996_v52, %v1008_v53  ;;  %v20014_v52 = vld [vmem:[#allocation8 + $0x7e0] ss:$24 sps:$4 sm:$0xff]  }
 0x3de   :  { %v1032_v0 = vld [vmem:[#allocation5 + $0x1d08] sm:$0xff] }
 0x3df   :  { %v18207_v8 = vcombine.high %v1020_v62, %v1032_v0 }
 0x3e0   :  { %7860 = vmatpush1.bf16.msra.mxu1 %v18038_v9  ;;  %15779 = vmatpush1.bf16.msra.mxu0 %v19981_v10  ;;  %v20004_v9 = vld [vmem:[#allocation8 + $0x724] ss:$24 sps:$4 sm:$0xff]   ;;  %v1044_v10 = vld [vmem:[#allocation5 + $0x1d68] sm:$0xff] }
 0x3e1   :  { %7872 = vmatprep.subr.bf16.mxu1 %v18063_v12  ;;  %15791 = vmatprep.subr.bf16.mxu0 %v19986_v14  ;;  %v1056_v12 = vld [vmem:[#allocation5 + $0x1dc8] sm:$0xff]  ;;  %v18206_v14 = vcombine.low %v1020_v62, %v1032_v0 }
 0x3e2   :  { %v18231_v17 = vcombine.high %v1044_v10, %v1056_v12  ;;  %v20017_v62 = vld [vmem:[#allocation8 + $0x810] ss:$24 sps:$4 sm:$0xff]  }
 0x3e3   :  { %7862 = vmatmul.mubr.bf16.vlgmr.msra.gmra.mrb[16].mxu1 %v21881_v30  ;;  %15781 = vmatmul.mubr.bf16.vlgmr.msra.gmra.mrb[16].mxu0 %v21955_v13 }
 0x3e4   :  { %7873 = vmatpush1.bf16.msra.mxu1 %v18062_v18  ;;  %15792 = vmatpush1.bf16.msra.mxu0 %v19984_v19  ;;  %v20007_v18 = vld [vmem:[#allocation8 + $0x754] ss:$24 sps:$4 sm:$0xff]  }
 0x3e5   :  { %15823 = vmatprep.mubr.bf16.mxu0 %v21981_v33  ;;  %7874 = vmatprep.subr.bf16.mxu1 %v18087_v20  ;;  %v1068_v19 = vld [vmem:[#allocation5 + $0x1e28] sm:$0xff] }
 0x3e6   :  { %15793 = vmatprep.subr.bf16.mxu0 %v19989_v22  ;;  %7904 = vmatprep.mubr.bf16.mxu1 %v21883_v39  ;;  %v1080_v20 = vld [vmem:[#allocation5 + $0x1e88] sm:$0xff]  ;;  %v18230_v22 = vcombine.low %v1044_v10, %v1056_v12  ;;  %v20020_v10 = vld [vmem:[#allocation8 + $0x840] ss:$24 sps:$4 sm:$0xff]  }
 0x3e7   :  { %v18255_v23 = vcombine.high %v1068_v19, %v1080_v20 }
 0x3e8   :  { %7875 = vmatpush1.bf16.msra.mxu1 %v18086_v26  ;;  %15794 = vmatpush1.bf16.msra.mxu0 %v19987_v31  ;;  %v20010_v26 = vld [vmem:[#allocation8 + $0x784] ss:$24 sps:$4 sm:$0xff]   ;;  %v1092_v31 = vld [vmem:[#allocation5 + $0x1ee8] sm:$0xff] }
 0x3e9   :  { %7876 = vmatprep.subr.bf16.mxu1 %v18111_v32  ;;  %15795 = vmatprep.subr.bf16.mxu0 %v19992_v34  ;;  %v1104_v32 = vld [vmem:[#allocation5 + $0x1f48] sm:$0xff]  ;;  %v18254_v34 = vcombine.low %v1068_v19, %v1080_v20 }
 0x3ea   :  { %v18279_v36 = vcombine.high %v1092_v31, %v1104_v32  ;;  %v20023_v19 = vld [vmem:[#allocation8 + $0x870] ss:$24 sps:$4 sm:$0xff]  }
 0x3ec   :  { %7877 = vmatpush1.bf16.msra.mxu1 %v18110_v40  ;;  %15796 = vmatpush1.bf16.msra.mxu0 %v19990_v41  ;;  %v20013_v40 = vld [vmem:[#allocation8 + $0x7b4] ss:$24 sps:$4 sm:$0xff]  }
 0x3ed   :  { %7878 = vmatprep.subr.bf16.mxu1 %v18135_v42  ;;  %15797 = vmatprep.subr.bf16.mxu0 %v19995_v43  ;;  %v1116_v41 = vld [vmem:[#allocation5 + $0x1fa8] sm:$0xff]  ;;  %v18278_v43 = vcombine.low %v1092_v31, %v1104_v32  ;;  %v20026_v31 = vld [vmem:[#allocation8 + $0x8a0] ss:$24 sps:$4 sm:$0xff]  }
 0x3ee   :  { %v1128_v42 = vld [vmem:[#allocation5 + $0x2008] sm:$0xff] }
 0x3ef   :  { %v18303_v46 = vcombine.high %v1116_v41, %v1128_v42 }
 0x3f0   :  { %7879 = vmatpush1.bf16.msra.mxu1 %v18134_v47  ;;  %15798 = vmatpush1.bf16.msra.mxu0 %v19993_v49  ;;  %v20016_v47 = vld [vmem:[#allocation8 + $0x7e4] ss:$24 sps:$4 sm:$0xff]   ;;  %v1140_v49 = vld [vmem:[#allocation5 + $0x2068] sm:$0xff] }
 0x3f1   :  { %7880 = vmatprep.subr.bf16.mxu1 %v18159_v50  ;;  %15799 = vmatprep.subr.bf16.mxu0 %v19998_v51  ;;  %v1152_v50 = vld [vmem:[#allocation5 + $0x20c8] sm:$0xff]  ;;  %v18302_v51 = vcombine.low %v1116_v41, %v1128_v42 }
 0x3f2   :  { %v18327_v53 = vcombine.high %v1140_v49, %v1152_v50  ;;  %v20029_v41 = vld [vmem:[#allocation8 + $0x8d0] ss:$24 sps:$4 sm:$0xff]  }
 0x3f4   :  { %7881 = vmatpush1.bf16.msra.mxu1 %v18158_v54  ;;  %15800 = vmatpush1.bf16.msra.mxu0 %v19996_v55  ;;  %v20019_v54 = vld [vmem:[#allocation8 + $0x814] ss:$24 sps:$4 sm:$0xff]  }
 0x3f5   :  { %7882 = vmatprep.subr.bf16.mxu1 %v18183_v57  ;;  %15801 = vmatprep.subr.bf16.mxu0 %v20001_v60  ;;  %v1164_v55 = vld [vmem:[#allocation5 + $0x2128] sm:$0xff]  ;;  %v18326_v60 = vcombine.low %v1140_v49, %v1152_v50  ;;  %v20032_v49 = vld [vmem:[#allocation8 + $0x900] ss:$24 sps:$4 sm:$0xff]  }
 0x3f6   :  { %v1176_v57 = vld [vmem:[#allocation5 + $0x2188] sm:$0xff] }
 0x3f7   :  { %v18351_v0 = vcombine.high %v1164_v55, %v1176_v57 }
 0x3f8   :  { %7883 = vmatpush1.bf16.msra.mxu1 %v18182_v4  ;;  %15802 = vmatpush1.bf16.msra.mxu0 %v19999_v7  ;;  %v20022_v4 = vld [vmem:[#allocation8 + $0x844] ss:$24 sps:$4 sm:$0xff]   ;;  %v1188_v7 = vld [vmem:[#allocation5 + $0x21e8] sm:$0xff] }
 0x3f9   :  { %7884 = vmatprep.subr.bf16.mxu1 %v18207_v8  ;;  %15803 = vmatprep.subr.bf16.mxu0 %v20004_v9  ;;  %v1200_v8 = vld [vmem:[#allocation5 + $0x2248] sm:$0xff]  ;;  %v18350_v9 = vcombine.low %v1164_v55, %v1176_v57 }
 0x3fa   :  { %v18375_v12 = vcombine.high %v1188_v7, %v1200_v8  ;;  %v20035_v55 = vld [vmem:[#allocation8 + $0x930] ss:$24 sps:$4 sm:$0xff]  }
 0x3fc   :  { %7885 = vmatpush1.bf16.msra.mxu1 %v18206_v14  ;;  %15804 = vmatpush1.bf16.msra.mxu0 %v20002_v16  ;;  %v20025_v14 = vld [vmem:[#allocation8 + $0x874] ss:$24 sps:$4 sm:$0xff]  }
 0x3fd   :  { %7886 = vmatprep.subr.bf16.mxu1 %v18231_v17  ;;  %15805 = vmatprep.subr.bf16.mxu0 %v20007_v18  ;;  %v1212_v16 = vld [vmem:[#allocation5 + $0x22a8] sm:$0xff]  ;;  %v18374_v18 = vcombine.low %v1188_v7, %v1200_v8  ;;  %v20038_v7 = vld [vmem:[#allocation8 + $0x960] ss:$24 sps:$4 sm:$0xff]  }
 0x3fe   :  { %v1224_v17 = vld [vmem:[#allocation5 + $0x2308] sm:$0xff] }
 0x3ff   :  { %v18399_v20 = vcombine.high %v1212_v16, %v1224_v17 }
 0x400   :  { %7887 = vmatpush1.bf16.msra.mxu1 %v18230_v22  ;;  %15806 = vmatpush1.bf16.msra.mxu0 %v20005_v27  ;;  %v20028_v22 = vld [vmem:[#allocation8 + $0x8a4] ss:$24 sps:$4 sm:$0xff]   ;;  %v1236_v27 = vld [vmem:[#allocation5 + $0x2368] sm:$0xff] }
 0x401   :  { %7888 = vmatprep.subr.bf16.mxu1 %v18255_v23  ;;  %15807 = vmatprep.subr.bf16.mxu0 %v20010_v26  ;;  %v1248_v23 = vld [vmem:[#allocation5 + $0x23c8] sm:$0xff]  ;;  %v18398_v26 = vcombine.low %v1212_v16, %v1224_v17 }
 0x402   :  { %v18423_v32 = vcombine.high %v1236_v27, %v1248_v23  ;;  %v20041_v16 = vld [vmem:[#allocation8 + $0x990] ss:$24 sps:$4 sm:$0xff]  }
 0x404   :  { %7889 = vmatpush1.bf16.msra.mxu1 %v18254_v34  ;;  %15808 = vmatpush1.bf16.msra.mxu0 %v20008_v35  ;;  %v20031_v34 = vld [vmem:[#allocation8 + $0x8d4] ss:$24 sps:$4 sm:$0xff]   ;;  %v110_v35 = vld [vmem:[#allocation5 + $0x38] sm:$0xff] }
 0x405   :  { %7890 = vmatprep.subr.bf16.mxu1 %v18279_v36  ;;  %15809 = vmatprep.subr.bf16.mxu0 %v20013_v40  ;;  %v122_v36 = vld [vmem:[#allocation5 + $0x98] sm:$0xff]  ;;  %v18422_v40 = vcombine.low %v1236_v27, %v1248_v23  ;;  %v22002_v23 = vsub.s32 7, %v21907_v48 }
 0x406   :  { %v17299_v42 = vcombine.high %v110_v35, %v122_v36 }
 0x408   :  { %7891 = vmatpush1.bf16.msra.mxu1 %v18278_v43  ;;  %15810 = vmatpush1.bf16.msra.mxu0 %v20011_v45  ;;  %v20034_v43 = vld [vmem:[#allocation8 + $0x904] ss:$24 sps:$4 sm:$0xff]  }
 0x409   :  { %7892 = vmatprep.subr.bf16.mxu1 %v18303_v46  ;;  %15811 = vmatprep.subr.bf16.mxu0 %v20016_v47  ;;  %v134_v45 = vld [vmem:[#allocation5 + $0xf8] sm:$0xff]  ;;  %v17298_v47 = vcombine.low %v110_v35, %v122_v36  ;;  %v21619_v36 = vld [vmem:[#allocation7] sm:$0xff] }
 0x40a   :  { %v146_v46 = vld [vmem:[#allocation5 + $0x158] sm:$0xff] }
 0x40b   :  { %v17323_v50 = vcombine.high %v134_v45, %v146_v46  ;;  %v266_v35 = vld [vmem:[#allocation5 + $0x518] sm:$0xff] }
 0x40c   :  { %7893 = vmatpush1.bf16.msra.mxu1 %v18302_v51  ;;  %15812 = vmatpush1.bf16.msra.mxu0 %v20014_v52  ;;  %v20037_v51 = vld [vmem:[#allocation8 + $0x934] ss:$24 sps:$4 sm:$0xff]   ;;  %v158_v52 = vld [vmem:[#allocation5 + $0x1b8] sm:$0xff] }
 0x40d   :  { %7894 = vmatprep.subr.bf16.mxu1 %v18327_v53  ;;  %15813 = vmatprep.subr.bf16.mxu0 %v20019_v54  ;;  %v170_v53 = vld [vmem:[#allocation5 + $0x218] sm:$0xff]  ;;  %v17322_v54 = vcombine.low %v134_v45, %v146_v46 }
 0x40e   :  { %v17347_v57 = vcombine.high %v158_v52, %v170_v53 }
 0x410   :  { %7895 = vmatpush1.bf16.msra.mxu1 %v18326_v60  ;;  %15814 = vmatpush1.bf16.msra.mxu0 %v20017_v62  ;;  %v20040_v60 = vld [vmem:[#allocation8 + $0x964] ss:$24 sps:$4 sm:$0xff]  }
 0x411   :  { %7896 = vmatprep.subr.bf16.mxu1 %v18351_v0  ;;  %15815 = vmatprep.subr.bf16.mxu0 %v20022_v4  ;;  %v182_v62 = vld [vmem:[#allocation5 + $0x278] sm:$0xff]  ;;  %v17346_v4 = vcombine.low %v158_v52, %v170_v53 }
 0x412   :  { %v194_v0 = vld [vmem:[#allocation5 + $0x2d8] sm:$0xff] }
 0x413   :  { %v17371_v8 = vcombine.high %v182_v62, %v194_v0  ;;  %v290_v52 = vld [vmem:[#allocation5 + $0x5d8] sm:$0xff] }
 0x414   :  { %7897 = vmatpush1.bf16.msra.mxu1 %v18350_v9  ;;  %15816 = vmatpush1.bf16.msra.mxu0 %v20020_v10  ;;  %v20043_v9 = vld [vmem:[#allocation8 + $0x994] ss:$24 sps:$4 sm:$0xff]   ;;  %v206_v10 = vld [vmem:[#allocation5 + $0x338] sm:$0xff] }
 0x415   :  { %7898 = vmatprep.subr.bf16.mxu1 %v18375_v12  ;;  %15817 = vmatprep.subr.bf16.mxu0 %v20025_v14  ;;  %v218_v12 = vld [vmem:[#allocation5 + $0x398] sm:$0xff]  ;;  %v17370_v14 = vcombine.low %v182_v62, %v194_v0 }
 0x416   :  { %v17395_v17 = vcombine.high %v206_v10, %v218_v12  ;;  %v17394_v27 = vcombine.low %v206_v10, %v218_v12 }
 0x418   :  { %7899 = vmatpush1.bf16.msra.mxu1 %v18374_v18  ;;  %15818 = vmatpush1.bf16.msra.mxu0 %v20023_v19  ;;  %v20046_v18 = vld [vmem:[#allocation8 + $0x9c4] ss:$24 sps:$4 sm:$0xff]  }
 0x419   :  { %7900 = vmatprep.subr.bf16.mxu1 %v18399_v20  ;;  %15819 = vmatprep.subr.bf16.mxu0 %v20028_v22  ;;  %v230_v19 = vld [vmem:[#allocation5 + $0x3f8] sm:$0xff]  ;;  %v21999_v22 = vsub.s32 6, %v21907_v48  ;;  %v20047_v48 = vld [vmem:[#allocation8 + $0x9f0] ss:$24 sps:$4 sm:$0xff]  }
 0x41a   :  { %v242_v20 = vld [vmem:[#allocation5 + $0x458] sm:$0xff] }
 0x41c   :  { %7901 = vmatpush1.bf16.msra.mxu1 %v18398_v26  ;;  %15820 = vmatpush1.bf16.msra.mxu0 %v20026_v31  ;;  %v20044_v26 = vld [vmem:[#allocation8 + $0x9c0] ss:$24 sps:$4 sm:$0xff]   ;;  %v17419_v31 = vcombine.high %v230_v19, %v242_v20 }
 0x41d   :  { %7902 = vmatprep.subr.bf16.mxu1 %v18423_v32  ;;  %15821 = vmatprep.subr.bf16.mxu0 %v20031_v34  ;;  %v20049_v32 = vld [vmem:[#allocation8 + $0x9f4] ss:$24 sps:$4 sm:$0xff]   ;;  %v254_v34 = vld [vmem:[#allocation5 + $0x4b8] sm:$0xff] }
 0x41e   :  { %v17443_v46 = vcombine.high %v254_v34, %v266_v35  ;;  %v17442_v62 = vcombine.low %v254_v34, %v266_v35 }
 0x420   :  { %7903 = vmatpush1.bf16.msra.mxu1 %v18422_v40  ;;  %15822 = vmatpush1.bf16.msra.mxu0 %v20029_v41  ;;  %v1288_v40 = vrot.slane %v21619_v36, %v21999_v22  ;;  %v1292_v41 = vrot.slane %v21619_v36, %v22002_v23 }
 0x421   :  { %8044 = vmatprep.subr.bf16.mxu1 %v17299_v42  ;;  %15834 = vmatprep.subr.bf16.mxu0 %v20034_v43  ;;  %v17418_v42 = vcombine.low %v230_v19, %v242_v20  ;;  %v21620_v43 = vld [vmem:[#allocation7 + $0x10] sm:$0xff]  ;;  %v314_v19 = vld [vmem:[#allocation5 + $0x698] sm:$0xff] }
 0x422   :  { %v1344_v45 = vrot.slane %v21620_v43, %v21946_v3 }
 0x423   :  { %7905 = vmatmul.mubr.bf16.vlgmr.msra.gmra.mrb[16].mxu1 %v21889_v44  ;;  %15824 = vmatmul.mubr.bf16.vlgmr.msra.gmra.mrb[16].mxu0 %v21979_v24 }
 0x424   :  { %8045 = vmatpush1.bf16.msra.mxu1 %v17298_v47  ;;  %15835 = vmatpush1.bf16.msra.mxu0 %v20032_v49  ;;  %v1348_v47 = vrot.slane %v21620_v43, %v21949_v11 }
 0x425   :  { %8046 = vmatprep.subr.bf16.mxu1 %v17323_v50  ;;  %15836 = vmatprep.subr.bf16.mxu0 %v20037_v51  ;;  %v20052_v50 = vld [vmem:[#allocation8 + $0xa24] ss:$24 sps:$4 sm:$0xff]  }
 0x426   :  { %8076 = vmatprep.mubr.bf16.mxu1 %v21869_v58  ;;  %v278_v51 = vld [vmem:[#allocation5 + $0x578] sm:$0xff] }
 0x427   :  { %v17467_v10 = vcombine.high %v278_v51, %v290_v52 }
 0x428   :  { %8047 = vmatpush1.bf16.msra.mxu1 %v17322_v54  ;;  %15837 = vmatpush1.bf16.msra.mxu0 %v20035_v55 }
 0x429   :  { %8048 = vmatprep.subr.bf16.mxu1 %v17347_v57  ;;  %15838 = vmatprep.subr.bf16.mxu0 %v20040_v60 }
 0x42c   :  { %8049 = vmatpush1.bf16.msra.mxu1 %v17346_v4  ;;  %15839 = vmatpush1.bf16.msra.mxu0 %v20038_v7 }
 0x42d   :  { %8050 = vmatprep.subr.bf16.mxu1 %v17371_v8  ;;  %15840 = vmatprep.subr.bf16.mxu0 %v20043_v9  ;;  %v20050_v9 = vld [vmem:[#allocation8 + $0xa20] ss:$24 sps:$4 sm:$0xff]  }
 0x430   :  { %8051 = vmatpush1.bf16.msra.mxu1 %v17370_v14  ;;  %15841 = vmatpush1.bf16.msra.mxu0 %v20041_v16 }
 0x431   :  { %8052 = vmatprep.subr.bf16.mxu1 %v17395_v17  ;;  %15842 = vmatprep.subr.bf16.mxu0 %v20046_v18  ;;  %v20055_v17 = vld [vmem:[#allocation8 + $0xa54] ss:$24 sps:$4 sm:$0xff]   ;;  %v302_v18 = vld [vmem:[#allocation5 + $0x638] sm:$0xff] }
 0x434   :  { %8053 = vmatpush1.bf16.msra.mxu1 %v17394_v27  ;;  %15843 = vmatpush1.bf16.msra.mxu0 %v20044_v26 }
 0x435   :  { %8054 = vmatprep.subr.bf16.mxu1 %v17419_v31  ;;  %15844 = vmatprep.subr.bf16.mxu0 %v20049_v32 }
 0x436   :  { %v7648_v49 = vpop.f32.mrb[12].mxu1  ;;  %v8551_v55 = vpop.f32.mrb[12].mxu0 }
 0x437   :  { %v19600_v53 = vadd.f32 %v7648_v49, %v1288_v40  ;;  %v7650_v54 = vpop.f32.mrb[13].mxu1  ;;  %v19628_v0 = vadd.f32 %v8551_v55, %v1344_v45  ;;  %v8553_v4 = vpop.f32.mrb[13].mxu0 }
 0x438   :  { %v19601_v57 = vadd.f32 %v7650_v54, %v1292_v41  ;;  %v7652_v60 = vpop.f32.mrb[14].mxu1  ;;  %8055 = vmatpush1.bf16.msra.mxu1 %v17418_v42  ;;  %15845 = vmatpush1.bf16.msra.mxu0 %v20047_v48  ;;  %v19629_v12 = vadd.f32 %v8553_v4, %v1348_v47  ;;  %v8555_v14 = vpop.f32.mrb[14].mxu0  ;;  %v17466_v42 = vcombine.low %v278_v51, %v290_v52  ;;  %v338_v54 = vld [vmem:[#allocation5 + $0x758] sm:$0xff] }
 0x439   :  { %v19602_v7 = vadd.f32 %v7652_v60, %v1288_v40  ;;  %v7654_v8 = vpop.f32.mrb[15].mxu1  ;;  %8056 = vmatprep.subr.bf16.mxu1 %v17443_v46  ;;  %15846 = vmatprep.subr.bf16.mxu0 %v20052_v50  ;;  %v8709_v20 = vmax.f32 %v19628_v0, 0.0  ;;  %v19630_v27 = vadd.f32 %v8555_v14, %v1344_v45  ;;  %v8557_v26 = vpop.f32.mrb[15].mxu0  ;;  %v8695_v31 = vmax.f32 %v19600_v53, 0.0  ;;  %v20058_v45 = vld [vmem:[#allocation8 + $0xa84] ss:$24 sps:$4 sm:$0xff]  }
 0x43a   :  { %v19603_v16 = vadd.f32 %v7654_v8, %v1292_v41  ;;  %v8710_v34 = vmax.f32 %v19629_v12, 0.0  ;;  %v19631_v35 = vadd.f32 %v8557_v26, %v1348_v47  ;;  %v8696_v36 = vmax.f32 %v19601_v57, 0.0  ;;  %v20053_v41 = vld [vmem:[#allocation8 + $0xa50] ss:$24 sps:$4 sm:$0xff]   ;;  %v326_v53 = vld [vmem:[#allocation5 + $0x6f8] sm:$0xff] }
 0x43b   :  { %v8719_v32 = vmax.f32 %v19602_v7, 0.0  ;;  %v8733_v43 = vmax.f32 %v19630_v27, 0.0  ;;  %v17491_v46 = vcombine.high %v302_v18, %v314_v19  ;;  %v17490_v51 = vcombine.low %v302_v18, %v314_v19  ;;  %v20056_v52 = vld [vmem:[#allocation8 + $0xa80] ss:$24 sps:$4 sm:$0xff]   ;;  %v20061_v60 = vld [vmem:[#allocation8 + $0xab4] ss:$24 sps:$4 sm:$0xff]  }
 0x43c   :  { %v8720_v40 = vmax.f32 %v19603_v16, 0.0  ;;  %8057 = vmatpush1.bf16.msra.mxu1 %v17442_v62  ;;  %15847 = vmatpush1.bf16.msra.mxu0 %v20050_v9  ;;  %v8734_v49 = vmax.f32 %v19631_v35, 0.0  ;;  %v17515_v57 = vcombine.high %v326_v53, %v338_v54  ;;  %v350_v62 = vld [vmem:[#allocation5 + $0x7b8] sm:$0xff]  ;;  %v17514_v4 = vcombine.low %v326_v53, %v338_v54  ;;  %v20059_v7 = vld [vmem:[#allocation8 + $0xab0] ss:$24 sps:$4 sm:$0xff]  }
 0x43d   :  { %v22008_v48 = vpack.c.bf16 %v8719_v32, %v8695_v31  ;;  %8058 = vmatprep.subr.bf16.mxu1 %v17467_v10  ;;  %15848 = vmatprep.subr.bf16.mxu0 %v20055_v17  ;;  %v22012_v55 = vpack.c.bf16 %v8733_v43, %v8709_v20  ;;  %v362_v0 = vld [vmem:[#allocation5 + $0x818] sm:$0xff]  ;;  %v20067_v18 = vld [vmem:[#allocation8 + $0xb14] ss:$24 sps:$4 sm:$0xff]   ;;  %v20065_v26 = vld [vmem:[#allocation8 + $0xb10] ss:$24 sps:$4 sm:$0xff]  }
 0x43e   :  { %v22010_v50 = vpack.c.bf16 %v8720_v40, %v8696_v36  ;;  %v22014_v47 = vpack.c.bf16 %v8734_v49, %v8710_v34  ;;  %v17539_v8 = vcombine.high %v350_v62, %v362_v0  ;;  %v20064_v9 = vld [vmem:[#allocation8 + $0xae4] ss:$24 sps:$4 sm:$0xff]   ;;  %v17538_v14 = vcombine.low %v350_v62, %v362_v0  ;;  %v20062_v16 = vld [vmem:[#allocation8 + $0xae0] ss:$24 sps:$4 sm:$0xff]   ;;  %v20073_v43 = vld [vmem:[#allocation8 + $0xb74] ss:$24 sps:$4 sm:$0xff]  }
 0x43f   :  { %v374_v10 = vld [vmem:[#allocation5 + $0x878] sm:$0xff]  ;;  %v20079_v0 = vld [vmem:[#allocation8 + $0xbd4] ss:$24 sps:$4 sm:$0xff]  }
 0x440   :  { %8059 = vmatpush1.bf16.msra.mxu1 %v17466_v42  ;;  %15866 = vmatprep.mubr.bf16.mxu0 %v22010_v50  ;;  %v386_v12 = vld [vmem:[#allocation5 + $0x8d8] sm:$0xff] }
 0x441   :  { %15849 = vmatpush1.bf16.msra.mxu0 %v20053_v41  ;;  %8060 = vmatprep.subr.bf16.mxu1 %v17491_v46  ;;  %v17563_v17 = vcombine.high %v374_v10, %v386_v12  ;;  %v398_v19 = vld [vmem:[#allocation5 + $0x938] sm:$0xff]  ;;  %v17562_v27 = vcombine.low %v374_v10, %v386_v12 }
 0x442   :  { %15850 = vmatprep.subr.bf16.mxu0 %v20058_v45  ;;  %v410_v20 = vld [vmem:[#allocation5 + $0x998] sm:$0xff]  ;;  %v20071_v45 = vld [vmem:[#allocation8 + $0xb70] ss:$24 sps:$4 sm:$0xff]  }
 0x443   :  { %v17587_v31 = vcombine.high %v398_v19, %v410_v20  ;;  %v20070_v32 = vld [vmem:[#allocation8 + $0xb44] ss:$24 sps:$4 sm:$0xff]   ;;  %v17586_v36 = vcombine.low %v398_v19, %v410_v20  ;;  %v20068_v40 = vld [vmem:[#allocation8 + $0xb40] ss:$24 sps:$4 sm:$0xff]   ;;  %v20085_v20 = vld [vmem:[#allocation8 + $0xc34] ss:$24 sps:$4 sm:$0xff]  }
 0x444   :  { %8061 = vmatpush1.bf16.msra.mxu1 %v17490_v51  ;;  %v422_v34 = vld [vmem:[#allocation5 + $0x9f8] sm:$0xff] }
 0x445   :  { %15851 = vmatpush1.bf16.msra.mxu0 %v20056_v52  ;;  %8062 = vmatprep.subr.bf16.mxu1 %v17515_v57  ;;  %v434_v35 = vld [vmem:[#allocation5 + $0xa58] sm:$0xff] }
 0x446   :  { %15852 = vmatprep.subr.bf16.mxu0 %v20061_v60  ;;  %v17611_v42 = vcombine.high %v422_v34, %v434_v35  ;;  %v446_v41 = vld [vmem:[#allocation5 + $0xab8] sm:$0xff]  ;;  %v17610_v49 = vcombine.low %v422_v34, %v434_v35 }
 0x447   :  { %v458_v46 = vld [vmem:[#allocation5 + $0xb18] sm:$0xff] }
 0x448   :  { %8063 = vmatpush1.bf16.msra.mxu1 %v17514_v4  ;;  %v17635_v53 = vcombine.high %v446_v41, %v458_v46  ;;  %v20076_v54 = vld [vmem:[#allocation8 + $0xba4] ss:$24 sps:$4 sm:$0xff]   ;;  %v17634_v57 = vcombine.low %v446_v41, %v458_v46  ;;  %v20074_v60 = vld [vmem:[#allocation8 + $0xba0] ss:$24 sps:$4 sm:$0xff]   ;;  %v20091_v46 = vld [vmem:[#allocation8 + $0xc94] ss:$24 sps:$4 sm:$0xff]  }
 0x449   :  { %15853 = vmatpush1.bf16.msra.mxu0 %v20059_v7  ;;  %8064 = vmatprep.subr.bf16.mxu1 %v17539_v8  ;;  %v470_v51 = vld [vmem:[#allocation5 + $0xb78] sm:$0xff] }
 0x44a   :  { %15854 = vmatprep.subr.bf16.mxu0 %v20064_v9  ;;  %v482_v52 = vld [vmem:[#allocation5 + $0xbd8] sm:$0xff]  ;;  %v20077_v9 = vld [vmem:[#allocation8 + $0xbd0] ss:$24 sps:$4 sm:$0xff]  }
 0x44b   :  { %v17659_v62 = vcombine.high %v470_v51, %v482_v52  ;;  %v494_v4 = vld [vmem:[#allocation5 + $0xc38] sm:$0xff]  ;;  %v17658_v8 = vcombine.low %v470_v51, %v482_v52 }
 0x44c   :  { %8065 = vmatpush1.bf16.msra.mxu1 %v17538_v14  ;;  %v506_v7 = vld [vmem:[#allocation5 + $0xc98] sm:$0xff] }
 0x44d   :  { %15855 = vmatpush1.bf16.msra.mxu0 %v20062_v16  ;;  %8066 = vmatprep.subr.bf16.mxu1 %v17563_v17  ;;  %v17683_v10 = vcombine.high %v494_v4, %v506_v7  ;;  %v20082_v12 = vld [vmem:[#allocation8 + $0xc04] ss:$24 sps:$4 sm:$0xff]   ;;  %v17682_v17 = vcombine.low %v494_v4, %v506_v7  ;;  %v20097_v7 = vld [vmem:[#allocation8 + $0xcf4] ss:$24 sps:$4 sm:$0xff]  }
 0x44e   :  { %15856 = vmatprep.subr.bf16.mxu0 %v20067_v18  ;;  %v518_v14 = vld [vmem:[#allocation5 + $0xcf8] sm:$0xff] }
 0x44f   :  { %v530_v16 = vld [vmem:[#allocation5 + $0xd58] sm:$0xff] }
 0x450   :  { %8067 = vmatpush1.bf16.msra.mxu1 %v17562_v27  ;;  %v20080_v18 = vld [vmem:[#allocation8 + $0xc00] ss:$24 sps:$4 sm:$0xff]   ;;  %v17707_v19 = vcombine.high %v518_v14, %v530_v16  ;;  %v20088_v35 = vld [vmem:[#allocation8 + $0xc64] ss:$24 sps:$4 sm:$0xff]  }
 0x451   :  { %15857 = vmatpush1.bf16.msra.mxu0 %v20065_v26  ;;  %8068 = vmatprep.subr.bf16.mxu1 %v17587_v31  ;;  %v542_v27 = vld [vmem:[#allocation5 + $0xdb8] sm:$0xff]  ;;  %v17706_v31 = vcombine.low %v518_v14, %v530_v16 }
 0x452   :  { %15858 = vmatprep.subr.bf16.mxu0 %v20070_v32  ;;  %v554_v26 = vld [vmem:[#allocation5 + $0xe18] sm:$0xff]  ;;  %v20083_v32 = vld [vmem:[#allocation8 + $0xc30] ss:$24 sps:$4 sm:$0xff]  }
 0x453   :  { %v17731_v34 = vcombine.high %v542_v27, %v554_v26  ;;  %v20094_v52 = vld [vmem:[#allocation8 + $0xcc4] ss:$24 sps:$4 sm:$0xff]  }
 0x454   :  { %8069 = vmatpush1.bf16.msra.mxu1 %v17586_v36  ;;  %v566_v36 = vld [vmem:[#allocation5 + $0xe78] sm:$0xff] }
 0x455   :  { %15859 = vmatpush1.bf16.msra.mxu0 %v20068_v40  ;;  %8070 = vmatprep.subr.bf16.mxu1 %v17611_v42  ;;  %v578_v40 = vld [vmem:[#allocation5 + $0xed8] sm:$0xff]  ;;  %v17730_v42 = vcombine.low %v542_v27, %v554_v26  ;;  %v20103_v26 = vld [vmem:[#allocation8 + $0xd54] ss:$24 sps:$4 sm:$0xff]  }
 0x456   :  { %15860 = vmatprep.subr.bf16.mxu0 %v20073_v43  ;;  %v20086_v43 = vld [vmem:[#allocation8 + $0xc60] ss:$24 sps:$4 sm:$0xff]   ;;  %v17755_v41 = vcombine.high %v566_v36, %v578_v40  ;;  %v20100_v16 = vld [vmem:[#allocation8 + $0xd24] ss:$24 sps:$4 sm:$0xff]  }
 0x458   :  { %8071 = vmatpush1.bf16.msra.mxu1 %v17610_v49  ;;  %v590_v49 = vld [vmem:[#allocation5 + $0xf38] sm:$0xff] }
 0x459   :  { %15861 = vmatpush1.bf16.msra.mxu0 %v20071_v45  ;;  %8072 = vmatprep.subr.bf16.mxu1 %v17635_v53  ;;  %v602_v45 = vld [vmem:[#allocation5 + $0xf98] sm:$0xff]  ;;  %v17754_v53 = vcombine.low %v566_v36, %v578_v40 }
 0x45a   :  { %15862 = vmatprep.subr.bf16.mxu0 %v20076_v54  ;;  %v20089_v54 = vld [vmem:[#allocation8 + $0xc90] ss:$24 sps:$4 sm:$0xff]   ;;  %v17779_v51 = vcombine.high %v590_v49, %v602_v45  ;;  %v20106_v40 = vld [vmem:[#allocation8 + $0xd84] ss:$24 sps:$4 sm:$0xff]  }
 0x45c   :  { %8073 = vmatpush1.bf16.msra.mxu1 %v17634_v57  ;;  %v614_v57 = vld [vmem:[#allocation5 + $0xff8] sm:$0xff] }
 0x45d   :  { %15863 = vmatpush1.bf16.msra.mxu0 %v20074_v60  ;;  %8074 = vmatprep.subr.bf16.mxu1 %v17659_v62  ;;  %v626_v60 = vld [vmem:[#allocation5 + $0x1058] sm:$0xff]  ;;  %v17778_v62 = vcombine.low %v590_v49, %v602_v45  ;;  %v20109_v45 = vld [vmem:[#allocation8 + $0xdb4] ss:$24 sps:$4 sm:$0xff]  }
 0x45e   :  { %15864 = vmatprep.subr.bf16.mxu0 %v20079_v0  ;;  %v20092_v0 = vld [vmem:[#allocation8 + $0xcc0] ss:$24 sps:$4 sm:$0xff]   ;;  %v17803_v4 = vcombine.high %v614_v57, %v626_v60 }
 0x460   :  { %8075 = vmatpush1.bf16.msra.mxu1 %v17658_v8  ;;  %v638_v8 = vld [vmem:[#allocation5 + $0x10b8] sm:$0xff] }
 0x461   :  { %15865 = vmatpush1.bf16.msra.mxu0 %v20077_v9  ;;  %8087 = vmatprep.subr.bf16.mxu1 %v17683_v10  ;;  %v650_v9 = vld [vmem:[#allocation5 + $0x1118] sm:$0xff]  ;;  %v17802_v10 = vcombine.low %v614_v57, %v626_v60 }
 0x462   :  { %15877 = vmatprep.subr.bf16.mxu0 %v20082_v12  ;;  %v20095_v12 = vld [vmem:[#allocation8 + $0xcf0] ss:$24 sps:$4 sm:$0xff]   ;;  %v17827_v14 = vcombine.high %v638_v8, %v650_v9  ;;  %v20112_v60 = vld [vmem:[#allocation8 + $0xde4] ss:$24 sps:$4 sm:$0xff]  }
 0x463   :  { %8077 = vmatmul.mubr.bf16.vlgmr.msra.gmra.mrb[20].mxu1 %v21873_v15 }
 0x464   :  { %15867 = vmatmul.mubr.bf16.vlgmr.msra.gmra.mrb[16].mxu0 %v22008_v48  ;;  %8088 = vmatpush1.bf16.msra.mxu1 %v17682_v17  ;;  %v662_v17 = vld [vmem:[#allocation5 + $0x1178] sm:$0xff] }
 0x465   :  { %15878 = vmatpush1.bf16.msra.mxu0 %v20080_v18  ;;  %15909 = vmatprep.mubr.bf16.mxu0 %v21925_v6  ;;  %v674_v18 = vld [vmem:[#allocation5 + $0x11d8] sm:$0xff] }
 0x466   :  { %8089 = vmatprep.subr.bf16.mxu1 %v17707_v19  ;;  %15879 = vmatprep.subr.bf16.mxu0 %v20085_v20  ;;  %v17826_v19 = vcombine.low %v638_v8, %v650_v9  ;;  %v20098_v20 = vld [vmem:[#allocation8 + $0xd20] ss:$24 sps:$4 sm:$0xff]   ;;  %v17851_v27 = vcombine.high %v662_v17, %v674_v18  ;;  %v20115_v9 = vld [vmem:[#allocation8 + $0xe14] ss:$24 sps:$4 sm:$0xff]  }
 0x467   :  { %8119 = vmatprep.mubr.bf16.mxu1 %v21875_v25 }
 0x468   :  { %8090 = vmatpush1.bf16.msra.mxu1 %v17706_v31  ;;  %v686_v31 = vld [vmem:[#allocation5 + $0x1238] sm:$0xff] }
 0x469   :  { %15880 = vmatpush1.bf16.msra.mxu0 %v20083_v32  ;;  %8091 = vmatprep.subr.bf16.mxu1 %v17731_v34  ;;  %v698_v32 = vld [vmem:[#allocation5 + $0x1298] sm:$0xff]  ;;  %v17850_v34 = vcombine.low %v662_v17, %v674_v18 }
 0x46a   :  { %15881 = vmatprep.subr.bf16.mxu0 %v20088_v35  ;;  %v20101_v35 = vld [vmem:[#allocation8 + $0xd50] ss:$24 sps:$4 sm:$0xff]   ;;  %v17875_v36 = vcombine.high %v686_v31, %v698_v32  ;;  %v20118_v18 = vld [vmem:[#allocation8 + $0xe44] ss:$24 sps:$4 sm:$0xff]  }
 0x46c   :  { %8092 = vmatpush1.bf16.msra.mxu1 %v17730_v42  ;;  %v710_v42 = vld [vmem:[#allocation5 + $0x12f8] sm:$0xff] }
 0x46d   :  { %15882 = vmatpush1.bf16.msra.mxu0 %v20086_v43  ;;  %8093 = vmatprep.subr.bf16.mxu1 %v17755_v41  ;;  %v722_v43 = vld [vmem:[#allocation5 + $0x1358] sm:$0xff]  ;;  %v17874_v41 = vcombine.low %v686_v31, %v698_v32  ;;  %v20121_v32 = vld [vmem:[#allocation8 + $0xe74] ss:$24 sps:$4 sm:$0xff]  }
 0x46e   :  { %15883 = vmatprep.subr.bf16.mxu0 %v20091_v46  ;;  %v20104_v46 = vld [vmem:[#allocation8 + $0xd80] ss:$24 sps:$4 sm:$0xff]   ;;  %v17899_v49 = vcombine.high %v710_v42, %v722_v43 }
 0x470   :  { %8094 = vmatpush1.bf16.msra.mxu1 %v17754_v53  ;;  %v734_v53 = vld [vmem:[#allocation5 + $0x13b8] sm:$0xff] }
 0x471   :  { %15884 = vmatpush1.bf16.msra.mxu0 %v20089_v54  ;;  %8095 = vmatprep.subr.bf16.mxu1 %v17779_v51  ;;  %v746_v54 = vld [vmem:[#allocation5 + $0x1418] sm:$0xff]  ;;  %v17898_v51 = vcombine.low %v710_v42, %v722_v43 }
 0x472   :  { %15885 = vmatprep.subr.bf16.mxu0 %v20094_v52  ;;  %v20107_v52 = vld [vmem:[#allocation8 + $0xdb0] ss:$24 sps:$4 sm:$0xff]   ;;  %v17923_v57 = vcombine.high %v734_v53, %v746_v54  ;;  %v20124_v43 = vld [vmem:[#allocation8 + $0xea4] ss:$24 sps:$4 sm:$0xff]  }
 0x474   :  { %8096 = vmatpush1.bf16.msra.mxu1 %v17778_v62  ;;  %v758_v62 = vld [vmem:[#allocation5 + $0x1478] sm:$0xff] }
 0x475   :  { %15886 = vmatpush1.bf16.msra.mxu0 %v20092_v0  ;;  %8097 = vmatprep.subr.bf16.mxu1 %v17803_v4  ;;  %v770_v0 = vld [vmem:[#allocation5 + $0x14d8] sm:$0xff]  ;;  %v17922_v4 = vcombine.low %v734_v53, %v746_v54  ;;  %v20127_v54 = vld [vmem:[#allocation8 + $0xed4] ss:$24 sps:$4 sm:$0xff]  }
 0x476   :  { %15887 = vmatprep.subr.bf16.mxu0 %v20097_v7  ;;  %v20110_v7 = vld [vmem:[#allocation8 + $0xde0] ss:$24 sps:$4 sm:$0xff]   ;;  %v17947_v8 = vcombine.high %v758_v62, %v770_v0 }
 0x478   :  { %8098 = vmatpush1.bf16.msra.mxu1 %v17802_v10  ;;  %v782_v10 = vld [vmem:[#allocation5 + $0x1538] sm:$0xff] }
 0x479   :  { %15888 = vmatpush1.bf16.msra.mxu0 %v20095_v12  ;;  %8099 = vmatprep.subr.bf16.mxu1 %v17827_v14  ;;  %v794_v12 = vld [vmem:[#allocation5 + $0x1598] sm:$0xff]  ;;  %v17946_v14 = vcombine.low %v758_v62, %v770_v0 }
 0x47a   :  { %15889 = vmatprep.subr.bf16.mxu0 %v20100_v16  ;;  %v20113_v16 = vld [vmem:[#allocation8 + $0xe10] ss:$24 sps:$4 sm:$0xff]   ;;  %v17971_v17 = vcombine.high %v782_v10, %v794_v12  ;;  %v902_v0 = vld [vmem:[#allocation5 + $0x18f8] sm:$0xff] }
 0x47c   :  { %8100 = vmatpush1.bf16.msra.mxu1 %v17826_v19  ;;  %v806_v19 = vld [vmem:[#allocation5 + $0x15f8] sm:$0xff] }
 0x47d   :  { %15890 = vmatpush1.bf16.msra.mxu0 %v20098_v20  ;;  %8101 = vmatprep.subr.bf16.mxu1 %v17851_v27  ;;  %v818_v20 = vld [vmem:[#allocation5 + $0x1658] sm:$0xff]  ;;  %v17970_v27 = vcombine.low %v782_v10, %v794_v12 }
 0x47e   :  { %15891 = vmatprep.subr.bf16.mxu0 %v20103_v26  ;;  %v20116_v26 = vld [vmem:[#allocation8 + $0xe40] ss:$24 sps:$4 sm:$0xff]   ;;  %v17995_v31 = vcombine.high %v806_v19, %v818_v20 }
 0x47f   :  { %v20128_v10 = vld [vmem:[#allocation8 + $0xf00] ss:$24 sps:$4 sm:$0xff]  }
 0x480   :  { %8102 = vmatpush1.bf16.msra.mxu1 %v17850_v34  ;;  %v830_v34 = vld [vmem:[#allocation5 + $0x16b8] sm:$0xff] }
 0x481   :  { %15892 = vmatpush1.bf16.msra.mxu0 %v20101_v35  ;;  %8103 = vmatprep.subr.bf16.mxu1 %v17875_v36  ;;  %v842_v35 = vld [vmem:[#allocation5 + $0x1718] sm:$0xff]  ;;  %v17994_v36 = vcombine.low %v806_v19, %v818_v20  ;;  %v20131_v19 = vld [vmem:[#allocation8 + $0xf30] ss:$24 sps:$4 sm:$0xff]  }
 0x482   :  { %15893 = vmatprep.subr.bf16.mxu0 %v20106_v40  ;;  %v20119_v40 = vld [vmem:[#allocation8 + $0xe70] ss:$24 sps:$4 sm:$0xff]   ;;  %v18019_v42 = vcombine.high %v830_v34, %v842_v35  ;;  %v926_v12 = vld [vmem:[#allocation5 + $0x19b8] sm:$0xff] }
 0x483   :  { %v950_v20 = vld [vmem:[#allocation5 + $0x1a78] sm:$0xff] }
 0x484   :  { %8104 = vmatpush1.bf16.msra.mxu1 %v17874_v41  ;;  %v854_v41 = vld [vmem:[#allocation5 + $0x1778] sm:$0xff] }
 0x485   :  { %15894 = vmatpush1.bf16.msra.mxu0 %v20104_v46  ;;  %8105 = vmatprep.subr.bf16.mxu1 %v17899_v49  ;;  %v866_v46 = vld [vmem:[#allocation5 + $0x17d8] sm:$0xff]  ;;  %v18018_v49 = vcombine.low %v830_v34, %v842_v35 }
 0x486   :  { %15895 = vmatprep.subr.bf16.mxu0 %v20109_v45  ;;  %v20122_v45 = vld [vmem:[#allocation8 + $0xea0] ss:$24 sps:$4 sm:$0xff]   ;;  %v18043_v53 = vcombine.high %v854_v41, %v866_v46 }
 0x487   :  { %v20134_v34 = vld [vmem:[#allocation8 + $0xf60] ss:$24 sps:$4 sm:$0xff]  }
 0x488   :  { %8106 = vmatpush1.bf16.msra.mxu1 %v17898_v51  ;;  %v878_v51 = vld [vmem:[#allocation5 + $0x1838] sm:$0xff] }
 0x489   :  { %15896 = vmatpush1.bf16.msra.mxu0 %v20107_v52  ;;  %8107 = vmatprep.subr.bf16.mxu1 %v17923_v57  ;;  %v890_v52 = vld [vmem:[#allocation5 + $0x1898] sm:$0xff]  ;;  %v18042_v57 = vcombine.low %v854_v41, %v866_v46  ;;  %v20137_v41 = vld [vmem:[#allocation8 + $0xf90] ss:$24 sps:$4 sm:$0xff]  }
 0x48a   :  { %15897 = vmatprep.subr.bf16.mxu0 %v20112_v60  ;;  %v20125_v60 = vld [vmem:[#allocation8 + $0xed0] ss:$24 sps:$4 sm:$0xff]   ;;  %v18067_v62 = vcombine.high %v878_v51, %v890_v52  ;;  %v974_v35 = vld [vmem:[#allocation5 + $0x1b38] sm:$0xff] }
 0x48b   :  { %v998_v46 = vld [vmem:[#allocation5 + $0x1bf8] sm:$0xff] }
 0x48c   :  { %8108 = vmatpush1.bf16.msra.mxu1 %v17922_v4  ;;  %v914_v4 = vld [vmem:[#allocation5 + $0x1958] sm:$0xff] }
 0x48d   :  { %15898 = vmatpush1.bf16.msra.mxu0 %v20110_v7  ;;  %8109 = vmatprep.subr.bf16.mxu1 %v17947_v8  ;;  %v20130_v7 = vld [vmem:[#allocation8 + $0xf04] ss:$24 sps:$4 sm:$0xff]   ;;  %v18066_v8 = vcombine.low %v878_v51, %v890_v52  ;;  %v20140_v51 = vld [vmem:[#allocation8 + $0xfc0] ss:$24 sps:$4 sm:$0xff]  }
 0x48e   :  { %15899 = vmatprep.subr.bf16.mxu0 %v20115_v9  ;;  %v18091_v9 = vcombine.high %v902_v0, %v914_v4  ;;  %v1022_v52 = vld [vmem:[#allocation5 + $0x1cb8] sm:$0xff] }
 0x490   :  { %8110 = vmatpush1.bf16.msra.mxu1 %v17946_v14  ;;  %v938_v14 = vld [vmem:[#allocation5 + $0x1a18] sm:$0xff] }
 0x491   :  { %15900 = vmatpush1.bf16.msra.mxu0 %v20113_v16  ;;  %8111 = vmatprep.subr.bf16.mxu1 %v17971_v17  ;;  %v20133_v16 = vld [vmem:[#allocation8 + $0xf34] ss:$24 sps:$4 sm:$0xff]   ;;  %v18090_v17 = vcombine.low %v902_v0, %v914_v4  ;;  %v20143_v4 = vld [vmem:[#allocation8 + $0xff0] ss:$24 sps:$4 sm:$0xff]  }
 0x492   :  { %15901 = vmatprep.subr.bf16.mxu0 %v20118_v18  ;;  %v18115_v18 = vcombine.high %v926_v12, %v938_v14 }
 0x494   :  { %8112 = vmatpush1.bf16.msra.mxu1 %v17970_v27  ;;  %v962_v27 = vld [vmem:[#allocation5 + $0x1ad8] sm:$0xff] }
 0x495   :  { %15902 = vmatpush1.bf16.msra.mxu0 %v20116_v26  ;;  %8113 = vmatprep.subr.bf16.mxu1 %v17995_v31  ;;  %v20136_v26 = vld [vmem:[#allocation8 + $0xf64] ss:$24 sps:$4 sm:$0xff]   ;;  %v18114_v31 = vcombine.low %v926_v12, %v938_v14  ;;  %v20146_v14 = vld [vmem:[#allocation8 + $0x1020] ss:$24 sps:$4 sm:$0xff]  }
 0x496   :  { %15903 = vmatprep.subr.bf16.mxu0 %v20121_v32  ;;  %v18139_v32 = vcombine.high %v950_v20, %v962_v27 }
 0x498   :  { %8114 = vmatpush1.bf16.msra.mxu1 %v17994_v36  ;;  %v986_v36 = vld [vmem:[#allocation5 + $0x1b98] sm:$0xff] }
 0x499   :  { %15904 = vmatpush1.bf16.msra.mxu0 %v20119_v40  ;;  %8115 = vmatprep.subr.bf16.mxu1 %v18019_v42  ;;  %v20139_v40 = vld [vmem:[#allocation8 + $0xf94] ss:$24 sps:$4 sm:$0xff]   ;;  %v18138_v42 = vcombine.low %v950_v20, %v962_v27  ;;  %v20149_v27 = vld [vmem:[#allocation8 + $0x1050] ss:$24 sps:$4 sm:$0xff]  }
 0x49a   :  { %15905 = vmatprep.subr.bf16.mxu0 %v20124_v43  ;;  %v18163_v43 = vcombine.high %v974_v35, %v986_v36 }
 0x49c   :  { %8116 = vmatpush1.bf16.msra.mxu1 %v18018_v49  ;;  %v1010_v49 = vld [vmem:[#allocation5 + $0x1c58] sm:$0xff] }
 0x49d   :  { %15906 = vmatpush1.bf16.msra.mxu0 %v20122_v45  ;;  %8117 = vmatprep.subr.bf16.mxu1 %v18043_v53  ;;  %v20142_v45 = vld [vmem:[#allocation8 + $0xfc4] ss:$24 sps:$4 sm:$0xff]   ;;  %v18162_v53 = vcombine.low %v974_v35, %v986_v36  ;;  %v20152_v36 = vld [vmem:[#allocation8 + $0x1080] ss:$24 sps:$4 sm:$0xff]  }
 0x49e   :  { %15907 = vmatprep.subr.bf16.mxu0 %v20127_v54  ;;  %v18187_v54 = vcombine.high %v998_v46, %v1010_v49 }
 0x4a0   :  { %8118 = vmatpush1.bf16.msra.mxu1 %v18042_v57  ;;  %v1034_v57 = vld [vmem:[#allocation5 + $0x1d18] sm:$0xff] }
 0x4a1   :  { %15908 = vmatpush1.bf16.msra.mxu0 %v20125_v60  ;;  %8130 = vmatprep.subr.bf16.mxu1 %v18067_v62  ;;  %v20145_v60 = vld [vmem:[#allocation8 + $0xff4] ss:$24 sps:$4 sm:$0xff]   ;;  %v18186_v62 = vcombine.low %v998_v46, %v1010_v49  ;;  %v18211_v0 = vcombine.high %v1022_v52, %v1034_v57  ;;  %v20155_v49 = vld [vmem:[#allocation8 + $0x10b0] ss:$24 sps:$4 sm:$0xff]  }
 0x4a2   :  { %15920 = vmatprep.subr.bf16.mxu0 %v20130_v7  ;;  %v1046_v7 = vld [vmem:[#allocation5 + $0x1d78] sm:$0xff] }
 0x4a3   :  { %8120 = vmatmul.mubr.bf16.vlgmr.msra.gmra.mrb[20].mxu1 %v21881_v30 }
 0x4a4   :  { %15910 = vmatmul.mubr.bf16.vlgmr.msra.gmra.mrb[16].mxu0 %v21923_v5  ;;  %8131 = vmatpush1.bf16.msra.mxu1 %v18066_v8  ;;  %v1058_v8 = vld [vmem:[#allocation5 + $0x1dd8] sm:$0xff] }
 0x4a5   :  { %8132 = vmatprep.subr.bf16.mxu1 %v18091_v9  ;;  %15921 = vmatpush1.bf16.msra.mxu0 %v20128_v10  ;;  %v20148_v9 = vld [vmem:[#allocation8 + $0x1024] ss:$24 sps:$4 sm:$0xff]   ;;  %v18210_v10 = vcombine.low %v1022_v52, %v1034_v57  ;;  %v18235_v12 = vcombine.high %v1046_v7, %v1058_v8  ;;  %v20158_v57 = vld [vmem:[#allocation8 + $0x10e0] ss:$24 sps:$4 sm:$0xff]  }
 0x4a6   :  { %15922 = vmatprep.subr.bf16.mxu0 %v20133_v16  ;;  %8162 = vmatprep.mubr.bf16.mxu1 %v21883_v39  ;;  %v1070_v16 = vld [vmem:[#allocation5 + $0x1e38] sm:$0xff] }
 0x4a8   :  { %8133 = vmatpush1.bf16.msra.mxu1 %v18090_v17  ;;  %v1082_v17 = vld [vmem:[#allocation5 + $0x1e98] sm:$0xff] }
 0x4a9   :  { %8134 = vmatprep.subr.bf16.mxu1 %v18115_v18  ;;  %15923 = vmatpush1.bf16.msra.mxu0 %v20131_v19  ;;  %v20151_v18 = vld [vmem:[#allocation8 + $0x1054] ss:$24 sps:$4 sm:$0xff]   ;;  %v18234_v19 = vcombine.low %v1046_v7, %v1058_v8  ;;  %v18259_v20 = vcombine.high %v1070_v16, %v1082_v17  ;;  %v20161_v8 = vld [vmem:[#allocation8 + $0x1110] ss:$24 sps:$4 sm:$0xff]  }
 0x4aa   :  { %15924 = vmatprep.subr.bf16.mxu0 %v20136_v26  ;;  %v1094_v26 = vld [vmem:[#allocation5 + $0x1ef8] sm:$0xff] }
 0x4ac   :  { %8135 = vmatpush1.bf16.msra.mxu1 %v18114_v31  ;;  %v1106_v31 = vld [vmem:[#allocation5 + $0x1f58] sm:$0xff] }
 0x4ad   :  { %8136 = vmatprep.subr.bf16.mxu1 %v18139_v32  ;;  %15925 = vmatpush1.bf16.msra.mxu0 %v20134_v34  ;;  %v20154_v32 = vld [vmem:[#allocation8 + $0x1084] ss:$24 sps:$4 sm:$0xff]   ;;  %v18258_v34 = vcombine.low %v1070_v16, %v1082_v17  ;;  %v18283_v35 = vcombine.high %v1094_v26, %v1106_v31  ;;  %v20164_v17 = vld [vmem:[#allocation8 + $0x1140] ss:$24 sps:$4 sm:$0xff]  }
 0x4ae   :  { %15926 = vmatprep.subr.bf16.mxu0 %v20139_v40  ;;  %v1118_v40 = vld [vmem:[#allocation5 + $0x1fb8] sm:$0xff] }
 0x4b0   :  { %8137 = vmatpush1.bf16.msra.mxu1 %v18138_v42  ;;  %v1130_v42 = vld [vmem:[#allocation5 + $0x2018] sm:$0xff] }
 0x4b1   :  { %8138 = vmatprep.subr.bf16.mxu1 %v18163_v43  ;;  %15927 = vmatpush1.bf16.msra.mxu0 %v20137_v41  ;;  %v20157_v43 = vld [vmem:[#allocation8 + $0x10b4] ss:$24 sps:$4 sm:$0xff]   ;;  %v18282_v41 = vcombine.low %v1094_v26, %v1106_v31  ;;  %v18307_v46 = vcombine.high %v1118_v40, %v1130_v42  ;;  %v20167_v31 = vld [vmem:[#allocation8 + $0x1170] ss:$24 sps:$4 sm:$0xff]  }
 0x4b2   :  { %15928 = vmatprep.subr.bf16.mxu0 %v20142_v45  ;;  %v1142_v45 = vld [vmem:[#allocation5 + $0x2078] sm:$0xff] }
 0x4b4   :  { %8139 = vmatpush1.bf16.msra.mxu1 %v18162_v53  ;;  %v1154_v53 = vld [vmem:[#allocation5 + $0x20d8] sm:$0xff] }
 0x4b5   :  { %8140 = vmatprep.subr.bf16.mxu1 %v18187_v54  ;;  %15929 = vmatpush1.bf16.msra.mxu0 %v20140_v51  ;;  %v20160_v54 = vld [vmem:[#allocation8 + $0x10e4] ss:$24 sps:$4 sm:$0xff]   ;;  %v18306_v51 = vcombine.low %v1118_v40, %v1130_v42  ;;  %v18331_v52 = vcombine.high %v1142_v45, %v1154_v53  ;;  %v20170_v42 = vld [vmem:[#allocation8 + $0x11a0] ss:$24 sps:$4 sm:$0xff]  }
 0x4b6   :  { %15930 = vmatprep.subr.bf16.mxu0 %v20145_v60  ;;  %v1166_v60 = vld [vmem:[#allocation5 + $0x2138] sm:$0xff] }
 0x4b8   :  { %8141 = vmatpush1.bf16.msra.mxu1 %v18186_v62  ;;  %v1178_v62 = vld [vmem:[#allocation5 + $0x2198] sm:$0xff] }
 0x4b9   :  { %8142 = vmatprep.subr.bf16.mxu1 %v18211_v0  ;;  %15931 = vmatpush1.bf16.msra.mxu0 %v20143_v4  ;;  %v20163_v0 = vld [vmem:[#allocation8 + $0x1114] ss:$24 sps:$4 sm:$0xff]   ;;  %v18330_v4 = vcombine.low %v1142_v45, %v1154_v53  ;;  %v18355_v7 = vcombine.high %v1166_v60, %v1178_v62  ;;  %v20173_v53 = vld [vmem:[#allocation8 + $0x11d0] ss:$24 sps:$4 sm:$0xff]  }
 0x4ba   :  { %15932 = vmatprep.subr.bf16.mxu0 %v20148_v9  ;;  %v1190_v9 = vld [vmem:[#allocation5 + $0x21f8] sm:$0xff] }
 0x4bc   :  { %8143 = vmatpush1.bf16.msra.mxu1 %v18210_v10  ;;  %v1202_v10 = vld [vmem:[#allocation5 + $0x2258] sm:$0xff] }
 0x4bd   :  { %8144 = vmatprep.subr.bf16.mxu1 %v18235_v12  ;;  %15933 = vmatpush1.bf16.msra.mxu0 %v20146_v14  ;;  %v20166_v12 = vld [vmem:[#allocation8 + $0x1144] ss:$24 sps:$4 sm:$0xff]   ;;  %v18354_v14 = vcombine.low %v1166_v60, %v1178_v62  ;;  %v18379_v16 = vcombine.high %v1190_v9, %v1202_v10  ;;  %v160_v62 = vld [vmem:[#allocation5 + $0x1c8] sm:$0xff] }
 0x4be   :  { %15934 = vmatprep.subr.bf16.mxu0 %v20151_v18  ;;  %v1214_v18 = vld [vmem:[#allocation5 + $0x22b8] sm:$0xff] }
 0x4c0   :  { %8145 = vmatpush1.bf16.msra.mxu1 %v18234_v19  ;;  %v1226_v19 = vld [vmem:[#allocation5 + $0x2318] sm:$0xff] }
 0x4c1   :  { %8146 = vmatprep.subr.bf16.mxu1 %v18259_v20  ;;  %15935 = vmatpush1.bf16.msra.mxu0 %v20149_v27  ;;  %v20169_v20 = vld [vmem:[#allocation8 + $0x1174] ss:$24 sps:$4 sm:$0xff]   ;;  %v18378_v27 = vcombine.low %v1190_v9, %v1202_v10  ;;  %v18403_v26 = vcombine.high %v1214_v18, %v1226_v19 }
 0x4c2   :  { %15936 = vmatprep.subr.bf16.mxu0 %v20154_v32  ;;  %v1238_v32 = vld [vmem:[#allocation5 + $0x2378] sm:$0xff]  ;;  %v196_v9 = vld [vmem:[#allocation5 + $0x2e8] sm:$0xff] }
 0x4c4   :  { %8147 = vmatpush1.bf16.msra.mxu1 %v18258_v34  ;;  %v1250_v34 = vld [vmem:[#allocation5 + $0x23d8] sm:$0xff] }
 0x4c5   :  { %8148 = vmatprep.subr.bf16.mxu1 %v18283_v35  ;;  %15937 = vmatpush1.bf16.msra.mxu0 %v20152_v36  ;;  %v20172_v35 = vld [vmem:[#allocation8 + $0x11a4] ss:$24 sps:$4 sm:$0xff]   ;;  %v18402_v36 = vcombine.low %v1214_v18, %v1226_v19  ;;  %v18427_v40 = vcombine.high %v1238_v32, %v1250_v34  ;;  %v232_v19 = vld [vmem:[#allocation5 + $0x408] sm:$0xff] }
 0x4c6   :  { %15938 = vmatprep.subr.bf16.mxu0 %v20157_v43  ;;  %v112_v43 = vld [vmem:[#allocation5 + $0x48] sm:$0xff] }
 0x4c8   :  { %8149 = vmatpush1.bf16.msra.mxu1 %v18282_v41  ;;  %v124_v41 = vld [vmem:[#allocation5 + $0xa8] sm:$0xff] }
 0x4c9   :  { %8150 = vmatprep.subr.bf16.mxu1 %v18307_v46  ;;  %15939 = vmatpush1.bf16.msra.mxu0 %v20155_v49  ;;  %v20175_v46 = vld [vmem:[#allocation8 + $0x11d4] ss:$24 sps:$4 sm:$0xff]   ;;  %v18426_v49 = vcombine.low %v1238_v32, %v1250_v34  ;;  %v17303_v45 = vcombine.high %v112_v43, %v124_v41 }
 0x4ca   :  { %15940 = vmatprep.subr.bf16.mxu0 %v20160_v54  ;;  %v136_v54 = vld [vmem:[#allocation5 + $0x108] sm:$0xff] }
 0x4cb   :  { %v268_v32 = vld [vmem:[#allocation5 + $0x528] sm:$0xff] }
 0x4cc   :  { %8151 = vmatpush1.bf16.msra.mxu1 %v18306_v51  ;;  %v148_v51 = vld [vmem:[#allocation5 + $0x168] sm:$0xff] }
 0x4cd   :  { %8152 = vmatprep.subr.bf16.mxu1 %v18331_v52  ;;  %15941 = vmatpush1.bf16.msra.mxu0 %v20158_v57  ;;  %v20178_v52 = vld [vmem:[#allocation8 + $0x1204] ss:$24 sps:$4 sm:$0xff]   ;;  %v17302_v57 = vcombine.low %v112_v43, %v124_v41  ;;  %v17327_v60 = vcombine.high %v136_v54, %v148_v51  ;;  %v22026_v34 = vld [vmem:[#allocation7 + $0x8] sm:$0xff] }
 0x4ce   :  { %15942 = vmatprep.subr.bf16.mxu0 %v20163_v0  ;;  %v172_v0 = vld [vmem:[#allocation5 + $0x228] sm:$0xff] }
 0x4cf   :  { %v17350_v10 = vcombine.low %v160_v62, %v172_v0  ;;  %v280_v41 = vld [vmem:[#allocation5 + $0x588] sm:$0xff] }
 0x4d0   :  { %8153 = vmatpush1.bf16.msra.mxu1 %v18330_v4  ;;  %v17326_v4 = vcombine.low %v136_v54, %v148_v51 }
 0x4d1   :  { %8154 = vmatprep.subr.bf16.mxu1 %v18355_v7  ;;  %15943 = vmatpush1.bf16.msra.mxu0 %v20161_v8  ;;  %v17351_v7 = vcombine.high %v160_v62, %v172_v0  ;;  %v184_v8 = vld [vmem:[#allocation5 + $0x288] sm:$0xff] }
 0x4d2   :  { %15944 = vmatprep.subr.bf16.mxu0 %v20166_v12  ;;  %v17375_v12 = vcombine.high %v184_v8, %v196_v9  ;;  %v304_v0 = vld [vmem:[#allocation5 + $0x648] sm:$0xff] }
 0x4d4   :  { %8155 = vmatpush1.bf16.msra.mxu1 %v18354_v14  ;;  %v208_v14 = vld [vmem:[#allocation5 + $0x348] sm:$0xff] }
 0x4d5   :  { %8156 = vmatprep.subr.bf16.mxu1 %v18379_v16  ;;  %15945 = vmatpush1.bf16.msra.mxu0 %v20164_v17  ;;  %v220_v16 = vld [vmem:[#allocation5 + $0x3a8] sm:$0xff]  ;;  %v17374_v17 = vcombine.low %v184_v8, %v196_v9 }
 0x4d6   :  { %15946 = vmatprep.subr.bf16.mxu0 %v20169_v20  ;;  %v17399_v18 = vcombine.high %v208_v14, %v220_v16  ;;  %v244_v20 = vld [vmem:[#allocation5 + $0x468] sm:$0xff] }
 0x4d8   :  { %8157 = vmatpush1.bf16.msra.mxu1 %v18378_v27  ;;  %v17398_v27 = vcombine.low %v208_v14, %v220_v16 }
 0x4d9   :  { %8158 = vmatprep.subr.bf16.mxu1 %v18403_v26  ;;  %15947 = vmatpush1.bf16.msra.mxu0 %v20167_v31  ;;  %v17423_v26 = vcombine.high %v232_v19, %v244_v20  ;;  %v256_v31 = vld [vmem:[#allocation5 + $0x4c8] sm:$0xff] }
 0x4da   :  { %15948 = vmatprep.subr.bf16.mxu0 %v20172_v35  ;;  %v1304_v35 = vrot.slane %v22026_v34, %v21940_v63  ;;  %v17446_v51 = vcombine.low %v256_v31, %v268_v32 }
 0x4dc   :  { %8159 = vmatpush1.bf16.msra.mxu1 %v18402_v36  ;;  %v1308_v36 = vrot.slane %v22026_v34, %v21943_v1 }
 0x4dd   :  { %8160 = vmatprep.subr.bf16.mxu1 %v18427_v40  ;;  %15949 = vmatpush1.bf16.msra.mxu0 %v20170_v42  ;;  %v17422_v40 = vcombine.low %v232_v19, %v244_v20  ;;  %v17447_v42 = vcombine.high %v256_v31, %v268_v32  ;;  %v328_v19 = vld [vmem:[#allocation5 + $0x708] sm:$0xff] }
 0x4de   :  { %15950 = vmatprep.subr.bf16.mxu0 %v20175_v46  ;;  %v292_v46 = vld [vmem:[#allocation5 + $0x5e8] sm:$0xff] }
 0x4df   :  { %v340_v20 = vld [vmem:[#allocation5 + $0x768] sm:$0xff] }
 0x4e0   :  { %8161 = vmatpush1.bf16.msra.mxu1 %v18426_v49  ;;  %v17519_v31 = vcombine.high %v328_v19, %v340_v20  ;;  %v20179_v32 = vld [vmem:[#allocation8 + $0x1230] ss:$24 sps:$4 sm:$0xff]  }
 0x4e1   :  { %8302 = vmatprep.subr.bf16.mxu1 %v17303_v45  ;;  %15951 = vmatpush1.bf16.msra.mxu0 %v20173_v53 }
 0x4e2   :  { %15963 = vmatprep.subr.bf16.mxu0 %v20178_v52 }
 0x4e3   :  { %8163 = vmatmul.mubr.bf16.vlgmr.msra.gmra.mrb[20].mxu1 %v21889_v44 }
 0x4e4   :  { %8303 = vmatpush1.bf16.msra.mxu1 %v17302_v57  ;;  %8334 = vmatprep.mubr.bf16.mxu1 %v21869_v58 }
 0x4e5   :  { %8304 = vmatprep.subr.bf16.mxu1 %v17327_v60  ;;  %v17471_v60 = vcombine.high %v280_v41, %v292_v46 }
 0x4e8   :  { %8305 = vmatpush1.bf16.msra.mxu1 %v17326_v4  ;;  %v316_v4 = vld [vmem:[#allocation5 + $0x6a8] sm:$0xff] }
 0x4e9   :  { %8306 = vmatprep.subr.bf16.mxu1 %v17351_v7  ;;  %v17495_v16 = vcombine.high %v304_v0, %v316_v4 }
 0x4ec   :  { %8307 = vmatpush1.bf16.msra.mxu1 %v17350_v10 }
 0x4ed   :  { %8308 = vmatprep.subr.bf16.mxu1 %v17375_v12  ;;  %v17470_v12 = vcombine.low %v280_v41, %v292_v46  ;;  %v20182_v41 = vld [vmem:[#allocation8 + $0x1260] ss:$24 sps:$4 sm:$0xff]   ;;  %v376_v46 = vld [vmem:[#allocation5 + $0x888] sm:$0xff] }
 0x4f0   :  { %8309 = vmatpush1.bf16.msra.mxu1 %v17374_v17 }
 0x4f1   :  { %8310 = vmatprep.subr.bf16.mxu1 %v17399_v18  ;;  %v20176_v18 = vld [vmem:[#allocation8 + $0x1200] ss:$24 sps:$4 sm:$0xff]  }
 0x4f4   :  { %8311 = vmatpush1.bf16.msra.mxu1 %v17398_v27  ;;  %v20181_v27 = vld [vmem:[#allocation8 + $0x1234] ss:$24 sps:$4 sm:$0xff]  }
 0x4f5   :  { %8312 = vmatprep.subr.bf16.mxu1 %v17423_v26  ;;  %v17494_v26 = vcombine.low %v304_v0, %v316_v4  ;;  %v20188_v4 = vld [vmem:[#allocation8 + $0x12c0] ss:$24 sps:$4 sm:$0xff]  }
 0x4f6   :  { %v7906_v43 = vpop.f32.mrb[16].mxu1 }
 0x4f7   :  { %v19608_v49 = vadd.f32 %v7906_v43, %v1304_v35  ;;  %v7908_v45 = vpop.f32.mrb[17].mxu1 }
 0x4f8   :  { %v19609_v53 = vadd.f32 %v7908_v45, %v1308_v36  ;;  %v7910_v54 = vpop.f32.mrb[18].mxu1  ;;  %8313 = vmatpush1.bf16.msra.mxu1 %v17422_v40  ;;  %v20184_v40 = vld [vmem:[#allocation8 + $0x1264] ss:$24 sps:$4 sm:$0xff]   ;;  %v20187_v45 = vld [vmem:[#allocation8 + $0x1294] ss:$24 sps:$4 sm:$0xff]  }
 0x4f9   :  { %v19610_v52 = vadd.f32 %v7910_v54, %v1304_v35  ;;  %v7912_v57 = vpop.f32.mrb[19].mxu1  ;;  %8314 = vmatprep.subr.bf16.mxu1 %v17447_v42  ;;  %v8699_v7 = vmax.f32 %v19608_v49, 0.0  ;;  %v352_v35 = vld [vmem:[#allocation5 + $0x7c8] sm:$0xff]  ;;  %v17518_v42 = vcombine.low %v328_v19, %v340_v20  ;;  %v20196_v20 = vld [vmem:[#allocation8 + $0x1324] ss:$24 sps:$4 sm:$0xff]  }
 0x4fa   :  { %v19611_v62 = vadd.f32 %v7912_v57, %v1308_v36  ;;  %v8700_v9 = vmax.f32 %v19609_v53, 0.0  ;;  %v364_v36 = vld [vmem:[#allocation5 + $0x828] sm:$0xff] }
 0x4fb   :  { %v8723_v8 = vmax.f32 %v19610_v52, 0.0  ;;  %v17543_v43 = vcombine.high %v352_v35, %v364_v36  ;;  %v388_v49 = vld [vmem:[#allocation5 + $0x8e8] sm:$0xff]  ;;  %v17542_v53 = vcombine.low %v352_v35, %v364_v36 }
 0x4fc   :  { %v8724_v10 = vmax.f32 %v19611_v62, 0.0  ;;  %8315 = vmatpush1.bf16.msra.mxu1 %v17446_v51  ;;  %v17567_v54 = vcombine.high %v376_v46, %v388_v49  ;;  %v20185_v51 = vld [vmem:[#allocation8 + $0x1290] ss:$24 sps:$4 sm:$0xff]   ;;  %v17566_v62 = vcombine.low %v376_v46, %v388_v49  ;;  %v20199_v36 = vld [vmem:[#allocation8 + $0x1354] ss:$24 sps:$4 sm:$0xff]  }
 0x4fd   :  { %v22032_v14 = vpack.c.bf16 %v8723_v8, %v8699_v7  ;;  %8316 = vmatprep.subr.bf16.mxu1 %v17471_v60  ;;  %v400_v52 = vld [vmem:[#allocation5 + $0x948] sm:$0xff]  ;;  %v20190_v60 = vld [vmem:[#allocation8 + $0x12c4] ss:$24 sps:$4 sm:$0xff]  }
 0x4fe   :  { %v22034_v17 = vpack.c.bf16 %v8724_v10, %v8700_v9  ;;  %v412_v57 = vld [vmem:[#allocation5 + $0x9a8] sm:$0xff]  ;;  %v20202_v49 = vld [vmem:[#allocation8 + $0x1384] ss:$24 sps:$4 sm:$0xff]  }
 0x4ff   :  { %v17591_v0 = vcombine.high %v400_v52, %v412_v57  ;;  %v424_v7 = vld [vmem:[#allocation5 + $0xa08] sm:$0xff]  ;;  %v17590_v10 = vcombine.low %v400_v52, %v412_v57 }
 0x500   :  { %8317 = vmatpush1.bf16.msra.mxu1 %v17470_v12  ;;  %15952 = vmatprep.mubr.bf16.mxu0 %v22034_v17  ;;  %v436_v8 = vld [vmem:[#allocation5 + $0xa68] sm:$0xff] }
 0x501   :  { %15953 = vmatmul.mubr.bf16.vlgmr.msra.gmra.mrb[16].mxu0 %v22032_v14  ;;  %8318 = vmatprep.subr.bf16.mxu1 %v17495_v16  ;;  %v20193_v9 = vld [vmem:[#allocation8 + $0x12f4] ss:$24 sps:$4 sm:$0xff]   ;;  %v17615_v12 = vcombine.high %v424_v7, %v436_v8  ;;  %v20191_v16 = vld [vmem:[#allocation8 + $0x12f0] ss:$24 sps:$4 sm:$0xff]  }
 0x502   :  { %15964 = vmatpush1.bf16.msra.mxu0 %v20176_v18  ;;  %15995 = vmatprep.mubr.bf16.mxu0 %v21961_v29  ;;  %v448_v18 = vld [vmem:[#allocation5 + $0xac8] sm:$0xff] }
 0x503   :  { %15965 = vmatprep.subr.bf16.mxu0 %v20181_v27  ;;  %v460_v19 = vld [vmem:[#allocation5 + $0xb28] sm:$0xff]  ;;  %v17614_v27 = vcombine.low %v424_v7, %v436_v8  ;;  %v20208_v8 = vld [vmem:[#allocation8 + $0x13e4] ss:$24 sps:$4 sm:$0xff]  }
 0x504   :  { %8319 = vmatpush1.bf16.msra.mxu1 %v17494_v26  ;;  %v17639_v26 = vcombine.high %v448_v18, %v460_v19  ;;  %v484_v35 = vld [vmem:[#allocation5 + $0xbe8] sm:$0xff] }
 0x505   :  { %8320 = vmatprep.subr.bf16.mxu1 %v17519_v31  ;;  %v20194_v31 = vld [vmem:[#allocation8 + $0x1320] ss:$24 sps:$4 sm:$0xff]   ;;  %v508_v46 = vld [vmem:[#allocation5 + $0xca8] sm:$0xff] }
 0x506   :  { %15966 = vmatpush1.bf16.msra.mxu0 %v20179_v32  ;;  %v472_v32 = vld [vmem:[#allocation5 + $0xb88] sm:$0xff] }
 0x507   :  { %15967 = vmatprep.subr.bf16.mxu0 %v20184_v40  ;;  %v17638_v40 = vcombine.low %v448_v18, %v460_v19  ;;  %v532_v52 = vld [vmem:[#allocation5 + $0xd68] sm:$0xff] }
 0x508   :  { %8321 = vmatpush1.bf16.msra.mxu1 %v17518_v42  ;;  %v17663_v42 = vcombine.high %v472_v32, %v484_v35  ;;  %v20205_v57 = vld [vmem:[#allocation8 + $0x13b4] ss:$24 sps:$4 sm:$0xff]  }
 0x509   :  { %8322 = vmatprep.subr.bf16.mxu1 %v17543_v43  ;;  %v20197_v43 = vld [vmem:[#allocation8 + $0x1350] ss:$24 sps:$4 sm:$0xff]   ;;  %v20211_v19 = vld [vmem:[#allocation8 + $0x1414] ss:$24 sps:$4 sm:$0xff]  }
 0x50a   :  { %15968 = vmatpush1.bf16.msra.mxu0 %v20182_v41  ;;  %v496_v41 = vld [vmem:[#allocation5 + $0xc48] sm:$0xff] }
 0x50b   :  { %15969 = vmatprep.subr.bf16.mxu0 %v20187_v45  ;;  %v17662_v45 = vcombine.low %v472_v32, %v484_v35  ;;  %v556_v7 = vld [vmem:[#allocation5 + $0xe28] sm:$0xff]  ;;  %v20214_v35 = vld [vmem:[#allocation8 + $0x1444] ss:$24 sps:$4 sm:$0xff]  }
 0x50c   :  { %8323 = vmatpush1.bf16.msra.mxu1 %v17542_v53  ;;  %v17687_v53 = vcombine.high %v496_v41, %v508_v46  ;;  %v580_v18 = vld [vmem:[#allocation5 + $0xee8] sm:$0xff] }
 0x50d   :  { %8324 = vmatprep.subr.bf16.mxu1 %v17567_v54  ;;  %v20200_v54 = vld [vmem:[#allocation8 + $0x1380] ss:$24 sps:$4 sm:$0xff]   ;;  %v604_v32 = vld [vmem:[#allocation5 + $0xfa8] sm:$0xff] }
 0x50e   :  { %15970 = vmatpush1.bf16.msra.mxu0 %v20185_v51  ;;  %v520_v51 = vld [vmem:[#allocation5 + $0xd08] sm:$0xff] }
 0x50f   :  { %15971 = vmatprep.subr.bf16.mxu0 %v20190_v60  ;;  %v17686_v60 = vcombine.low %v496_v41, %v508_v46  ;;  %v628_v41 = vld [vmem:[#allocation5 + $0x1068] sm:$0xff] }
 0x510   :  { %8325 = vmatpush1.bf16.msra.mxu1 %v17566_v62  ;;  %v17711_v62 = vcombine.high %v520_v51, %v532_v52  ;;  %v20217_v46 = vld [vmem:[#allocation8 + $0x1474] ss:$24 sps:$4 sm:$0xff]  }
 0x511   :  { %8326 = vmatprep.subr.bf16.mxu1 %v17591_v0  ;;  %v20203_v0 = vld [vmem:[#allocation8 + $0x13b0] ss:$24 sps:$4 sm:$0xff]  }
 0x512   :  { %15972 = vmatpush1.bf16.msra.mxu0 %v20188_v4  ;;  %v544_v4 = vld [vmem:[#allocation5 + $0xdc8] sm:$0xff] }
 0x513   :  { %15973 = vmatprep.subr.bf16.mxu0 %v20193_v9  ;;  %v17710_v9 = vcombine.low %v520_v51, %v532_v52  ;;  %v652_v51 = vld [vmem:[#allocation5 + $0x1128] sm:$0xff]  ;;  %v20220_v52 = vld [vmem:[#allocation8 + $0x14a4] ss:$24 sps:$4 sm:$0xff]  }
 0x514   :  { %8327 = vmatpush1.bf16.msra.mxu1 %v17590_v10  ;;  %v17735_v10 = vcombine.high %v544_v4, %v556_v7 }
 0x515   :  { %8328 = vmatprep.subr.bf16.mxu1 %v17615_v12  ;;  %v20206_v12 = vld [vmem:[#allocation8 + $0x13e0] ss:$24 sps:$4 sm:$0xff]  }
 0x516   :  { %15974 = vmatpush1.bf16.msra.mxu0 %v20191_v16  ;;  %v568_v16 = vld [vmem:[#allocation5 + $0xe88] sm:$0xff] }
 0x517   :  { %15975 = vmatprep.subr.bf16.mxu0 %v20196_v20  ;;  %v17734_v20 = vcombine.low %v544_v4, %v556_v7  ;;  %v676_v4 = vld [vmem:[#allocation5 + $0x11e8] sm:$0xff] }
 0x518   :  { %8329 = vmatpush1.bf16.msra.mxu1 %v17614_v27  ;;  %v17759_v27 = vcombine.high %v568_v16, %v580_v18  ;;  %v20223_v7 = vld [vmem:[#allocation8 + $0x14d4] ss:$24 sps:$4 sm:$0xff]  }
 0x519   :  { %8330 = vmatprep.subr.bf16.mxu1 %v17639_v26  ;;  %v20209_v26 = vld [vmem:[#allocation8 + $0x1410] ss:$24 sps:$4 sm:$0xff]  }
 0x51a   :  { %15976 = vmatpush1.bf16.msra.mxu0 %v20194_v31  ;;  %v592_v31 = vld [vmem:[#allocation5 + $0xf48] sm:$0xff] }
 0x51b   :  { %15977 = vmatprep.subr.bf16.mxu0 %v20199_v36  ;;  %v17758_v36 = vcombine.low %v568_v16, %v580_v18  ;;  %v700_v16 = vld [vmem:[#allocation5 + $0x12a8] sm:$0xff]  ;;  %v20226_v18 = vld [vmem:[#allocation8 + $0x1504] ss:$24 sps:$4 sm:$0xff]  }
 0x51c   :  { %8331 = vmatpush1.bf16.msra.mxu1 %v17638_v40  ;;  %v17783_v40 = vcombine.high %v592_v31, %v604_v32 }
 0x51d   :  { %8332 = vmatprep.subr.bf16.mxu1 %v17663_v42  ;;  %v20212_v42 = vld [vmem:[#allocation8 + $0x1440] ss:$24 sps:$4 sm:$0xff]  }
 0x51e   :  { %15978 = vmatpush1.bf16.msra.mxu0 %v20197_v43  ;;  %v616_v43 = vld [vmem:[#allocation5 + $0x1008] sm:$0xff] }
 0x51f   :  { %15979 = vmatprep.subr.bf16.mxu0 %v20202_v49  ;;  %v17782_v49 = vcombine.low %v592_v31, %v604_v32  ;;  %v20224_v31 = vld [vmem:[#allocation8 + $0x1500] ss:$24 sps:$4 sm:$0xff]   ;;  %v20229_v32 = vld [vmem:[#allocation8 + $0x1534] ss:$24 sps:$4 sm:$0xff]  }
 0x520   :  { %8333 = vmatpush1.bf16.msra.mxu1 %v17662_v45  ;;  %v17807_v45 = vcombine.high %v616_v43, %v628_v41 }
 0x521   :  { %8345 = vmatprep.subr.bf16.mxu1 %v17687_v53  ;;  %v20215_v53 = vld [vmem:[#allocation8 + $0x1470] ss:$24 sps:$4 sm:$0xff]  }
 0x522   :  { %15980 = vmatpush1.bf16.msra.mxu0 %v20200_v54  ;;  %v640_v54 = vld [vmem:[#allocation5 + $0x10c8] sm:$0xff] }
 0x523   :  { %8335 = vmatmul.mubr.bf16.vlgmr.msra.gmra.mrb[24].mxu1 %v21873_v15  ;;  %15981 = vmatprep.subr.bf16.mxu0 %v20205_v57  ;;  %v17806_v57 = vcombine.low %v616_v43, %v628_v41  ;;  %v20227_v43 = vld [vmem:[#allocation8 + $0x1530] ss:$24 sps:$4 sm:$0xff]   ;;  %v20232_v41 = vld [vmem:[#allocation8 + $0x1564] ss:$24 sps:$4 sm:$0xff]  }
 0x524   :  { %8346 = vmatpush1.bf16.msra.mxu1 %v17686_v60  ;;  %8377 = vmatprep.mubr.bf16.mxu1 %v21875_v25  ;;  %v17831_v60 = vcombine.high %v640_v54, %v652_v51 }
 0x525   :  { %8347 = vmatprep.subr.bf16.mxu1 %v17711_v62  ;;  %v20218_v62 = vld [vmem:[#allocation8 + $0x14a0] ss:$24 sps:$4 sm:$0xff]  }
 0x526   :  { %15982 = vmatpush1.bf16.msra.mxu0 %v20203_v0  ;;  %v664_v0 = vld [vmem:[#allocation5 + $0x1188] sm:$0xff] }
 0x527   :  { %15983 = vmatprep.subr.bf16.mxu0 %v20208_v8  ;;  %v17830_v8 = vcombine.low %v640_v54, %v652_v51  ;;  %v20230_v54 = vld [vmem:[#allocation8 + $0x1560] ss:$24 sps:$4 sm:$0xff]   ;;  %v20235_v51 = vld [vmem:[#allocation8 + $0x1594] ss:$24 sps:$4 sm:$0xff]  }
 0x528   :  { %8348 = vmatpush1.bf16.msra.mxu1 %v17710_v9  ;;  %v17855_v9 = vcombine.high %v664_v0, %v676_v4 }
 0x529   :  { %8349 = vmatprep.subr.bf16.mxu1 %v17735_v10  ;;  %v20221_v10 = vld [vmem:[#allocation8 + $0x14d0] ss:$24 sps:$4 sm:$0xff]  }
 0x52a   :  { %15984 = vmatpush1.bf16.msra.mxu0 %v20206_v12  ;;  %v688_v12 = vld [vmem:[#allocation5 + $0x1248] sm:$0xff] }
 0x52b   :  { %15985 = vmatprep.subr.bf16.mxu0 %v20211_v19  ;;  %v17854_v19 = vcombine.low %v664_v0, %v676_v4  ;;  %v20233_v0 = vld [vmem:[#allocation8 + $0x1590] ss:$24 sps:$4 sm:$0xff]   ;;  %v20238_v4 = vld [vmem:[#allocation8 + $0x15c4] ss:$24 sps:$4 sm:$0xff]  }
 0x52c   :  { %8350 = vmatpush1.bf16.msra.mxu1 %v17734_v20  ;;  %v17879_v20 = vcombine.high %v688_v12, %v700_v16 }
 0x52d   :  { %8351 = vmatprep.subr.bf16.mxu1 %v17759_v27  ;;  %v712_v27 = vld [vmem:[#allocation5 + $0x1308] sm:$0xff] }
 0x52e   :  { %15986 = vmatpush1.bf16.msra.mxu0 %v20209_v26  ;;  %v724_v26 = vld [vmem:[#allocation5 + $0x1368] sm:$0xff] }
 0x52f   :  { %15987 = vmatprep.subr.bf16.mxu0 %v20214_v35  ;;  %v17878_v35 = vcombine.low %v688_v12, %v700_v16  ;;  %v20236_v12 = vld [vmem:[#allocation8 + $0x15c0] ss:$24 sps:$4 sm:$0xff]   ;;  %v20241_v16 = vld [vmem:[#allocation8 + $0x15f4] ss:$24 sps:$4 sm:$0xff]  }
 0x530   :  { %8352 = vmatpush1.bf16.msra.mxu1 %v17758_v36  ;;  %v17903_v36 = vcombine.high %v712_v27, %v724_v26 }
 0x531   :  { %8353 = vmatprep.subr.bf16.mxu1 %v17783_v40  ;;  %v736_v40 = vld [vmem:[#allocation5 + $0x13c8] sm:$0xff] }
 0x532   :  { %15988 = vmatpush1.bf16.msra.mxu0 %v20212_v42  ;;  %v748_v42 = vld [vmem:[#allocation5 + $0x1428] sm:$0xff] }
 0x533   :  { %15989 = vmatprep.subr.bf16.mxu0 %v20217_v46  ;;  %v17902_v46 = vcombine.low %v712_v27, %v724_v26  ;;  %v844_v27 = vld [vmem:[#allocation5 + $0x1728] sm:$0xff] }
 0x534   :  { %8354 = vmatpush1.bf16.msra.mxu1 %v17782_v49  ;;  %v17927_v49 = vcombine.high %v736_v40, %v748_v42  ;;  %v20239_v26 = vld [vmem:[#allocation8 + $0x15f0] ss:$24 sps:$4 sm:$0xff]  }
 0x535   :  { %8355 = vmatprep.subr.bf16.mxu1 %v17807_v45  ;;  %v760_v45 = vld [vmem:[#allocation5 + $0x1488] sm:$0xff] }
 0x536   :  { %15990 = vmatpush1.bf16.msra.mxu0 %v20215_v53  ;;  %v772_v53 = vld [vmem:[#allocation5 + $0x14e8] sm:$0xff] }
 0x537   :  { %15991 = vmatprep.subr.bf16.mxu0 %v20220_v52  ;;  %v17926_v52 = vcombine.low %v736_v40, %v748_v42  ;;  %v868_v40 = vld [vmem:[#allocation5 + $0x17e8] sm:$0xff]  ;;  %v20242_v42 = vld [vmem:[#allocation8 + $0x1620] ss:$24 sps:$4 sm:$0xff]  }
 0x538   :  { %8356 = vmatpush1.bf16.msra.mxu1 %v17806_v57  ;;  %v17951_v57 = vcombine.high %v760_v45, %v772_v53 }
 0x539   :  { %8357 = vmatprep.subr.bf16.mxu1 %v17831_v60  ;;  %v784_v60 = vld [vmem:[#allocation5 + $0x1548] sm:$0xff] }
 0x53a   :  { %15992 = vmatpush1.bf16.msra.mxu0 %v20218_v62  ;;  %v796_v62 = vld [vmem:[#allocation5 + $0x15a8] sm:$0xff] }
 0x53b   :  { %15993 = vmatprep.subr.bf16.mxu0 %v20223_v7  ;;  %v17950_v7 = vcombine.low %v760_v45, %v772_v53  ;;  %v892_v45 = vld [vmem:[#allocation5 + $0x18a8] sm:$0xff] }
 0x53c   :  { %8358 = vmatpush1.bf16.msra.mxu1 %v17830_v8  ;;  %v17975_v8 = vcombine.high %v784_v60, %v796_v62  ;;  %v20245_v53 = vld [vmem:[#allocation8 + $0x1650] ss:$24 sps:$4 sm:$0xff]  }
 0x53d   :  { %8359 = vmatprep.subr.bf16.mxu1 %v17855_v9  ;;  %v808_v9 = vld [vmem:[#allocation5 + $0x1608] sm:$0xff] }
 0x53e   :  { %15994 = vmatpush1.bf16.msra.mxu0 %v20221_v10  ;;  %v820_v10 = vld [vmem:[#allocation5 + $0x1668] sm:$0xff] }
 0x53f   :  { %16006 = vmatprep.subr.bf16.mxu0 %v20226_v18  ;;  %v17974_v18 = vcombine.low %v784_v60, %v796_v62  ;;  %v916_v60 = vld [vmem:[#allocation5 + $0x1968] sm:$0xff]  ;;  %v20248_v62 = vld [vmem:[#allocation8 + $0x1680] ss:$24 sps:$4 sm:$0xff]  }
 0x540   :  { %8360 = vmatpush1.bf16.msra.mxu1 %v17854_v19  ;;  %v17999_v19 = vcombine.high %v808_v9, %v820_v10 }
 0x541   :  { %15996 = vmatmul.mubr.bf16.vlgmr.msra.gmra.mrb[16].mxu0 %v21959_v28  ;;  %8361 = vmatprep.subr.bf16.mxu1 %v17879_v20  ;;  %v832_v20 = vld [vmem:[#allocation5 + $0x16c8] sm:$0xff] }
 0x542   :  { %16007 = vmatpush1.bf16.msra.mxu0 %v20224_v31  ;;  %v20244_v31 = vld [vmem:[#allocation8 + $0x1624] ss:$24 sps:$4 sm:$0xff]  }
 0x543   :  { %16008 = vmatprep.subr.bf16.mxu0 %v20229_v32  ;;  %v17998_v32 = vcombine.low %v808_v9, %v820_v10  ;;  %v940_v9 = vld [vmem:[#allocation5 + $0x1a28] sm:$0xff] }
 0x544   :  { %8362 = vmatpush1.bf16.msra.mxu1 %v17878_v35  ;;  %v18023_v35 = vcombine.high %v832_v20, %v844_v27  ;;  %v20251_v10 = vld [vmem:[#allocation8 + $0x16b0] ss:$24 sps:$4 sm:$0xff]  }
 0x545   :  { %8363 = vmatprep.subr.bf16.mxu1 %v17903_v36  ;;  %v856_v36 = vld [vmem:[#allocation5 + $0x1788] sm:$0xff] }
 0x546   :  { %16009 = vmatpush1.bf16.msra.mxu0 %v20227_v43  ;;  %v20247_v43 = vld [vmem:[#allocation8 + $0x1654] ss:$24 sps:$4 sm:$0xff]  }
 0x547   :  { %16010 = vmatprep.subr.bf16.mxu0 %v20232_v41  ;;  %v18022_v41 = vcombine.low %v832_v20, %v844_v27  ;;  %v964_v20 = vld [vmem:[#allocation5 + $0x1ae8] sm:$0xff]  ;;  %v20254_v27 = vld [vmem:[#allocation8 + $0x16e0] ss:$24 sps:$4 sm:$0xff]  }
 0x548   :  { %8364 = vmatpush1.bf16.msra.mxu1 %v17902_v46  ;;  %v18047_v46 = vcombine.high %v856_v36, %v868_v40 }
 0x549   :  { %8365 = vmatprep.subr.bf16.mxu1 %v17927_v49  ;;  %v880_v49 = vld [vmem:[#allocation5 + $0x1848] sm:$0xff] }
 0x54a   :  { %16011 = vmatpush1.bf16.msra.mxu0 %v20230_v54  ;;  %v20250_v54 = vld [vmem:[#allocation8 + $0x1684] ss:$24 sps:$4 sm:$0xff]  }
 0x54b   :  { %16012 = vmatprep.subr.bf16.mxu0 %v20235_v51  ;;  %v18046_v51 = vcombine.low %v856_v36, %v868_v40  ;;  %v988_v36 = vld [vmem:[#allocation5 + $0x1ba8] sm:$0xff] }
 0x54c   :  { %8366 = vmatpush1.bf16.msra.mxu1 %v17926_v52  ;;  %v18071_v52 = vcombine.high %v880_v49, %v892_v45  ;;  %v20257_v40 = vld [vmem:[#allocation8 + $0x1710] ss:$24 sps:$4 sm:$0xff]  }
 0x54d   :  { %8367 = vmatprep.subr.bf16.mxu1 %v17951_v57  ;;  %v904_v57 = vld [vmem:[#allocation5 + $0x1908] sm:$0xff] }
 0x54e   :  { %16013 = vmatpush1.bf16.msra.mxu0 %v20233_v0  ;;  %v20253_v0 = vld [vmem:[#allocation8 + $0x16b4] ss:$24 sps:$4 sm:$0xff]  }
 0x54f   :  { %16014 = vmatprep.subr.bf16.mxu0 %v20238_v4  ;;  %v18070_v4 = vcombine.low %v880_v49, %v892_v45  ;;  %v1012_v49 = vld [vmem:[#allocation5 + $0x1c68] sm:$0xff]  ;;  %v20260_v45 = vld [vmem:[#allocation8 + $0x1740] ss:$24 sps:$4 sm:$0xff]  }
 0x550   :  { %8368 = vmatpush1.bf16.msra.mxu1 %v17950_v7  ;;  %v18095_v7 = vcombine.high %v904_v57, %v916_v60 }
 0x551   :  { %8369 = vmatprep.subr.bf16.mxu1 %v17975_v8  ;;  %v928_v8 = vld [vmem:[#allocation5 + $0x19c8] sm:$0xff] }
 0x552   :  { %16015 = vmatpush1.bf16.msra.mxu0 %v20236_v12  ;;  %v20256_v12 = vld [vmem:[#allocation8 + $0x16e4] ss:$24 sps:$4 sm:$0xff]  }
 0x553   :  { %16016 = vmatprep.subr.bf16.mxu0 %v20241_v16  ;;  %v18094_v16 = vcombine.low %v904_v57, %v916_v60  ;;  %v1036_v57 = vld [vmem:[#allocation5 + $0x1d28] sm:$0xff] }
 0x554   :  { %8370 = vmatpush1.bf16.msra.mxu1 %v17974_v18  ;;  %v18119_v18 = vcombine.high %v928_v8, %v940_v9  ;;  %v20263_v60 = vld [vmem:[#allocation8 + $0x1770] ss:$24 sps:$4 sm:$0xff]  }
 0x555   :  { %8371 = vmatprep.subr.bf16.mxu1 %v17999_v19  ;;  %v952_v19 = vld [vmem:[#allocation5 + $0x1a88] sm:$0xff] }
 0x556   :  { %16017 = vmatpush1.bf16.msra.mxu0 %v20239_v26  ;;  %v20259_v26 = vld [vmem:[#allocation8 + $0x1714] ss:$24 sps:$4 sm:$0xff]  }
 0x557   :  { %16018 = vmatprep.subr.bf16.mxu0 %v20244_v31  ;;  %v18118_v31 = vcombine.low %v928_v8, %v940_v9  ;;  %v1060_v8 = vld [vmem:[#allocation5 + $0x1de8] sm:$0xff]  ;;  %v20266_v9 = vld [vmem:[#allocation8 + $0x17a0] ss:$24 sps:$4 sm:$0xff]  }
 0x558   :  { %8372 = vmatpush1.bf16.msra.mxu1 %v17998_v32  ;;  %v18143_v32 = vcombine.high %v952_v19, %v964_v20 }
 0x559   :  { %8373 = vmatprep.subr.bf16.mxu1 %v18023_v35  ;;  %v976_v35 = vld [vmem:[#allocation5 + $0x1b48] sm:$0xff] }
 0x55a   :  { %16019 = vmatpush1.bf16.msra.mxu0 %v20242_v42  ;;  %v20262_v42 = vld [vmem:[#allocation8 + $0x1744] ss:$24 sps:$4 sm:$0xff]  }
 0x55b   :  { %16020 = vmatprep.subr.bf16.mxu0 %v20247_v43  ;;  %v18142_v43 = vcombine.low %v952_v19, %v964_v20  ;;  %v1084_v19 = vld [vmem:[#allocation5 + $0x1ea8] sm:$0xff] }
 0x55c   :  { %8374 = vmatpush1.bf16.msra.mxu1 %v18022_v41  ;;  %v18167_v41 = vcombine.high %v976_v35, %v988_v36  ;;  %v20269_v20 = vld [vmem:[#allocation8 + $0x17d0] ss:$24 sps:$4 sm:$0xff]  }
 0x55d   :  { %8375 = vmatprep.subr.bf16.mxu1 %v18047_v46  ;;  %v1000_v46 = vld [vmem:[#allocation5 + $0x1c08] sm:$0xff] }
 0x55e   :  { %16021 = vmatpush1.bf16.msra.mxu0 %v20245_v53  ;;  %v20265_v53 = vld [vmem:[#allocation8 + $0x1774] ss:$24 sps:$4 sm:$0xff]  }
 0x55f   :  { %16022 = vmatprep.subr.bf16.mxu0 %v20250_v54  ;;  %v18166_v54 = vcombine.low %v976_v35, %v988_v36  ;;  %v1108_v35 = vld [vmem:[#allocation5 + $0x1f68] sm:$0xff] }
 0x560   :  { %8376 = vmatpush1.bf16.msra.mxu1 %v18046_v51  ;;  %v18191_v51 = vcombine.high %v1000_v46, %v1012_v49 }
 0x561   :  { %8388 = vmatprep.subr.bf16.mxu1 %v18071_v52  ;;  %v1024_v52 = vld [vmem:[#allocation5 + $0x1cc8] sm:$0xff] }
 0x562   :  { %16023 = vmatpush1.bf16.msra.mxu0 %v20248_v62  ;;  %v20268_v62 = vld [vmem:[#allocation8 + $0x17a4] ss:$24 sps:$4 sm:$0xff]  }
 0x563   :  { %8378 = vmatmul.mubr.bf16.vlgmr.msra.gmra.mrb[24].mxu1 %v21881_v30  ;;  %16024 = vmatprep.subr.bf16.mxu0 %v20253_v0  ;;  %v18190_v0 = vcombine.low %v1000_v46, %v1012_v49  ;;  %v1144_v49 = vld [vmem:[#allocation5 + $0x2088] sm:$0xff] }
 0x564   :  { %8389 = vmatpush1.bf16.msra.mxu1 %v18070_v4  ;;  %8420 = vmatprep.mubr.bf16.mxu1 %v21883_v39  ;;  %v18215_v4 = vcombine.high %v1024_v52, %v1036_v57 }
 0x565   :  { %8390 = vmatprep.subr.bf16.mxu1 %v18095_v7  ;;  %v1048_v7 = vld [vmem:[#allocation5 + $0x1d88] sm:$0xff] }
 0x566   :  { %16025 = vmatpush1.bf16.msra.mxu0 %v20251_v10  ;;  %v20271_v10 = vld [vmem:[#allocation8 + $0x17d4] ss:$24 sps:$4 sm:$0xff]  }
 0x567   :  { %16026 = vmatprep.subr.bf16.mxu0 %v20256_v12  ;;  %v18214_v12 = vcombine.low %v1024_v52, %v1036_v57  ;;  %v1180_v52 = vld [vmem:[#allocation5 + $0x21a8] sm:$0xff] }
 0x568   :  { %8391 = vmatpush1.bf16.msra.mxu1 %v18094_v16  ;;  %v18239_v16 = vcombine.high %v1048_v7, %v1060_v8 }
 0x569   :  { %8392 = vmatprep.subr.bf16.mxu1 %v18119_v18  ;;  %v1072_v18 = vld [vmem:[#allocation5 + $0x1e48] sm:$0xff] }
 0x56a   :  { %16027 = vmatpush1.bf16.msra.mxu0 %v20254_v27  ;;  %v20274_v27 = vld [vmem:[#allocation8 + $0x1804] ss:$24 sps:$4 sm:$0xff]   ;;  %v18262_v36 = vcombine.low %v1072_v18, %v1084_v19 }
 0x56b   :  { %16028 = vmatprep.subr.bf16.mxu0 %v20259_v26  ;;  %v18238_v26 = vcombine.low %v1048_v7, %v1060_v8  ;;  %v1216_v8 = vld [vmem:[#allocation5 + $0x22c8] sm:$0xff] }
 0x56c   :  { %8393 = vmatpush1.bf16.msra.mxu1 %v18118_v31  ;;  %v18263_v31 = vcombine.high %v1072_v18, %v1084_v19  ;;  %v1252_v18 = vld [vmem:[#allocation5 + $0x23e8] sm:$0xff] }
 0x56d   :  { %8394 = vmatprep.subr.bf16.mxu1 %v18143_v32  ;;  %v1096_v32 = vld [vmem:[#allocation5 + $0x1f08] sm:$0xff] }
 0x56e   :  { %16029 = vmatpush1.bf16.msra.mxu0 %v20257_v40  ;;  %v18287_v40 = vcombine.high %v1096_v32, %v1108_v35 }
 0x56f   :  { %16030 = vmatprep.subr.bf16.mxu0 %v20262_v42  ;;  %v1120_v42 = vld [vmem:[#allocation5 + $0x1fc8] sm:$0xff] }
 0x570   :  { %8395 = vmatpush1.bf16.msra.mxu1 %v18142_v43  ;;  %v1132_v43 = vld [vmem:[#allocation5 + $0x2028] sm:$0xff] }
 0x571   :  { %8396 = vmatprep.subr.bf16.mxu1 %v18167_v41  ;;  %v18286_v41 = vcombine.low %v1096_v32, %v1108_v35  ;;  %v18311_v46 = vcombine.high %v1120_v42, %v1132_v43  ;;  %v138_v35 = vld [vmem:[#allocation5 + $0x118] sm:$0xff] }
 0x572   :  { %16031 = vmatpush1.bf16.msra.mxu0 %v20260_v45  ;;  %v1156_v45 = vld [vmem:[#allocation5 + $0x20e8] sm:$0xff] }
 0x573   :  { %16032 = vmatprep.subr.bf16.mxu0 %v20265_v53  ;;  %v18310_v53 = vcombine.low %v1120_v42, %v1132_v43  ;;  %v18334_v57 = vcombine.low %v1144_v49, %v1156_v45  ;;  %v162_v43 = vld [vmem:[#allocation5 + $0x1d8] sm:$0xff] }
 0x574   :  { %8397 = vmatpush1.bf16.msra.mxu1 %v18166_v54  ;;  %v18335_v54 = vcombine.high %v1144_v49, %v1156_v45  ;;  %v186_v45 = vld [vmem:[#allocation5 + $0x298] sm:$0xff] }
 0x575   :  { %8398 = vmatprep.subr.bf16.mxu1 %v18191_v51  ;;  %v1168_v51 = vld [vmem:[#allocation5 + $0x2148] sm:$0xff] }
 0x576   :  { %16033 = vmatpush1.bf16.msra.mxu0 %v20263_v60  ;;  %v18359_v60 = vcombine.high %v1168_v51, %v1180_v52 }
 0x577   :  { %16034 = vmatprep.subr.bf16.mxu0 %v20268_v62  ;;  %v1192_v62 = vld [vmem:[#allocation5 + $0x2208] sm:$0xff] }
 0x578   :  { %8399 = vmatpush1.bf16.msra.mxu1 %v18190_v0  ;;  %v1204_v0 = vld [vmem:[#allocation5 + $0x2268] sm:$0xff] }
 0x579   :  { %8400 = vmatprep.subr.bf16.mxu1 %v18215_v4  ;;  %v18358_v4 = vcombine.low %v1168_v51, %v1180_v52  ;;  %v18383_v7 = vcombine.high %v1192_v62, %v1204_v0  ;;  %v210_v52 = vld [vmem:[#allocation5 + $0x358] sm:$0xff] }
 0x57a   :  { %16035 = vmatpush1.bf16.msra.mxu0 %v20266_v9  ;;  %v1228_v9 = vld [vmem:[#allocation5 + $0x2328] sm:$0xff] }
 0x57b   :  { %16036 = vmatprep.subr.bf16.mxu0 %v20271_v10  ;;  %v18382_v10 = vcombine.low %v1192_v62, %v1204_v0  ;;  %v18406_v19 = vcombine.low %v1216_v8, %v1228_v9  ;;  %v234_v0 = vld [vmem:[#allocation5 + $0x418] sm:$0xff] }
 0x57c   :  { %8401 = vmatpush1.bf16.msra.mxu1 %v18214_v12  ;;  %v18407_v12 = vcombine.high %v1216_v8, %v1228_v9  ;;  %v258_v8 = vld [vmem:[#allocation5 + $0x4d8] sm:$0xff] }
 0x57d   :  { %8402 = vmatprep.subr.bf16.mxu1 %v18239_v16  ;;  %v1240_v16 = vld [vmem:[#allocation5 + $0x2388] sm:$0xff]  ;;  %v270_v9 = vld [vmem:[#allocation5 + $0x538] sm:$0xff] }
 0x57e   :  { %16037 = vmatpush1.bf16.msra.mxu0 %v20269_v20  ;;  %v18431_v20 = vcombine.high %v1240_v16, %v1252_v18 }
 0x57f   :  { %16049 = vmatprep.subr.bf16.mxu0 %v20274_v27  ;;  %v114_v27 = vld [vmem:[#allocation5 + $0x58] sm:$0xff] }
 0x580   :  { %8403 = vmatpush1.bf16.msra.mxu1 %v18238_v26  ;;  %v126_v26 = vld [vmem:[#allocation5 + $0xb8] sm:$0xff] }
 0x581   :  { %8404 = vmatprep.subr.bf16.mxu1 %v18263_v31  ;;  %v18430_v31 = vcombine.low %v1240_v16, %v1252_v18  ;;  %v17307_v32 = vcombine.high %v114_v27, %v126_v26  ;;  %v17451_v18 = vcombine.high %v258_v8, %v270_v9 }
 0x584   :  { %8405 = vmatpush1.bf16.msra.mxu1 %v18262_v36  ;;  %v150_v36 = vld [vmem:[#allocation5 + $0x178] sm:$0xff] }
 0x585   :  { %8406 = vmatprep.subr.bf16.mxu1 %v18287_v40  ;;  %v17306_v40 = vcombine.low %v114_v27, %v126_v26  ;;  %v17331_v42 = vcombine.high %v138_v35, %v150_v36  ;;  %v294_v27 = vld [vmem:[#allocation5 + $0x5f8] sm:$0xff] }
 0x588   :  { %8407 = vmatpush1.bf16.msra.mxu1 %v18286_v41  ;;  %v174_v41 = vld [vmem:[#allocation5 + $0x238] sm:$0xff] }
 0x589   :  { %8408 = vmatprep.subr.bf16.mxu1 %v18311_v46  ;;  %v17330_v46 = vcombine.low %v138_v35, %v150_v36  ;;  %v17355_v49 = vcombine.high %v162_v43, %v174_v41  ;;  %v17450_v36 = vcombine.low %v258_v8, %v270_v9  ;;  %v20275_v9 = vld [vmem:[#allocation8 + $0x1830] ss:$24 sps:$4 sm:$0xff]  }
 0x58c   :  { %8409 = vmatpush1.bf16.msra.mxu1 %v18310_v53  ;;  %v198_v53 = vld [vmem:[#allocation5 + $0x2f8] sm:$0xff] }
 0x58d   :  { %8410 = vmatprep.subr.bf16.mxu1 %v18335_v54  ;;  %v17354_v54 = vcombine.low %v162_v43, %v174_v41  ;;  %v17379_v51 = vcombine.high %v186_v45, %v198_v53 }
 0x590   :  { %8411 = vmatpush1.bf16.msra.mxu1 %v18334_v57  ;;  %v222_v57 = vld [vmem:[#allocation5 + $0x3b8] sm:$0xff] }
 0x591   :  { %8412 = vmatprep.subr.bf16.mxu1 %v18359_v60  ;;  %v17378_v60 = vcombine.low %v186_v45, %v198_v53  ;;  %v17403_v62 = vcombine.high %v210_v52, %v222_v57 }
 0x594   :  { %8413 = vmatpush1.bf16.msra.mxu1 %v18358_v4  ;;  %v246_v4 = vld [vmem:[#allocation5 + $0x478] sm:$0xff] }
 0x595   :  { %8414 = vmatprep.subr.bf16.mxu1 %v18383_v7  ;;  %v17402_v7 = vcombine.low %v210_v52, %v222_v57  ;;  %v17426_v16 = vcombine.low %v234_v0, %v246_v4 }
 0x598   :  { %8415 = vmatpush1.bf16.msra.mxu1 %v18382_v10  ;;  %v1320_v10 = vrot.slane %v22026_v34, %v21999_v22 }
 0x599   :  { %8416 = vmatprep.subr.bf16.mxu1 %v18407_v12  ;;  %v1324_v12 = vrot.slane %v22026_v34, %v22002_v23 }
 0x59c   :  { %8417 = vmatpush1.bf16.msra.mxu1 %v18406_v19 }
 0x59d   :  { %8418 = vmatprep.subr.bf16.mxu1 %v18431_v20  ;;  %v282_v20 = vld [vmem:[#allocation5 + $0x598] sm:$0xff] }
 0x59e   :  { %v17475_v43 = vcombine.high %v282_v20, %v294_v27 }
 0x5a0   :  { %8419 = vmatpush1.bf16.msra.mxu1 %v18430_v31 }
 0x5a1   :  { %8560 = vmatprep.subr.bf16.mxu1 %v17307_v32 }
 0x5a3   :  { %8421 = vmatmul.mubr.bf16.vlgmr.msra.gmra.mrb[24].mxu1 %v21889_v44 }
 0x5a4   :  { %8561 = vmatpush1.bf16.msra.mxu1 %v17306_v40  ;;  %8592 = vmatprep.mubr.bf16.mxu1 %v21869_v58  ;;  %v17427_v58 = vcombine.high %v234_v0, %v246_v4  ;;  %v330_v0 = vld [vmem:[#allocation5 + $0x718] sm:$0xff] }
 0x5a5   :  { %8562 = vmatprep.subr.bf16.mxu1 %v17331_v42  ;;  %v342_v4 = vld [vmem:[#allocation5 + $0x778] sm:$0xff] }
 0x5a6   :  { %v17523_v8 = vcombine.high %v330_v0, %v342_v4 }
 0x5a8   :  { %8563 = vmatpush1.bf16.msra.mxu1 %v17330_v46  ;;  %v306_v46 = vld [vmem:[#allocation5 + $0x658] sm:$0xff] }
 0x5a9   :  { %8564 = vmatprep.subr.bf16.mxu1 %v17355_v49  ;;  %v318_v49 = vld [vmem:[#allocation5 + $0x6b8] sm:$0xff] }
 0x5aa   :  { %v17499_v57 = vcombine.high %v306_v46, %v318_v49 }
 0x5ac   :  { %8565 = vmatpush1.bf16.msra.mxu1 %v17354_v54 }
 0x5ad   :  { %8566 = vmatprep.subr.bf16.mxu1 %v17379_v51  ;;  %v17474_v51 = vcombine.low %v282_v20, %v294_v27  ;;  %v20278_v20 = vld [vmem:[#allocation8 + $0x1860] ss:$24 sps:$4 sm:$0xff]  }
 0x5ae   :  { %v378_v27 = vld [vmem:[#allocation5 + $0x898] sm:$0xff] }
 0x5b0   :  { %8567 = vmatpush1.bf16.msra.mxu1 %v17378_v60 }
 0x5b1   :  { %8568 = vmatprep.subr.bf16.mxu1 %v17403_v62  ;;  %v20272_v62 = vld [vmem:[#allocation8 + $0x1800] ss:$24 sps:$4 sm:$0xff]  }
 0x5b4   :  { %8569 = vmatpush1.bf16.msra.mxu1 %v17402_v7  ;;  %v20277_v7 = vld [vmem:[#allocation8 + $0x1834] ss:$24 sps:$4 sm:$0xff]  }
 0x5b5   :  { %8570 = vmatprep.subr.bf16.mxu1 %v17427_v58  ;;  %v17498_v58 = vcombine.low %v306_v46, %v318_v49  ;;  %v20284_v49 = vld [vmem:[#allocation8 + $0x18c0] ss:$24 sps:$4 sm:$0xff]  }
 0x5b6   :  { %v8164_v19 = vpop.f32.mrb[20].mxu1 }
 0x5b7   :  { %v19616_v26 = vadd.f32 %v8164_v19, %v1320_v10  ;;  %v8166_v31 = vpop.f32.mrb[21].mxu1 }
 0x5b8   :  { %v19617_v32 = vadd.f32 %v8166_v31, %v1324_v12  ;;  %v8168_v35 = vpop.f32.mrb[22].mxu1  ;;  %8571 = vmatpush1.bf16.msra.mxu1 %v17426_v16  ;;  %v20280_v16 = vld [vmem:[#allocation8 + $0x1864] ss:$24 sps:$4 sm:$0xff]   ;;  %v20283_v31 = vld [vmem:[#allocation8 + $0x1894] ss:$24 sps:$4 sm:$0xff]  }
 0x5b9   :  { %v19618_v40 = vadd.f32 %v8168_v35, %v1320_v10  ;;  %v8170_v42 = vpop.f32.mrb[23].mxu1  ;;  %8572 = vmatprep.subr.bf16.mxu1 %v17451_v18  ;;  %v8703_v34 = vmax.f32 %v19616_v26, 0.0  ;;  %v354_v10 = vld [vmem:[#allocation5 + $0x7d8] sm:$0xff]  ;;  %v17522_v18 = vcombine.low %v330_v0, %v342_v4 }
 0x5ba   :  { %v19619_v41 = vadd.f32 %v8170_v42, %v1324_v12  ;;  %v8704_v53 = vmax.f32 %v19617_v32, 0.0  ;;  %v366_v12 = vld [vmem:[#allocation5 + $0x838] sm:$0xff] }
 0x5bb   :  { %v8727_v45 = vmax.f32 %v19618_v40, 0.0  ;;  %v17547_v19 = vcombine.high %v354_v10, %v366_v12  ;;  %v390_v26 = vld [vmem:[#allocation5 + $0x8f8] sm:$0xff]  ;;  %v17546_v32 = vcombine.low %v354_v10, %v366_v12  ;;  %v20295_v12 = vld [vmem:[#allocation8 + $0x1954] ss:$24 sps:$4 sm:$0xff]  }
 0x5bc   :  { %v8728_v54 = vmax.f32 %v19619_v41, 0.0  ;;  %8573 = vmatpush1.bf16.msra.mxu1 %v17450_v36  ;;  %v17571_v35 = vcombine.high %v378_v27, %v390_v26  ;;  %v20281_v36 = vld [vmem:[#allocation8 + $0x1890] ss:$24 sps:$4 sm:$0xff]   ;;  %v402_v40 = vld [vmem:[#allocation5 + $0x958] sm:$0xff]  ;;  %v17570_v41 = vcombine.low %v378_v27, %v390_v26 }
 0x5bd   :  { %v22050_v52 = vpack.c.bf16 %v8727_v45, %v8703_v34  ;;  %8574 = vmatprep.subr.bf16.mxu1 %v17475_v43  ;;  %v414_v42 = vld [vmem:[#allocation5 + $0x9b8] sm:$0xff] }
 0x5be   :  { %v22052_v60 = vpack.c.bf16 %v8728_v54, %v8704_v53  ;;  %v20286_v43 = vld [vmem:[#allocation8 + $0x18c4] ss:$24 sps:$4 sm:$0xff]   ;;  %v17595_v46 = vcombine.high %v402_v40, %v414_v42  ;;  %v20289_v53 = vld [vmem:[#allocation8 + $0x18f4] ss:$24 sps:$4 sm:$0xff]   ;;  %v17594_v54 = vcombine.low %v402_v40, %v414_v42 }
 0x5bf   :  { %v426_v34 = vld [vmem:[#allocation5 + $0xa18] sm:$0xff]  ;;  %v20301_v42 = vld [vmem:[#allocation8 + $0x19b4] ss:$24 sps:$4 sm:$0xff]  }
 0x5c0   :  { %8575 = vmatpush1.bf16.msra.mxu1 %v17474_v51  ;;  %16038 = vmatprep.mubr.bf16.mxu0 %v22052_v60  ;;  %v438_v45 = vld [vmem:[#allocation5 + $0xa78] sm:$0xff] }
 0x5c1   :  { %16039 = vmatmul.mubr.bf16.vlgmr.msra.gmra.mrb[16].mxu0 %v22050_v52  ;;  %8576 = vmatprep.subr.bf16.mxu1 %v17499_v57  ;;  %v17619_v51 = vcombine.high %v426_v34, %v438_v45  ;;  %v20287_v57 = vld [vmem:[#allocation8 + $0x18f0] ss:$24 sps:$4 sm:$0xff]   ;;  %v462_v0 = vld [vmem:[#allocation5 + $0xb38] sm:$0xff] }
 0x5c2   :  { %16050 = vmatpush1.bf16.msra.mxu0 %v20272_v62  ;;  %16081 = vmatprep.mubr.bf16.mxu0 %v21985_v38  ;;  %v450_v62 = vld [vmem:[#allocation5 + $0xad8] sm:$0xff] }
 0x5c3   :  { %16051 = vmatprep.subr.bf16.mxu0 %v20277_v7  ;;  %v20292_v4 = vld [vmem:[#allocation8 + $0x1924] ss:$24 sps:$4 sm:$0xff]   ;;  %v17618_v7 = vcombine.low %v426_v34, %v438_v45 }
 0x5c4   :  { %8577 = vmatpush1.bf16.msra.mxu1 %v17498_v58  ;;  %v17643_v58 = vcombine.high %v450_v62, %v462_v0  ;;  %v486_v10 = vld [vmem:[#allocation5 + $0xbf8] sm:$0xff] }
 0x5c5   :  { %8578 = vmatprep.subr.bf16.mxu1 %v17523_v8  ;;  %v20290_v8 = vld [vmem:[#allocation8 + $0x1920] ss:$24 sps:$4 sm:$0xff]   ;;  %v20298_v26 = vld [vmem:[#allocation8 + $0x1984] ss:$24 sps:$4 sm:$0xff]  }
 0x5c6   :  { %16052 = vmatpush1.bf16.msra.mxu0 %v20275_v9  ;;  %v474_v9 = vld [vmem:[#allocation5 + $0xb98] sm:$0xff] }
 0x5c7   :  { %16053 = vmatprep.subr.bf16.mxu0 %v20280_v16  ;;  %v17642_v16 = vcombine.low %v450_v62, %v462_v0  ;;  %v510_v27 = vld [vmem:[#allocation5 + $0xcb8] sm:$0xff]  ;;  %v20307_v0 = vld [vmem:[#allocation8 + $0x1a14] ss:$24 sps:$4 sm:$0xff]  }
 0x5c8   :  { %8579 = vmatpush1.bf16.msra.mxu1 %v17522_v18  ;;  %v17667_v18 = vcombine.high %v474_v9, %v486_v10  ;;  %v534_v40 = vld [vmem:[#allocation5 + $0xd78] sm:$0xff] }
 0x5c9   :  { %8580 = vmatprep.subr.bf16.mxu1 %v17547_v19  ;;  %v20293_v19 = vld [vmem:[#allocation8 + $0x1950] ss:$24 sps:$4 sm:$0xff]   ;;  %v558_v34 = vld [vmem:[#allocation5 + $0xe38] sm:$0xff] }
 0x5ca   :  { %16054 = vmatpush1.bf16.msra.mxu0 %v20278_v20  ;;  %v498_v20 = vld [vmem:[#allocation5 + $0xc58] sm:$0xff] }
 0x5cb   :  { %16055 = vmatprep.subr.bf16.mxu0 %v20283_v31  ;;  %v17666_v31 = vcombine.low %v474_v9, %v486_v10  ;;  %v20304_v45 = vld [vmem:[#allocation8 + $0x19e4] ss:$24 sps:$4 sm:$0xff]  }
 0x5cc   :  { %8581 = vmatpush1.bf16.msra.mxu1 %v17546_v32  ;;  %v17691_v32 = vcombine.high %v498_v20, %v510_v27  ;;  %v582_v62 = vld [vmem:[#allocation5 + $0xef8] sm:$0xff] }
 0x5cd   :  { %8582 = vmatprep.subr.bf16.mxu1 %v17571_v35  ;;  %v20296_v35 = vld [vmem:[#allocation8 + $0x1980] ss:$24 sps:$4 sm:$0xff]   ;;  %v20310_v9 = vld [vmem:[#allocation8 + $0x1a44] ss:$24 sps:$4 sm:$0xff]  }
 0x5ce   :  { %16056 = vmatpush1.bf16.msra.mxu0 %v20281_v36  ;;  %v522_v36 = vld [vmem:[#allocation5 + $0xd18] sm:$0xff] }
 0x5cf   :  { %16057 = vmatprep.subr.bf16.mxu0 %v20286_v43  ;;  %v17690_v43 = vcombine.low %v498_v20, %v510_v27 }
 0x5d0   :  { %8583 = vmatpush1.bf16.msra.mxu1 %v17570_v41  ;;  %v17715_v41 = vcombine.high %v522_v36, %v534_v40 }
 0x5d1   :  { %8584 = vmatprep.subr.bf16.mxu1 %v17595_v46  ;;  %v20299_v46 = vld [vmem:[#allocation8 + $0x19b0] ss:$24 sps:$4 sm:$0xff]  }
 0x5d2   :  { %16058 = vmatpush1.bf16.msra.mxu0 %v20284_v49  ;;  %v546_v49 = vld [vmem:[#allocation5 + $0xdd8] sm:$0xff] }
 0x5d3   :  { %16059 = vmatprep.subr.bf16.mxu0 %v20289_v53  ;;  %v17714_v53 = vcombine.low %v522_v36, %v534_v40 }
 0x5d4   :  { %8585 = vmatpush1.bf16.msra.mxu1 %v17594_v54  ;;  %v17739_v54 = vcombine.high %v546_v49, %v558_v34 }
 0x5d5   :  { %8586 = vmatprep.subr.bf16.mxu1 %v17619_v51  ;;  %v20302_v51 = vld [vmem:[#allocation8 + $0x19e0] ss:$24 sps:$4 sm:$0xff]  }
 0x5d6   :  { %16060 = vmatpush1.bf16.msra.mxu0 %v20287_v57  ;;  %v570_v57 = vld [vmem:[#allocation5 + $0xe98] sm:$0xff] }
 0x5d7   :  { %16061 = vmatprep.subr.bf16.mxu0 %v20292_v4  ;;  %v17738_v4 = vcombine.low %v546_v49, %v558_v34 }
 0x5d8   :  { %8587 = vmatpush1.bf16.msra.mxu1 %v17618_v7  ;;  %v17763_v7 = vcombine.high %v570_v57, %v582_v62 }
 0x5d9   :  { %8588 = vmatprep.subr.bf16.mxu1 %v17643_v58  ;;  %v594_v58 = vld [vmem:[#allocation5 + $0xf58] sm:$0xff] }
 0x5da   :  { %16062 = vmatpush1.bf16.msra.mxu0 %v20290_v8  ;;  %v606_v8 = vld [vmem:[#allocation5 + $0xfb8] sm:$0xff] }
 0x5db   :  { %16063 = vmatprep.subr.bf16.mxu0 %v20295_v12  ;;  %v17787_v10 = vcombine.high %v594_v58, %v606_v8  ;;  %v20308_v12 = vld [vmem:[#allocation8 + $0x1a40] ss:$24 sps:$4 sm:$0xff]   ;;  %v17786_v20 = vcombine.low %v594_v58, %v606_v8 }
 0x5dc   :  { %8589 = vmatpush1.bf16.msra.mxu1 %v17642_v16  ;;  %v618_v16 = vld [vmem:[#allocation5 + $0x1018] sm:$0xff] }
 0x5dd   :  { %8590 = vmatprep.subr.bf16.mxu1 %v17667_v18  ;;  %v630_v18 = vld [vmem:[#allocation5 + $0x1078] sm:$0xff] }
 0x5de   :  { %16064 = vmatpush1.bf16.msra.mxu0 %v20293_v19  ;;  %v20313_v19 = vld [vmem:[#allocation8 + $0x1a74] ss:$24 sps:$4 sm:$0xff]   ;;  %v17811_v27 = vcombine.high %v618_v16, %v630_v18  ;;  %v17810_v36 = vcombine.low %v618_v16, %v630_v18 }
 0x5df   :  { %16065 = vmatprep.subr.bf16.mxu0 %v20298_v26  ;;  %v20311_v26 = vld [vmem:[#allocation8 + $0x1a70] ss:$24 sps:$4 sm:$0xff]  }
 0x5e0   :  { %8591 = vmatpush1.bf16.msra.mxu1 %v17666_v31  ;;  %v642_v31 = vld [vmem:[#allocation5 + $0x10d8] sm:$0xff] }
 0x5e1   :  { %8603 = vmatprep.subr.bf16.mxu1 %v17691_v32  ;;  %v654_v32 = vld [vmem:[#allocation5 + $0x1138] sm:$0xff] }
 0x5e2   :  { %16066 = vmatpush1.bf16.msra.mxu0 %v20296_v35  ;;  %v20316_v35 = vld [vmem:[#allocation8 + $0x1aa4] ss:$24 sps:$4 sm:$0xff]   ;;  %v17835_v40 = vcombine.high %v642_v31, %v654_v32  ;;  %v17834_v49 = vcombine.low %v642_v31, %v654_v32 }
 0x5e3   :  { %8593 = vmatmul.mubr.bf16.vlgmr.msra.gmra.mrb[28].mxu1 %v21873_v15  ;;  %16067 = vmatprep.subr.bf16.mxu0 %v20301_v42  ;;  %v20305_v15 = vld [vmem:[#allocation8 + $0x1a10] ss:$24 sps:$4 sm:$0xff]   ;;  %v20314_v42 = vld [vmem:[#allocation8 + $0x1aa0] ss:$24 sps:$4 sm:$0xff]  }
 0x5e4   :  { %8604 = vmatpush1.bf16.msra.mxu1 %v17690_v43  ;;  %8635 = vmatprep.mubr.bf16.mxu1 %v21875_v25  ;;  %v17762_v25 = vcombine.low %v570_v57, %v582_v62  ;;  %v666_v43 = vld [vmem:[#allocation5 + $0x1198] sm:$0xff] }
 0x5e5   :  { %8605 = vmatprep.subr.bf16.mxu1 %v17715_v41  ;;  %v678_v41 = vld [vmem:[#allocation5 + $0x11f8] sm:$0xff] }
 0x5e6   :  { %16068 = vmatpush1.bf16.msra.mxu0 %v20299_v46  ;;  %v20319_v46 = vld [vmem:[#allocation8 + $0x1ad4] ss:$24 sps:$4 sm:$0xff]   ;;  %v17859_v34 = vcombine.high %v666_v43, %v678_v41  ;;  %v17858_v57 = vcombine.low %v666_v43, %v678_v41 }
 0x5e7   :  { %16069 = vmatprep.subr.bf16.mxu0 %v20304_v45  ;;  %v20317_v45 = vld [vmem:[#allocation8 + $0x1ad0] ss:$24 sps:$4 sm:$0xff]  }
 0x5e8   :  { %8606 = vmatpush1.bf16.msra.mxu1 %v17714_v53  ;;  %v690_v53 = vld [vmem:[#allocation5 + $0x1258] sm:$0xff] }
 0x5e9   :  { %8607 = vmatprep.subr.bf16.mxu1 %v17739_v54  ;;  %v702_v54 = vld [vmem:[#allocation5 + $0x12b8] sm:$0xff] }
 0x5ea   :  { %16070 = vmatpush1.bf16.msra.mxu0 %v20302_v51  ;;  %v20322_v51 = vld [vmem:[#allocation8 + $0x1b04] ss:$24 sps:$4 sm:$0xff]   ;;  %v17883_v62 = vcombine.high %v690_v53, %v702_v54  ;;  %v17882_v58 = vcombine.low %v690_v53, %v702_v54 }
 0x5eb   :  { %16071 = vmatprep.subr.bf16.mxu0 %v20307_v0  ;;  %v714_v0 = vld [vmem:[#allocation5 + $0x1318] sm:$0xff] }
 0x5ec   :  { %8608 = vmatpush1.bf16.msra.mxu1 %v17738_v4  ;;  %v726_v4 = vld [vmem:[#allocation5 + $0x1378] sm:$0xff] }
 0x5ed   :  { %8609 = vmatprep.subr.bf16.mxu1 %v17763_v7  ;;  %v20320_v7 = vld [vmem:[#allocation8 + $0x1b00] ss:$24 sps:$4 sm:$0xff]   ;;  %v17907_v8 = vcombine.high %v714_v0, %v726_v4  ;;  %v17906_v16 = vcombine.low %v714_v0, %v726_v4  ;;  %v20340_v0 = vld [vmem:[#allocation8 + $0x1c24] ss:$24 sps:$4 sm:$0xff]  }
 0x5ee   :  { %16072 = vmatpush1.bf16.msra.mxu0 %v20305_v15  ;;  %v20325_v15 = vld [vmem:[#allocation8 + $0x1b34] ss:$24 sps:$4 sm:$0xff]  }
 0x5ef   :  { %16073 = vmatprep.subr.bf16.mxu0 %v20310_v9  ;;  %v738_v9 = vld [vmem:[#allocation5 + $0x13d8] sm:$0xff] }
 0x5f0   :  { %8610 = vmatpush1.bf16.msra.mxu1 %v17762_v25  ;;  %v750_v25 = vld [vmem:[#allocation5 + $0x1438] sm:$0xff] }
 0x5f1   :  { %8611 = vmatprep.subr.bf16.mxu1 %v17787_v10  ;;  %v20323_v10 = vld [vmem:[#allocation8 + $0x1b30] ss:$24 sps:$4 sm:$0xff]   ;;  %v17931_v18 = vcombine.high %v738_v9, %v750_v25  ;;  %v17930_v31 = vcombine.low %v738_v9, %v750_v25  ;;  %v20343_v9 = vld [vmem:[#allocation8 + $0x1c54] ss:$24 sps:$4 sm:$0xff]  }
 0x5f2   :  { %16074 = vmatpush1.bf16.msra.mxu0 %v20308_v12  ;;  %v20328_v12 = vld [vmem:[#allocation8 + $0x1b64] ss:$24 sps:$4 sm:$0xff]  }
 0x5f3   :  { %16075 = vmatprep.subr.bf16.mxu0 %v20313_v19  ;;  %v762_v19 = vld [vmem:[#allocation5 + $0x1498] sm:$0xff] }
 0x5f4   :  { %8612 = vmatpush1.bf16.msra.mxu1 %v17786_v20  ;;  %v774_v20 = vld [vmem:[#allocation5 + $0x14f8] sm:$0xff] }
 0x5f5   :  { %8613 = vmatprep.subr.bf16.mxu1 %v17811_v27  ;;  %v20326_v27 = vld [vmem:[#allocation8 + $0x1b60] ss:$24 sps:$4 sm:$0xff]   ;;  %v17955_v32 = vcombine.high %v762_v19, %v774_v20  ;;  %v17954_v43 = vcombine.low %v762_v19, %v774_v20  ;;  %v20346_v19 = vld [vmem:[#allocation8 + $0x1c84] ss:$24 sps:$4 sm:$0xff]  }
 0x5f6   :  { %16076 = vmatpush1.bf16.msra.mxu0 %v20311_v26  ;;  %v20331_v26 = vld [vmem:[#allocation8 + $0x1b94] ss:$24 sps:$4 sm:$0xff]  }
 0x5f7   :  { %16077 = vmatprep.subr.bf16.mxu0 %v20316_v35  ;;  %v786_v35 = vld [vmem:[#allocation5 + $0x1558] sm:$0xff] }
 0x5f8   :  { %8614 = vmatpush1.bf16.msra.mxu1 %v17810_v36  ;;  %v798_v36 = vld [vmem:[#allocation5 + $0x15b8] sm:$0xff] }
 0x5f9   :  { %8615 = vmatprep.subr.bf16.mxu1 %v17835_v40  ;;  %v20329_v40 = vld [vmem:[#allocation8 + $0x1b90] ss:$24 sps:$4 sm:$0xff]   ;;  %v17979_v41 = vcombine.high %v786_v35, %v798_v36  ;;  %v17978_v53 = vcombine.low %v786_v35, %v798_v36  ;;  %v20352_v35 = vld [vmem:[#allocation8 + $0x1cb4] ss:$24 sps:$4 sm:$0xff]  }
 0x5fa   :  { %16078 = vmatpush1.bf16.msra.mxu0 %v20314_v42  ;;  %v20334_v42 = vld [vmem:[#allocation8 + $0x1bc4] ss:$24 sps:$4 sm:$0xff]  }
 0x5fb   :  { %16079 = vmatprep.subr.bf16.mxu0 %v20319_v46  ;;  %v810_v46 = vld [vmem:[#allocation5 + $0x1618] sm:$0xff] }
 0x5fc   :  { %8616 = vmatpush1.bf16.msra.mxu1 %v17834_v49  ;;  %v822_v49 = vld [vmem:[#allocation5 + $0x1678] sm:$0xff] }
 0x5fd   :  { %8617 = vmatprep.subr.bf16.mxu1 %v17859_v34  ;;  %v20332_v34 = vld [vmem:[#allocation8 + $0x1bc0] ss:$24 sps:$4 sm:$0xff]   ;;  %v18003_v54 = vcombine.high %v810_v46, %v822_v49  ;;  %v18002_v4 = vcombine.low %v810_v46, %v822_v49  ;;  %v20358_v46 = vld [vmem:[#allocation8 + $0x1ce4] ss:$24 sps:$4 sm:$0xff]  }
 0x5fe   :  { %16080 = vmatpush1.bf16.msra.mxu0 %v20317_v45  ;;  %v20337_v45 = vld [vmem:[#allocation8 + $0x1bf4] ss:$24 sps:$4 sm:$0xff]  }
 0x5ff   :  { %16092 = vmatprep.subr.bf16.mxu0 %v20322_v51  ;;  %v834_v51 = vld [vmem:[#allocation5 + $0x16d8] sm:$0xff] }
 0x600   :  { %8618 = vmatpush1.bf16.msra.mxu1 %v17858_v57  ;;  %v846_v57 = vld [vmem:[#allocation5 + $0x1738] sm:$0xff] }
 0x601   :  { %16082 = vmatmul.mubr.bf16.vlgmr.msra.gmra.mrb[16].mxu0 %v21983_v37  ;;  %8619 = vmatprep.subr.bf16.mxu1 %v17883_v62  ;;  %v20335_v62 = vld [vmem:[#allocation8 + $0x1bf0] ss:$24 sps:$4 sm:$0xff]   ;;  %v18026_v25 = vcombine.low %v834_v51, %v846_v57 }
 0x602   :  { %16093 = vmatpush1.bf16.msra.mxu0 %v20320_v7  ;;  %v18027_v7 = vcombine.high %v834_v51, %v846_v57  ;;  %v20364_v51 = vld [vmem:[#allocation8 + $0x1d14] ss:$24 sps:$4 sm:$0xff]  }
 0x603   :  { %16094 = vmatprep.subr.bf16.mxu0 %v20325_v15  ;;  %v858_v15 = vld [vmem:[#allocation5 + $0x1798] sm:$0xff] }
 0x604   :  { %8620 = vmatpush1.bf16.msra.mxu1 %v17882_v58  ;;  %v870_v58 = vld [vmem:[#allocation5 + $0x17f8] sm:$0xff] }
 0x605   :  { %8621 = vmatprep.subr.bf16.mxu1 %v17907_v8  ;;  %v20338_v8 = vld [vmem:[#allocation8 + $0x1c20] ss:$24 sps:$4 sm:$0xff]   ;;  %v18050_v20 = vcombine.low %v858_v15, %v870_v58 }
 0x606   :  { %16095 = vmatpush1.bf16.msra.mxu0 %v20323_v10  ;;  %v18051_v10 = vcombine.high %v858_v15, %v870_v58  ;;  %v1002_v58 = vld [vmem:[#allocation5 + $0x1c18] sm:$0xff] }
 0x607   :  { %16096 = vmatprep.subr.bf16.mxu0 %v20328_v12  ;;  %v882_v12 = vld [vmem:[#allocation5 + $0x1858] sm:$0xff] }
 0x608   :  { %8622 = vmatpush1.bf16.msra.mxu1 %v17906_v16  ;;  %v894_v16 = vld [vmem:[#allocation5 + $0x18b8] sm:$0xff] }
 0x609   :  { %8623 = vmatprep.subr.bf16.mxu1 %v17931_v18  ;;  %v20341_v18 = vld [vmem:[#allocation8 + $0x1c50] ss:$24 sps:$4 sm:$0xff]   ;;  %v18074_v36 = vcombine.low %v882_v12, %v894_v16 }
 0x60a   :  { %16097 = vmatpush1.bf16.msra.mxu0 %v20326_v27  ;;  %v18075_v27 = vcombine.high %v882_v12, %v894_v16  ;;  %v1026_v16 = vld [vmem:[#allocation5 + $0x1cd8] sm:$0xff] }
 0x60b   :  { %16098 = vmatprep.subr.bf16.mxu0 %v20331_v26  ;;  %v906_v26 = vld [vmem:[#allocation5 + $0x1918] sm:$0xff] }
 0x60c   :  { %8624 = vmatpush1.bf16.msra.mxu1 %v17930_v31  ;;  %v918_v31 = vld [vmem:[#allocation5 + $0x1978] sm:$0xff] }
 0x60d   :  { %8625 = vmatprep.subr.bf16.mxu1 %v17955_v32  ;;  %v20344_v32 = vld [vmem:[#allocation8 + $0x1c80] ss:$24 sps:$4 sm:$0xff]   ;;  %v18098_v49 = vcombine.low %v906_v26, %v918_v31 }
 0x60e   :  { %16099 = vmatpush1.bf16.msra.mxu0 %v20329_v40  ;;  %v18099_v40 = vcombine.high %v906_v26, %v918_v31  ;;  %v1050_v31 = vld [vmem:[#allocation5 + $0x1d98] sm:$0xff] }
 0x60f   :  { %16100 = vmatprep.subr.bf16.mxu0 %v20334_v42  ;;  %v930_v42 = vld [vmem:[#allocation5 + $0x19d8] sm:$0xff] }
 0x610   :  { %8626 = vmatpush1.bf16.msra.mxu1 %v17954_v43  ;;  %v942_v43 = vld [vmem:[#allocation5 + $0x1a38] sm:$0xff] }
 0x611   :  { %8627 = vmatprep.subr.bf16.mxu1 %v17979_v41  ;;  %v20350_v41 = vld [vmem:[#allocation8 + $0x1cb0] ss:$24 sps:$4 sm:$0xff]   ;;  %v18122_v57 = vcombine.low %v930_v42, %v942_v43 }
 0x612   :  { %16101 = vmatpush1.bf16.msra.mxu0 %v20332_v34  ;;  %v18123_v34 = vcombine.high %v930_v42, %v942_v43  ;;  %v1074_v43 = vld [vmem:[#allocation5 + $0x1e58] sm:$0xff] }
 0x613   :  { %16102 = vmatprep.subr.bf16.mxu0 %v20337_v45  ;;  %v954_v45 = vld [vmem:[#allocation5 + $0x1a98] sm:$0xff] }
 0x614   :  { %8628 = vmatpush1.bf16.msra.mxu1 %v17978_v53  ;;  %v966_v53 = vld [vmem:[#allocation5 + $0x1af8] sm:$0xff] }
 0x615   :  { %8629 = vmatprep.subr.bf16.mxu1 %v18003_v54  ;;  %v20356_v54 = vld [vmem:[#allocation8 + $0x1ce0] ss:$24 sps:$4 sm:$0xff]  }
 0x616   :  { %16103 = vmatpush1.bf16.msra.mxu0 %v20335_v62  ;;  %v18147_v62 = vcombine.high %v954_v45, %v966_v53 }
 0x617   :  { %16104 = vmatprep.subr.bf16.mxu0 %v20340_v0  ;;  %v978_v0 = vld [vmem:[#allocation5 + $0x1b58] sm:$0xff] }
 0x618   :  { %8630 = vmatpush1.bf16.msra.mxu1 %v18002_v4  ;;  %v20362_v4 = vld [vmem:[#allocation8 + $0x1d10] ss:$24 sps:$4 sm:$0xff]  }
 0x619   :  { %8631 = vmatprep.subr.bf16.mxu1 %v18027_v7  ;;  %v20370_v7 = vld [vmem:[#allocation8 + $0x1d44] ss:$24 sps:$4 sm:$0xff]  }
 0x61a   :  { %16105 = vmatpush1.bf16.msra.mxu0 %v20338_v8  ;;  %v1014_v8 = vld [vmem:[#allocation5 + $0x1c78] sm:$0xff] }
 0x61b   :  { %16106 = vmatprep.subr.bf16.mxu0 %v20343_v9  ;;  %v20368_v9 = vld [vmem:[#allocation8 + $0x1d40] ss:$24 sps:$4 sm:$0xff]   ;;  %v18195_v12 = vcombine.high %v1002_v58, %v1014_v8 }
 0x61c   :  { %8632 = vmatpush1.bf16.msra.mxu1 %v18026_v25  ;;  %v20376_v25 = vld [vmem:[#allocation8 + $0x1d74] ss:$24 sps:$4 sm:$0xff]  }
 0x61d   :  { %8633 = vmatprep.subr.bf16.mxu1 %v18051_v10 }
 0x61e   :  { %16107 = vmatpush1.bf16.msra.mxu0 %v20341_v18  ;;  %v1038_v18 = vld [vmem:[#allocation5 + $0x1d38] sm:$0xff] }
 0x61f   :  { %16108 = vmatprep.subr.bf16.mxu0 %v20346_v19  ;;  %v20374_v19 = vld [vmem:[#allocation8 + $0x1d70] ss:$24 sps:$4 sm:$0xff]   ;;  %v18219_v26 = vcombine.high %v1026_v16, %v1038_v18 }
 0x620   :  { %8634 = vmatpush1.bf16.msra.mxu1 %v18050_v20  ;;  %v20382_v20 = vld [vmem:[#allocation8 + $0x1da4] ss:$24 sps:$4 sm:$0xff]  }
 0x621   :  { %8646 = vmatprep.subr.bf16.mxu1 %v18075_v27  ;;  %v18194_v27 = vcombine.low %v1002_v58, %v1014_v8  ;;  %v1170_v8 = vld [vmem:[#allocation5 + $0x2158] sm:$0xff] }
 0x622   :  { %16109 = vmatpush1.bf16.msra.mxu0 %v20344_v32  ;;  %v1062_v32 = vld [vmem:[#allocation5 + $0x1df8] sm:$0xff] }
 0x623   :  { %8636 = vmatmul.mubr.bf16.vlgmr.msra.gmra.mrb[28].mxu1 %v21881_v30  ;;  %16110 = vmatprep.subr.bf16.mxu0 %v20352_v35  ;;  %v990_v30 = vld [vmem:[#allocation5 + $0x1bb8] sm:$0xff]  ;;  %v18243_v42 = vcombine.high %v1050_v31, %v1062_v32 }
 0x624   :  { %8647 = vmatpush1.bf16.msra.mxu1 %v18074_v36  ;;  %8678 = vmatprep.mubr.bf16.mxu1 %v21883_v39  ;;  %v18146_v39 = vcombine.low %v954_v45, %v966_v53  ;;  %v18171_v15 = vcombine.high %v978_v0, %v990_v30  ;;  %v18170_v10 = vcombine.low %v978_v0, %v990_v30  ;;  %v20380_v35 = vld [vmem:[#allocation8 + $0x1da0] ss:$24 sps:$4 sm:$0xff]   ;;  %v20388_v36 = vld [vmem:[#allocation8 + $0x1dd4] ss:$24 sps:$4 sm:$0xff]  }
 0x625   :  { %8648 = vmatprep.subr.bf16.mxu1 %v18099_v40  ;;  %v18218_v40 = vcombine.low %v1026_v16, %v1038_v18  ;;  %v1098_v53 = vld [vmem:[#allocation5 + $0x1f18] sm:$0xff] }
 0x626   :  { %16111 = vmatpush1.bf16.msra.mxu0 %v20350_v41  ;;  %v1086_v41 = vld [vmem:[#allocation5 + $0x1eb8] sm:$0xff] }
 0x627   :  { %16112 = vmatprep.subr.bf16.mxu0 %v20358_v46  ;;  %v20386_v46 = vld [vmem:[#allocation8 + $0x1dd0] ss:$24 sps:$4 sm:$0xff]   ;;  %v18267_v45 = vcombine.high %v1074_v43, %v1086_v41  ;;  %v1134_v0 = vld [vmem:[#allocation5 + $0x2038] sm:$0xff] }
 0x628   :  { %8649 = vmatpush1.bf16.msra.mxu1 %v18098_v49  ;;  %v20394_v49 = vld [vmem:[#allocation8 + $0x1e04] ss:$24 sps:$4 sm:$0xff]  }
 0x629   :  { %8650 = vmatprep.subr.bf16.mxu1 %v18123_v34  ;;  %v18242_v34 = vcombine.low %v1050_v31, %v1062_v32  ;;  %v1206_v16 = vld [vmem:[#allocation5 + $0x2278] sm:$0xff] }
 0x62a   :  { %16113 = vmatpush1.bf16.msra.mxu0 %v20356_v54  ;;  %v1110_v54 = vld [vmem:[#allocation5 + $0x1f78] sm:$0xff] }
 0x62b   :  { %16114 = vmatprep.subr.bf16.mxu0 %v20364_v51  ;;  %v18266_v51 = vcombine.low %v1074_v43, %v1086_v41  ;;  %v18290_v30 = vcombine.low %v1098_v53, %v1110_v54  ;;  %v1242_v32 = vld [vmem:[#allocation5 + $0x2398] sm:$0xff] }
 0x62c   :  { %8651 = vmatpush1.bf16.msra.mxu1 %v18122_v57  ;;  %v18291_v57 = vcombine.high %v1098_v53, %v1110_v54  ;;  %v20349_v43 = vld [vmem:[#allocation8 + $0xc] ss:$24 sps:$4 sm:$0xff]   ;;  %v20347_v41 = vld [vmem:[#allocation8 + $0x8] ss:$24 sps:$4 sm:$0xff]   ;;  %v20367_v53 = vld [vmem:[#allocation8 + $0x9c] ss:$24 sps:$4 sm:$0xff]  }
 0x62d   :  { %8652 = vmatprep.subr.bf16.mxu1 %v18147_v62  ;;  %v1122_v62 = vld [vmem:[#allocation5 + $0x1fd8] sm:$0xff]  ;;  %v20365_v54 = vld [vmem:[#allocation8 + $0x98] ss:$24 sps:$4 sm:$0xff]  }
 0x62e   :  { %16115 = vmatpush1.bf16.msra.mxu0 %v20362_v4  ;;  %v18315_v4 = vcombine.high %v1122_v62, %v1134_v0 }
 0x62f   :  { %16116 = vmatprep.subr.bf16.mxu0 %v20370_v7  ;;  %v1146_v7 = vld [vmem:[#allocation5 + $0x2098] sm:$0xff] }
 0x630   :  { %8653 = vmatpush1.bf16.msra.mxu1 %v18146_v39  ;;  %v1158_v39 = vld [vmem:[#allocation5 + $0x20f8] sm:$0xff] }
 0x631   :  { %8654 = vmatprep.subr.bf16.mxu1 %v18171_v15  ;;  %v18314_v15 = vcombine.low %v1122_v62, %v1134_v0  ;;  %v18339_v58 = vcombine.high %v1146_v7, %v1158_v39  ;;  %v20379_v62 = vld [vmem:[#allocation8 + $0xfc] ss:$24 sps:$4 sm:$0xff]  }
 0x632   :  { %16117 = vmatpush1.bf16.msra.mxu0 %v20368_v9  ;;  %v1182_v9 = vld [vmem:[#allocation5 + $0x21b8] sm:$0xff]  ;;  %v22064_v0 = vld [vmem:[#allocation7 + $0x10] sm:$0xff] }
 0x633   :  { %16118 = vmatprep.subr.bf16.mxu0 %v20376_v25  ;;  %v18338_v25 = vcombine.low %v1146_v7, %v1158_v39  ;;  %v18362_v18 = vcombine.low %v1170_v8, %v1182_v9  ;;  %v20385_v7 = vld [vmem:[#allocation8 + $0x12c] ss:$24 sps:$4 sm:$0xff]  }
 0x634   :  { %8655 = vmatpush1.bf16.msra.mxu1 %v18170_v10  ;;  %v18363_v10 = vcombine.high %v1170_v8, %v1182_v9 }
 0x635   :  { %8656 = vmatprep.subr.bf16.mxu1 %v18195_v12  ;;  %v1194_v12 = vld [vmem:[#allocation5 + $0x2218] sm:$0xff] }
 0x636   :  { %16119 = vmatpush1.bf16.msra.mxu0 %v20374_v19  ;;  %v18387_v19 = vcombine.high %v1194_v12, %v1206_v16 }
 0x637   :  { %16120 = vmatprep.subr.bf16.mxu0 %v20382_v20  ;;  %v1218_v20 = vld [vmem:[#allocation5 + $0x22d8] sm:$0xff] }
 0x638   :  { %8657 = vmatpush1.bf16.msra.mxu1 %v18194_v27  ;;  %v1230_v27 = vld [vmem:[#allocation5 + $0x2338] sm:$0xff] }
 0x639   :  { %8658 = vmatprep.subr.bf16.mxu1 %v18219_v26  ;;  %v18386_v26 = vcombine.low %v1194_v12, %v1206_v16  ;;  %v18411_v31 = vcombine.high %v1218_v20, %v1230_v27  ;;  %v20391_v16 = vld [vmem:[#allocation8 + $0x15c] ss:$24 sps:$4 sm:$0xff]  }
 0x63a   :  { %16121 = vmatpush1.bf16.msra.mxu0 %v20380_v35  ;;  %v1254_v35 = vld [vmem:[#allocation5 + $0x23f8] sm:$0xff] }
 0x63b   :  { %16122 = vmatprep.subr.bf16.mxu0 %v20388_v36  ;;  %v18410_v36 = vcombine.low %v1218_v20, %v1230_v27 }
 0x63c   :  { %8659 = vmatpush1.bf16.msra.mxu1 %v18218_v40  ;;  %v18435_v40 = vcombine.high %v1242_v32, %v1254_v35 }
 0x63d   :  { %8660 = vmatprep.subr.bf16.mxu1 %v18243_v42  ;;  %v18434_v42 = vcombine.low %v1242_v32, %v1254_v35  ;;  %v20397_v35 = vld [vmem:[#allocation8 + $0x18c] ss:$24 sps:$4 sm:$0xff]  }
 0x63e   :  { %16123 = vmatpush1.bf16.msra.mxu0 %v20386_v46  ;;  %v20355_v46 = vld [vmem:[#allocation8 + $0x3c] ss:$24 sps:$4 sm:$0xff]  }
 0x63f   :  { %16135 = vmatprep.subr.bf16.mxu0 %v20394_v49  ;;  %v20353_v49 = vld [vmem:[#allocation8 + $0x38] ss:$24 sps:$4 sm:$0xff]  }
 0x640   :  { %8661 = vmatpush1.bf16.msra.mxu1 %v18242_v34  ;;  %v20361_v34 = vld [vmem:[#allocation8 + $0x6c] ss:$24 sps:$4 sm:$0xff]  }
 0x641   :  { %8662 = vmatprep.subr.bf16.mxu1 %v18267_v45  ;;  %v20359_v45 = vld [vmem:[#allocation8 + $0x68] ss:$24 sps:$4 sm:$0xff]  }
 0x644   :  { %8663 = vmatpush1.bf16.msra.mxu1 %v18266_v51  ;;  %v20373_v51 = vld [vmem:[#allocation8 + $0xcc] ss:$24 sps:$4 sm:$0xff]  }
 0x645   :  { %8664 = vmatprep.subr.bf16.mxu1 %v18291_v57  ;;  %v20371_v57 = vld [vmem:[#allocation8 + $0xc8] ss:$24 sps:$4 sm:$0xff]  }
 0x648   :  { %8665 = vmatpush1.bf16.msra.mxu1 %v18290_v30  ;;  %v1340_v30 = vrot.slane %v22064_v0, %v21943_v1 }
 0x649   :  { %8666 = vmatprep.subr.bf16.mxu1 %v18315_v4  ;;  %v20377_v4 = vld [vmem:[#allocation8 + $0xf8] ss:$24 sps:$4 sm:$0xff]  }
 0x64c   :  { %8667 = vmatpush1.bf16.msra.mxu1 %v18314_v15 }
 0x64d   :  { %8668 = vmatprep.subr.bf16.mxu1 %v18339_v58 }
 0x650   :  { %8669 = vmatpush1.bf16.msra.mxu1 %v18338_v25  ;;  %v20383_v25 = vld [vmem:[#allocation8 + $0x128] ss:$24 sps:$4 sm:$0xff]  }
 0x651   :  { %8670 = vmatprep.subr.bf16.mxu1 %v18363_v10 }
 0x654   :  { %8671 = vmatpush1.bf16.msra.mxu1 %v18362_v18 }
 0x655   :  { %8672 = vmatprep.subr.bf16.mxu1 %v18387_v19 }
 0x658   :  { %8673 = vmatpush1.bf16.msra.mxu1 %v18386_v26 }
 0x659   :  { %8674 = vmatprep.subr.bf16.mxu1 %v18411_v31  ;;  %v20389_v31 = vld [vmem:[#allocation8 + $0x158] ss:$24 sps:$4 sm:$0xff]  }
 0x65c   :  { %8675 = vmatpush1.bf16.msra.mxu1 %v18410_v36 }
 0x65d   :  { %8676 = vmatprep.subr.bf16.mxu1 %v18435_v40  ;;  %v20392_v40 = vld [vmem:[#allocation8 + $0x1e00] ss:$24 sps:$4 sm:$0xff]  }
 0x660   :  { %8677 = vmatpush1.bf16.msra.mxu1 %v18434_v42  ;;  %v20400_v42 = vld [vmem:[#allocation8 + $0x1e34] ss:$24 sps:$4 sm:$0xff]  }
 0x661   :  { %16221 = vmatprep.subr.bf16.mxu1 %v20349_v43  ;;  %v20395_v43 = vld [vmem:[#allocation8 + $0x188] ss:$24 sps:$4 sm:$0xff]  }
 0x663   :  { %8679 = vmatmul.mubr.bf16.vlgmr.msra.gmra.mrb[28].mxu1 %v21889_v44  ;;  %v1336_v44 = vrot.slane %v22064_v0, %v21940_v63 }
 0x664   :  { %16222 = vmatpush1.bf16.msra.mxu1 %v20347_v41  ;;  %16253 = vmatprep.mubr.bf16.mxu1 %v21921_v2  ;;  %v20403_v41 = vld [vmem:[#allocation8 + $0x1bc] ss:$24 sps:$4 sm:$0xff]  }
 0x665   :  { %16223 = vmatprep.subr.bf16.mxu1 %v20355_v46  ;;  %v20398_v46 = vld [vmem:[#allocation8 + $0x1e30] ss:$24 sps:$4 sm:$0xff]  }
 0x668   :  { %16224 = vmatpush1.bf16.msra.mxu1 %v20353_v49  ;;  %v20406_v49 = vld [vmem:[#allocation8 + $0x1e64] ss:$24 sps:$4 sm:$0xff]  }
 0x669   :  { %16225 = vmatprep.subr.bf16.mxu1 %v20361_v34  ;;  %v20401_v34 = vld [vmem:[#allocation8 + $0x1b8] ss:$24 sps:$4 sm:$0xff]  }
 0x66c   :  { %16226 = vmatpush1.bf16.msra.mxu1 %v20359_v45  ;;  %v20409_v45 = vld [vmem:[#allocation8 + $0x1ec] ss:$24 sps:$4 sm:$0xff]  }
 0x66d   :  { %16227 = vmatprep.subr.bf16.mxu1 %v20367_v53  ;;  %v20404_v53 = vld [vmem:[#allocation8 + $0x1e60] ss:$24 sps:$4 sm:$0xff]  }
 0x670   :  { %16228 = vmatpush1.bf16.msra.mxu1 %v20365_v54  ;;  %v20412_v54 = vld [vmem:[#allocation8 + $0x1e94] ss:$24 sps:$4 sm:$0xff]  }
 0x671   :  { %16229 = vmatprep.subr.bf16.mxu1 %v20373_v51  ;;  %v20407_v51 = vld [vmem:[#allocation8 + $0x1e8] ss:$24 sps:$4 sm:$0xff]  }
 0x674   :  { %16230 = vmatpush1.bf16.msra.mxu1 %v20371_v57  ;;  %v20415_v57 = vld [vmem:[#allocation8 + $0x21c] ss:$24 sps:$4 sm:$0xff]  }
 0x675   :  { %16231 = vmatprep.subr.bf16.mxu1 %v20379_v62  ;;  %v20410_v62 = vld [vmem:[#allocation8 + $0x1e90] ss:$24 sps:$4 sm:$0xff]  }
 0x676   :  { %v8422_v39 = vpop.f32.mrb[24].mxu1 }
 0x677   :  { %v19624_v15 = vadd.f32 %v8422_v39, %v1336_v44  ;;  %v8424_v58 = vpop.f32.mrb[25].mxu1  ;;  %v20424_v39 = vld [vmem:[#allocation8 + $0x1ef4] ss:$24 sps:$4 sm:$0xff]  }
 0x678   :  { %v19625_v8 = vadd.f32 %v8424_v58, %v1340_v30  ;;  %v8426_v9 = vpop.f32.mrb[26].mxu1  ;;  %16232 = vmatpush1.bf16.msra.mxu1 %v20377_v4  ;;  %v20421_v4 = vld [vmem:[#allocation8 + $0x24c] ss:$24 sps:$4 sm:$0xff]   ;;  %v20427_v58 = vld [vmem:[#allocation8 + $0x27c] ss:$24 sps:$4 sm:$0xff]  }
 0x679   :  { %v19626_v10 = vadd.f32 %v8426_v9, %v1336_v44  ;;  %v8428_v12 = vpop.f32.mrb[27].mxu1  ;;  %16233 = vmatprep.subr.bf16.mxu1 %v20385_v7  ;;  %v8707_v19 = vmax.f32 %v19624_v15, 0.0  ;;  %v20418_v44 = vld [vmem:[#allocation8 + $0x1ec4] ss:$24 sps:$4 sm:$0xff]   ;;  %v20416_v7 = vld [vmem:[#allocation8 + $0x1ec0] ss:$24 sps:$4 sm:$0xff]  }
 0x67a   :  { %v19627_v18 = vadd.f32 %v8428_v12, %v1340_v30  ;;  %v8708_v27 = vmax.f32 %v19625_v8, 0.0  ;;  %v20413_v30 = vld [vmem:[#allocation8 + $0x218] ss:$24 sps:$4 sm:$0xff]   ;;  %v20419_v15 = vld [vmem:[#allocation8 + $0x248] ss:$24 sps:$4 sm:$0xff]  }
 0x67b   :  { %v8731_v20 = vmax.f32 %v19626_v10, 0.0  ;;  %v20422_v8 = vld [vmem:[#allocation8 + $0x1ef0] ss:$24 sps:$4 sm:$0xff]   ;;  %v20430_v9 = vld [vmem:[#allocation8 + $0x1f24] ss:$24 sps:$4 sm:$0xff]  }
 0x67c   :  { %v8732_v26 = vmax.f32 %v19627_v18, 0.0  ;;  %16234 = vmatpush1.bf16.msra.mxu1 %v20383_v25  ;;  %v20425_v25 = vld [vmem:[#allocation8 + $0x278] ss:$24 sps:$4 sm:$0xff]   ;;  %v20433_v10 = vld [vmem:[#allocation8 + $0x2ac] ss:$24 sps:$4 sm:$0xff]  }
 0x67d   :  { %v22070_v32 = vpack.c.bf16 %v8731_v20, %v8707_v19  ;;  %16235 = vmatprep.subr.bf16.mxu1 %v20391_v16  ;;  %v20428_v12 = vld [vmem:[#allocation8 + $0x1f20] ss:$24 sps:$4 sm:$0xff]   ;;  %v20436_v16 = vld [vmem:[#allocation8 + $0x1f54] ss:$24 sps:$4 sm:$0xff]   ;;  %v20434_v20 = vld [vmem:[#allocation8 + $0x1f50] ss:$24 sps:$4 sm:$0xff]  }
 0x67e   :  { %v22072_v36 = vpack.c.bf16 %v8732_v26, %v8708_v27  ;;  %v20431_v18 = vld [vmem:[#allocation8 + $0x2a8] ss:$24 sps:$4 sm:$0xff]   ;;  %v20439_v19 = vld [vmem:[#allocation8 + $0x2dc] ss:$24 sps:$4 sm:$0xff]   ;;  %v20437_v26 = vld [vmem:[#allocation8 + $0x2d8] ss:$24 sps:$4 sm:$0xff]  }
 0x67f   :  { %v20442_v27 = vld [vmem:[#allocation8 + $0x1f84] ss:$24 sps:$4 sm:$0xff]  }
 0x680   :  { %16124 = vmatprep.mubr.bf16.mxu0 %v22072_v36  ;;  %16236 = vmatpush1.bf16.msra.mxu1 %v20389_v31  ;;  %v20445_v31 = vld [vmem:[#allocation8 + $0x30c] ss:$24 sps:$4 sm:$0xff]  }
 0x681   :  { %16125 = vmatmul.mubr.bf16.vlgmr.msra.gmra.mrb[16].mxu0 %v22070_v32  ;;  %16237 = vmatprep.subr.bf16.mxu1 %v20397_v35  ;;  %v20440_v35 = vld [vmem:[#allocation8 + $0x1f80] ss:$24 sps:$4 sm:$0xff]  }
 0x682   :  { %16136 = vmatpush1.bf16.msra.mxu0 %v20392_v40  ;;  %16167 = vmatprep.mubr.bf16.mxu0 %v22014_v47  ;;  %v20448_v40 = vld [vmem:[#allocation8 + $0x1fb4] ss:$24 sps:$4 sm:$0xff]  }
 0x683   :  { %16137 = vmatprep.subr.bf16.mxu0 %v20400_v42  ;;  %v20443_v42 = vld [vmem:[#allocation8 + $0x308] ss:$24 sps:$4 sm:$0xff]  }
 0x684   :  { %16238 = vmatpush1.bf16.msra.mxu1 %v20395_v43  ;;  %v20451_v43 = vld [vmem:[#allocation8 + $0x33c] ss:$24 sps:$4 sm:$0xff]  }
 0x685   :  { %16239 = vmatprep.subr.bf16.mxu1 %v20403_v41  ;;  %v20446_v41 = vld [vmem:[#allocation8 + $0x1fb0] ss:$24 sps:$4 sm:$0xff]  }
 0x686   :  { %16138 = vmatpush1.bf16.msra.mxu0 %v20398_v46  ;;  %v20454_v46 = vld [vmem:[#allocation8 + $0x1fe4] ss:$24 sps:$4 sm:$0xff]  }
 0x687   :  { %16139 = vmatprep.subr.bf16.mxu0 %v20406_v49  ;;  %v20449_v49 = vld [vmem:[#allocation8 + $0x338] ss:$24 sps:$4 sm:$0xff]  }
 0x688   :  { %16240 = vmatpush1.bf16.msra.mxu1 %v20401_v34  ;;  %v20457_v34 = vld [vmem:[#allocation8 + $0x36c] ss:$24 sps:$4 sm:$0xff]  }
 0x689   :  { %16241 = vmatprep.subr.bf16.mxu1 %v20409_v45  ;;  %v20452_v45 = vld [vmem:[#allocation8 + $0x1fe0] ss:$24 sps:$4 sm:$0xff]  }
 0x68a   :  { %16140 = vmatpush1.bf16.msra.mxu0 %v20404_v53  ;;  %v20460_v53 = vld [vmem:[#allocation8 + $0x2014] ss:$24 sps:$4 sm:$0xff]  }
 0x68b   :  { %16141 = vmatprep.subr.bf16.mxu0 %v20412_v54  ;;  %v20455_v54 = vld [vmem:[#allocation8 + $0x368] ss:$24 sps:$4 sm:$0xff]  }
 0x68c   :  { %16242 = vmatpush1.bf16.msra.mxu1 %v20407_v51  ;;  %v20463_v51 = vld [vmem:[#allocation8 + $0x39c] ss:$24 sps:$4 sm:$0xff]  }
 0x68d   :  { %16243 = vmatprep.subr.bf16.mxu1 %v20415_v57  ;;  %v20458_v57 = vld [vmem:[#allocation8 + $0x2010] ss:$24 sps:$4 sm:$0xff]  }
 0x68e   :  { %16142 = vmatpush1.bf16.msra.mxu0 %v20410_v62  ;;  %v20466_v62 = vld [vmem:[#allocation8 + $0x2044] ss:$24 sps:$4 sm:$0xff]  }
 0x68f   :  { %16143 = vmatprep.subr.bf16.mxu0 %v20418_v44  ;;  %v20461_v44 = vld [vmem:[#allocation8 + $0x398] ss:$24 sps:$4 sm:$0xff]  }
 0x690   :  { %16244 = vmatpush1.bf16.msra.mxu1 %v20413_v30  ;;  %v20469_v30 = vld [vmem:[#allocation8 + $0x3cc] ss:$24 sps:$4 sm:$0xff]  }
 0x691   :  { %16245 = vmatprep.subr.bf16.mxu1 %v20421_v4  ;;  %v20464_v4 = vld [vmem:[#allocation8 + $0x2040] ss:$24 sps:$4 sm:$0xff]  }
 0x692   :  { %16144 = vmatpush1.bf16.msra.mxu0 %v20416_v7  ;;  %v20472_v7 = vld [vmem:[#allocation8 + $0x2074] ss:$24 sps:$4 sm:$0xff]  }
 0x693   :  { %16145 = vmatprep.subr.bf16.mxu0 %v20424_v39  ;;  %v20467_v39 = vld [vmem:[#allocation8 + $0x3c8] ss:$24 sps:$4 sm:$0xff]  }
 0x694   :  { %16246 = vmatpush1.bf16.msra.mxu1 %v20419_v15  ;;  %v20475_v15 = vld [vmem:[#allocation8 + $0x3fc] ss:$24 sps:$4 sm:$0xff]  }
 0x695   :  { %16247 = vmatprep.subr.bf16.mxu1 %v20427_v58  ;;  %v20470_v58 = vld [vmem:[#allocation8 + $0x2070] ss:$24 sps:$4 sm:$0xff]  }
 0x696   :  { %16146 = vmatpush1.bf16.msra.mxu0 %v20422_v8  ;;  %v20478_v8 = vld [vmem:[#allocation8 + $0x20a4] ss:$24 sps:$4 sm:$0xff]  }
 0x697   :  { %16147 = vmatprep.subr.bf16.mxu0 %v20430_v9  ;;  %v20473_v9 = vld [vmem:[#allocation8 + $0x3f8] ss:$24 sps:$4 sm:$0xff]  }
 0x698   :  { %16248 = vmatpush1.bf16.msra.mxu1 %v20425_v25  ;;  %v20481_v25 = vld [vmem:[#allocation8 + $0x42c] ss:$24 sps:$4 sm:$0xff]  }
 0x699   :  { %16249 = vmatprep.subr.bf16.mxu1 %v20433_v10  ;;  %v20476_v10 = vld [vmem:[#allocation8 + $0x20a0] ss:$24 sps:$4 sm:$0xff]  }
 0x69a   :  { %16148 = vmatpush1.bf16.msra.mxu0 %v20428_v12  ;;  %v20484_v12 = vld [vmem:[#allocation8 + $0x20d4] ss:$24 sps:$4 sm:$0xff]  }
 0x69b   :  { %16149 = vmatprep.subr.bf16.mxu0 %v20436_v16  ;;  %v20479_v16 = vld [vmem:[#allocation8 + $0x428] ss:$24 sps:$4 sm:$0xff]  }
 0x69c   :  { %16250 = vmatpush1.bf16.msra.mxu1 %v20431_v18  ;;  %v20487_v18 = vld [vmem:[#allocation8 + $0x45c] ss:$24 sps:$4 sm:$0xff]  }
 0x69d   :  { %16251 = vmatprep.subr.bf16.mxu1 %v20439_v19  ;;  %v20482_v19 = vld [vmem:[#allocation8 + $0x20d0] ss:$24 sps:$4 sm:$0xff]  }
 0x69e   :  { %16150 = vmatpush1.bf16.msra.mxu0 %v20434_v20  ;;  %v20538_v20 = vld [vmem:[#allocation8 + $0x2104] ss:$24 sps:$4 sm:$0xff]  }
 0x69f   :  { %16151 = vmatprep.subr.bf16.mxu0 %v20442_v27  ;;  %v20485_v27 = vld [vmem:[#allocation8 + $0x458] ss:$24 sps:$4 sm:$0xff]  }
 0x6a0   :  { %16252 = vmatpush1.bf16.msra.mxu1 %v20437_v26  ;;  %v20490_v26 = vld [vmem:[#allocation8 + $0x48c] ss:$24 sps:$4 sm:$0xff]  }
 0x6a1   :  { %16264 = vmatprep.subr.bf16.mxu1 %v20445_v31  ;;  %v20536_v31 = vld [vmem:[#allocation8 + $0x2100] ss:$24 sps:$4 sm:$0xff]  }
 0x6a2   :  { %16152 = vmatpush1.bf16.msra.mxu0 %v20440_v35  ;;  %v20544_v35 = vld [vmem:[#allocation8 + $0x2134] ss:$24 sps:$4 sm:$0xff]  }
 0x6a3   :  { %16254 = vmatmul.mubr.bf16.vlgmr.msra.gmra.mrb[32].mxu1 %v21919_v56  ;;  %16153 = vmatprep.subr.bf16.mxu0 %v20448_v40  ;;  %v20488_v40 = vld [vmem:[#allocation8 + $0x488] ss:$24 sps:$4 sm:$0xff]  }
 0x6a4   :  { %16265 = vmatpush1.bf16.msra.mxu1 %v20443_v42  ;;  %16296 = vmatprep.mubr.bf16.mxu1 %v21957_v21  ;;  %v20493_v42 = vld [vmem:[#allocation8 + $0x4bc] ss:$24 sps:$4 sm:$0xff]  }
 0x6a5   :  { %16266 = vmatprep.subr.bf16.mxu1 %v20451_v43  ;;  %v20542_v43 = vld [vmem:[#allocation8 + $0x2130] ss:$24 sps:$4 sm:$0xff]  }
 0x6a6   :  { %16154 = vmatpush1.bf16.msra.mxu0 %v20446_v41  ;;  %v20550_v41 = vld [vmem:[#allocation8 + $0x2164] ss:$24 sps:$4 sm:$0xff]  }
 0x6a7   :  { %16155 = vmatprep.subr.bf16.mxu0 %v20454_v46  ;;  %v20491_v46 = vld [vmem:[#allocation8 + $0x4b8] ss:$24 sps:$4 sm:$0xff]  }
 0x6a8   :  { %16267 = vmatpush1.bf16.msra.mxu1 %v20449_v49  ;;  %v20496_v49 = vld [vmem:[#allocation8 + $0x4ec] ss:$24 sps:$4 sm:$0xff]  }
 0x6a9   :  { %16268 = vmatprep.subr.bf16.mxu1 %v20457_v34  ;;  %v20548_v34 = vld [vmem:[#allocation8 + $0x2160] ss:$24 sps:$4 sm:$0xff]  }
 0x6aa   :  { %16156 = vmatpush1.bf16.msra.mxu0 %v20452_v45  ;;  %v20556_v45 = vld [vmem:[#allocation8 + $0x2194] ss:$24 sps:$4 sm:$0xff]  }
 0x6ab   :  { %16157 = vmatprep.subr.bf16.mxu0 %v20460_v53  ;;  %v20494_v53 = vld [vmem:[#allocation8 + $0x4e8] ss:$24 sps:$4 sm:$0xff]  }
 0x6ac   :  { %16269 = vmatpush1.bf16.msra.mxu1 %v20455_v54  ;;  %v20499_v54 = vld [vmem:[#allocation8 + $0x51c] ss:$24 sps:$4 sm:$0xff]  }
 0x6ad   :  { %16270 = vmatprep.subr.bf16.mxu1 %v20463_v51  ;;  %v20554_v51 = vld [vmem:[#allocation8 + $0x2190] ss:$24 sps:$4 sm:$0xff]  }
 0x6ae   :  { %16158 = vmatpush1.bf16.msra.mxu0 %v20458_v57  ;;  %v20562_v57 = vld [vmem:[#allocation8 + $0x21c4] ss:$24 sps:$4 sm:$0xff]  }
 0x6af   :  { %16159 = vmatprep.subr.bf16.mxu0 %v20466_v62  ;;  %v20497_v62 = vld [vmem:[#allocation8 + $0x518] ss:$24 sps:$4 sm:$0xff]  }
 0x6b0   :  { %16271 = vmatpush1.bf16.msra.mxu1 %v20461_v44  ;;  %v20502_v44 = vld [vmem:[#allocation8 + $0x54c] ss:$24 sps:$4 sm:$0xff]  }
 0x6b1   :  { %16272 = vmatprep.subr.bf16.mxu1 %v20469_v30  ;;  %v20560_v30 = vld [vmem:[#allocation8 + $0x21c0] ss:$24 sps:$4 sm:$0xff]  }
 0x6b2   :  { %16160 = vmatpush1.bf16.msra.mxu0 %v20464_v4  ;;  %v20568_v4 = vld [vmem:[#allocation8 + $0x21f4] ss:$24 sps:$4 sm:$0xff]  }
 0x6b3   :  { %16161 = vmatprep.subr.bf16.mxu0 %v20472_v7  ;;  %v20500_v7 = vld [vmem:[#allocation8 + $0x548] ss:$24 sps:$4 sm:$0xff]  }
 0x6b4   :  { %16273 = vmatpush1.bf16.msra.mxu1 %v20467_v39  ;;  %v20505_v39 = vld [vmem:[#allocation8 + $0x57c] ss:$24 sps:$4 sm:$0xff]  }
 0x6b5   :  { %16274 = vmatprep.subr.bf16.mxu1 %v20475_v15  ;;  %v20566_v15 = vld [vmem:[#allocation8 + $0x21f0] ss:$24 sps:$4 sm:$0xff]  }
 0x6b6   :  { %16162 = vmatpush1.bf16.msra.mxu0 %v20470_v58  ;;  %v20574_v58 = vld [vmem:[#allocation8 + $0x2224] ss:$24 sps:$4 sm:$0xff]  }
 0x6b7   :  { %16163 = vmatprep.subr.bf16.mxu0 %v20478_v8  ;;  %v20503_v8 = vld [vmem:[#allocation8 + $0x578] ss:$24 sps:$4 sm:$0xff]  }
 0x6b8   :  { %16275 = vmatpush1.bf16.msra.mxu1 %v20473_v9  ;;  %v20508_v9 = vld [vmem:[#allocation8 + $0x5ac] ss:$24 sps:$4 sm:$0xff]  }
 0x6b9   :  { %16276 = vmatprep.subr.bf16.mxu1 %v20481_v25  ;;  %v20572_v25 = vld [vmem:[#allocation8 + $0x2220] ss:$24 sps:$4 sm:$0xff]  }
 0x6ba   :  { %16164 = vmatpush1.bf16.msra.mxu0 %v20476_v10  ;;  %v20580_v10 = vld [vmem:[#allocation8 + $0x2254] ss:$24 sps:$4 sm:$0xff]  }
 0x6bb   :  { %16165 = vmatprep.subr.bf16.mxu0 %v20484_v12  ;;  %v20506_v12 = vld [vmem:[#allocation8 + $0x5a8] ss:$24 sps:$4 sm:$0xff]  }
 0x6bc   :  { %16277 = vmatpush1.bf16.msra.mxu1 %v20479_v16  ;;  %v20511_v16 = vld [vmem:[#allocation8 + $0x5dc] ss:$24 sps:$4 sm:$0xff]  }
 0x6bd   :  { %16278 = vmatprep.subr.bf16.mxu1 %v20487_v18  ;;  %v20578_v18 = vld [vmem:[#allocation8 + $0x2250] ss:$24 sps:$4 sm:$0xff]  }
 0x6be   :  { %16166 = vmatpush1.bf16.msra.mxu0 %v20482_v19  ;;  %v20586_v19 = vld [vmem:[#allocation8 + $0x2284] ss:$24 sps:$4 sm:$0xff]  }
 0x6bf   :  { %16178 = vmatprep.subr.bf16.mxu0 %v20538_v20  ;;  %v20509_v20 = vld [vmem:[#allocation8 + $0x5d8] ss:$24 sps:$4 sm:$0xff]  }
 0x6c0   :  { %16279 = vmatpush1.bf16.msra.mxu1 %v20485_v27  ;;  %v20514_v27 = vld [vmem:[#allocation8 + $0x60c] ss:$24 sps:$4 sm:$0xff]  }
 0x6c1   :  { %16168 = vmatmul.mubr.bf16.vlgmr.msra.gmra.mrb[16].mxu0 %v22012_v55  ;;  %16280 = vmatprep.subr.bf16.mxu1 %v20490_v26  ;;  %v20584_v26 = vld [vmem:[#allocation8 + $0x2280] ss:$24 sps:$4 sm:$0xff]  }
 0x6c2   :  { %16179 = vmatpush1.bf16.msra.mxu0 %v20536_v31  ;;  %v20592_v31 = vld [vmem:[#allocation8 + $0x22b4] ss:$24 sps:$4 sm:$0xff]  }
 0x6c3   :  { %16180 = vmatprep.subr.bf16.mxu0 %v20544_v35  ;;  %v20512_v35 = vld [vmem:[#allocation8 + $0x608] ss:$24 sps:$4 sm:$0xff]  }
 0x6c4   :  { %16281 = vmatpush1.bf16.msra.mxu1 %v20488_v40  ;;  %v20517_v40 = vld [vmem:[#allocation8 + $0x63c] ss:$24 sps:$4 sm:$0xff]  }
 0x6c5   :  { %16282 = vmatprep.subr.bf16.mxu1 %v20493_v42  ;;  %v20590_v42 = vld [vmem:[#allocation8 + $0x22b0] ss:$24 sps:$4 sm:$0xff]  }
 0x6c6   :  { %16181 = vmatpush1.bf16.msra.mxu0 %v20542_v43  ;;  %v20598_v43 = vld [vmem:[#allocation8 + $0x22e4] ss:$24 sps:$4 sm:$0xff]  }
 0x6c7   :  { %16182 = vmatprep.subr.bf16.mxu0 %v20550_v41  ;;  %v20515_v41 = vld [vmem:[#allocation8 + $0x638] ss:$24 sps:$4 sm:$0xff]  }
 0x6c8   :  { %16283 = vmatpush1.bf16.msra.mxu1 %v20491_v46  ;;  %v20520_v46 = vld [vmem:[#allocation8 + $0x66c] ss:$24 sps:$4 sm:$0xff]  }
 0x6c9   :  { %16284 = vmatprep.subr.bf16.mxu1 %v20496_v49  ;;  %v20596_v49 = vld [vmem:[#allocation8 + $0x22e0] ss:$24 sps:$4 sm:$0xff]  }
 0x6ca   :  { %16183 = vmatpush1.bf16.msra.mxu0 %v20548_v34  ;;  %v20604_v34 = vld [vmem:[#allocation8 + $0x2314] ss:$24 sps:$4 sm:$0xff]  }
 0x6cb   :  { %16184 = vmatprep.subr.bf16.mxu0 %v20556_v45  ;;  %v20518_v45 = vld [vmem:[#allocation8 + $0x668] ss:$24 sps:$4 sm:$0xff]  }
 0x6cc   :  { %16285 = vmatpush1.bf16.msra.mxu1 %v20494_v53  ;;  %v20523_v53 = vld [vmem:[#allocation8 + $0x69c] ss:$24 sps:$4 sm:$0xff]  }
 0x6cd   :  { %16286 = vmatprep.subr.bf16.mxu1 %v20499_v54  ;;  %v20602_v54 = vld [vmem:[#allocation8 + $0x2310] ss:$24 sps:$4 sm:$0xff]  }
 0x6ce   :  { %16185 = vmatpush1.bf16.msra.mxu0 %v20554_v51  ;;  %v20610_v51 = vld [vmem:[#allocation8 + $0x2344] ss:$24 sps:$4 sm:$0xff]  }
 0x6cf   :  { %16186 = vmatprep.subr.bf16.mxu0 %v20562_v57  ;;  %v20521_v57 = vld [vmem:[#allocation8 + $0x698] ss:$24 sps:$4 sm:$0xff]  }
 0x6d0   :  { %16287 = vmatpush1.bf16.msra.mxu1 %v20497_v62  ;;  %v20526_v62 = vld [vmem:[#allocation8 + $0x6cc] ss:$24 sps:$4 sm:$0xff]  }
 0x6d1   :  { %16288 = vmatprep.subr.bf16.mxu1 %v20502_v44  ;;  %v20608_v44 = vld [vmem:[#allocation8 + $0x2340] ss:$24 sps:$4 sm:$0xff]  }
 0x6d2   :  { %16187 = vmatpush1.bf16.msra.mxu0 %v20560_v30  ;;  %v20616_v30 = vld [vmem:[#allocation8 + $0x2374] ss:$24 sps:$4 sm:$0xff]  }
 0x6d3   :  { %16188 = vmatprep.subr.bf16.mxu0 %v20568_v4  ;;  %v20524_v4 = vld [vmem:[#allocation8 + $0x6c8] ss:$24 sps:$4 sm:$0xff]  }
 0x6d4   :  { %16289 = vmatpush1.bf16.msra.mxu1 %v20500_v7  ;;  %v20529_v7 = vld [vmem:[#allocation8 + $0x6fc] ss:$24 sps:$4 sm:$0xff]  }
 0x6d5   :  { %16290 = vmatprep.subr.bf16.mxu1 %v20505_v39  ;;  %v20614_v39 = vld [vmem:[#allocation8 + $0x2370] ss:$24 sps:$4 sm:$0xff]  }
 0x6d6   :  { %16189 = vmatpush1.bf16.msra.mxu0 %v20566_v15  ;;  %v20622_v15 = vld [vmem:[#allocation8 + $0x23a4] ss:$24 sps:$4 sm:$0xff]  }
 0x6d7   :  { %16190 = vmatprep.subr.bf16.mxu0 %v20574_v58  ;;  %v20527_v58 = vld [vmem:[#allocation8 + $0x6f8] ss:$24 sps:$4 sm:$0xff]  }
 0x6d8   :  { %16291 = vmatpush1.bf16.msra.mxu1 %v20503_v8  ;;  %v20532_v8 = vld [vmem:[#allocation8 + $0x72c] ss:$24 sps:$4 sm:$0xff]  }
 0x6d9   :  { %16292 = vmatprep.subr.bf16.mxu1 %v20508_v9  ;;  %v20620_v9 = vld [vmem:[#allocation8 + $0x23a0] ss:$24 sps:$4 sm:$0xff]  }
 0x6da   :  { %16191 = vmatpush1.bf16.msra.mxu0 %v20572_v25  ;;  %v20628_v25 = vld [vmem:[#allocation8 + $0x23d4] ss:$24 sps:$4 sm:$0xff]  }
 0x6db   :  { %16192 = vmatprep.subr.bf16.mxu0 %v20580_v10  ;;  %v20530_v10 = vld [vmem:[#allocation8 + $0x728] ss:$24 sps:$4 sm:$0xff]  }
 0x6dc   :  { %16293 = vmatpush1.bf16.msra.mxu1 %v20506_v12  ;;  %v20535_v12 = vld [vmem:[#allocation8 + $0x75c] ss:$24 sps:$4 sm:$0xff]  }
 0x6dd   :  { %16294 = vmatprep.subr.bf16.mxu1 %v20511_v16  ;;  %v20626_v16 = vld [vmem:[#allocation8 + $0x23d0] ss:$24 sps:$4 sm:$0xff]  }
 0x6de   :  { %16193 = vmatpush1.bf16.msra.mxu0 %v20578_v18  ;;  %v20634_v18 = vld [vmem:[#allocation8 + $0x14] ss:$24 sps:$4 sm:$0xff]  }
 0x6df   :  { %16194 = vmatprep.subr.bf16.mxu0 %v20586_v19  ;;  %v20533_v19 = vld [vmem:[#allocation8 + $0x758] ss:$24 sps:$4 sm:$0xff]  }
 0x6e0   :  { %16295 = vmatpush1.bf16.msra.mxu1 %v20509_v20  ;;  %v20541_v20 = vld [vmem:[#allocation8 + $0x78c] ss:$24 sps:$4 sm:$0xff]  }
 0x6e1   :  { %16307 = vmatprep.subr.bf16.mxu1 %v20514_v27  ;;  %v20539_v27 = vld [vmem:[#allocation8 + $0x788] ss:$24 sps:$4 sm:$0xff]  }
 0x6e2   :  { %16195 = vmatpush1.bf16.msra.mxu0 %v20584_v26  ;;  %v20547_v26 = vld [vmem:[#allocation8 + $0x7bc] ss:$24 sps:$4 sm:$0xff]  }
 0x6e3   :  { %16297 = vmatmul.mubr.bf16.vlgmr.msra.gmra.mrb[32].mxu1 %v21955_v13  ;;  %16196 = vmatprep.subr.bf16.mxu0 %v20592_v31  ;;  %v20545_v31 = vld [vmem:[#allocation8 + $0x7b8] ss:$24 sps:$4 sm:$0xff]  }
 0x6e4   :  { %16308 = vmatpush1.bf16.msra.mxu1 %v20512_v35  ;;  %16339 = vmatprep.mubr.bf16.mxu1 %v21981_v33  ;;  %v20553_v35 = vld [vmem:[#allocation8 + $0x7ec] ss:$24 sps:$4 sm:$0xff]  }
 0x6e5   :  { %16309 = vmatprep.subr.bf16.mxu1 %v20517_v40  ;;  %v20551_v40 = vld [vmem:[#allocation8 + $0x7e8] ss:$24 sps:$4 sm:$0xff]  }
 0x6e6   :  { %16197 = vmatpush1.bf16.msra.mxu0 %v20590_v42  ;;  %v20559_v42 = vld [vmem:[#allocation8 + $0x81c] ss:$24 sps:$4 sm:$0xff]  }
 0x6e7   :  { %16198 = vmatprep.subr.bf16.mxu0 %v20598_v43  ;;  %v20557_v43 = vld [vmem:[#allocation8 + $0x818] ss:$24 sps:$4 sm:$0xff]  }
 0x6e8   :  { %16310 = vmatpush1.bf16.msra.mxu1 %v20515_v41  ;;  %v20565_v41 = vld [vmem:[#allocation8 + $0x84c] ss:$24 sps:$4 sm:$0xff]  }
 0x6e9   :  { %16311 = vmatprep.subr.bf16.mxu1 %v20520_v46  ;;  %v20563_v46 = vld [vmem:[#allocation8 + $0x848] ss:$24 sps:$4 sm:$0xff]  }
 0x6ea   :  { %16199 = vmatpush1.bf16.msra.mxu0 %v20596_v49  ;;  %v20571_v49 = vld [vmem:[#allocation8 + $0x87c] ss:$24 sps:$4 sm:$0xff]  }
 0x6eb   :  { %16200 = vmatprep.subr.bf16.mxu0 %v20604_v34  ;;  %v20569_v34 = vld [vmem:[#allocation8 + $0x878] ss:$24 sps:$4 sm:$0xff]  }
 0x6ec   :  { %16312 = vmatpush1.bf16.msra.mxu1 %v20518_v45  ;;  %v20577_v45 = vld [vmem:[#allocation8 + $0x8ac] ss:$24 sps:$4 sm:$0xff]  }
 0x6ed   :  { %16313 = vmatprep.subr.bf16.mxu1 %v20523_v53  ;;  %v20575_v53 = vld [vmem:[#allocation8 + $0x8a8] ss:$24 sps:$4 sm:$0xff]  }
 0x6ee   :  { %16201 = vmatpush1.bf16.msra.mxu0 %v20602_v54  ;;  %v20583_v54 = vld [vmem:[#allocation8 + $0x8dc] ss:$24 sps:$4 sm:$0xff]  }
 0x6ef   :  { %16202 = vmatprep.subr.bf16.mxu0 %v20610_v51  ;;  %v20581_v51 = vld [vmem:[#allocation8 + $0x8d8] ss:$24 sps:$4 sm:$0xff]  }
 0x6f0   :  { %16314 = vmatpush1.bf16.msra.mxu1 %v20521_v57  ;;  %v20589_v57 = vld [vmem:[#allocation8 + $0x90c] ss:$24 sps:$4 sm:$0xff]  }
 0x6f1   :  { %16315 = vmatprep.subr.bf16.mxu1 %v20526_v62  ;;  %v20587_v62 = vld [vmem:[#allocation8 + $0x908] ss:$24 sps:$4 sm:$0xff]  }
 0x6f2   :  { %16203 = vmatpush1.bf16.msra.mxu0 %v20608_v44  ;;  %v20595_v44 = vld [vmem:[#allocation8 + $0x93c] ss:$24 sps:$4 sm:$0xff]  }
 0x6f3   :  { %16204 = vmatprep.subr.bf16.mxu0 %v20616_v30  ;;  %v20593_v30 = vld [vmem:[#allocation8 + $0x938] ss:$24 sps:$4 sm:$0xff]  }
 0x6f4   :  { %16316 = vmatpush1.bf16.msra.mxu1 %v20524_v4  ;;  %v20601_v4 = vld [vmem:[#allocation8 + $0x96c] ss:$24 sps:$4 sm:$0xff]  }
 0x6f5   :  { %16317 = vmatprep.subr.bf16.mxu1 %v20529_v7  ;;  %v20599_v7 = vld [vmem:[#allocation8 + $0x968] ss:$24 sps:$4 sm:$0xff]  }
 0x6f6   :  { %16205 = vmatpush1.bf16.msra.mxu0 %v20614_v39  ;;  %v20607_v39 = vld [vmem:[#allocation8 + $0x99c] ss:$24 sps:$4 sm:$0xff]  }
 0x6f7   :  { %16206 = vmatprep.subr.bf16.mxu0 %v20622_v15  ;;  %v20605_v15 = vld [vmem:[#allocation8 + $0x998] ss:$24 sps:$4 sm:$0xff]  }
 0x6f8   :  { %16318 = vmatpush1.bf16.msra.mxu1 %v20527_v58  ;;  %v20613_v58 = vld [vmem:[#allocation8 + $0x9cc] ss:$24 sps:$4 sm:$0xff]  }
 0x6f9   :  { %16319 = vmatprep.subr.bf16.mxu1 %v20532_v8  ;;  %v20611_v8 = vld [vmem:[#allocation8 + $0x9c8] ss:$24 sps:$4 sm:$0xff]  }
 0x6fa   :  { %16207 = vmatpush1.bf16.msra.mxu0 %v20620_v9  ;;  %v20619_v9 = vld [vmem:[#allocation8 + $0x9fc] ss:$24 sps:$4 sm:$0xff]  }
 0x6fb   :  { %16208 = vmatprep.subr.bf16.mxu0 %v20628_v25  ;;  %v1352_v25 = vrot.slane %v22064_v0, %v21999_v22 }
 0x6fc   :  { %16320 = vmatpush1.bf16.msra.mxu1 %v20530_v10  ;;  %v1356_v10 = vrot.slane %v22064_v0, %v22002_v23  ;;  %v20629_v23 = vld [vmem:[#allocation8 + $0xa58] ss:$24 sps:$4 sm:$0xff]  }
 0x6fd   :  { %16321 = vmatprep.subr.bf16.mxu1 %v20535_v12  ;;  %v20617_v12 = vld [vmem:[#allocation8 + $0x9f8] ss:$24 sps:$4 sm:$0xff]  }
 0x6fe   :  { %16209 = vmatpush1.bf16.msra.mxu0 %v20626_v16  ;;  %v20625_v16 = vld [vmem:[#allocation8 + $0xa2c] ss:$24 sps:$4 sm:$0xff]  }
 0x6ff   :  { %16737 = vmatprep.subr.bf16.mxu0 %v20634_v18 }
 0x700   :  { %16322 = vmatpush1.bf16.msra.mxu1 %v20533_v19 }
 0x701   :  { %16323 = vmatprep.subr.bf16.mxu1 %v20541_v20 }
 0x704   :  { %16324 = vmatpush1.bf16.msra.mxu1 %v20539_v27 }
 0x705   :  { %16325 = vmatprep.subr.bf16.mxu1 %v20547_v26 }
 0x708   :  { %16326 = vmatpush1.bf16.msra.mxu1 %v20545_v31  ;;  %v20623_v31 = vld [vmem:[#allocation8 + $0xa28] ss:$24 sps:$4 sm:$0xff]  }
 0x709   :  { %16327 = vmatprep.subr.bf16.mxu1 %v20553_v35 }
 0x70c   :  { %16328 = vmatpush1.bf16.msra.mxu1 %v20551_v40 }
 0x70d   :  { %16329 = vmatprep.subr.bf16.mxu1 %v20559_v42  ;;  %v20631_v42 = vld [vmem:[#allocation8 + $0xa5c] ss:$24 sps:$4 sm:$0xff]  }
 0x710   :  { %16330 = vmatpush1.bf16.msra.mxu1 %v20557_v43 }
 0x711   :  { %16331 = vmatprep.subr.bf16.mxu1 %v20565_v41 }
 0x714   :  { %16332 = vmatpush1.bf16.msra.mxu1 %v20563_v46 }
 0x715   :  { %16333 = vmatprep.subr.bf16.mxu1 %v20571_v49 }
 0x718   :  { %16334 = vmatpush1.bf16.msra.mxu1 %v20569_v34  ;;  %v20637_v34 = vld [vmem:[#allocation8 + $0xa8c] ss:$24 sps:$4 sm:$0xff]  }
 0x719   :  { %16335 = vmatprep.subr.bf16.mxu1 %v20577_v45 }
 0x71c   :  { %16336 = vmatpush1.bf16.msra.mxu1 %v20575_v53  ;;  %v20632_v53 = vld [vmem:[#allocation8 + $0x10] ss:$24 sps:$4 sm:$0xff]  }
 0x71d   :  { %16337 = vmatprep.subr.bf16.mxu1 %v20583_v54  ;;  %v20640_v54 = vld [vmem:[#allocation8 + $0x44] ss:$24 sps:$4 sm:$0xff]  }
 0x720   :  { %16338 = vmatpush1.bf16.msra.mxu1 %v20581_v51  ;;  %v20635_v51 = vld [vmem:[#allocation8 + $0xa88] ss:$24 sps:$4 sm:$0xff]  }
 0x721   :  { %16350 = vmatprep.subr.bf16.mxu1 %v20589_v57  ;;  %v20643_v57 = vld [vmem:[#allocation8 + $0xabc] ss:$24 sps:$4 sm:$0xff]  }
 0x723   :  { %16340 = vmatmul.mubr.bf16.vlgmr.msra.gmra.mrb[32].mxu1 %v21979_v24 }
 0x724   :  { %16351 = vmatpush1.bf16.msra.mxu1 %v20587_v62  ;;  %16382 = vmatprep.mubr.bf16.mxu1 %v22010_v50  ;;  %v20638_v62 = vld [vmem:[#allocation8 + $0x40] ss:$24 sps:$4 sm:$0xff]  }
 0x725   :  { %16352 = vmatprep.subr.bf16.mxu1 %v20595_v44  ;;  %v20646_v44 = vld [vmem:[#allocation8 + $0x74] ss:$24 sps:$4 sm:$0xff]  }
 0x728   :  { %16353 = vmatpush1.bf16.msra.mxu1 %v20593_v30  ;;  %v20641_v30 = vld [vmem:[#allocation8 + $0xab8] ss:$24 sps:$4 sm:$0xff]  }
 0x729   :  { %16354 = vmatprep.subr.bf16.mxu1 %v20601_v4  ;;  %v20649_v4 = vld [vmem:[#allocation8 + $0xaec] ss:$24 sps:$4 sm:$0xff]  }
 0x72c   :  { %16355 = vmatpush1.bf16.msra.mxu1 %v20599_v7  ;;  %v20644_v7 = vld [vmem:[#allocation8 + $0x70] ss:$24 sps:$4 sm:$0xff]  }
 0x72d   :  { %16356 = vmatprep.subr.bf16.mxu1 %v20607_v39  ;;  %v20652_v39 = vld [vmem:[#allocation8 + $0xa4] ss:$24 sps:$4 sm:$0xff]  }
 0x730   :  { %16357 = vmatpush1.bf16.msra.mxu1 %v20605_v15  ;;  %v20647_v15 = vld [vmem:[#allocation8 + $0xae8] ss:$24 sps:$4 sm:$0xff]  }
 0x731   :  { %16358 = vmatprep.subr.bf16.mxu1 %v20613_v58  ;;  %v20655_v58 = vld [vmem:[#allocation8 + $0xb1c] ss:$24 sps:$4 sm:$0xff]  }
 0x734   :  { %16359 = vmatpush1.bf16.msra.mxu1 %v20611_v8  ;;  %v20650_v8 = vld [vmem:[#allocation8 + $0xa0] ss:$24 sps:$4 sm:$0xff]  }
 0x735   :  { %16360 = vmatprep.subr.bf16.mxu1 %v20619_v9  ;;  %v20658_v9 = vld [vmem:[#allocation8 + $0xd4] ss:$24 sps:$4 sm:$0xff]  }
 0x736   :  { %v8680_v18 = vpop.f32.mrb[28].mxu1 }
 0x737   :  { %v19632_v19 = vadd.f32 %v8680_v18, %v1352_v25  ;;  %v8682_v20 = vpop.f32.mrb[29].mxu1  ;;  %v20667_v18 = vld [vmem:[#allocation8 + $0xb7c] ss:$24 sps:$4 sm:$0xff]  }
 0x738   :  { %v19633_v27 = vadd.f32 %v8682_v20, %v1356_v10  ;;  %v8684_v26 = vpop.f32.mrb[30].mxu1  ;;  %16361 = vmatpush1.bf16.msra.mxu1 %v20617_v12  ;;  %v20664_v12 = vld [vmem:[#allocation8 + $0x104] ss:$24 sps:$4 sm:$0xff]   ;;  %v20670_v20 = vld [vmem:[#allocation8 + $0x134] ss:$24 sps:$4 sm:$0xff]  }
 0x739   :  { %v19634_v35 = vadd.f32 %v8684_v26, %v1352_v25  ;;  %v8686_v40 = vpop.f32.mrb[31].mxu1  ;;  %16362 = vmatprep.subr.bf16.mxu1 %v20625_v16  ;;  %v8711_v22 = vmax.f32 %v19632_v19, 0.0  ;;  %v20661_v25 = vld [vmem:[#allocation8 + $0xb4c] ss:$24 sps:$4 sm:$0xff]   ;;  %v20659_v16 = vld [vmem:[#allocation8 + $0xb48] ss:$24 sps:$4 sm:$0xff]  }
 0x73a   :  { %v19635_v43 = vadd.f32 %v8686_v40, %v1356_v10  ;;  %v8712_v46 = vmax.f32 %v19633_v27, 0.0  ;;  %v20656_v10 = vld [vmem:[#allocation8 + $0xd0] ss:$24 sps:$4 sm:$0xff]   ;;  %v20662_v19 = vld [vmem:[#allocation8 + $0x100] ss:$24 sps:$4 sm:$0xff]  }
 0x73b   :  { %v8735_v41 = vmax.f32 %v19634_v35, 0.0  ;;  %v20665_v27 = vld [vmem:[#allocation8 + $0xb78] ss:$24 sps:$4 sm:$0xff]   ;;  %v20673_v26 = vld [vmem:[#allocation8 + $0xbac] ss:$24 sps:$4 sm:$0xff]  }
 0x73c   :  { %v8736_v49 = vmax.f32 %v19635_v43, 0.0  ;;  %16363 = vmatpush1.bf16.msra.mxu1 %v20623_v31  ;;  %v20668_v31 = vld [vmem:[#allocation8 + $0x130] ss:$24 sps:$4 sm:$0xff]   ;;  %v20676_v35 = vld [vmem:[#allocation8 + $0x164] ss:$24 sps:$4 sm:$0xff]  }
 0x73d   :  { %v22088_v0 = vpack.c.bf16 %v8735_v41, %v8711_v22  ;;  %16364 = vmatprep.subr.bf16.mxu1 %v20631_v42  ;;  %v20671_v40 = vld [vmem:[#allocation8 + $0xba8] ss:$24 sps:$4 sm:$0xff]   ;;  %v20679_v42 = vld [vmem:[#allocation8 + $0xbdc] ss:$24 sps:$4 sm:$0xff]   ;;  %v20677_v41 = vld [vmem:[#allocation8 + $0xbd8] ss:$24 sps:$4 sm:$0xff]  }
 0x73e   :  { %v22090_v45 = vpack.c.bf16 %v8736_v49, %v8712_v46  ;;  %v20674_v43 = vld [vmem:[#allocation8 + $0x160] ss:$24 sps:$4 sm:$0xff]   ;;  %v20682_v22 = vld [vmem:[#allocation8 + $0x194] ss:$24 sps:$4 sm:$0xff]   ;;  %v20680_v49 = vld [vmem:[#allocation8 + $0x190] ss:$24 sps:$4 sm:$0xff]  }
 0x73f   :  { %v20685_v46 = vld [vmem:[#allocation8 + $0xc0c] ss:$24 sps:$4 sm:$0xff]  }
 0x740   :  { %16210 = vmatprep.mubr.bf16.mxu0 %v22090_v45  ;;  %16365 = vmatpush1.bf16.msra.mxu1 %v20629_v23  ;;  %v20688_v23 = vld [vmem:[#allocation8 + $0x1c4] ss:$24 sps:$4 sm:$0xff]  }
 0x741   :  { %16211 = vmatmul.mubr.bf16.vlgmr.msra.gmra.mrb[16].mxu0 %v22088_v0  ;;  %16366 = vmatprep.subr.bf16.mxu1 %v20637_v34  ;;  %v20683_v34 = vld [vmem:[#allocation8 + $0xc08] ss:$24 sps:$4 sm:$0xff]  }
 0x742   :  { %16738 = vmatpush1.bf16.msra.mxu0 %v20632_v53  ;;  %16769 = vmatprep.mubr.bf16.mxu0 %v21921_v2  ;;  %v20653_v2 = vld [vmem:[#allocation8 + $0xb18] ss:$24 sps:$4 sm:$0xff]   ;;  %v20691_v53 = vld [vmem:[#allocation8 + $0xc3c] ss:$24 sps:$4 sm:$0xff]  }
 0x743   :  { %16739 = vmatprep.subr.bf16.mxu0 %v20640_v54  ;;  %v20686_v54 = vld [vmem:[#allocation8 + $0x1c0] ss:$24 sps:$4 sm:$0xff]  }
 0x744   :  { %16367 = vmatpush1.bf16.msra.mxu1 %v20635_v51  ;;  %v20694_v51 = vld [vmem:[#allocation8 + $0x1f4] ss:$24 sps:$4 sm:$0xff]  }
 0x745   :  { %16368 = vmatprep.subr.bf16.mxu1 %v20643_v57  ;;  %v20689_v57 = vld [vmem:[#allocation8 + $0xc38] ss:$24 sps:$4 sm:$0xff]  }
 0x746   :  { %16740 = vmatpush1.bf16.msra.mxu0 %v20638_v62  ;;  %v20697_v62 = vld [vmem:[#allocation8 + $0xc6c] ss:$24 sps:$4 sm:$0xff]  }
 0x747   :  { %16741 = vmatprep.subr.bf16.mxu0 %v20646_v44  ;;  %v20692_v44 = vld [vmem:[#allocation8 + $0x1f0] ss:$24 sps:$4 sm:$0xff]  }
 0x748   :  { %16369 = vmatpush1.bf16.msra.mxu1 %v20641_v30  ;;  %v20700_v30 = vld [vmem:[#allocation8 + $0x224] ss:$24 sps:$4 sm:$0xff]  }
 0x749   :  { %16370 = vmatprep.subr.bf16.mxu1 %v20649_v4  ;;  %v20695_v4 = vld [vmem:[#allocation8 + $0xc68] ss:$24 sps:$4 sm:$0xff]  }
 0x74a   :  { %16742 = vmatpush1.bf16.msra.mxu0 %v20644_v7  ;;  %v20703_v7 = vld [vmem:[#allocation8 + $0xc9c] ss:$24 sps:$4 sm:$0xff]  }
 0x74b   :  { %16743 = vmatprep.subr.bf16.mxu0 %v20652_v39  ;;  %v20698_v39 = vld [vmem:[#allocation8 + $0x220] ss:$24 sps:$4 sm:$0xff]  }
 0x74c   :  { %16371 = vmatpush1.bf16.msra.mxu1 %v20647_v15  ;;  %v20706_v15 = vld [vmem:[#allocation8 + $0x254] ss:$24 sps:$4 sm:$0xff]  }
 0x74d   :  { %16372 = vmatprep.subr.bf16.mxu1 %v20655_v58  ;;  %v20701_v58 = vld [vmem:[#allocation8 + $0xc98] ss:$24 sps:$4 sm:$0xff]  }
 0x74e   :  { %16744 = vmatpush1.bf16.msra.mxu0 %v20650_v8  ;;  %v20709_v8 = vld [vmem:[#allocation8 + $0xccc] ss:$24 sps:$4 sm:$0xff]  }
 0x74f   :  { %16745 = vmatprep.subr.bf16.mxu0 %v20658_v9  ;;  %v20704_v9 = vld [vmem:[#allocation8 + $0x250] ss:$24 sps:$4 sm:$0xff]  }
 0x750   :  { %16373 = vmatpush1.bf16.msra.mxu1 %v20653_v2  ;;  %v20712_v2 = vld [vmem:[#allocation8 + $0x284] ss:$24 sps:$4 sm:$0xff]  }
 0x751   :  { %16374 = vmatprep.subr.bf16.mxu1 %v20661_v25  ;;  %v20707_v25 = vld [vmem:[#allocation8 + $0xcc8] ss:$24 sps:$4 sm:$0xff]  }
 0x752   :  { %16746 = vmatpush1.bf16.msra.mxu0 %v20656_v10  ;;  %v20715_v10 = vld [vmem:[#allocation8 + $0xcfc] ss:$24 sps:$4 sm:$0xff]  }
 0x753   :  { %16747 = vmatprep.subr.bf16.mxu0 %v20664_v12  ;;  %v20710_v12 = vld [vmem:[#allocation8 + $0x280] ss:$24 sps:$4 sm:$0xff]  }
 0x754   :  { %16375 = vmatpush1.bf16.msra.mxu1 %v20659_v16  ;;  %v20718_v16 = vld [vmem:[#allocation8 + $0x2b4] ss:$24 sps:$4 sm:$0xff]  }
 0x755   :  { %16376 = vmatprep.subr.bf16.mxu1 %v20667_v18  ;;  %v20713_v18 = vld [vmem:[#allocation8 + $0xcf8] ss:$24 sps:$4 sm:$0xff]  }
 0x756   :  { %16748 = vmatpush1.bf16.msra.mxu0 %v20662_v19  ;;  %v20721_v19 = vld [vmem:[#allocation8 + $0xd2c] ss:$24 sps:$4 sm:$0xff]  }
 0x757   :  { %16749 = vmatprep.subr.bf16.mxu0 %v20670_v20  ;;  %v20716_v20 = vld [vmem:[#allocation8 + $0x2b0] ss:$24 sps:$4 sm:$0xff]  }
 0x758   :  { %16377 = vmatpush1.bf16.msra.mxu1 %v20665_v27  ;;  %v20724_v27 = vld [vmem:[#allocation8 + $0x2e4] ss:$24 sps:$4 sm:$0xff]  }
 0x759   :  { %16378 = vmatprep.subr.bf16.mxu1 %v20673_v26  ;;  %v20719_v26 = vld [vmem:[#allocation8 + $0xd28] ss:$24 sps:$4 sm:$0xff]  }
 0x75a   :  { %16750 = vmatpush1.bf16.msra.mxu0 %v20668_v31  ;;  %v20727_v31 = vld [vmem:[#allocation8 + $0xd5c] ss:$24 sps:$4 sm:$0xff]  }
 0x75b   :  { %16751 = vmatprep.subr.bf16.mxu0 %v20676_v35  ;;  %v20722_v35 = vld [vmem:[#allocation8 + $0x2e0] ss:$24 sps:$4 sm:$0xff]  }
 0x75c   :  { %16379 = vmatpush1.bf16.msra.mxu1 %v20671_v40  ;;  %v20730_v40 = vld [vmem:[#allocation8 + $0x314] ss:$24 sps:$4 sm:$0xff]  }
 0x75d   :  { %16380 = vmatprep.subr.bf16.mxu1 %v20679_v42  ;;  %v20725_v42 = vld [vmem:[#allocation8 + $0xd58] ss:$24 sps:$4 sm:$0xff]  }
 0x75e   :  { %16752 = vmatpush1.bf16.msra.mxu0 %v20674_v43  ;;  %v20733_v43 = vld [vmem:[#allocation8 + $0xd8c] ss:$24 sps:$4 sm:$0xff]  }
 0x75f   :  { %16753 = vmatprep.subr.bf16.mxu0 %v20682_v22  ;;  %v20728_v22 = vld [vmem:[#allocation8 + $0x310] ss:$24 sps:$4 sm:$0xff]  }
 0x760   :  { %16381 = vmatpush1.bf16.msra.mxu1 %v20677_v41  ;;  %v20736_v41 = vld [vmem:[#allocation8 + $0x344] ss:$24 sps:$4 sm:$0xff]  }
 0x761   :  { %16393 = vmatprep.subr.bf16.mxu1 %v20685_v46  ;;  %v20731_v46 = vld [vmem:[#allocation8 + $0xd88] ss:$24 sps:$4 sm:$0xff]  }
 0x762   :  { %16754 = vmatpush1.bf16.msra.mxu0 %v20680_v49  ;;  %v20739_v49 = vld [vmem:[#allocation8 + $0xdbc] ss:$24 sps:$4 sm:$0xff]  }
 0x763   :  { %16383 = vmatmul.mubr.bf16.vlgmr.msra.gmra.mrb[32].mxu1 %v22008_v48  ;;  %16755 = vmatprep.subr.bf16.mxu0 %v20688_v23  ;;  %v20734_v23 = vld [vmem:[#allocation8 + $0x340] ss:$24 sps:$4 sm:$0xff]  }
 0x764   :  { %16394 = vmatpush1.bf16.msra.mxu1 %v20683_v34  ;;  %16425 = vmatprep.mubr.bf16.mxu1 %v21925_v6  ;;  %v20742_v34 = vld [vmem:[#allocation8 + $0x374] ss:$24 sps:$4 sm:$0xff]  }
 0x765   :  { %16395 = vmatprep.subr.bf16.mxu1 %v20691_v53  ;;  %v20737_v53 = vld [vmem:[#allocation8 + $0xdb8] ss:$24 sps:$4 sm:$0xff]  }
 0x766   :  { %16756 = vmatpush1.bf16.msra.mxu0 %v20686_v54  ;;  %v20745_v54 = vld [vmem:[#allocation8 + $0xdec] ss:$24 sps:$4 sm:$0xff]  }
 0x767   :  { %16757 = vmatprep.subr.bf16.mxu0 %v20694_v51  ;;  %v20740_v51 = vld [vmem:[#allocation8 + $0x370] ss:$24 sps:$4 sm:$0xff]  }
 0x768   :  { %16396 = vmatpush1.bf16.msra.mxu1 %v20689_v57  ;;  %v20748_v57 = vld [vmem:[#allocation8 + $0x3a4] ss:$24 sps:$4 sm:$0xff]  }
 0x769   :  { %16397 = vmatprep.subr.bf16.mxu1 %v20697_v62  ;;  %v20743_v62 = vld [vmem:[#allocation8 + $0xde8] ss:$24 sps:$4 sm:$0xff]  }
 0x76a   :  { %16758 = vmatpush1.bf16.msra.mxu0 %v20692_v44  ;;  %v20746_v44 = vld [vmem:[#allocation8 + $0x3a0] ss:$24 sps:$4 sm:$0xff]  }
 0x76b   :  { %16759 = vmatprep.subr.bf16.mxu0 %v20700_v30  ;;  %v20754_v30 = vld [vmem:[#allocation8 + $0x3d4] ss:$24 sps:$4 sm:$0xff]  }
 0x76c   :  { %16398 = vmatpush1.bf16.msra.mxu1 %v20695_v4  ;;  %v20757_v4 = vld [vmem:[#allocation8 + $0xe4c] ss:$24 sps:$4 sm:$0xff]  }
 0x76d   :  { %16399 = vmatprep.subr.bf16.mxu1 %v20703_v7  ;;  %v20752_v7 = vld [vmem:[#allocation8 + $0x3d0] ss:$24 sps:$4 sm:$0xff]  }
 0x76e   :  { %16760 = vmatpush1.bf16.msra.mxu0 %v20698_v39  ;;  %v20760_v39 = vld [vmem:[#allocation8 + $0x404] ss:$24 sps:$4 sm:$0xff]  }
 0x76f   :  { %16761 = vmatprep.subr.bf16.mxu0 %v20706_v15  ;;  %v20755_v15 = vld [vmem:[#allocation8 + $0xe48] ss:$24 sps:$4 sm:$0xff]  }
 0x770   :  { %16400 = vmatpush1.bf16.msra.mxu1 %v20701_v58  ;;  %v20763_v58 = vld [vmem:[#allocation8 + $0xe7c] ss:$24 sps:$4 sm:$0xff]  }
 0x771   :  { %16401 = vmatprep.subr.bf16.mxu1 %v20709_v8  ;;  %v20758_v8 = vld [vmem:[#allocation8 + $0x400] ss:$24 sps:$4 sm:$0xff]  }
 0x772   :  { %16762 = vmatpush1.bf16.msra.mxu0 %v20704_v9  ;;  %v20766_v9 = vld [vmem:[#allocation8 + $0x434] ss:$24 sps:$4 sm:$0xff]  }
 0x773   :  { %16763 = vmatprep.subr.bf16.mxu0 %v20712_v2  ;;  %v20761_v2 = vld [vmem:[#allocation8 + $0xe78] ss:$24 sps:$4 sm:$0xff]  }
 0x774   :  { %16402 = vmatpush1.bf16.msra.mxu1 %v20707_v25  ;;  %v20769_v25 = vld [vmem:[#allocation8 + $0xeac] ss:$24 sps:$4 sm:$0xff]  }
 0x775   :  { %16403 = vmatprep.subr.bf16.mxu1 %v20715_v10  ;;  %v20764_v10 = vld [vmem:[#allocation8 + $0x430] ss:$24 sps:$4 sm:$0xff]  }
 0x776   :  { %16764 = vmatpush1.bf16.msra.mxu0 %v20710_v12  ;;  %v20772_v12 = vld [vmem:[#allocation8 + $0x464] ss:$24 sps:$4 sm:$0xff]  }
 0x777   :  { %16765 = vmatprep.subr.bf16.mxu0 %v20718_v16  ;;  %v20767_v16 = vld [vmem:[#allocation8 + $0xea8] ss:$24 sps:$4 sm:$0xff]  }
 0x778   :  { %16404 = vmatpush1.bf16.msra.mxu1 %v20713_v18  ;;  %v20775_v18 = vld [vmem:[#allocation8 + $0xedc] ss:$24 sps:$4 sm:$0xff]  }
 0x779   :  { %16405 = vmatprep.subr.bf16.mxu1 %v20721_v19  ;;  %v20770_v19 = vld [vmem:[#allocation8 + $0x460] ss:$24 sps:$4 sm:$0xff]  }
 0x77a   :  { %16766 = vmatpush1.bf16.msra.mxu0 %v20716_v20  ;;  %v20778_v20 = vld [vmem:[#allocation8 + $0x494] ss:$24 sps:$4 sm:$0xff]  }
 0x77b   :  { %16767 = vmatprep.subr.bf16.mxu0 %v20724_v27  ;;  %v20773_v27 = vld [vmem:[#allocation8 + $0xed8] ss:$24 sps:$4 sm:$0xff]  }
 0x77c   :  { %16406 = vmatpush1.bf16.msra.mxu1 %v20719_v26  ;;  %v20781_v26 = vld [vmem:[#allocation8 + $0xf0c] ss:$24 sps:$4 sm:$0xff]  }
 0x77d   :  { %16407 = vmatprep.subr.bf16.mxu1 %v20727_v31  ;;  %v20776_v31 = vld [vmem:[#allocation8 + $0x490] ss:$24 sps:$4 sm:$0xff]  }
 0x77e   :  { %16768 = vmatpush1.bf16.msra.mxu0 %v20722_v35  ;;  %v20784_v35 = vld [vmem:[#allocation8 + $0x4c4] ss:$24 sps:$4 sm:$0xff]  }
 0x77f   :  { %16780 = vmatprep.subr.bf16.mxu0 %v20730_v40  ;;  %v20779_v40 = vld [vmem:[#allocation8 + $0xf08] ss:$24 sps:$4 sm:$0xff]  }
 0x780   :  { %16408 = vmatpush1.bf16.msra.mxu1 %v20725_v42  ;;  %v20787_v42 = vld [vmem:[#allocation8 + $0xf3c] ss:$24 sps:$4 sm:$0xff]  }
 0x781   :  { %16770 = vmatmul.mubr.bf16.vlgmr.msra.gmra.mrb[20].mxu0 %v21919_v56  ;;  %16409 = vmatprep.subr.bf16.mxu1 %v20733_v43  ;;  %v20751_v56 = vld [vmem:[#allocation8 + $0xe1c] ss:$24 sps:$4 sm:$0xff]   ;;  %v20782_v43 = vld [vmem:[#allocation8 + $0x4c0] ss:$24 sps:$4 sm:$0xff]  }
 0x782   :  { %16781 = vmatpush1.bf16.msra.mxu0 %v20728_v22  ;;  %16812 = vmatprep.mubr.bf16.mxu0 %v21957_v21  ;;  %v20749_v21 = vld [vmem:[#allocation8 + $0xe18] ss:$24 sps:$4 sm:$0xff]   ;;  %v20790_v22 = vld [vmem:[#allocation8 + $0x4f4] ss:$24 sps:$4 sm:$0xff]  }
 0x783   :  { %16782 = vmatprep.subr.bf16.mxu0 %v20736_v41  ;;  %v20785_v41 = vld [vmem:[#allocation8 + $0xf38] ss:$24 sps:$4 sm:$0xff]  }
 0x784   :  { %16410 = vmatpush1.bf16.msra.mxu1 %v20731_v46  ;;  %v20793_v46 = vld [vmem:[#allocation8 + $0xf6c] ss:$24 sps:$4 sm:$0xff]  }
 0x785   :  { %16411 = vmatprep.subr.bf16.mxu1 %v20739_v49  ;;  %v20788_v49 = vld [vmem:[#allocation8 + $0x4f0] ss:$24 sps:$4 sm:$0xff]  }
 0x786   :  { %16783 = vmatpush1.bf16.msra.mxu0 %v20734_v23  ;;  %v20796_v23 = vld [vmem:[#allocation8 + $0x524] ss:$24 sps:$4 sm:$0xff]  }
 0x787   :  { %16784 = vmatprep.subr.bf16.mxu0 %v20742_v34  ;;  %v20791_v34 = vld [vmem:[#allocation8 + $0xf68] ss:$24 sps:$4 sm:$0xff]  }
 0x788   :  { %16412 = vmatpush1.bf16.msra.mxu1 %v20737_v53  ;;  %v20799_v53 = vld [vmem:[#allocation8 + $0xf9c] ss:$24 sps:$4 sm:$0xff]  }
 0x789   :  { %16413 = vmatprep.subr.bf16.mxu1 %v20745_v54  ;;  %v20794_v54 = vld [vmem:[#allocation8 + $0x520] ss:$24 sps:$4 sm:$0xff]  }
 0x78a   :  { %16785 = vmatpush1.bf16.msra.mxu0 %v20740_v51  ;;  %v20802_v51 = vld [vmem:[#allocation8 + $0x554] ss:$24 sps:$4 sm:$0xff]  }
 0x78b   :  { %16786 = vmatprep.subr.bf16.mxu0 %v20748_v57  ;;  %v20797_v57 = vld [vmem:[#allocation8 + $0xf98] ss:$24 sps:$4 sm:$0xff]  }
 0x78c   :  { %16414 = vmatpush1.bf16.msra.mxu1 %v20743_v62  ;;  %v20805_v62 = vld [vmem:[#allocation8 + $0xfcc] ss:$24 sps:$4 sm:$0xff]  }
 0x78d   :  { %16415 = vmatprep.subr.bf16.mxu1 %v20751_v56  ;;  %v20800_v56 = vld [vmem:[#allocation8 + $0x550] ss:$24 sps:$4 sm:$0xff]  }
 0x78e   :  { %16787 = vmatpush1.bf16.msra.mxu0 %v20746_v44  ;;  %v20808_v44 = vld [vmem:[#allocation8 + $0x584] ss:$24 sps:$4 sm:$0xff]  }
 0x78f   :  { %16788 = vmatprep.subr.bf16.mxu0 %v20754_v30  ;;  %v20803_v30 = vld [vmem:[#allocation8 + $0xfc8] ss:$24 sps:$4 sm:$0xff]  }
 0x790   :  { %16416 = vmatpush1.bf16.msra.mxu1 %v20749_v21  ;;  %v20811_v21 = vld [vmem:[#allocation8 + $0xffc] ss:$24 sps:$4 sm:$0xff]  }
 0x791   :  { %16417 = vmatprep.subr.bf16.mxu1 %v20757_v4  ;;  %v20806_v4 = vld [vmem:[#allocation8 + $0x580] ss:$24 sps:$4 sm:$0xff]  }
 0x792   :  { %16789 = vmatpush1.bf16.msra.mxu0 %v20752_v7  ;;  %v20814_v7 = vld [vmem:[#allocation8 + $0x5b4] ss:$24 sps:$4 sm:$0xff]  }
 0x793   :  { %16790 = vmatprep.subr.bf16.mxu0 %v20760_v39  ;;  %v20809_v39 = vld [vmem:[#allocation8 + $0xff8] ss:$24 sps:$4 sm:$0xff]  }
 0x794   :  { %16418 = vmatpush1.bf16.msra.mxu1 %v20755_v15  ;;  %v20817_v15 = vld [vmem:[#allocation8 + $0x102c] ss:$24 sps:$4 sm:$0xff]  }
 0x795   :  { %16419 = vmatprep.subr.bf16.mxu1 %v20763_v58  ;;  %v20812_v58 = vld [vmem:[#allocation8 + $0x5b0] ss:$24 sps:$4 sm:$0xff]  }
 0x796   :  { %16791 = vmatpush1.bf16.msra.mxu0 %v20758_v8  ;;  %v20820_v8 = vld [vmem:[#allocation8 + $0x5e4] ss:$24 sps:$4 sm:$0xff]  }
 0x797   :  { %16792 = vmatprep.subr.bf16.mxu0 %v20766_v9  ;;  %v20815_v9 = vld [vmem:[#allocation8 + $0x1028] ss:$24 sps:$4 sm:$0xff]  }
 0x798   :  { %16420 = vmatpush1.bf16.msra.mxu1 %v20761_v2  ;;  %v20823_v2 = vld [vmem:[#allocation8 + $0x105c] ss:$24 sps:$4 sm:$0xff]  }
 0x799   :  { %16421 = vmatprep.subr.bf16.mxu1 %v20769_v25  ;;  %v20818_v25 = vld [vmem:[#allocation8 + $0x5e0] ss:$24 sps:$4 sm:$0xff]  }
 0x79a   :  { %16793 = vmatpush1.bf16.msra.mxu0 %v20764_v10  ;;  %v20826_v10 = vld [vmem:[#allocation8 + $0x614] ss:$24 sps:$4 sm:$0xff]  }
 0x79b   :  { %16794 = vmatprep.subr.bf16.mxu0 %v20772_v12  ;;  %v20821_v12 = vld [vmem:[#allocation8 + $0x1058] ss:$24 sps:$4 sm:$0xff]  }
 0x79c   :  { %16422 = vmatpush1.bf16.msra.mxu1 %v20767_v16  ;;  %v20829_v16 = vld [vmem:[#allocation8 + $0x108c] ss:$24 sps:$4 sm:$0xff]  }
 0x79d   :  { %16423 = vmatprep.subr.bf16.mxu1 %v20775_v18  ;;  %v20824_v18 = vld [vmem:[#allocation8 + $0x610] ss:$24 sps:$4 sm:$0xff]  }
 0x79e   :  { %16795 = vmatpush1.bf16.msra.mxu0 %v20770_v19  ;;  %v20832_v19 = vld [vmem:[#allocation8 + $0x644] ss:$24 sps:$4 sm:$0xff]  }
 0x79f   :  { %16796 = vmatprep.subr.bf16.mxu0 %v20778_v20  ;;  %v20827_v20 = vld [vmem:[#allocation8 + $0x1088] ss:$24 sps:$4 sm:$0xff]  }
 0x7a0   :  { %16424 = vmatpush1.bf16.msra.mxu1 %v20773_v27  ;;  %v20835_v27 = vld [vmem:[#allocation8 + $0x10bc] ss:$24 sps:$4 sm:$0xff]  }
 0x7a1   :  { %16436 = vmatprep.subr.bf16.mxu1 %v20781_v26  ;;  %v20830_v26 = vld [vmem:[#allocation8 + $0x640] ss:$24 sps:$4 sm:$0xff]  }
 0x7a2   :  { %16797 = vmatpush1.bf16.msra.mxu0 %v20776_v31  ;;  %v20838_v31 = vld [vmem:[#allocation8 + $0x674] ss:$24 sps:$4 sm:$0xff]  }
 0x7a3   :  { %16426 = vmatmul.mubr.bf16.vlgmr.msra.gmra.mrb[32].mxu1 %v21923_v5  ;;  %16798 = vmatprep.subr.bf16.mxu0 %v20784_v35  ;;  %v20833_v35 = vld [vmem:[#allocation8 + $0x10b8] ss:$24 sps:$4 sm:$0xff]  }
 0x7a4   :  { %16437 = vmatpush1.bf16.msra.mxu1 %v20779_v40  ;;  %16468 = vmatprep.mubr.bf16.mxu1 %v22034_v17  ;;  %v20841_v40 = vld [vmem:[#allocation8 + $0x10ec] ss:$24 sps:$4 sm:$0xff]  }
 0x7a5   :  { %16438 = vmatprep.subr.bf16.mxu1 %v20787_v42  ;;  %v20836_v42 = vld [vmem:[#allocation8 + $0x670] ss:$24 sps:$4 sm:$0xff]  }
 0x7a6   :  { %16799 = vmatpush1.bf16.msra.mxu0 %v20782_v43  ;;  %v20844_v43 = vld [vmem:[#allocation8 + $0x6a4] ss:$24 sps:$4 sm:$0xff]  }
 0x7a7   :  { %16800 = vmatprep.subr.bf16.mxu0 %v20790_v22  ;;  %v20839_v22 = vld [vmem:[#allocation8 + $0x10e8] ss:$24 sps:$4 sm:$0xff]  }
 0x7a8   :  { %16439 = vmatpush1.bf16.msra.mxu1 %v20785_v41  ;;  %v20842_v41 = vld [vmem:[#allocation8 + $0x6a0] ss:$24 sps:$4 sm:$0xff]  }
 0x7a9   :  { %16440 = vmatprep.subr.bf16.mxu1 %v20793_v46  ;;  %v20850_v46 = vld [vmem:[#allocation8 + $0x6d4] ss:$24 sps:$4 sm:$0xff]  }
 0x7aa   :  { %16801 = vmatpush1.bf16.msra.mxu0 %v20788_v49  ;;  %v20853_v49 = vld [vmem:[#allocation8 + $0x114c] ss:$24 sps:$4 sm:$0xff]  }
 0x7ab   :  { %16802 = vmatprep.subr.bf16.mxu0 %v20796_v23  ;;  %v20848_v23 = vld [vmem:[#allocation8 + $0x6d0] ss:$24 sps:$4 sm:$0xff]  }
 0x7ac   :  { %16441 = vmatpush1.bf16.msra.mxu1 %v20791_v34  ;;  %v20856_v34 = vld [vmem:[#allocation8 + $0x704] ss:$24 sps:$4 sm:$0xff]  }
 0x7ad   :  { %16442 = vmatprep.subr.bf16.mxu1 %v20799_v53  ;;  %v20851_v53 = vld [vmem:[#allocation8 + $0x1148] ss:$24 sps:$4 sm:$0xff]  }
 0x7ae   :  { %16803 = vmatpush1.bf16.msra.mxu0 %v20794_v54  ;;  %v20859_v54 = vld [vmem:[#allocation8 + $0x117c] ss:$24 sps:$4 sm:$0xff]  }
 0x7af   :  { %16804 = vmatprep.subr.bf16.mxu0 %v20802_v51  ;;  %v20854_v51 = vld [vmem:[#allocation8 + $0x700] ss:$24 sps:$4 sm:$0xff]  }
 0x7b0   :  { %16443 = vmatpush1.bf16.msra.mxu1 %v20797_v57  ;;  %v20862_v57 = vld [vmem:[#allocation8 + $0x734] ss:$24 sps:$4 sm:$0xff]  }
 0x7b1   :  { %16444 = vmatprep.subr.bf16.mxu1 %v20805_v62  ;;  %v20857_v62 = vld [vmem:[#allocation8 + $0x1178] ss:$24 sps:$4 sm:$0xff]  }
 0x7b2   :  { %16805 = vmatpush1.bf16.msra.mxu0 %v20800_v56  ;;  %v20865_v56 = vld [vmem:[#allocation8 + $0x11ac] ss:$24 sps:$4 sm:$0xff]  }
 0x7b3   :  { %16806 = vmatprep.subr.bf16.mxu0 %v20808_v44  ;;  %v20860_v44 = vld [vmem:[#allocation8 + $0x730] ss:$24 sps:$4 sm:$0xff]  }
 0x7b4   :  { %16445 = vmatpush1.bf16.msra.mxu1 %v20803_v30  ;;  %v20868_v30 = vld [vmem:[#allocation8 + $0x764] ss:$24 sps:$4 sm:$0xff]  }
 0x7b5   :  { %16446 = vmatprep.subr.bf16.mxu1 %v20811_v21  ;;  %v20863_v21 = vld [vmem:[#allocation8 + $0x11a8] ss:$24 sps:$4 sm:$0xff]  }
 0x7b6   :  { %16807 = vmatpush1.bf16.msra.mxu0 %v20806_v4  ;;  %v20871_v4 = vld [vmem:[#allocation8 + $0x11dc] ss:$24 sps:$4 sm:$0xff]  }
 0x7b7   :  { %16808 = vmatprep.subr.bf16.mxu0 %v20814_v7  ;;  %v20866_v7 = vld [vmem:[#allocation8 + $0x760] ss:$24 sps:$4 sm:$0xff]  }
 0x7b8   :  { %16447 = vmatpush1.bf16.msra.mxu1 %v20809_v39  ;;  %v20874_v39 = vld [vmem:[#allocation8 + $0x794] ss:$24 sps:$4 sm:$0xff]  }
 0x7b9   :  { %16448 = vmatprep.subr.bf16.mxu1 %v20817_v15  ;;  %v20869_v15 = vld [vmem:[#allocation8 + $0x11d8] ss:$24 sps:$4 sm:$0xff]  }
 0x7ba   :  { %16809 = vmatpush1.bf16.msra.mxu0 %v20812_v58  ;;  %v20877_v58 = vld [vmem:[#allocation8 + $0x120c] ss:$24 sps:$4 sm:$0xff]  }
 0x7bb   :  { %16810 = vmatprep.subr.bf16.mxu0 %v20820_v8  ;;  %v20872_v8 = vld [vmem:[#allocation8 + $0x790] ss:$24 sps:$4 sm:$0xff]  }
 0x7bc   :  { %16449 = vmatpush1.bf16.msra.mxu1 %v20815_v9  ;;  %v20880_v9 = vld [vmem:[#allocation8 + $0x7c4] ss:$24 sps:$4 sm:$0xff]  }
 0x7bd   :  { %16450 = vmatprep.subr.bf16.mxu1 %v20823_v2  ;;  %v20875_v2 = vld [vmem:[#allocation8 + $0x1208] ss:$24 sps:$4 sm:$0xff]  }
 0x7be   :  { %16811 = vmatpush1.bf16.msra.mxu0 %v20818_v25  ;;  %v20883_v25 = vld [vmem:[#allocation8 + $0x123c] ss:$24 sps:$4 sm:$0xff]  }
 0x7bf   :  { %16823 = vmatprep.subr.bf16.mxu0 %v20826_v10  ;;  %v20878_v10 = vld [vmem:[#allocation8 + $0x7c0] ss:$24 sps:$4 sm:$0xff]  }
 0x7c0   :  { %16451 = vmatpush1.bf16.msra.mxu1 %v20821_v12  ;;  %v20886_v12 = vld [vmem:[#allocation8 + $0x7f4] ss:$24 sps:$4 sm:$0xff]  }
 0x7c1   :  { %16813 = vmatmul.mubr.bf16.vlgmr.msra.gmra.mrb[20].mxu0 %v21955_v13  ;;  %16452 = vmatprep.subr.bf16.mxu1 %v20829_v16  ;;  %v20847_v13 = vld [vmem:[#allocation8 + $0x111c] ss:$24 sps:$4 sm:$0xff]   ;;  %v20881_v16 = vld [vmem:[#allocation8 + $0x1238] ss:$24 sps:$4 sm:$0xff]  }
 0x7c2   :  { %16824 = vmatpush1.bf16.msra.mxu0 %v20824_v18  ;;  %16855 = vmatprep.mubr.bf16.mxu0 %v21981_v33  ;;  %v20845_v33 = vld [vmem:[#allocation8 + $0x1118] ss:$24 sps:$4 sm:$0xff]   ;;  %v20889_v18 = vld [vmem:[#allocation8 + $0x126c] ss:$24 sps:$4 sm:$0xff]  }
 0x7c3   :  { %16825 = vmatprep.subr.bf16.mxu0 %v20832_v19  ;;  %v20884_v19 = vld [vmem:[#allocation8 + $0x7f0] ss:$24 sps:$4 sm:$0xff]  }
 0x7c4   :  { %16453 = vmatpush1.bf16.msra.mxu1 %v20827_v20  ;;  %v20892_v20 = vld [vmem:[#allocation8 + $0x824] ss:$24 sps:$4 sm:$0xff]  }
 0x7c5   :  { %16454 = vmatprep.subr.bf16.mxu1 %v20835_v27  ;;  %v20887_v27 = vld [vmem:[#allocation8 + $0x1268] ss:$24 sps:$4 sm:$0xff]  }
 0x7c6   :  { %16826 = vmatpush1.bf16.msra.mxu0 %v20830_v26  ;;  %v20895_v26 = vld [vmem:[#allocation8 + $0x129c] ss:$24 sps:$4 sm:$0xff]  }
 0x7c7   :  { %16827 = vmatprep.subr.bf16.mxu0 %v20838_v31  ;;  %v20890_v31 = vld [vmem:[#allocation8 + $0x820] ss:$24 sps:$4 sm:$0xff]  }
 0x7c8   :  { %16455 = vmatpush1.bf16.msra.mxu1 %v20833_v35  ;;  %v20898_v35 = vld [vmem:[#allocation8 + $0x854] ss:$24 sps:$4 sm:$0xff]  }
 0x7c9   :  { %16456 = vmatprep.subr.bf16.mxu1 %v20841_v40  ;;  %v20893_v40 = vld [vmem:[#allocation8 + $0x1298] ss:$24 sps:$4 sm:$0xff]  }
 0x7ca   :  { %16828 = vmatpush1.bf16.msra.mxu0 %v20836_v42  ;;  %v20901_v42 = vld [vmem:[#allocation8 + $0x12cc] ss:$24 sps:$4 sm:$0xff]  }
 0x7cb   :  { %16829 = vmatprep.subr.bf16.mxu0 %v20844_v43  ;;  %v20896_v43 = vld [vmem:[#allocation8 + $0x850] ss:$24 sps:$4 sm:$0xff]  }
 0x7cc   :  { %16457 = vmatpush1.bf16.msra.mxu1 %v20839_v22  ;;  %v20904_v22 = vld [vmem:[#allocation8 + $0x884] ss:$24 sps:$4 sm:$0xff]  }
 0x7cd   :  { %16458 = vmatprep.subr.bf16.mxu1 %v20847_v13  ;;  %v20899_v13 = vld [vmem:[#allocation8 + $0x12c8] ss:$24 sps:$4 sm:$0xff]  }
 0x7ce   :  { %16830 = vmatpush1.bf16.msra.mxu0 %v20842_v41  ;;  %v20907_v41 = vld [vmem:[#allocation8 + $0x12fc] ss:$24 sps:$4 sm:$0xff]  }
 0x7cf   :  { %16831 = vmatprep.subr.bf16.mxu0 %v20850_v46  ;;  %v20902_v46 = vld [vmem:[#allocation8 + $0x880] ss:$24 sps:$4 sm:$0xff]  }
 0x7d0   :  { %16459 = vmatpush1.bf16.msra.mxu1 %v20845_v33  ;;  %v20910_v33 = vld [vmem:[#allocation8 + $0x8b4] ss:$24 sps:$4 sm:$0xff]  }
 0x7d1   :  { %16460 = vmatprep.subr.bf16.mxu1 %v20853_v49  ;;  %v20905_v49 = vld [vmem:[#allocation8 + $0x12f8] ss:$24 sps:$4 sm:$0xff]  }
 0x7d2   :  { %16832 = vmatpush1.bf16.msra.mxu0 %v20848_v23  ;;  %v20913_v23 = vld [vmem:[#allocation8 + $0x132c] ss:$24 sps:$4 sm:$0xff]  }
 0x7d3   :  { %16833 = vmatprep.subr.bf16.mxu0 %v20856_v34  ;;  %v20908_v34 = vld [vmem:[#allocation8 + $0x8b0] ss:$24 sps:$4 sm:$0xff]  }
 0x7d4   :  { %16461 = vmatpush1.bf16.msra.mxu1 %v20851_v53  ;;  %v20916_v53 = vld [vmem:[#allocation8 + $0x8e4] ss:$24 sps:$4 sm:$0xff]  }
 0x7d5   :  { %16462 = vmatprep.subr.bf16.mxu1 %v20859_v54  ;;  %v20911_v54 = vld [vmem:[#allocation8 + $0x1328] ss:$24 sps:$4 sm:$0xff]  }
 0x7d6   :  { %16834 = vmatpush1.bf16.msra.mxu0 %v20854_v51  ;;  %v20919_v51 = vld [vmem:[#allocation8 + $0x135c] ss:$24 sps:$4 sm:$0xff]  }
 0x7d7   :  { %16835 = vmatprep.subr.bf16.mxu0 %v20862_v57  ;;  %v20914_v57 = vld [vmem:[#allocation8 + $0x8e0] ss:$24 sps:$4 sm:$0xff]  }
 0x7d8   :  { %16463 = vmatpush1.bf16.msra.mxu1 %v20857_v62  ;;  %v20922_v62 = vld [vmem:[#allocation8 + $0x914] ss:$24 sps:$4 sm:$0xff]  }
 0x7d9   :  { %16464 = vmatprep.subr.bf16.mxu1 %v20865_v56  ;;  %v20917_v56 = vld [vmem:[#allocation8 + $0x1358] ss:$24 sps:$4 sm:$0xff]  }
 0x7da   :  { %16836 = vmatpush1.bf16.msra.mxu0 %v20860_v44  ;;  %v20925_v44 = vld [vmem:[#allocation8 + $0x138c] ss:$24 sps:$4 sm:$0xff]  }
 0x7db   :  { %16837 = vmatprep.subr.bf16.mxu0 %v20868_v30  ;;  %v20920_v30 = vld [vmem:[#allocation8 + $0x910] ss:$24 sps:$4 sm:$0xff]  }
 0x7dc   :  { %16465 = vmatpush1.bf16.msra.mxu1 %v20863_v21  ;;  %v20928_v21 = vld [vmem:[#allocation8 + $0x944] ss:$24 sps:$4 sm:$0xff]  }
 0x7dd   :  { %16466 = vmatprep.subr.bf16.mxu1 %v20871_v4  ;;  %v20923_v4 = vld [vmem:[#allocation8 + $0x1388] ss:$24 sps:$4 sm:$0xff]  }
 0x7de   :  { %16838 = vmatpush1.bf16.msra.mxu0 %v20866_v7  ;;  %v20931_v7 = vld [vmem:[#allocation8 + $0x13bc] ss:$24 sps:$4 sm:$0xff]  }
 0x7df   :  { %16839 = vmatprep.subr.bf16.mxu0 %v20874_v39  ;;  %v20926_v39 = vld [vmem:[#allocation8 + $0x940] ss:$24 sps:$4 sm:$0xff]  }
 0x7e0   :  { %16467 = vmatpush1.bf16.msra.mxu1 %v20869_v15  ;;  %v20934_v15 = vld [vmem:[#allocation8 + $0x974] ss:$24 sps:$4 sm:$0xff]  }
 0x7e1   :  { %16479 = vmatprep.subr.bf16.mxu1 %v20877_v58  ;;  %v20929_v58 = vld [vmem:[#allocation8 + $0x13b8] ss:$24 sps:$4 sm:$0xff]  }
 0x7e2   :  { %16840 = vmatpush1.bf16.msra.mxu0 %v20872_v8  ;;  %v20937_v8 = vld [vmem:[#allocation8 + $0x13ec] ss:$24 sps:$4 sm:$0xff]  }
 0x7e3   :  { %16469 = vmatmul.mubr.bf16.vlgmr.msra.gmra.mrb[32].mxu1 %v22032_v14  ;;  %16841 = vmatprep.subr.bf16.mxu0 %v20880_v9  ;;  %v20932_v9 = vld [vmem:[#allocation8 + $0x970] ss:$24 sps:$4 sm:$0xff]  }
 0x7e4   :  { %16480 = vmatpush1.bf16.msra.mxu1 %v20875_v2  ;;  %16511 = vmatprep.mubr.bf16.mxu1 %v21961_v29  ;;  %v20940_v2 = vld [vmem:[#allocation8 + $0x9a4] ss:$24 sps:$4 sm:$0xff]  }
 0x7e5   :  { %16481 = vmatprep.subr.bf16.mxu1 %v20883_v25  ;;  %v20935_v25 = vld [vmem:[#allocation8 + $0x13e8] ss:$24 sps:$4 sm:$0xff]  }
 0x7e6   :  { %16842 = vmatpush1.bf16.msra.mxu0 %v20878_v10  ;;  %v20938_v10 = vld [vmem:[#allocation8 + $0x9a0] ss:$24 sps:$4 sm:$0xff]  }
 0x7e7   :  { %16843 = vmatprep.subr.bf16.mxu0 %v20886_v12  ;;  %v20946_v12 = vld [vmem:[#allocation8 + $0x9d4] ss:$24 sps:$4 sm:$0xff]  }
 0x7e8   :  { %16482 = vmatpush1.bf16.msra.mxu1 %v20881_v16  ;;  %v20949_v16 = vld [vmem:[#allocation8 + $0x144c] ss:$24 sps:$4 sm:$0xff]  }
 0x7e9   :  { %16483 = vmatprep.subr.bf16.mxu1 %v20889_v18  ;;  %v20944_v18 = vld [vmem:[#allocation8 + $0x9d0] ss:$24 sps:$4 sm:$0xff]  }
 0x7ea   :  { %16844 = vmatpush1.bf16.msra.mxu0 %v20884_v19  ;;  %v9913_v19 = vld [vmem:[#allocation10] sm:$0x3f] }
 0x7eb   :  { %16845 = vmatprep.subr.bf16.mxu0 %v20892_v20  ;;  %v20952_v20 = vld [vmem:[#allocation8 + $0xa04] ss:$24 sps:$4 sm:$0xff]  }
 0x7ec   :  { %16484 = vmatpush1.bf16.msra.mxu1 %v20887_v27  ;;  %v20947_v27 = vld [vmem:[#allocation8 + $0x1448] ss:$24 sps:$4 sm:$0xff]  }
 0x7ed   :  { %16485 = vmatprep.subr.bf16.mxu1 %v20895_v26  ;;  %v9918_v26 = vrot.slane %v9913_v19, %v21910_v59 }
 0x7ee   :  { %16846 = vmatpush1.bf16.msra.mxu0 %v20890_v31  ;;  %v20955_v31 = vld [vmem:[#allocation8 + $0x147c] ss:$24 sps:$4 sm:$0xff]  }
 0x7ef   :  { %16847 = vmatprep.subr.bf16.mxu0 %v20898_v35  ;;  %v20950_v35 = vld [vmem:[#allocation8 + $0xa00] ss:$24 sps:$4 sm:$0xff]  }
 0x7f0   :  { %16486 = vmatpush1.bf16.msra.mxu1 %v20893_v40  ;;  %v9922_v40 = vrot.slane %v9913_v19, %v21913_v61  ;;  %v21000_v19 = vld [vmem:[#allocation8 + $0xb84] ss:$24 sps:$4 sm:$0xff]  }
 0x7f1   :  { %16487 = vmatprep.subr.bf16.mxu1 %v20901_v42  ;;  %v20958_v42 = vld [vmem:[#allocation8 + $0xa34] ss:$24 sps:$4 sm:$0xff]  }
 0x7f2   :  { %16848 = vmatpush1.bf16.msra.mxu0 %v20896_v43 }
 0x7f3   :  { %16849 = vmatprep.subr.bf16.mxu0 %v20904_v22  ;;  %v20953_v22 = vld [vmem:[#allocation8 + $0x1478] ss:$24 sps:$4 sm:$0xff]  }
 0x7f4   :  { %16488 = vmatpush1.bf16.msra.mxu1 %v20899_v13 }
 0x7f5   :  { %16489 = vmatprep.subr.bf16.mxu1 %v20907_v41 }
 0x7f6   :  { %16850 = vmatpush1.bf16.msra.mxu0 %v20902_v46  ;;  %v20961_v46 = vld [vmem:[#allocation8 + $0x14ac] ss:$24 sps:$4 sm:$0xff]  }
 0x7f7   :  { %16851 = vmatprep.subr.bf16.mxu0 %v20910_v33 }
 0x7f8   :  { %16490 = vmatpush1.bf16.msra.mxu1 %v20905_v49 }
 0x7f9   :  { %16491 = vmatprep.subr.bf16.mxu1 %v20913_v23  ;;  %v20956_v23 = vld [vmem:[#allocation8 + $0xa30] ss:$24 sps:$4 sm:$0xff]  }
 0x7fa   :  { %16852 = vmatpush1.bf16.msra.mxu0 %v20908_v34 }
 0x7fb   :  { %16853 = vmatprep.subr.bf16.mxu0 %v20916_v53  ;;  %v20964_v53 = vld [vmem:[#allocation8 + $0xa64] ss:$24 sps:$4 sm:$0xff]  }
 0x7fc   :  { %16492 = vmatpush1.bf16.msra.mxu1 %v20911_v54  ;;  %v20959_v54 = vld [vmem:[#allocation8 + $0x14a8] ss:$24 sps:$4 sm:$0xff]  }
 0x7fd   :  { %16493 = vmatprep.subr.bf16.mxu1 %v20919_v51  ;;  %v20967_v51 = vld [vmem:[#allocation8 + $0x14dc] ss:$24 sps:$4 sm:$0xff]  }
 0x7fe   :  { %16854 = vmatpush1.bf16.msra.mxu0 %v20914_v57  ;;  %v20962_v57 = vld [vmem:[#allocation8 + $0xa60] ss:$24 sps:$4 sm:$0xff]  }
 0x7ff   :  { %16866 = vmatprep.subr.bf16.mxu0 %v20922_v62  ;;  %v20970_v62 = vld [vmem:[#allocation8 + $0xa94] ss:$24 sps:$4 sm:$0xff]  }
 0x800   :  { %16494 = vmatpush1.bf16.msra.mxu1 %v20917_v56  ;;  %v20965_v56 = vld [vmem:[#allocation8 + $0x14d8] ss:$24 sps:$4 sm:$0xff]  }
 0x801   :  { %16856 = vmatmul.mubr.bf16.vlgmr.msra.gmra.mrb[20].mxu0 %v21979_v24  ;;  %16495 = vmatprep.subr.bf16.mxu1 %v20925_v44  ;;  %v20943_v24 = vld [vmem:[#allocation8 + $0x141c] ss:$24 sps:$4 sm:$0xff]   ;;  %v20973_v44 = vld [vmem:[#allocation8 + $0x150c] ss:$24 sps:$4 sm:$0xff]  }
 0x802   :  { %16867 = vmatpush1.bf16.msra.mxu0 %v20920_v30  ;;  %16898 = vmatprep.mubr.bf16.mxu0 %v22010_v50  ;;  %v20941_v50 = vld [vmem:[#allocation8 + $0x1418] ss:$24 sps:$4 sm:$0xff]  }
 0x803   :  { %16868 = vmatprep.subr.bf16.mxu0 %v20928_v21  ;;  %v20968_v30 = vld [vmem:[#allocation8 + $0xa90] ss:$24 sps:$4 sm:$0xff]   ;;  %v20976_v21 = vld [vmem:[#allocation8 + $0xac4] ss:$24 sps:$4 sm:$0xff]  }
 0x804   :  { %16496 = vmatpush1.bf16.msra.mxu1 %v20923_v4  ;;  %v20971_v4 = vld [vmem:[#allocation8 + $0x1508] ss:$24 sps:$4 sm:$0xff]  }
 0x805   :  { %16497 = vmatprep.subr.bf16.mxu1 %v20931_v7  ;;  %v20979_v7 = vld [vmem:[#allocation8 + $0x153c] ss:$24 sps:$4 sm:$0xff]  }
 0x806   :  { %16869 = vmatpush1.bf16.msra.mxu0 %v20926_v39  ;;  %v20974_v39 = vld [vmem:[#allocation8 + $0xac0] ss:$24 sps:$4 sm:$0xff]  }
 0x807   :  { %16870 = vmatprep.subr.bf16.mxu0 %v20934_v15  ;;  %v20982_v15 = vld [vmem:[#allocation8 + $0xaf4] ss:$24 sps:$4 sm:$0xff]  }
 0x808   :  { %16498 = vmatpush1.bf16.msra.mxu1 %v20929_v58  ;;  %v20977_v58 = vld [vmem:[#allocation8 + $0x1538] ss:$24 sps:$4 sm:$0xff]  }
 0x809   :  { %16499 = vmatprep.subr.bf16.mxu1 %v20937_v8  ;;  %v20985_v8 = vld [vmem:[#allocation8 + $0x156c] ss:$24 sps:$4 sm:$0xff]  }
 0x80a   :  { %16871 = vmatpush1.bf16.msra.mxu0 %v20932_v9  ;;  %v20980_v9 = vld [vmem:[#allocation8 + $0xaf0] ss:$24 sps:$4 sm:$0xff]  }
 0x80b   :  { %16872 = vmatprep.subr.bf16.mxu0 %v20940_v2  ;;  %v20988_v2 = vld [vmem:[#allocation8 + $0xb24] ss:$24 sps:$4 sm:$0xff]  }
 0x80c   :  { %16500 = vmatpush1.bf16.msra.mxu1 %v20935_v25  ;;  %v20983_v25 = vld [vmem:[#allocation8 + $0x1568] ss:$24 sps:$4 sm:$0xff]  }
 0x80d   :  { %16501 = vmatprep.subr.bf16.mxu1 %v20943_v24  ;;  %v20991_v24 = vld [vmem:[#allocation8 + $0x159c] ss:$24 sps:$4 sm:$0xff]  }
 0x80e   :  { %16873 = vmatpush1.bf16.msra.mxu0 %v20938_v10  ;;  %v20986_v10 = vld [vmem:[#allocation8 + $0xb20] ss:$24 sps:$4 sm:$0xff]  }
 0x80f   :  { %16874 = vmatprep.subr.bf16.mxu0 %v20946_v12  ;;  %v20994_v12 = vld [vmem:[#allocation8 + $0xb54] ss:$24 sps:$4 sm:$0xff]  }
 0x810   :  { %16502 = vmatpush1.bf16.msra.mxu1 %v20941_v50  ;;  %v20989_v50 = vld [vmem:[#allocation8 + $0x1598] ss:$24 sps:$4 sm:$0xff]  }
 0x811   :  { %16503 = vmatprep.subr.bf16.mxu1 %v20949_v16  ;;  %v20997_v16 = vld [vmem:[#allocation8 + $0x15cc] ss:$24 sps:$4 sm:$0xff]  }
 0x812   :  { %16875 = vmatpush1.bf16.msra.mxu0 %v20944_v18  ;;  %v20992_v18 = vld [vmem:[#allocation8 + $0xb50] ss:$24 sps:$4 sm:$0xff]  }
 0x813   :  { %16876 = vmatprep.subr.bf16.mxu0 %v20952_v20  ;;  %v20995_v20 = vld [vmem:[#allocation8 + $0x15c8] ss:$24 sps:$4 sm:$0xff]  }
 0x814   :  { %v16212_v43 = vpop.f32.mrb[16].mxu0  ;;  %16504 = vmatpush1.bf16.msra.mxu1 %v20947_v27  ;;  %v21003_v27 = vld [vmem:[#allocation8 + $0x15fc] ss:$24 sps:$4 sm:$0xff]  }
 0x815   :  { %v19636_v13 = vadd.f32 %v16212_v43, %v9918_v26  ;;  %v16214_v41 = vpop.f32.mrb[17].mxu0  ;;  %16505 = vmatprep.subr.bf16.mxu1 %v20955_v31  ;;  %v21006_v31 = vld [vmem:[#allocation8 + $0xbb4] ss:$24 sps:$4 sm:$0xff]   ;;  %v21012_v43 = vld [vmem:[#allocation8 + $0xbe4] ss:$24 sps:$4 sm:$0xff]  }
 0x816   :  { %v19637_v33 = vadd.f32 %v16214_v41, %v9922_v40  ;;  %16877 = vmatpush1.bf16.msra.mxu0 %v20950_v35  ;;  %v16216_v49 = vpop.f32.mrb[18].mxu0  ;;  %v21001_v35 = vld [vmem:[#allocation8 + $0x15f8] ss:$24 sps:$4 sm:$0xff]  }
 0x817   :  { %17253 = vst [vmem:[#allocation11] sm:$0xff] %v19636_v13  ;;  %v19638_v59 = vadd.f32 %v16216_v49, %v9918_v26  ;;  %v16218_v34 = vpop.f32.mrb[19].mxu0  ;;  %16878 = vmatprep.subr.bf16.mxu0 %v20958_v42  ;;  %v20998_v26 = vld [vmem:[#allocation8 + $0xb80] ss:$24 sps:$4 sm:$0xff]   ;;  %v21004_v42 = vld [vmem:[#allocation8 + $0xbb0] ss:$24 sps:$4 sm:$0xff]  }
 0x818   :  { %17254 = vst [vmem:[#allocation11 + $0x8] sm:$0xff] %v19637_v33  ;;  %v19639_v61 = vadd.f32 %v16218_v34, %v9922_v40  ;;  %16506 = vmatpush1.bf16.msra.mxu1 %v20953_v22  ;;  %v21009_v40 = vld [vmem:[#allocation8 + $0x162c] ss:$24 sps:$4 sm:$0xff]   ;;  %v21007_v22 = vld [vmem:[#allocation8 + $0x1628] ss:$24 sps:$4 sm:$0xff]  }
 0x819   :  { %17259 = vst [vmem:[#allocation11 + $0x30] sm:$0xff] %v19638_v59  ;;  %16507 = vmatprep.subr.bf16.mxu1 %v20961_v46  ;;  %v21015_v13 = vld [vmem:[#allocation8 + $0x165c] ss:$24 sps:$4 sm:$0xff]   ;;  %v21010_v41 = vld [vmem:[#allocation8 + $0xbe0] ss:$24 sps:$4 sm:$0xff]  }
 0x81a   :  { %17260 = vst [vmem:[#allocation11 + $0x38] sm:$0xff] %v19639_v61  ;;  %16879 = vmatpush1.bf16.msra.mxu0 %v20956_v23  ;;  %v21018_v46 = vld [vmem:[#allocation8 + $0xc14] ss:$24 sps:$4 sm:$0xff]   ;;  %v21013_v33 = vld [vmem:[#allocation8 + $0x1658] ss:$24 sps:$4 sm:$0xff]  }
 0x81b   :  { %16880 = vmatprep.subr.bf16.mxu0 %v20964_v53  ;;  %v21021_v49 = vld [vmem:[#allocation8 + $0x168c] ss:$24 sps:$4 sm:$0xff]   ;;  %v21016_v23 = vld [vmem:[#allocation8 + $0xc10] ss:$24 sps:$4 sm:$0xff]   ;;  %v21027_v53 = vld [vmem:[#allocation8 + $0x16bc] ss:$24 sps:$4 sm:$0xff]  }
 0x81c   :  { %16508 = vmatpush1.bf16.msra.mxu1 %v20959_v54  ;;  %v21024_v59 = vld [vmem:[#allocation8 + $0xc44] ss:$24 sps:$4 sm:$0xff]   ;;  %v21019_v34 = vld [vmem:[#allocation8 + $0x1688] ss:$24 sps:$4 sm:$0xff]   ;;  %v21030_v54 = vld [vmem:[#allocation8 + $0xc74] ss:$24 sps:$4 sm:$0xff]  }
 0x81d   :  { %16509 = vmatprep.subr.bf16.mxu1 %v20967_v51  ;;  %v21022_v61 = vld [vmem:[#allocation8 + $0xc40] ss:$24 sps:$4 sm:$0xff]  }
 0x81e   :  { %16881 = vmatpush1.bf16.msra.mxu0 %v20962_v57  ;;  %v21025_v51 = vld [vmem:[#allocation8 + $0x16b8] ss:$24 sps:$4 sm:$0xff]   ;;  %v21033_v57 = vld [vmem:[#allocation8 + $0x16ec] ss:$24 sps:$4 sm:$0xff]  }
 0x81f   :  { %16882 = vmatprep.subr.bf16.mxu0 %v20970_v62  ;;  %v21028_v62 = vld [vmem:[#allocation8 + $0xc70] ss:$24 sps:$4 sm:$0xff]  }
 0x820   :  { %16510 = vmatpush1.bf16.msra.mxu1 %v20965_v56  ;;  %v21036_v56 = vld [vmem:[#allocation8 + $0xca4] ss:$24 sps:$4 sm:$0xff]  }
 0x821   :  { %16522 = vmatprep.subr.bf16.mxu1 %v20973_v44  ;;  %v21031_v44 = vld [vmem:[#allocation8 + $0x16e8] ss:$24 sps:$4 sm:$0xff]  }
 0x822   :  { %16883 = vmatpush1.bf16.msra.mxu0 %v20968_v30  ;;  %v21034_v30 = vld [vmem:[#allocation8 + $0xca0] ss:$24 sps:$4 sm:$0xff]  }
 0x823   :  { %16512 = vmatmul.mubr.bf16.vlgmr.msra.gmra.mrb[32].mxu1 %v21959_v28  ;;  %16884 = vmatprep.subr.bf16.mxu0 %v20976_v21  ;;  %v21042_v21 = vld [vmem:[#allocation8 + $0xcd4] ss:$24 sps:$4 sm:$0xff]  }
 0x824   :  { %16523 = vmatpush1.bf16.msra.mxu1 %v20971_v4  ;;  %16554 = vmatprep.mubr.bf16.mxu1 %v22052_v60  ;;  %v21045_v4 = vld [vmem:[#allocation8 + $0x174c] ss:$24 sps:$4 sm:$0xff]  }
 0x825   :  { %16524 = vmatprep.subr.bf16.mxu1 %v20979_v7  ;;  %v21040_v7 = vld [vmem:[#allocation8 + $0xcd0] ss:$24 sps:$4 sm:$0xff]  }
 0x826   :  { %16885 = vmatpush1.bf16.msra.mxu0 %v20974_v39  ;;  %v21048_v39 = vld [vmem:[#allocation8 + $0xd04] ss:$24 sps:$4 sm:$0xff]  }
 0x827   :  { %16886 = vmatprep.subr.bf16.mxu0 %v20982_v15  ;;  %v21043_v15 = vld [vmem:[#allocation8 + $0x1748] ss:$24 sps:$4 sm:$0xff]  }
 0x828   :  { %16525 = vmatpush1.bf16.msra.mxu1 %v20977_v58  ;;  %v21051_v58 = vld [vmem:[#allocation8 + $0x177c] ss:$24 sps:$4 sm:$0xff]  }
 0x829   :  { %16526 = vmatprep.subr.bf16.mxu1 %v20985_v8  ;;  %v21046_v8 = vld [vmem:[#allocation8 + $0xd00] ss:$24 sps:$4 sm:$0xff]  }
 0x82a   :  { %16887 = vmatpush1.bf16.msra.mxu0 %v20980_v9  ;;  %v21054_v9 = vld [vmem:[#allocation8 + $0xd34] ss:$24 sps:$4 sm:$0xff]  }
 0x82b   :  { %16888 = vmatprep.subr.bf16.mxu0 %v20988_v2  ;;  %v21049_v2 = vld [vmem:[#allocation8 + $0x1778] ss:$24 sps:$4 sm:$0xff]  }
 0x82c   :  { %16527 = vmatpush1.bf16.msra.mxu1 %v20983_v25  ;;  %v21057_v25 = vld [vmem:[#allocation8 + $0x17ac] ss:$24 sps:$4 sm:$0xff]  }
 0x82d   :  { %16528 = vmatprep.subr.bf16.mxu1 %v20991_v24  ;;  %v21052_v24 = vld [vmem:[#allocation8 + $0xd30] ss:$24 sps:$4 sm:$0xff]  }
 0x82e   :  { %16889 = vmatpush1.bf16.msra.mxu0 %v20986_v10  ;;  %v21060_v10 = vld [vmem:[#allocation8 + $0xd64] ss:$24 sps:$4 sm:$0xff]  }
 0x82f   :  { %16890 = vmatprep.subr.bf16.mxu0 %v20994_v12  ;;  %v21055_v12 = vld [vmem:[#allocation8 + $0x17a8] ss:$24 sps:$4 sm:$0xff]  }
 0x830   :  { %16529 = vmatpush1.bf16.msra.mxu1 %v20989_v50  ;;  %v21063_v50 = vld [vmem:[#allocation8 + $0x17dc] ss:$24 sps:$4 sm:$0xff]  }
 0x831   :  { %16530 = vmatprep.subr.bf16.mxu1 %v20997_v16  ;;  %v21058_v16 = vld [vmem:[#allocation8 + $0xd60] ss:$24 sps:$4 sm:$0xff]  }
 0x832   :  { %16891 = vmatpush1.bf16.msra.mxu0 %v20992_v18  ;;  %v21066_v18 = vld [vmem:[#allocation8 + $0xd94] ss:$24 sps:$4 sm:$0xff]  }
 0x833   :  { %16892 = vmatprep.subr.bf16.mxu0 %v21000_v19  ;;  %v21061_v19 = vld [vmem:[#allocation8 + $0x17d8] ss:$24 sps:$4 sm:$0xff]  }
 0x834   :  { %16531 = vmatpush1.bf16.msra.mxu1 %v20995_v20  ;;  %v21069_v20 = vld [vmem:[#allocation8 + $0x180c] ss:$24 sps:$4 sm:$0xff]  }
 0x835   :  { %16532 = vmatprep.subr.bf16.mxu1 %v21003_v27  ;;  %v21064_v27 = vld [vmem:[#allocation8 + $0xd90] ss:$24 sps:$4 sm:$0xff]  }
 0x836   :  { %16893 = vmatpush1.bf16.msra.mxu0 %v20998_v26  ;;  %v21072_v26 = vld [vmem:[#allocation8 + $0xdc4] ss:$24 sps:$4 sm:$0xff]  }
 0x837   :  { %16894 = vmatprep.subr.bf16.mxu0 %v21006_v31  ;;  %v21067_v31 = vld [vmem:[#allocation8 + $0x1808] ss:$24 sps:$4 sm:$0xff]  }
 0x838   :  { %16533 = vmatpush1.bf16.msra.mxu1 %v21001_v35  ;;  %v21075_v35 = vld [vmem:[#allocation8 + $0x183c] ss:$24 sps:$4 sm:$0xff]  }
 0x839   :  { %16534 = vmatprep.subr.bf16.mxu1 %v21009_v40  ;;  %v21070_v40 = vld [vmem:[#allocation8 + $0xdc0] ss:$24 sps:$4 sm:$0xff]  }
 0x83a   :  { %16895 = vmatpush1.bf16.msra.mxu0 %v21004_v42  ;;  %v21078_v42 = vld [vmem:[#allocation8 + $0xdf4] ss:$24 sps:$4 sm:$0xff]  }
 0x83b   :  { %16896 = vmatprep.subr.bf16.mxu0 %v21012_v43  ;;  %v21073_v43 = vld [vmem:[#allocation8 + $0x1838] ss:$24 sps:$4 sm:$0xff]  }
 0x83c   :  { %16535 = vmatpush1.bf16.msra.mxu1 %v21007_v22  ;;  %v21081_v22 = vld [vmem:[#allocation8 + $0x186c] ss:$24 sps:$4 sm:$0xff]  }
 0x83d   :  { %16536 = vmatprep.subr.bf16.mxu1 %v21015_v13  ;;  %v21076_v13 = vld [vmem:[#allocation8 + $0xdf0] ss:$24 sps:$4 sm:$0xff]  }
 0x83e   :  { %16897 = vmatpush1.bf16.msra.mxu0 %v21010_v41  ;;  %v21084_v41 = vld [vmem:[#allocation8 + $0xe24] ss:$24 sps:$4 sm:$0xff]  }
 0x83f   :  { %16909 = vmatprep.subr.bf16.mxu0 %v21018_v46  ;;  %v21079_v46 = vld [vmem:[#allocation8 + $0x1868] ss:$24 sps:$4 sm:$0xff]  }
 0x840   :  { %16537 = vmatpush1.bf16.msra.mxu1 %v21013_v33  ;;  %v21087_v33 = vld [vmem:[#allocation8 + $0x189c] ss:$24 sps:$4 sm:$0xff]  }
 0x841   :  { %16899 = vmatmul.mubr.bf16.vlgmr.msra.gmra.mrb[20].mxu0 %v22008_v48  ;;  %16538 = vmatprep.subr.bf16.mxu1 %v21021_v49  ;;  %v21039_v48 = vld [vmem:[#allocation8 + $0x171c] ss:$24 sps:$4 sm:$0xff]   ;;  %v21082_v49 = vld [vmem:[#allocation8 + $0xe20] ss:$24 sps:$4 sm:$0xff]  }
 0x842   :  { %16910 = vmatpush1.bf16.msra.mxu0 %v21016_v23  ;;  %16941 = vmatprep.mubr.bf16.mxu0 %v21925_v6  ;;  %v21037_v6 = vld [vmem:[#allocation8 + $0x1718] ss:$24 sps:$4 sm:$0xff]   ;;  %v21090_v23 = vld [vmem:[#allocation8 + $0xe54] ss:$24 sps:$4 sm:$0xff]  }
 0x843   :  { %16911 = vmatprep.subr.bf16.mxu0 %v21024_v59  ;;  %v21085_v59 = vld [vmem:[#allocation8 + $0x1898] ss:$24 sps:$4 sm:$0xff]  }
 0x844   :  { %16539 = vmatpush1.bf16.msra.mxu1 %v21019_v34  ;;  %v21093_v34 = vld [vmem:[#allocation8 + $0x18cc] ss:$24 sps:$4 sm:$0xff]  }
 0x845   :  { %16540 = vmatprep.subr.bf16.mxu1 %v21027_v53  ;;  %v21088_v53 = vld [vmem:[#allocation8 + $0xe50] ss:$24 sps:$4 sm:$0xff]  }
 0x846   :  { %16912 = vmatpush1.bf16.msra.mxu0 %v21022_v61  ;;  %v21096_v61 = vld [vmem:[#allocation8 + $0xe84] ss:$24 sps:$4 sm:$0xff]  }
 0x847   :  { %16913 = vmatprep.subr.bf16.mxu0 %v21030_v54  ;;  %v21091_v54 = vld [vmem:[#allocation8 + $0x18c8] ss:$24 sps:$4 sm:$0xff]  }
 0x848   :  { %16541 = vmatpush1.bf16.msra.mxu1 %v21025_v51  ;;  %v21099_v51 = vld [vmem:[#allocation8 + $0x18fc] ss:$24 sps:$4 sm:$0xff]  }
 0x849   :  { %16542 = vmatprep.subr.bf16.mxu1 %v21033_v57  ;;  %v21094_v57 = vld [vmem:[#allocation8 + $0xe80] ss:$24 sps:$4 sm:$0xff]  }
 0x84a   :  { %16914 = vmatpush1.bf16.msra.mxu0 %v21028_v62  ;;  %v21102_v62 = vld [vmem:[#allocation8 + $0xeb4] ss:$24 sps:$4 sm:$0xff]  }
 0x84b   :  { %16915 = vmatprep.subr.bf16.mxu0 %v21036_v56  ;;  %v21097_v56 = vld [vmem:[#allocation8 + $0x18f8] ss:$24 sps:$4 sm:$0xff]  }
 0x84c   :  { %16543 = vmatpush1.bf16.msra.mxu1 %v21031_v44  ;;  %v21105_v44 = vld [vmem:[#allocation8 + $0x192c] ss:$24 sps:$4 sm:$0xff]  }
 0x84d   :  { %16544 = vmatprep.subr.bf16.mxu1 %v21039_v48  ;;  %v21100_v48 = vld [vmem:[#allocation8 + $0xeb0] ss:$24 sps:$4 sm:$0xff]  }
 0x84e   :  { %16916 = vmatpush1.bf16.msra.mxu0 %v21034_v30  ;;  %v21108_v30 = vld [vmem:[#allocation8 + $0xee4] ss:$24 sps:$4 sm:$0xff]  }
 0x84f   :  { %16917 = vmatprep.subr.bf16.mxu0 %v21042_v21  ;;  %v21103_v21 = vld [vmem:[#allocation8 + $0x1928] ss:$24 sps:$4 sm:$0xff]  }
 0x850   :  { %16545 = vmatpush1.bf16.msra.mxu1 %v21037_v6  ;;  %v21111_v6 = vld [vmem:[#allocation8 + $0x195c] ss:$24 sps:$4 sm:$0xff]  }
 0x851   :  { %16546 = vmatprep.subr.bf16.mxu1 %v21045_v4  ;;  %v21106_v4 = vld [vmem:[#allocation8 + $0xee0] ss:$24 sps:$4 sm:$0xff]  }
 0x852   :  { %16918 = vmatpush1.bf16.msra.mxu0 %v21040_v7  ;;  %v21114_v7 = vld [vmem:[#allocation8 + $0xf14] ss:$24 sps:$4 sm:$0xff]  }
 0x853   :  { %16919 = vmatprep.subr.bf16.mxu0 %v21048_v39  ;;  %v21109_v39 = vld [vmem:[#allocation8 + $0x1958] ss:$24 sps:$4 sm:$0xff]  }
 0x854   :  { %16547 = vmatpush1.bf16.msra.mxu1 %v21043_v15  ;;  %v21117_v15 = vld [vmem:[#allocation8 + $0x198c] ss:$24 sps:$4 sm:$0xff]  }
 0x855   :  { %16548 = vmatprep.subr.bf16.mxu1 %v21051_v58  ;;  %v21112_v58 = vld [vmem:[#allocation8 + $0xf10] ss:$24 sps:$4 sm:$0xff]  }
 0x856   :  { %16920 = vmatpush1.bf16.msra.mxu0 %v21046_v8  ;;  %v21120_v8 = vld [vmem:[#allocation8 + $0xf44] ss:$24 sps:$4 sm:$0xff]  }
 0x857   :  { %16921 = vmatprep.subr.bf16.mxu0 %v21054_v9  ;;  %v21115_v9 = vld [vmem:[#allocation8 + $0x1988] ss:$24 sps:$4 sm:$0xff]  }
 0x858   :  { %16549 = vmatpush1.bf16.msra.mxu1 %v21049_v2  ;;  %v21123_v2 = vld [vmem:[#allocation8 + $0x19bc] ss:$24 sps:$4 sm:$0xff]  }
 0x859   :  { %16550 = vmatprep.subr.bf16.mxu1 %v21057_v25  ;;  %v21118_v25 = vld [vmem:[#allocation8 + $0xf40] ss:$24 sps:$4 sm:$0xff]  }
 0x85a   :  { %16922 = vmatpush1.bf16.msra.mxu0 %v21052_v24  ;;  %v21126_v24 = vld [vmem:[#allocation8 + $0xf74] ss:$24 sps:$4 sm:$0xff]  }
 0x85b   :  { %16923 = vmatprep.subr.bf16.mxu0 %v21060_v10  ;;  %v21121_v10 = vld [vmem:[#allocation8 + $0x19b8] ss:$24 sps:$4 sm:$0xff]  }
 0x85c   :  { %16551 = vmatpush1.bf16.msra.mxu1 %v21055_v12  ;;  %v21129_v12 = vld [vmem:[#allocation8 + $0x19ec] ss:$24 sps:$4 sm:$0xff]  }
 0x85d   :  { %16552 = vmatprep.subr.bf16.mxu1 %v21063_v50  ;;  %v21124_v50 = vld [vmem:[#allocation8 + $0xf70] ss:$24 sps:$4 sm:$0xff]  }
 0x85e   :  { %16924 = vmatpush1.bf16.msra.mxu0 %v21058_v16  ;;  %v21132_v16 = vld [vmem:[#allocation8 + $0xfa4] ss:$24 sps:$4 sm:$0xff]  }
 0x85f   :  { %16925 = vmatprep.subr.bf16.mxu0 %v21066_v18  ;;  %v21127_v18 = vld [vmem:[#allocation8 + $0x19e8] ss:$24 sps:$4 sm:$0xff]  }
 0x860   :  { %16553 = vmatpush1.bf16.msra.mxu1 %v21061_v19  ;;  %v21130_v19 = vld [vmem:[#allocation8 + $0xfa0] ss:$24 sps:$4 sm:$0xff]  }
 0x861   :  { %16565 = vmatprep.subr.bf16.mxu1 %v21069_v20  ;;  %v21138_v20 = vld [vmem:[#allocation8 + $0xfd4] ss:$24 sps:$4 sm:$0xff]  }
 0x862   :  { %16926 = vmatpush1.bf16.msra.mxu0 %v21064_v27  ;;  %v21141_v27 = vld [vmem:[#allocation8 + $0x1a4c] ss:$24 sps:$4 sm:$0xff]  }
 0x863   :  { %16555 = vmatmul.mubr.bf16.vlgmr.msra.gmra.mrb[32].mxu1 %v22050_v52  ;;  %16927 = vmatprep.subr.bf16.mxu0 %v21072_v26  ;;  %v21136_v26 = vld [vmem:[#allocation8 + $0xfd0] ss:$24 sps:$4 sm:$0xff]  }
 0x864   :  { %16566 = vmatpush1.bf16.msra.mxu1 %v21067_v31  ;;  %16597 = vmatprep.mubr.bf16.mxu1 %v21985_v38  ;;  %v21144_v31 = vld [vmem:[#allocation8 + $0x1004] ss:$24 sps:$4 sm:$0xff]  }
 0x865   :  { %16567 = vmatprep.subr.bf16.mxu1 %v21075_v35  ;;  %v21139_v35 = vld [vmem:[#allocation8 + $0x1a48] ss:$24 sps:$4 sm:$0xff]  }
 0x866   :  { %16928 = vmatpush1.bf16.msra.mxu0 %v21070_v40  ;;  %v21147_v40 = vld [vmem:[#allocation8 + $0x1a7c] ss:$24 sps:$4 sm:$0xff]  }
 0x867   :  { %16929 = vmatprep.subr.bf16.mxu0 %v21078_v42  ;;  %v21142_v42 = vld [vmem:[#allocation8 + $0x1000] ss:$24 sps:$4 sm:$0xff]  }
 0x868   :  { %16568 = vmatpush1.bf16.msra.mxu1 %v21073_v43  ;;  %v21150_v43 = vld [vmem:[#allocation8 + $0x1034] ss:$24 sps:$4 sm:$0xff]  }
 0x869   :  { %16569 = vmatprep.subr.bf16.mxu1 %v21081_v22  ;;  %v21145_v22 = vld [vmem:[#allocation8 + $0x1a78] ss:$24 sps:$4 sm:$0xff]  }
 0x86a   :  { %16930 = vmatpush1.bf16.msra.mxu0 %v21076_v13  ;;  %v21153_v13 = vld [vmem:[#allocation8 + $0x1aac] ss:$24 sps:$4 sm:$0xff]  }
 0x86b   :  { %16931 = vmatprep.subr.bf16.mxu0 %v21084_v41  ;;  %v21148_v41 = vld [vmem:[#allocation8 + $0x1030] ss:$24 sps:$4 sm:$0xff]  }
 0x86c   :  { %16570 = vmatpush1.bf16.msra.mxu1 %v21079_v46  ;;  %v21156_v46 = vld [vmem:[#allocation8 + $0x1064] ss:$24 sps:$4 sm:$0xff]  }
 0x86d   :  { %16571 = vmatprep.subr.bf16.mxu1 %v21087_v33  ;;  %v21151_v33 = vld [vmem:[#allocation8 + $0x1aa8] ss:$24 sps:$4 sm:$0xff]  }
 0x86e   :  { %16932 = vmatpush1.bf16.msra.mxu0 %v21082_v49  ;;  %v21159_v49 = vld [vmem:[#allocation8 + $0x1adc] ss:$24 sps:$4 sm:$0xff]  }
 0x86f   :  { %16933 = vmatprep.subr.bf16.mxu0 %v21090_v23  ;;  %v21154_v23 = vld [vmem:[#allocation8 + $0x1060] ss:$24 sps:$4 sm:$0xff]  }
 0x870   :  { %16572 = vmatpush1.bf16.msra.mxu1 %v21085_v59  ;;  %v21162_v59 = vld [vmem:[#allocation8 + $0x1094] ss:$24 sps:$4 sm:$0xff]  }
 0x871   :  { %16573 = vmatprep.subr.bf16.mxu1 %v21093_v34  ;;  %v21157_v34 = vld [vmem:[#allocation8 + $0x1ad8] ss:$24 sps:$4 sm:$0xff]  }
 0x872   :  { %16934 = vmatpush1.bf16.msra.mxu0 %v21088_v53  ;;  %v21165_v53 = vld [vmem:[#allocation8 + $0x1b0c] ss:$24 sps:$4 sm:$0xff]  }
 0x873   :  { %16935 = vmatprep.subr.bf16.mxu0 %v21096_v61  ;;  %v21160_v61 = vld [vmem:[#allocation8 + $0x1090] ss:$24 sps:$4 sm:$0xff]  }
 0x874   :  { %16574 = vmatpush1.bf16.msra.mxu1 %v21091_v54  ;;  %v21168_v54 = vld [vmem:[#allocation8 + $0x10c4] ss:$24 sps:$4 sm:$0xff]  }
 0x875   :  { %16575 = vmatprep.subr.bf16.mxu1 %v21099_v51  ;;  %v21163_v51 = vld [vmem:[#allocation8 + $0x1b08] ss:$24 sps:$4 sm:$0xff]  }
 0x876   :  { %16936 = vmatpush1.bf16.msra.mxu0 %v21094_v57  ;;  %v21171_v57 = vld [vmem:[#allocation8 + $0x1b3c] ss:$24 sps:$4 sm:$0xff]  }
 0x877   :  { %16937 = vmatprep.subr.bf16.mxu0 %v21102_v62  ;;  %v21166_v62 = vld [vmem:[#allocation8 + $0x10c0] ss:$24 sps:$4 sm:$0xff]  }
 0x878   :  { %16576 = vmatpush1.bf16.msra.mxu1 %v21097_v56  ;;  %v21174_v56 = vld [vmem:[#allocation8 + $0x10f4] ss:$24 sps:$4 sm:$0xff]  }
 0x879   :  { %16577 = vmatprep.subr.bf16.mxu1 %v21105_v44  ;;  %v21169_v44 = vld [vmem:[#allocation8 + $0x1b38] ss:$24 sps:$4 sm:$0xff]  }
 0x87a   :  { %16938 = vmatpush1.bf16.msra.mxu0 %v21100_v48  ;;  %v21177_v48 = vld [vmem:[#allocation8 + $0x1b6c] ss:$24 sps:$4 sm:$0xff]  }
 0x87b   :  { %16939 = vmatprep.subr.bf16.mxu0 %v21108_v30  ;;  %v21172_v30 = vld [vmem:[#allocation8 + $0x10f0] ss:$24 sps:$4 sm:$0xff]  }
 0x87c   :  { %16578 = vmatpush1.bf16.msra.mxu1 %v21103_v21  ;;  %v21180_v21 = vld [vmem:[#allocation8 + $0x1124] ss:$24 sps:$4 sm:$0xff]  }
 0x87d   :  { %16579 = vmatprep.subr.bf16.mxu1 %v21111_v6  ;;  %v21175_v6 = vld [vmem:[#allocation8 + $0x1b68] ss:$24 sps:$4 sm:$0xff]  }
 0x87e   :  { %16940 = vmatpush1.bf16.msra.mxu0 %v21106_v4  ;;  %v21183_v4 = vld [vmem:[#allocation8 + $0x1b9c] ss:$24 sps:$4 sm:$0xff]  }
 0x87f   :  { %16952 = vmatprep.subr.bf16.mxu0 %v21114_v7  ;;  %v21178_v7 = vld [vmem:[#allocation8 + $0x1120] ss:$24 sps:$4 sm:$0xff]  }
 0x880   :  { %16580 = vmatpush1.bf16.msra.mxu1 %v21109_v39  ;;  %v21186_v39 = vld [vmem:[#allocation8 + $0x1154] ss:$24 sps:$4 sm:$0xff]  }
 0x881   :  { %16942 = vmatmul.mubr.bf16.vlgmr.msra.gmra.mrb[20].mxu0 %v21923_v5  ;;  %16581 = vmatprep.subr.bf16.mxu1 %v21117_v15  ;;  %v21135_v5 = vld [vmem:[#allocation8 + $0x1a1c] ss:$24 sps:$4 sm:$0xff]   ;;  %v21181_v15 = vld [vmem:[#allocation8 + $0x1b98] ss:$24 sps:$4 sm:$0xff]  }
 0x882   :  { %16953 = vmatpush1.bf16.msra.mxu0 %v21112_v58  ;;  %16984 = vmatprep.mubr.bf16.mxu0 %v22034_v17  ;;  %v21133_v17 = vld [vmem:[#allocation8 + $0x1a18] ss:$24 sps:$4 sm:$0xff]   ;;  %v21189_v58 = vld [vmem:[#allocation8 + $0x1bcc] ss:$24 sps:$4 sm:$0xff]  }
 0x883   :  { %16954 = vmatprep.subr.bf16.mxu0 %v21120_v8  ;;  %v21184_v8 = vld [vmem:[#allocation8 + $0x1150] ss:$24 sps:$4 sm:$0xff]  }
 0x884   :  { %16582 = vmatpush1.bf16.msra.mxu1 %v21115_v9  ;;  %v21192_v9 = vld [vmem:[#allocation8 + $0x1184] ss:$24 sps:$4 sm:$0xff]  }
 0x885   :  { %16583 = vmatprep.subr.bf16.mxu1 %v21123_v2  ;;  %v21187_v2 = vld [vmem:[#allocation8 + $0x1bc8] ss:$24 sps:$4 sm:$0xff]  }
 0x886   :  { %16955 = vmatpush1.bf16.msra.mxu0 %v21118_v25  ;;  %v21195_v25 = vld [vmem:[#allocation8 + $0x1bfc] ss:$24 sps:$4 sm:$0xff]  }
 0x887   :  { %16956 = vmatprep.subr.bf16.mxu0 %v21126_v24  ;;  %v21190_v24 = vld [vmem:[#allocation8 + $0x1180] ss:$24 sps:$4 sm:$0xff]  }
 0x888   :  { %16584 = vmatpush1.bf16.msra.mxu1 %v21121_v10  ;;  %v21198_v10 = vld [vmem:[#allocation8 + $0x11b4] ss:$24 sps:$4 sm:$0xff]  }
 0x889   :  { %16585 = vmatprep.subr.bf16.mxu1 %v21129_v12  ;;  %v21193_v12 = vld [vmem:[#allocation8 + $0x1bf8] ss:$24 sps:$4 sm:$0xff]  }
 0x88a   :  { %16957 = vmatpush1.bf16.msra.mxu0 %v21124_v50  ;;  %v21201_v50 = vld [vmem:[#allocation8 + $0x1c2c] ss:$24 sps:$4 sm:$0xff]  }
 0x88b   :  { %16958 = vmatprep.subr.bf16.mxu0 %v21132_v16  ;;  %v21196_v16 = vld [vmem:[#allocation8 + $0x11b0] ss:$24 sps:$4 sm:$0xff]  }
 0x88c   :  { %16586 = vmatpush1.bf16.msra.mxu1 %v21127_v18  ;;  %v21204_v18 = vld [vmem:[#allocation8 + $0x11e4] ss:$24 sps:$4 sm:$0xff]  }
 0x88d   :  { %16587 = vmatprep.subr.bf16.mxu1 %v21135_v5  ;;  %v21199_v5 = vld [vmem:[#allocation8 + $0x1c28] ss:$24 sps:$4 sm:$0xff]  }
 0x88e   :  { %16959 = vmatpush1.bf16.msra.mxu0 %v21130_v19  ;;  %v21207_v19 = vld [vmem:[#allocation8 + $0x1c5c] ss:$24 sps:$4 sm:$0xff]  }
 0x88f   :  { %16960 = vmatprep.subr.bf16.mxu0 %v21138_v20  ;;  %v21202_v20 = vld [vmem:[#allocation8 + $0x11e0] ss:$24 sps:$4 sm:$0xff]  }
 0x890   :  { %16588 = vmatpush1.bf16.msra.mxu1 %v21133_v17  ;;  %v21210_v17 = vld [vmem:[#allocation8 + $0x1214] ss:$24 sps:$4 sm:$0xff]  }
 0x891   :  { %16589 = vmatprep.subr.bf16.mxu1 %v21141_v27  ;;  %v21205_v27 = vld [vmem:[#allocation8 + $0x1c58] ss:$24 sps:$4 sm:$0xff]  }
 0x892   :  { %16961 = vmatpush1.bf16.msra.mxu0 %v21136_v26  ;;  %v21213_v26 = vld [vmem:[#allocation8 + $0x1c8c] ss:$24 sps:$4 sm:$0xff]  }
 0x893   :  { %16962 = vmatprep.subr.bf16.mxu0 %v21144_v31  ;;  %v21208_v31 = vld [vmem:[#allocation8 + $0x1210] ss:$24 sps:$4 sm:$0xff]  }
 0x894   :  { %16590 = vmatpush1.bf16.msra.mxu1 %v21139_v35  ;;  %v21216_v35 = vld [vmem:[#allocation8 + $0x1244] ss:$24 sps:$4 sm:$0xff]  }
 0x895   :  { %16591 = vmatprep.subr.bf16.mxu1 %v21147_v40  ;;  %v21211_v40 = vld [vmem:[#allocation8 + $0x1c88] ss:$24 sps:$4 sm:$0xff]  }
 0x896   :  { %16963 = vmatpush1.bf16.msra.mxu0 %v21142_v42  ;;  %v21219_v42 = vld [vmem:[#allocation8 + $0x1cbc] ss:$24 sps:$4 sm:$0xff]  }
 0x897   :  { %16964 = vmatprep.subr.bf16.mxu0 %v21150_v43  ;;  %v21214_v43 = vld [vmem:[#allocation8 + $0x1240] ss:$24 sps:$4 sm:$0xff]  }
 0x898   :  { %16592 = vmatpush1.bf16.msra.mxu1 %v21145_v22  ;;  %v21222_v22 = vld [vmem:[#allocation8 + $0x1274] ss:$24 sps:$4 sm:$0xff]  }
 0x899   :  { %16593 = vmatprep.subr.bf16.mxu1 %v21153_v13  ;;  %v21217_v13 = vld [vmem:[#allocation8 + $0x1cb8] ss:$24 sps:$4 sm:$0xff]  }
 0x89a   :  { %16965 = vmatpush1.bf16.msra.mxu0 %v21148_v41  ;;  %v21225_v41 = vld [vmem:[#allocation8 + $0x1cec] ss:$24 sps:$4 sm:$0xff]  }
 0x89b   :  { %16966 = vmatprep.subr.bf16.mxu0 %v21156_v46  ;;  %v21220_v46 = vld [vmem:[#allocation8 + $0x1270] ss:$24 sps:$4 sm:$0xff]  }
 0x89c   :  { %16594 = vmatpush1.bf16.msra.mxu1 %v21151_v33  ;;  %v21228_v33 = vld [vmem:[#allocation8 + $0x12a4] ss:$24 sps:$4 sm:$0xff]  }
 0x89d   :  { %16595 = vmatprep.subr.bf16.mxu1 %v21159_v49  ;;  %v21223_v49 = vld [vmem:[#allocation8 + $0x1ce8] ss:$24 sps:$4 sm:$0xff]  }
 0x89e   :  { %16967 = vmatpush1.bf16.msra.mxu0 %v21154_v23  ;;  %v21226_v23 = vld [vmem:[#allocation8 + $0x12a0] ss:$24 sps:$4 sm:$0xff]  }
 0x89f   :  { %16968 = vmatprep.subr.bf16.mxu0 %v21162_v59  ;;  %v21234_v59 = vld [vmem:[#allocation8 + $0x12d4] ss:$24 sps:$4 sm:$0xff]  }
 0x8a0   :  { %16596 = vmatpush1.bf16.msra.mxu1 %v21157_v34  ;;  %v21237_v34 = vld [vmem:[#allocation8 + $0x1d4c] ss:$24 sps:$4 sm:$0xff]  }
 0x8a1   :  { %16608 = vmatprep.subr.bf16.mxu1 %v21165_v53  ;;  %v21232_v53 = vld [vmem:[#allocation8 + $0x12d0] ss:$24 sps:$4 sm:$0xff]  }
 0x8a2   :  { %16969 = vmatpush1.bf16.msra.mxu0 %v21160_v61  ;;  %v21240_v61 = vld [vmem:[#allocation8 + $0x1304] ss:$24 sps:$4 sm:$0xff]  }
 0x8a3   :  { %16598 = vmatmul.mubr.bf16.vlgmr.msra.gmra.mrb[32].mxu1 %v21983_v37  ;;  %16970 = vmatprep.subr.bf16.mxu0 %v21168_v54  ;;  %v21235_v54 = vld [vmem:[#allocation8 + $0x1d48] ss:$24 sps:$4 sm:$0xff]  }
 0x8a4   :  { %16609 = vmatpush1.bf16.msra.mxu1 %v21163_v51  ;;  %16640 = vmatprep.mubr.bf16.mxu1 %v22072_v36  ;;  %v21243_v51 = vld [vmem:[#allocation8 + $0x1d7c] ss:$24 sps:$4 sm:$0xff]  }
 0x8a5   :  { %16610 = vmatprep.subr.bf16.mxu1 %v21171_v57  ;;  %v21238_v57 = vld [vmem:[#allocation8 + $0x1300] ss:$24 sps:$4 sm:$0xff]  }
 0x8a6   :  { %16971 = vmatpush1.bf16.msra.mxu0 %v21166_v62  ;;  %v21246_v62 = vld [vmem:[#allocation8 + $0x1334] ss:$24 sps:$4 sm:$0xff]  }
 0x8a7   :  { %16972 = vmatprep.subr.bf16.mxu0 %v21174_v56  ;;  %v21241_v56 = vld [vmem:[#allocation8 + $0x1d78] ss:$24 sps:$4 sm:$0xff]  }
 0x8a8   :  { %16611 = vmatpush1.bf16.msra.mxu1 %v21169_v44  ;;  %v21249_v44 = vld [vmem:[#allocation8 + $0x1dac] ss:$24 sps:$4 sm:$0xff]  }
 0x8a9   :  { %16612 = vmatprep.subr.bf16.mxu1 %v21177_v48  ;;  %v21244_v48 = vld [vmem:[#allocation8 + $0x1330] ss:$24 sps:$4 sm:$0xff]  }
 0x8aa   :  { %16973 = vmatpush1.bf16.msra.mxu0 %v21172_v30  ;;  %v21252_v30 = vld [vmem:[#allocation8 + $0x1364] ss:$24 sps:$4 sm:$0xff]  }
 0x8ab   :  { %16974 = vmatprep.subr.bf16.mxu0 %v21180_v21  ;;  %v21247_v21 = vld [vmem:[#allocation8 + $0x1da8] ss:$24 sps:$4 sm:$0xff]  }
 0x8ac   :  { %16613 = vmatpush1.bf16.msra.mxu1 %v21175_v6  ;;  %v21255_v6 = vld [vmem:[#allocation8 + $0x1ddc] ss:$24 sps:$4 sm:$0xff]  }
 0x8ad   :  { %16614 = vmatprep.subr.bf16.mxu1 %v21183_v4  ;;  %v21250_v4 = vld [vmem:[#allocation8 + $0x1360] ss:$24 sps:$4 sm:$0xff]  }
 0x8ae   :  { %16975 = vmatpush1.bf16.msra.mxu0 %v21178_v7  ;;  %v21258_v7 = vld [vmem:[#allocation8 + $0x1394] ss:$24 sps:$4 sm:$0xff]  }
 0x8af   :  { %16976 = vmatprep.subr.bf16.mxu0 %v21186_v39  ;;  %v21253_v39 = vld [vmem:[#allocation8 + $0x1dd8] ss:$24 sps:$4 sm:$0xff]  }
 0x8b0   :  { %16615 = vmatpush1.bf16.msra.mxu1 %v21181_v15  ;;  %v21261_v15 = vld [vmem:[#allocation8 + $0x1e0c] ss:$24 sps:$4 sm:$0xff]  }
 0x8b1   :  { %16616 = vmatprep.subr.bf16.mxu1 %v21189_v58  ;;  %v21256_v58 = vld [vmem:[#allocation8 + $0x1390] ss:$24 sps:$4 sm:$0xff]  }
 0x8b2   :  { %16977 = vmatpush1.bf16.msra.mxu0 %v21184_v8  ;;  %v21264_v8 = vld [vmem:[#allocation8 + $0x13c4] ss:$24 sps:$4 sm:$0xff]  }
 0x8b3   :  { %16978 = vmatprep.subr.bf16.mxu0 %v21192_v9  ;;  %v21259_v9 = vld [vmem:[#allocation8 + $0x1e08] ss:$24 sps:$4 sm:$0xff]  }
 0x8b4   :  { %16617 = vmatpush1.bf16.msra.mxu1 %v21187_v2  ;;  %v21267_v2 = vld [vmem:[#allocation8 + $0x1e3c] ss:$24 sps:$4 sm:$0xff]  }
 0x8b5   :  { %16618 = vmatprep.subr.bf16.mxu1 %v21195_v25  ;;  %v21262_v25 = vld [vmem:[#allocation8 + $0x13c0] ss:$24 sps:$4 sm:$0xff]  }
 0x8b6   :  { %16979 = vmatpush1.bf16.msra.mxu0 %v21190_v24  ;;  %v21270_v24 = vld [vmem:[#allocation8 + $0x13f4] ss:$24 sps:$4 sm:$0xff]  }
 0x8b7   :  { %16980 = vmatprep.subr.bf16.mxu0 %v21198_v10  ;;  %v21265_v10 = vld [vmem:[#allocation8 + $0x1e38] ss:$24 sps:$4 sm:$0xff]  }
 0x8b8   :  { %16619 = vmatpush1.bf16.msra.mxu1 %v21193_v12  ;;  %v21273_v12 = vld [vmem:[#allocation8 + $0x1e6c] ss:$24 sps:$4 sm:$0xff]  }
 0x8b9   :  { %16620 = vmatprep.subr.bf16.mxu1 %v21201_v50  ;;  %v21268_v50 = vld [vmem:[#allocation8 + $0x13f0] ss:$24 sps:$4 sm:$0xff]  }
 0x8ba   :  { %16981 = vmatpush1.bf16.msra.mxu0 %v21196_v16  ;;  %v21276_v16 = vld [vmem:[#allocation8 + $0x1424] ss:$24 sps:$4 sm:$0xff]  }
 0x8bb   :  { %16982 = vmatprep.subr.bf16.mxu0 %v21204_v18  ;;  %v21271_v18 = vld [vmem:[#allocation8 + $0x1e68] ss:$24 sps:$4 sm:$0xff]  }
 0x8bc   :  { %16621 = vmatpush1.bf16.msra.mxu1 %v21199_v5  ;;  %v21279_v5 = vld [vmem:[#allocation8 + $0x1e9c] ss:$24 sps:$4 sm:$0xff]  }
 0x8bd   :  { %16622 = vmatprep.subr.bf16.mxu1 %v21207_v19  ;;  %v21274_v19 = vld [vmem:[#allocation8 + $0x1420] ss:$24 sps:$4 sm:$0xff]  }
 0x8be   :  { %16983 = vmatpush1.bf16.msra.mxu0 %v21202_v20  ;;  %v21282_v20 = vld [vmem:[#allocation8 + $0x1454] ss:$24 sps:$4 sm:$0xff]  }
 0x8bf   :  { %16995 = vmatprep.subr.bf16.mxu0 %v21210_v17  ;;  %v21277_v17 = vld [vmem:[#allocation8 + $0x1e98] ss:$24 sps:$4 sm:$0xff]  }
 0x8c0   :  { %16623 = vmatpush1.bf16.msra.mxu1 %v21205_v27  ;;  %v21285_v27 = vld [vmem:[#allocation8 + $0x1ecc] ss:$24 sps:$4 sm:$0xff]  }
 0x8c1   :  { %16985 = vmatmul.mubr.bf16.vlgmr.msra.gmra.mrb[20].mxu0 %v22032_v14  ;;  %16624 = vmatprep.subr.bf16.mxu1 %v21213_v26  ;;  %v21231_v14 = vld [vmem:[#allocation8 + $0x1d1c] ss:$24 sps:$4 sm:$0xff]   ;;  %v21280_v26 = vld [vmem:[#allocation8 + $0x1450] ss:$24 sps:$4 sm:$0xff]  }
 0x8c2   :  { %16996 = vmatpush1.bf16.msra.mxu0 %v21208_v31  ;;  %17027 = vmatprep.mubr.bf16.mxu0 %v21961_v29  ;;  %v21229_v29 = vld [vmem:[#allocation8 + $0x1d18] ss:$24 sps:$4 sm:$0xff]   ;;  %v21288_v31 = vld [vmem:[#allocation8 + $0x1484] ss:$24 sps:$4 sm:$0xff]  }
 0x8c3   :  { %16997 = vmatprep.subr.bf16.mxu0 %v21216_v35  ;;  %v21283_v35 = vld [vmem:[#allocation8 + $0x1ec8] ss:$24 sps:$4 sm:$0xff]  }
 0x8c4   :  { %16625 = vmatpush1.bf16.msra.mxu1 %v21211_v40  ;;  %v21291_v40 = vld [vmem:[#allocation8 + $0x1efc] ss:$24 sps:$4 sm:$0xff]  }
 0x8c5   :  { %16626 = vmatprep.subr.bf16.mxu1 %v21219_v42  ;;  %v21286_v42 = vld [vmem:[#allocation8 + $0x1480] ss:$24 sps:$4 sm:$0xff]  }
 0x8c6   :  { %16998 = vmatpush1.bf16.msra.mxu0 %v21214_v43  ;;  %v21294_v43 = vld [vmem:[#allocation8 + $0x14b4] ss:$24 sps:$4 sm:$0xff]  }
 0x8c7   :  { %16999 = vmatprep.subr.bf16.mxu0 %v21222_v22  ;;  %v21289_v22 = vld [vmem:[#allocation8 + $0x1ef8] ss:$24 sps:$4 sm:$0xff]  }
 0x8c8   :  { %16627 = vmatpush1.bf16.msra.mxu1 %v21217_v13  ;;  %v21297_v13 = vld [vmem:[#allocation8 + $0x1f2c] ss:$24 sps:$4 sm:$0xff]  }
 0x8c9   :  { %16628 = vmatprep.subr.bf16.mxu1 %v21225_v41  ;;  %v21292_v41 = vld [vmem:[#allocation8 + $0x14b0] ss:$24 sps:$4 sm:$0xff]  }
 0x8ca   :  { %17000 = vmatpush1.bf16.msra.mxu0 %v21220_v46  ;;  %v21300_v46 = vld [vmem:[#allocation8 + $0x14e4] ss:$24 sps:$4 sm:$0xff]  }
 0x8cb   :  { %17001 = vmatprep.subr.bf16.mxu0 %v21228_v33  ;;  %v21295_v33 = vld [vmem:[#allocation8 + $0x1f28] ss:$24 sps:$4 sm:$0xff]  }
 0x8cc   :  { %16629 = vmatpush1.bf16.msra.mxu1 %v21223_v49  ;;  %v21303_v49 = vld [vmem:[#allocation8 + $0x1f5c] ss:$24 sps:$4 sm:$0xff]  }
 0x8cd   :  { %16630 = vmatprep.subr.bf16.mxu1 %v21231_v14  ;;  %v21298_v14 = vld [vmem:[#allocation8 + $0x14e0] ss:$24 sps:$4 sm:$0xff]  }
 0x8ce   :  { %17002 = vmatpush1.bf16.msra.mxu0 %v21226_v23  ;;  %v21306_v23 = vld [vmem:[#allocation8 + $0x1514] ss:$24 sps:$4 sm:$0xff]  }
 0x8cf   :  { %17003 = vmatprep.subr.bf16.mxu0 %v21234_v59  ;;  %v21301_v59 = vld [vmem:[#allocation8 + $0x1f58] ss:$24 sps:$4 sm:$0xff]  }
 0x8d0   :  { %16631 = vmatpush1.bf16.msra.mxu1 %v21229_v29  ;;  %v21309_v29 = vld [vmem:[#allocation8 + $0x1f8c] ss:$24 sps:$4 sm:$0xff]  }
 0x8d1   :  { %16632 = vmatprep.subr.bf16.mxu1 %v21237_v34  ;;  %v21304_v34 = vld [vmem:[#allocation8 + $0x1510] ss:$24 sps:$4 sm:$0xff]  }
 0x8d2   :  { %17004 = vmatpush1.bf16.msra.mxu0 %v21232_v53  ;;  %v21312_v53 = vld [vmem:[#allocation8 + $0x1544] ss:$24 sps:$4 sm:$0xff]  }
 0x8d3   :  { %17005 = vmatprep.subr.bf16.mxu0 %v21240_v61  ;;  %v21307_v61 = vld [vmem:[#allocation8 + $0x1f88] ss:$24 sps:$4 sm:$0xff]  }
 0x8d4   :  { %16633 = vmatpush1.bf16.msra.mxu1 %v21235_v54  ;;  %v21315_v54 = vld [vmem:[#allocation8 + $0x1fbc] ss:$24 sps:$4 sm:$0xff]  }
 0x8d5   :  { %16634 = vmatprep.subr.bf16.mxu1 %v21243_v51  ;;  %v21310_v51 = vld [vmem:[#allocation8 + $0x1540] ss:$24 sps:$4 sm:$0xff]  }
 0x8d6   :  { %17006 = vmatpush1.bf16.msra.mxu0 %v21238_v57  ;;  %v21318_v57 = vld [vmem:[#allocation8 + $0x1574] ss:$24 sps:$4 sm:$0xff]  }
 0x8d7   :  { %17007 = vmatprep.subr.bf16.mxu0 %v21246_v62  ;;  %v21313_v62 = vld [vmem:[#allocation8 + $0x1fb8] ss:$24 sps:$4 sm:$0xff]  }
 0x8d8   :  { %16635 = vmatpush1.bf16.msra.mxu1 %v21241_v56  ;;  %v21321_v56 = vld [vmem:[#allocation8 + $0x1fec] ss:$24 sps:$4 sm:$0xff]  }
 0x8d9   :  { %16636 = vmatprep.subr.bf16.mxu1 %v21249_v44  ;;  %v21316_v44 = vld [vmem:[#allocation8 + $0x1570] ss:$24 sps:$4 sm:$0xff]  }
 0x8da   :  { %17008 = vmatpush1.bf16.msra.mxu0 %v21244_v48  ;;  %v21324_v48 = vld [vmem:[#allocation8 + $0x15a4] ss:$24 sps:$4 sm:$0xff]  }
 0x8db   :  { %17009 = vmatprep.subr.bf16.mxu0 %v21252_v30  ;;  %v21319_v30 = vld [vmem:[#allocation8 + $0x1fe8] ss:$24 sps:$4 sm:$0xff]  }
 0x8dc   :  { %16637 = vmatpush1.bf16.msra.mxu1 %v21247_v21  ;;  %v21322_v21 = vld [vmem:[#allocation8 + $0x15a0] ss:$24 sps:$4 sm:$0xff]  }
 0x8dd   :  { %16638 = vmatprep.subr.bf16.mxu1 %v21255_v6  ;;  %v21330_v6 = vld [vmem:[#allocation8 + $0x15d4] ss:$24 sps:$4 sm:$0xff]  }
 0x8de   :  { %17010 = vmatpush1.bf16.msra.mxu0 %v21250_v4  ;;  %v21333_v4 = vld [vmem:[#allocation8 + $0x204c] ss:$24 sps:$4 sm:$0xff]  }
 0x8df   :  { %17011 = vmatprep.subr.bf16.mxu0 %v21258_v7  ;;  %v21328_v7 = vld [vmem:[#allocation8 + $0x15d0] ss:$24 sps:$4 sm:$0xff]  }
 0x8e0   :  { %16639 = vmatpush1.bf16.msra.mxu1 %v21253_v39  ;;  %v21336_v39 = vld [vmem:[#allocation8 + $0x1604] ss:$24 sps:$4 sm:$0xff]  }
 0x8e1   :  { %16651 = vmatprep.subr.bf16.mxu1 %v21261_v15  ;;  %v21331_v15 = vld [vmem:[#allocation8 + $0x2048] ss:$24 sps:$4 sm:$0xff]  }
 0x8e2   :  { %17012 = vmatpush1.bf16.msra.mxu0 %v21256_v58  ;;  %v21339_v58 = vld [vmem:[#allocation8 + $0x207c] ss:$24 sps:$4 sm:$0xff]  }
 0x8e3   :  { %16641 = vmatmul.mubr.bf16.vlgmr.msra.gmra.mrb[32].mxu1 %v22070_v32  ;;  %17013 = vmatprep.subr.bf16.mxu0 %v21264_v8  ;;  %v21334_v8 = vld [vmem:[#allocation8 + $0x1600] ss:$24 sps:$4 sm:$0xff]  }
 0x8e4   :  { %16652 = vmatpush1.bf16.msra.mxu1 %v21259_v9  ;;  %16683 = vmatprep.mubr.bf16.mxu1 %v22014_v47  ;;  %v21342_v9 = vld [vmem:[#allocation8 + $0x1634] ss:$24 sps:$4 sm:$0xff]  }
 0x8e5   :  { %16653 = vmatprep.subr.bf16.mxu1 %v21267_v2  ;;  %v21337_v2 = vld [vmem:[#allocation8 + $0x2078] ss:$24 sps:$4 sm:$0xff]  }
 0x8e6   :  { %17014 = vmatpush1.bf16.msra.mxu0 %v21262_v25  ;;  %v21345_v25 = vld [vmem:[#allocation8 + $0x20ac] ss:$24 sps:$4 sm:$0xff]  }
 0x8e7   :  { %17015 = vmatprep.subr.bf16.mxu0 %v21270_v24  ;;  %v21340_v24 = vld [vmem:[#allocation8 + $0x1630] ss:$24 sps:$4 sm:$0xff]  }
 0x8e8   :  { %16654 = vmatpush1.bf16.msra.mxu1 %v21265_v10  ;;  %v21348_v10 = vld [vmem:[#allocation8 + $0x1664] ss:$24 sps:$4 sm:$0xff]  }
 0x8e9   :  { %16655 = vmatprep.subr.bf16.mxu1 %v21273_v12  ;;  %v21343_v12 = vld [vmem:[#allocation8 + $0x20a8] ss:$24 sps:$4 sm:$0xff]  }
 0x8ea   :  { %17016 = vmatpush1.bf16.msra.mxu0 %v21268_v50  ;;  %v21351_v50 = vld [vmem:[#allocation8 + $0x20dc] ss:$24 sps:$4 sm:$0xff]  }
 0x8eb   :  { %17017 = vmatprep.subr.bf16.mxu0 %v21276_v16  ;;  %v21346_v16 = vld [vmem:[#allocation8 + $0x1660] ss:$24 sps:$4 sm:$0xff]  }
 0x8ec   :  { %16656 = vmatpush1.bf16.msra.mxu1 %v21271_v18  ;;  %v21354_v18 = vld [vmem:[#allocation8 + $0x1694] ss:$24 sps:$4 sm:$0xff]  }
 0x8ed   :  { %16657 = vmatprep.subr.bf16.mxu1 %v21279_v5  ;;  %v21349_v5 = vld [vmem:[#allocation8 + $0x20d8] ss:$24 sps:$4 sm:$0xff]  }
 0x8ee   :  { %17018 = vmatpush1.bf16.msra.mxu0 %v21274_v19  ;;  %v21357_v19 = vld [vmem:[#allocation8 + $0x210c] ss:$24 sps:$4 sm:$0xff]  }
 0x8ef   :  { %17019 = vmatprep.subr.bf16.mxu0 %v21282_v20  ;;  %v21352_v20 = vld [vmem:[#allocation8 + $0x1690] ss:$24 sps:$4 sm:$0xff]  }
 0x8f0   :  { %16658 = vmatpush1.bf16.msra.mxu1 %v21277_v17  ;;  %v21360_v17 = vld [vmem:[#allocation8 + $0x16c4] ss:$24 sps:$4 sm:$0xff]  }
 0x8f1   :  { %16659 = vmatprep.subr.bf16.mxu1 %v21285_v27  ;;  %v21355_v27 = vld [vmem:[#allocation8 + $0x2108] ss:$24 sps:$4 sm:$0xff]  }
 0x8f2   :  { %17020 = vmatpush1.bf16.msra.mxu0 %v21280_v26  ;;  %v21363_v26 = vld [vmem:[#allocation8 + $0x213c] ss:$24 sps:$4 sm:$0xff]  }
 0x8f3   :  { %17021 = vmatprep.subr.bf16.mxu0 %v21288_v31  ;;  %v21358_v31 = vld [vmem:[#allocation8 + $0x16c0] ss:$24 sps:$4 sm:$0xff]  }
 0x8f4   :  { %16660 = vmatpush1.bf16.msra.mxu1 %v21283_v35  ;;  %v21366_v35 = vld [vmem:[#allocation8 + $0x16f4] ss:$24 sps:$4 sm:$0xff]  }
 0x8f5   :  { %16661 = vmatprep.subr.bf16.mxu1 %v21291_v40  ;;  %v21361_v40 = vld [vmem:[#allocation8 + $0x2138] ss:$24 sps:$4 sm:$0xff]  }
 0x8f6   :  { %17022 = vmatpush1.bf16.msra.mxu0 %v21286_v42  ;;  %v21369_v42 = vld [vmem:[#allocation8 + $0x216c] ss:$24 sps:$4 sm:$0xff]  }
 0x8f7   :  { %17023 = vmatprep.subr.bf16.mxu0 %v21294_v43  ;;  %v21364_v43 = vld [vmem:[#allocation8 + $0x16f0] ss:$24 sps:$4 sm:$0xff]  }
 0x8f8   :  { %16662 = vmatpush1.bf16.msra.mxu1 %v21289_v22  ;;  %v21372_v22 = vld [vmem:[#allocation8 + $0x1724] ss:$24 sps:$4 sm:$0xff]  }
 0x8f9   :  { %16663 = vmatprep.subr.bf16.mxu1 %v21297_v13  ;;  %v21367_v13 = vld [vmem:[#allocation8 + $0x2168] ss:$24 sps:$4 sm:$0xff]  }
 0x8fa   :  { %17024 = vmatpush1.bf16.msra.mxu0 %v21292_v41  ;;  %v21375_v41 = vld [vmem:[#allocation8 + $0x219c] ss:$24 sps:$4 sm:$0xff]  }
 0x8fb   :  { %17025 = vmatprep.subr.bf16.mxu0 %v21300_v46  ;;  %v21370_v46 = vld [vmem:[#allocation8 + $0x1720] ss:$24 sps:$4 sm:$0xff]  }
 0x8fc   :  { %16664 = vmatpush1.bf16.msra.mxu1 %v21295_v33  ;;  %v21378_v33 = vld [vmem:[#allocation8 + $0x1754] ss:$24 sps:$4 sm:$0xff]  }
 0x8fd   :  { %16665 = vmatprep.subr.bf16.mxu1 %v21303_v49  ;;  %v21373_v49 = vld [vmem:[#allocation8 + $0x2198] ss:$24 sps:$4 sm:$0xff]  }
 0x8fe   :  { %17026 = vmatpush1.bf16.msra.mxu0 %v21298_v14  ;;  %v21381_v14 = vld [vmem:[#allocation8 + $0x21cc] ss:$24 sps:$4 sm:$0xff]  }
 0x8ff   :  { %17038 = vmatprep.subr.bf16.mxu0 %v21306_v23  ;;  %v21376_v23 = vld [vmem:[#allocation8 + $0x1750] ss:$24 sps:$4 sm:$0xff]  }
 0x900   :  { %16666 = vmatpush1.bf16.msra.mxu1 %v21301_v59  ;;  %v21384_v59 = vld [vmem:[#allocation8 + $0x1784] ss:$24 sps:$4 sm:$0xff]  }
 0x901   :  { %17028 = vmatmul.mubr.bf16.vlgmr.msra.gmra.mrb[20].mxu0 %v21959_v28  ;;  %16667 = vmatprep.subr.bf16.mxu1 %v21309_v29  ;;  %v21327_v28 = vld [vmem:[#allocation8 + $0x201c] ss:$24 sps:$4 sm:$0xff]   ;;  %v21379_v29 = vld [vmem:[#allocation8 + $0x21c8] ss:$24 sps:$4 sm:$0xff]  }
 0x902   :  { %17039 = vmatpush1.bf16.msra.mxu0 %v21304_v34  ;;  %17070 = vmatprep.mubr.bf16.mxu0 %v22052_v60  ;;  %v21325_v60 = vld [vmem:[#allocation8 + $0x2018] ss:$24 sps:$4 sm:$0xff]   ;;  %v21387_v34 = vld [vmem:[#allocation8 + $0x21fc] ss:$24 sps:$4 sm:$0xff]  }
 0x903   :  { %17040 = vmatprep.subr.bf16.mxu0 %v21312_v53  ;;  %v21382_v53 = vld [vmem:[#allocation8 + $0x1780] ss:$24 sps:$4 sm:$0xff]  }
 0x904   :  { %16668 = vmatpush1.bf16.msra.mxu1 %v21307_v61  ;;  %v21390_v61 = vld [vmem:[#allocation8 + $0x17b4] ss:$24 sps:$4 sm:$0xff]  }
 0x905   :  { %16669 = vmatprep.subr.bf16.mxu1 %v21315_v54  ;;  %v21385_v54 = vld [vmem:[#allocation8 + $0x21f8] ss:$24 sps:$4 sm:$0xff]  }
 0x906   :  { %17041 = vmatpush1.bf16.msra.mxu0 %v21310_v51  ;;  %v21393_v51 = vld [vmem:[#allocation8 + $0x222c] ss:$24 sps:$4 sm:$0xff]  }
 0x907   :  { %17042 = vmatprep.subr.bf16.mxu0 %v21318_v57  ;;  %v21388_v57 = vld [vmem:[#allocation8 + $0x17b0] ss:$24 sps:$4 sm:$0xff]  }
 0x908   :  { %16670 = vmatpush1.bf16.msra.mxu1 %v21313_v62  ;;  %v21396_v62 = vld [vmem:[#allocation8 + $0x17e4] ss:$24 sps:$4 sm:$0xff]  }
 0x909   :  { %16671 = vmatprep.subr.bf16.mxu1 %v21321_v56  ;;  %v21391_v56 = vld [vmem:[#allocation8 + $0x2228] ss:$24 sps:$4 sm:$0xff]  }
 0x90a   :  { %17043 = vmatpush1.bf16.msra.mxu0 %v21316_v44  ;;  %v21399_v44 = vld [vmem:[#allocation8 + $0x225c] ss:$24 sps:$4 sm:$0xff]  }
 0x90b   :  { %17044 = vmatprep.subr.bf16.mxu0 %v21324_v48  ;;  %v21394_v48 = vld [vmem:[#allocation8 + $0x17e0] ss:$24 sps:$4 sm:$0xff]  }
 0x90c   :  { %16672 = vmatpush1.bf16.msra.mxu1 %v21319_v30  ;;  %v21402_v30 = vld [vmem:[#allocation8 + $0x1814] ss:$24 sps:$4 sm:$0xff]  }
 0x90d   :  { %16673 = vmatprep.subr.bf16.mxu1 %v21327_v28  ;;  %v21397_v28 = vld [vmem:[#allocation8 + $0x2258] ss:$24 sps:$4 sm:$0xff]  }
 0x90e   :  { %17045 = vmatpush1.bf16.msra.mxu0 %v21322_v21  ;;  %v21405_v21 = vld [vmem:[#allocation8 + $0x228c] ss:$24 sps:$4 sm:$0xff]  }
 0x90f   :  { %17046 = vmatprep.subr.bf16.mxu0 %v21330_v6  ;;  %v21400_v6 = vld [vmem:[#allocation8 + $0x1810] ss:$24 sps:$4 sm:$0xff]  }
 0x910   :  { %16674 = vmatpush1.bf16.msra.mxu1 %v21325_v60  ;;  %v21408_v60 = vld [vmem:[#allocation8 + $0x1844] ss:$24 sps:$4 sm:$0xff]  }
 0x911   :  { %16675 = vmatprep.subr.bf16.mxu1 %v21333_v4  ;;  %v21403_v4 = vld [vmem:[#allocation8 + $0x2288] ss:$24 sps:$4 sm:$0xff]  }
 0x912   :  { %17047 = vmatpush1.bf16.msra.mxu0 %v21328_v7  ;;  %v21411_v7 = vld [vmem:[#allocation8 + $0x22bc] ss:$24 sps:$4 sm:$0xff]  }
 0x913   :  { %17048 = vmatprep.subr.bf16.mxu0 %v21336_v39  ;;  %v21406_v39 = vld [vmem:[#allocation8 + $0x1840] ss:$24 sps:$4 sm:$0xff]  }
 0x914   :  { %16676 = vmatpush1.bf16.msra.mxu1 %v21331_v15  ;;  %v21414_v15 = vld [vmem:[#allocation8 + $0x1874] ss:$24 sps:$4 sm:$0xff]  }
 0x915   :  { %16677 = vmatprep.subr.bf16.mxu1 %v21339_v58  ;;  %v21409_v58 = vld [vmem:[#allocation8 + $0x22b8] ss:$24 sps:$4 sm:$0xff]  }
 0x916   :  { %17049 = vmatpush1.bf16.msra.mxu0 %v21334_v8  ;;  %v21417_v8 = vld [vmem:[#allocation8 + $0x22ec] ss:$24 sps:$4 sm:$0xff]  }
 0x917   :  { %17050 = vmatprep.subr.bf16.mxu0 %v21342_v9  ;;  %v21412_v9 = vld [vmem:[#allocation8 + $0x1870] ss:$24 sps:$4 sm:$0xff]  }
 0x918   :  { %16678 = vmatpush1.bf16.msra.mxu1 %v21337_v2  ;;  %v21420_v2 = vld [vmem:[#allocation8 + $0x18a4] ss:$24 sps:$4 sm:$0xff]  }
 0x919   :  { %16679 = vmatprep.subr.bf16.mxu1 %v21345_v25  ;;  %v21415_v25 = vld [vmem:[#allocation8 + $0x22e8] ss:$24 sps:$4 sm:$0xff]  }
 0x91a   :  { %17051 = vmatpush1.bf16.msra.mxu0 %v21340_v24  ;;  %v21418_v24 = vld [vmem:[#allocation8 + $0x18a0] ss:$24 sps:$4 sm:$0xff]  }
 0x91b   :  { %17052 = vmatprep.subr.bf16.mxu0 %v21348_v10  ;;  %v21426_v10 = vld [vmem:[#allocation8 + $0x18d4] ss:$24 sps:$4 sm:$0xff]  }
 0x91c   :  { %16680 = vmatpush1.bf16.msra.mxu1 %v21343_v12  ;;  %v21429_v12 = vld [vmem:[#allocation8 + $0x234c] ss:$24 sps:$4 sm:$0xff]  }
 0x91d   :  { %16681 = vmatprep.subr.bf16.mxu1 %v21351_v50  ;;  %v21424_v50 = vld [vmem:[#allocation8 + $0x18d0] ss:$24 sps:$4 sm:$0xff]  }
 0x91e   :  { %17053 = vmatpush1.bf16.msra.mxu0 %v21346_v16  ;;  %v21432_v16 = vld [vmem:[#allocation8 + $0x1904] ss:$24 sps:$4 sm:$0xff]  }
 0x91f   :  { %17054 = vmatprep.subr.bf16.mxu0 %v21354_v18  ;;  %v21427_v18 = vld [vmem:[#allocation8 + $0x2348] ss:$24 sps:$4 sm:$0xff]  }
 0x920   :  { %16682 = vmatpush1.bf16.msra.mxu1 %v21349_v5  ;;  %v21435_v5 = vld [vmem:[#allocation8 + $0x237c] ss:$24 sps:$4 sm:$0xff]  }
 0x921   :  { %16694 = vmatprep.subr.bf16.mxu1 %v21357_v19  ;;  %v21430_v19 = vld [vmem:[#allocation8 + $0x1900] ss:$24 sps:$4 sm:$0xff]  }
 0x922   :  { %17055 = vmatpush1.bf16.msra.mxu0 %v21352_v20  ;;  %v21438_v20 = vld [vmem:[#allocation8 + $0x1934] ss:$24 sps:$4 sm:$0xff]  }
 0x923   :  { %16684 = vmatmul.mubr.bf16.vlgmr.msra.gmra.mrb[32].mxu1 %v22012_v55  ;;  %17056 = vmatprep.subr.bf16.mxu0 %v21360_v17  ;;  %v21433_v17 = vld [vmem:[#allocation8 + $0x2378] ss:$24 sps:$4 sm:$0xff]  }
 0x924   :  { %16695 = vmatpush1.bf16.msra.mxu1 %v21355_v27  ;;  %16726 = vmatprep.mubr.bf16.mxu1 %v22090_v45  ;;  %v21441_v27 = vld [vmem:[#allocation8 + $0x23ac] ss:$24 sps:$4 sm:$0xff]  }
 0x925   :  { %16696 = vmatprep.subr.bf16.mxu1 %v21363_v26  ;;  %v21436_v26 = vld [vmem:[#allocation8 + $0x1930] ss:$24 sps:$4 sm:$0xff]  }
 0x926   :  { %17057 = vmatpush1.bf16.msra.mxu0 %v21358_v31  ;;  %v21444_v31 = vld [vmem:[#allocation8 + $0x1964] ss:$24 sps:$4 sm:$0xff]  }
 0x927   :  { %17058 = vmatprep.subr.bf16.mxu0 %v21366_v35  ;;  %v21439_v35 = vld [vmem:[#allocation8 + $0x23a8] ss:$24 sps:$4 sm:$0xff]  }
 0x928   :  { %16697 = vmatpush1.bf16.msra.mxu1 %v21361_v40  ;;  %v21447_v40 = vld [vmem:[#allocation8 + $0x23dc] ss:$24 sps:$4 sm:$0xff]  }
 0x929   :  { %16698 = vmatprep.subr.bf16.mxu1 %v21369_v42  ;;  %v21442_v42 = vld [vmem:[#allocation8 + $0x1960] ss:$24 sps:$4 sm:$0xff]  }
 0x92a   :  { %17059 = vmatpush1.bf16.msra.mxu0 %v21364_v43  ;;  %v21450_v43 = vld [vmem:[#allocation8 + $0x1994] ss:$24 sps:$4 sm:$0xff]  }
 0x92b   :  { %17060 = vmatprep.subr.bf16.mxu0 %v21372_v22  ;;  %v21445_v22 = vld [vmem:[#allocation8 + $0x23d8] ss:$24 sps:$4 sm:$0xff]  }
 0x92c   :  { %16699 = vmatpush1.bf16.msra.mxu1 %v21367_v13  ;;  %v21448_v13 = vld [vmem:[#allocation8 + $0x1990] ss:$24 sps:$4 sm:$0xff]  }
 0x92d   :  { %16700 = vmatprep.subr.bf16.mxu1 %v21375_v41  ;;  %v21453_v41 = vld [vmem:[#allocation8 + $0x19c4] ss:$24 sps:$4 sm:$0xff]  }
 0x92e   :  { %17061 = vmatpush1.bf16.msra.mxu0 %v21370_v46  ;;  %v21451_v46 = vld [vmem:[#allocation8 + $0x19c0] ss:$24 sps:$4 sm:$0xff]  }
 0x92f   :  { %17062 = vmatprep.subr.bf16.mxu0 %v21378_v33  ;;  %v21456_v33 = vld [vmem:[#allocation8 + $0x19f4] ss:$24 sps:$4 sm:$0xff]  }
 0x930   :  { %16701 = vmatpush1.bf16.msra.mxu1 %v21373_v49  ;;  %v21454_v49 = vld [vmem:[#allocation8 + $0x19f0] ss:$24 sps:$4 sm:$0xff]  }
 0x931   :  { %16702 = vmatprep.subr.bf16.mxu1 %v21381_v14  ;;  %v21459_v14 = vld [vmem:[#allocation8 + $0x1a24] ss:$24 sps:$4 sm:$0xff]  }
 0x932   :  { %17063 = vmatpush1.bf16.msra.mxu0 %v21376_v23  ;;  %v21457_v23 = vld [vmem:[#allocation8 + $0x1a20] ss:$24 sps:$4 sm:$0xff]  }
 0x933   :  { %17064 = vmatprep.subr.bf16.mxu0 %v21384_v59  ;;  %v21462_v59 = vld [vmem:[#allocation8 + $0x1a54] ss:$24 sps:$4 sm:$0xff]  }
 0x934   :  { %16703 = vmatpush1.bf16.msra.mxu1 %v21379_v29  ;;  %v21460_v29 = vld [vmem:[#allocation8 + $0x1a50] ss:$24 sps:$4 sm:$0xff]  }
 0x935   :  { %16704 = vmatprep.subr.bf16.mxu1 %v21387_v34  ;;  %v21465_v34 = vld [vmem:[#allocation8 + $0x1a84] ss:$24 sps:$4 sm:$0xff]  }
 0x936   :  { %17065 = vmatpush1.bf16.msra.mxu0 %v21382_v53  ;;  %v21463_v53 = vld [vmem:[#allocation8 + $0x1a80] ss:$24 sps:$4 sm:$0xff]  }
 0x937   :  { %17066 = vmatprep.subr.bf16.mxu0 %v21390_v61  ;;  %v21468_v61 = vld [vmem:[#allocation8 + $0x1ab4] ss:$24 sps:$4 sm:$0xff]  }
 0x938   :  { %16705 = vmatpush1.bf16.msra.mxu1 %v21385_v54  ;;  %v21466_v54 = vld [vmem:[#allocation8 + $0x1ab0] ss:$24 sps:$4 sm:$0xff]  }
 0x939   :  { %16706 = vmatprep.subr.bf16.mxu1 %v21393_v51  ;;  %v21471_v51 = vld [vmem:[#allocation8 + $0x1ae4] ss:$24 sps:$4 sm:$0xff]  }
 0x93a   :  { %17067 = vmatpush1.bf16.msra.mxu0 %v21388_v57  ;;  %v21469_v57 = vld [vmem:[#allocation8 + $0x1ae0] ss:$24 sps:$4 sm:$0xff]  }
 0x93b   :  { %17068 = vmatprep.subr.bf16.mxu0 %v21396_v62  ;;  %v21474_v62 = vld [vmem:[#allocation8 + $0x1b14] ss:$24 sps:$4 sm:$0xff]  }
 0x93c   :  { %16707 = vmatpush1.bf16.msra.mxu1 %v21391_v56  ;;  %v21472_v56 = vld [vmem:[#allocation8 + $0x1b10] ss:$24 sps:$4 sm:$0xff]  }
 0x93d   :  { %16708 = vmatprep.subr.bf16.mxu1 %v21399_v44  ;;  %v21477_v44 = vld [vmem:[#allocation8 + $0x1b44] ss:$24 sps:$4 sm:$0xff]  }
 0x93e   :  { %17069 = vmatpush1.bf16.msra.mxu0 %v21394_v48  ;;  %v21475_v48 = vld [vmem:[#allocation8 + $0x1b40] ss:$24 sps:$4 sm:$0xff]  }
 0x93f   :  { %17081 = vmatprep.subr.bf16.mxu0 %v21402_v30  ;;  %v21480_v30 = vld [vmem:[#allocation8 + $0x1b74] ss:$24 sps:$4 sm:$0xff]  }
 0x940   :  { %16709 = vmatpush1.bf16.msra.mxu1 %v21397_v28  ;;  %v21478_v28 = vld [vmem:[#allocation8 + $0x1b70] ss:$24 sps:$4 sm:$0xff]  }
 0x941   :  { %17071 = vmatmul.mubr.bf16.vlgmr.msra.gmra.mrb[20].mxu0 %v22050_v52  ;;  %16710 = vmatprep.subr.bf16.mxu1 %v21405_v21  ;;  %v21423_v52 = vld [vmem:[#allocation8 + $0x231c] ss:$24 sps:$4 sm:$0xff]  }
 0x942   :  { %17082 = vmatpush1.bf16.msra.mxu0 %v21400_v6  ;;  %17113 = vmatprep.mubr.bf16.mxu0 %v21985_v38  ;;  %v21421_v38 = vld [vmem:[#allocation8 + $0x2318] ss:$24 sps:$4 sm:$0xff]   ;;  %v21483_v21 = vld [vmem:[#allocation8 + $0x1ba4] ss:$24 sps:$4 sm:$0xff]  }
 0x943   :  { %17083 = vmatprep.subr.bf16.mxu0 %v21408_v60  ;;  %v21481_v6 = vld [vmem:[#allocation8 + $0x1ba0] ss:$24 sps:$4 sm:$0xff]   ;;  %v21486_v60 = vld [vmem:[#allocation8 + $0x1bd4] ss:$24 sps:$4 sm:$0xff]  }
 0x944   :  { %16711 = vmatpush1.bf16.msra.mxu1 %v21403_v4  ;;  %v21484_v4 = vld [vmem:[#allocation8 + $0x1bd0] ss:$24 sps:$4 sm:$0xff]  }
 0x945   :  { %16712 = vmatprep.subr.bf16.mxu1 %v21411_v7  ;;  %v21489_v7 = vld [vmem:[#allocation8 + $0x1c04] ss:$24 sps:$4 sm:$0xff]  }
 0x946   :  { %17084 = vmatpush1.bf16.msra.mxu0 %v21406_v39  ;;  %v21492_v39 = vld [vmem:[#allocation8 + $0x1c34] ss:$24 sps:$4 sm:$0xff]  }
 0x947   :  { %17085 = vmatprep.subr.bf16.mxu0 %v21414_v15  ;;  %v21495_v15 = vld [vmem:[#allocation8 + $0x1c64] ss:$24 sps:$4 sm:$0xff]  }
 0x948   :  { %16713 = vmatpush1.bf16.msra.mxu1 %v21409_v58  ;;  %v21493_v58 = vld [vmem:[#allocation8 + $0x1c60] ss:$24 sps:$4 sm:$0xff]  }
 0x949   :  { %16714 = vmatprep.subr.bf16.mxu1 %v21417_v8  ;;  %v21498_v8 = vld [vmem:[#allocation8 + $0x1c94] ss:$24 sps:$4 sm:$0xff]  }
 0x94a   :  { %17086 = vmatpush1.bf16.msra.mxu0 %v21412_v9  ;;  %v21496_v9 = vld [vmem:[#allocation8 + $0x1c90] ss:$24 sps:$4 sm:$0xff]  }
 0x94b   :  { %17087 = vmatprep.subr.bf16.mxu0 %v21420_v2  ;;  %v21501_v2 = vld [vmem:[#allocation8 + $0x1cc4] ss:$24 sps:$4 sm:$0xff]  }
 0x94c   :  { %16715 = vmatpush1.bf16.msra.mxu1 %v21415_v25  ;;  %v21499_v25 = vld [vmem:[#allocation8 + $0x1cc0] ss:$24 sps:$4 sm:$0xff]  }
 0x94d   :  { %16716 = vmatprep.subr.bf16.mxu1 %v21423_v52  ;;  %v21504_v52 = vld [vmem:[#allocation8 + $0x1cf4] ss:$24 sps:$4 sm:$0xff]  }
 0x94e   :  { %17088 = vmatpush1.bf16.msra.mxu0 %v21418_v24  ;;  %v21502_v24 = vld [vmem:[#allocation8 + $0x1cf0] ss:$24 sps:$4 sm:$0xff]  }
 0x94f   :  { %17089 = vmatprep.subr.bf16.mxu0 %v21426_v10  ;;  %v21507_v10 = vld [vmem:[#allocation8 + $0x1d24] ss:$24 sps:$4 sm:$0xff]  }
 0x950   :  { %16717 = vmatpush1.bf16.msra.mxu1 %v21421_v38  ;;  %v21505_v38 = vld [vmem:[#allocation8 + $0x1d20] ss:$24 sps:$4 sm:$0xff]  }
 0x951   :  { %16718 = vmatprep.subr.bf16.mxu1 %v21429_v12  ;;  %v21510_v12 = vld [vmem:[#allocation8 + $0x1d54] ss:$24 sps:$4 sm:$0xff]  }
 0x952   :  { %17090 = vmatpush1.bf16.msra.mxu0 %v21424_v50  ;;  %v21508_v50 = vld [vmem:[#allocation8 + $0x1d50] ss:$24 sps:$4 sm:$0xff]  }
 0x953   :  { %17091 = vmatprep.subr.bf16.mxu0 %v21432_v16  ;;  %v21513_v16 = vld [vmem:[#allocation8 + $0x1d84] ss:$24 sps:$4 sm:$0xff]  }
 0x954   :  { %16719 = vmatpush1.bf16.msra.mxu1 %v21427_v18  ;;  %v21511_v18 = vld [vmem:[#allocation8 + $0x1d80] ss:$24 sps:$4 sm:$0xff]  }
 0x955   :  { %16720 = vmatprep.subr.bf16.mxu1 %v21435_v5  ;;  %v21516_v5 = vld [vmem:[#allocation8 + $0x1db4] ss:$24 sps:$4 sm:$0xff]  }
 0x956   :  { %17092 = vmatpush1.bf16.msra.mxu0 %v21430_v19  ;;  %v21514_v19 = vld [vmem:[#allocation8 + $0x1db0] ss:$24 sps:$4 sm:$0xff]  }
 0x957   :  { %17093 = vmatprep.subr.bf16.mxu0 %v21438_v20  ;;  %v21519_v20 = vld [vmem:[#allocation8 + $0x1de4] ss:$24 sps:$4 sm:$0xff]  }
 0x958   :  { %16721 = vmatpush1.bf16.msra.mxu1 %v21433_v17  ;;  %v21517_v17 = vld [vmem:[#allocation8 + $0x1de0] ss:$24 sps:$4 sm:$0xff]  }
 0x959   :  { %16722 = vmatprep.subr.bf16.mxu1 %v21441_v27  ;;  %v21522_v27 = vld [vmem:[#allocation8 + $0x1e14] ss:$24 sps:$4 sm:$0xff]  }
 0x95a   :  { %17094 = vmatpush1.bf16.msra.mxu0 %v21436_v26  ;;  %v21520_v26 = vld [vmem:[#allocation8 + $0x1e10] ss:$24 sps:$4 sm:$0xff]  }
 0x95b   :  { %17095 = vmatprep.subr.bf16.mxu0 %v21444_v31  ;;  %v21525_v31 = vld [vmem:[#allocation8 + $0x1e44] ss:$24 sps:$4 sm:$0xff]  }
 0x95c   :  { %16723 = vmatpush1.bf16.msra.mxu1 %v21439_v35  ;;  %v21523_v35 = vld [vmem:[#allocation8 + $0x1e40] ss:$24 sps:$4 sm:$0xff]  }
 0x95d   :  { %16724 = vmatprep.subr.bf16.mxu1 %v21447_v40  ;;  %v21528_v40 = vld [vmem:[#allocation8 + $0x1e74] ss:$24 sps:$4 sm:$0xff]  }
 0x95e   :  { %17096 = vmatpush1.bf16.msra.mxu0 %v21442_v42  ;;  %v21526_v42 = vld [vmem:[#allocation8 + $0x1e70] ss:$24 sps:$4 sm:$0xff]  }
 0x95f   :  { %17097 = vmatprep.subr.bf16.mxu0 %v21450_v43  ;;  %v21531_v43 = vld [vmem:[#allocation8 + $0x1ea4] ss:$24 sps:$4 sm:$0xff]  }
 0x960   :  { %16725 = vmatpush1.bf16.msra.mxu1 %v21445_v22  ;;  %v21529_v22 = vld [vmem:[#allocation8 + $0x1ea0] ss:$24 sps:$4 sm:$0xff]  }
 0x962   :  { %17098 = vmatpush1.bf16.msra.mxu0 %v21448_v13  ;;  %v21534_v13 = vld [vmem:[#allocation8 + $0x1ed4] ss:$24 sps:$4 sm:$0xff]  }
 0x963   :  { %16727 = vmatmul.mubr.bf16.vlgmr.msra.gmra.mrb[32].mxu1 %v22088_v0  ;;  %17099 = vmatprep.subr.bf16.mxu0 %v21453_v41  ;;  %v21532_v41 = vld [vmem:[#allocation8 + $0x1ed0] ss:$24 sps:$4 sm:$0xff]  }
 0x966   :  { %17100 = vmatpush1.bf16.msra.mxu0 %v21451_v46  ;;  %v21537_v46 = vld [vmem:[#allocation8 + $0x1f04] ss:$24 sps:$4 sm:$0xff]  }
 0x967   :  { %17101 = vmatprep.subr.bf16.mxu0 %v21456_v33  ;;  %v21540_v33 = vld [vmem:[#allocation8 + $0x1f34] ss:$24 sps:$4 sm:$0xff]  }
 0x96a   :  { %17102 = vmatpush1.bf16.msra.mxu0 %v21454_v49  ;;  %v21543_v49 = vld [vmem:[#allocation8 + $0x1f64] ss:$24 sps:$4 sm:$0xff]  }
 0x96b   :  { %17103 = vmatprep.subr.bf16.mxu0 %v21459_v14  ;;  %v21541_v14 = vld [vmem:[#allocation8 + $0x1f60] ss:$24 sps:$4 sm:$0xff]  }
 0x96e   :  { %17104 = vmatpush1.bf16.msra.mxu0 %v21457_v23  ;;  %v21546_v23 = vld [vmem:[#allocation8 + $0x1f94] ss:$24 sps:$4 sm:$0xff]  }
 0x96f   :  { %17105 = vmatprep.subr.bf16.mxu0 %v21462_v59  ;;  %v21544_v59 = vld [vmem:[#allocation8 + $0x1f90] ss:$24 sps:$4 sm:$0xff]  }
 0x972   :  { %17106 = vmatpush1.bf16.msra.mxu0 %v21460_v29  ;;  %v21549_v29 = vld [vmem:[#allocation8 + $0x1fc4] ss:$24 sps:$4 sm:$0xff]  }
 0x973   :  { %17107 = vmatprep.subr.bf16.mxu0 %v21465_v34  ;;  %v21547_v34 = vld [vmem:[#allocation8 + $0x1fc0] ss:$24 sps:$4 sm:$0xff]  }
 0x976   :  { %17108 = vmatpush1.bf16.msra.mxu0 %v21463_v53  ;;  %v21552_v53 = vld [vmem:[#allocation8 + $0x1ff4] ss:$24 sps:$4 sm:$0xff]  }
 0x977   :  { %17109 = vmatprep.subr.bf16.mxu0 %v21468_v61  ;;  %v21550_v61 = vld [vmem:[#allocation8 + $0x1ff0] ss:$24 sps:$4 sm:$0xff]  }
 0x97a   :  { %17110 = vmatpush1.bf16.msra.mxu0 %v21466_v54  ;;  %v21555_v54 = vld [vmem:[#allocation8 + $0x2024] ss:$24 sps:$4 sm:$0xff]  }
 0x97b   :  { %17111 = vmatprep.subr.bf16.mxu0 %v21471_v51  ;;  %v21553_v51 = vld [vmem:[#allocation8 + $0x2020] ss:$24 sps:$4 sm:$0xff]  }
 0x97e   :  { %17112 = vmatpush1.bf16.msra.mxu0 %v21469_v57  ;;  %v21558_v57 = vld [vmem:[#allocation8 + $0x2054] ss:$24 sps:$4 sm:$0xff]  }
 0x97f   :  { %17124 = vmatprep.subr.bf16.mxu0 %v21474_v62  ;;  %v21556_v62 = vld [vmem:[#allocation8 + $0x2050] ss:$24 sps:$4 sm:$0xff]  }
 0x981   :  { %17114 = vmatmul.mubr.bf16.vlgmr.msra.gmra.mrb[20].mxu0 %v21983_v37  ;;  %v21487_v37 = vld [vmem:[#allocation8 + $0x1c00] ss:$24 sps:$4 sm:$0xff]  }
 0x982   :  { %17125 = vmatpush1.bf16.msra.mxu0 %v21472_v56  ;;  %17156 = vmatprep.mubr.bf16.mxu0 %v22072_v36  ;;  %v21490_v36 = vld [vmem:[#allocation8 + $0x1c30] ss:$24 sps:$4 sm:$0xff]   ;;  %v21561_v56 = vld [vmem:[#allocation8 + $0x2084] ss:$24 sps:$4 sm:$0xff]  }
 0x983   :  { %17126 = vmatprep.subr.bf16.mxu0 %v21477_v44  ;;  %v21559_v44 = vld [vmem:[#allocation8 + $0x2080] ss:$24 sps:$4 sm:$0xff]  }
 0x986   :  { %17127 = vmatpush1.bf16.msra.mxu0 %v21475_v48  ;;  %v21564_v48 = vld [vmem:[#allocation8 + $0x20b4] ss:$24 sps:$4 sm:$0xff]  }
 0x987   :  { %17128 = vmatprep.subr.bf16.mxu0 %v21480_v30  ;;  %v21562_v30 = vld [vmem:[#allocation8 + $0x20b0] ss:$24 sps:$4 sm:$0xff]  }
 0x98a   :  { %17129 = vmatpush1.bf16.msra.mxu0 %v21478_v28  ;;  %v21567_v28 = vld [vmem:[#allocation8 + $0x20e4] ss:$24 sps:$4 sm:$0xff]  }
 0x98b   :  { %17130 = vmatprep.subr.bf16.mxu0 %v21483_v21  ;;  %v21565_v21 = vld [vmem:[#allocation8 + $0x20e0] ss:$24 sps:$4 sm:$0xff]  }
 0x98e   :  { %17131 = vmatpush1.bf16.msra.mxu0 %v21481_v6  ;;  %v21570_v6 = vld [vmem:[#allocation8 + $0x2114] ss:$24 sps:$4 sm:$0xff]  }
 0x98f   :  { %17132 = vmatprep.subr.bf16.mxu0 %v21486_v60  ;;  %v21568_v60 = vld [vmem:[#allocation8 + $0x2110] ss:$24 sps:$4 sm:$0xff]  }
 0x992   :  { %17133 = vmatpush1.bf16.msra.mxu0 %v21484_v4  ;;  %v21573_v4 = vld [vmem:[#allocation8 + $0x2144] ss:$24 sps:$4 sm:$0xff]  }
 0x993   :  { %17134 = vmatprep.subr.bf16.mxu0 %v21489_v7  ;;  %v21571_v7 = vld [vmem:[#allocation8 + $0x2140] ss:$24 sps:$4 sm:$0xff]  }
 0x996   :  { %17135 = vmatpush1.bf16.msra.mxu0 %v21487_v37  ;;  %v21576_v37 = vld [vmem:[#allocation8 + $0x2174] ss:$24 sps:$4 sm:$0xff]  }
 0x997   :  { %17136 = vmatprep.subr.bf16.mxu0 %v21492_v39  ;;  %v21574_v39 = vld [vmem:[#allocation8 + $0x2170] ss:$24 sps:$4 sm:$0xff]  }
 0x99a   :  { %17137 = vmatpush1.bf16.msra.mxu0 %v21490_v36  ;;  %v21579_v36 = vld [vmem:[#allocation8 + $0x21a4] ss:$24 sps:$4 sm:$0xff]  }
 0x99b   :  { %17138 = vmatprep.subr.bf16.mxu0 %v21495_v15  ;;  %v21577_v15 = vld [vmem:[#allocation8 + $0x21a0] ss:$24 sps:$4 sm:$0xff]  }
 0x99e   :  { %17139 = vmatpush1.bf16.msra.mxu0 %v21493_v58  ;;  %v21582_v58 = vld [vmem:[#allocation8 + $0x21d4] ss:$24 sps:$4 sm:$0xff]  }
 0x99f   :  { %17140 = vmatprep.subr.bf16.mxu0 %v21498_v8  ;;  %v21580_v8 = vld [vmem:[#allocation8 + $0x21d0] ss:$24 sps:$4 sm:$0xff]  }
 0x9a2   :  { %17141 = vmatpush1.bf16.msra.mxu0 %v21496_v9  ;;  %v21585_v9 = vld [vmem:[#allocation8 + $0x2204] ss:$24 sps:$4 sm:$0xff]  }
 0x9a3   :  { %17142 = vmatprep.subr.bf16.mxu0 %v21501_v2  ;;  %v21588_v2 = vld [vmem:[#allocation8 + $0x2234] ss:$24 sps:$4 sm:$0xff]  }
 0x9a6   :  { %17143 = vmatpush1.bf16.msra.mxu0 %v21499_v25  ;;  %v21591_v25 = vld [vmem:[#allocation8 + $0x2264] ss:$24 sps:$4 sm:$0xff]  }
 0x9a7   :  { %17144 = vmatprep.subr.bf16.mxu0 %v21504_v52  ;;  %v21589_v52 = vld [vmem:[#allocation8 + $0x2260] ss:$24 sps:$4 sm:$0xff]  }
 0x9aa   :  { %17145 = vmatpush1.bf16.msra.mxu0 %v21502_v24  ;;  %v21594_v24 = vld [vmem:[#allocation8 + $0x2294] ss:$24 sps:$4 sm:$0xff]  }
 0x9ab   :  { %17146 = vmatprep.subr.bf16.mxu0 %v21507_v10  ;;  %v21592_v10 = vld [vmem:[#allocation8 + $0x2290] ss:$24 sps:$4 sm:$0xff]  }
 0x9ae   :  { %17147 = vmatpush1.bf16.msra.mxu0 %v21505_v38  ;;  %v21597_v38 = vld [vmem:[#allocation8 + $0x22c4] ss:$24 sps:$4 sm:$0xff]  }
 0x9af   :  { %17148 = vmatprep.subr.bf16.mxu0 %v21510_v12  ;;  %v21595_v12 = vld [vmem:[#allocation8 + $0x22c0] ss:$24 sps:$4 sm:$0xff]  }
 0x9b2   :  { %17149 = vmatpush1.bf16.msra.mxu0 %v21508_v50  ;;  %v21600_v50 = vld [vmem:[#allocation8 + $0x22f4] ss:$24 sps:$4 sm:$0xff]  }
 0x9b3   :  { %17150 = vmatprep.subr.bf16.mxu0 %v21513_v16  ;;  %v21598_v16 = vld [vmem:[#allocation8 + $0x22f0] ss:$24 sps:$4 sm:$0xff]  }
 0x9b6   :  { %17151 = vmatpush1.bf16.msra.mxu0 %v21511_v18  ;;  %v21603_v18 = vld [vmem:[#allocation8 + $0x2324] ss:$24 sps:$4 sm:$0xff]  }
 0x9b7   :  { %17152 = vmatprep.subr.bf16.mxu0 %v21516_v5  ;;  %v21601_v5 = vld [vmem:[#allocation8 + $0x2320] ss:$24 sps:$4 sm:$0xff]  }
 0x9ba   :  { %17153 = vmatpush1.bf16.msra.mxu0 %v21514_v19  ;;  %v21606_v19 = vld [vmem:[#allocation8 + $0x2354] ss:$24 sps:$4 sm:$0xff]  }
 0x9bb   :  { %17154 = vmatprep.subr.bf16.mxu0 %v21519_v20  ;;  %v21604_v20 = vld [vmem:[#allocation8 + $0x2350] ss:$24 sps:$4 sm:$0xff]  }
 0x9be   :  { %17155 = vmatpush1.bf16.msra.mxu0 %v21517_v17  ;;  %v21609_v17 = vld [vmem:[#allocation8 + $0x2384] ss:$24 sps:$4 sm:$0xff]  }
 0x9bf   :  { %17167 = vmatprep.subr.bf16.mxu0 %v21522_v27  ;;  %v21607_v27 = vld [vmem:[#allocation8 + $0x2380] ss:$24 sps:$4 sm:$0xff]  }
 0x9c1   :  { %17157 = vmatmul.mubr.bf16.vlgmr.msra.gmra.mrb[20].mxu0 %v22070_v32  ;;  %v21535_v32 = vld [vmem:[#allocation8 + $0x1f00] ss:$24 sps:$4 sm:$0xff]  }
 0x9c2   :  { %17168 = vmatpush1.bf16.msra.mxu0 %v21520_v26  ;;  %17199 = vmatprep.mubr.bf16.mxu0 %v22014_v47  ;;  %v21538_v47 = vld [vmem:[#allocation8 + $0x1f30] ss:$24 sps:$4 sm:$0xff]   ;;  %v21623_v26 = vld [vmem:[#allocation10] sm:$0x3f] }
 0x9c3   :  { %17169 = vmatprep.subr.bf16.mxu0 %v21525_v31  ;;  %v9926_v31 = vrot.slane %v21623_v26, %v21940_v63  ;;  %v9934_v63 = vrot.slane %v21623_v26, %v21946_v3 }
 0x9c6   :  { %17170 = vmatpush1.bf16.msra.mxu0 %v21523_v35  ;;  %v21612_v35 = vld [vmem:[#allocation8 + $0x23b4] ss:$24 sps:$4 sm:$0xff]  }
 0x9c7   :  { %17171 = vmatprep.subr.bf16.mxu0 %v21528_v40  ;;  %v9930_v40 = vrot.slane %v21623_v26, %v21943_v1  ;;  %v9938_v1 = vrot.slane %v21623_v26, %v21949_v11 }
 0x9ca   :  { %17172 = vmatpush1.bf16.msra.mxu0 %v21526_v42 }
 0x9cb   :  { %17173 = vmatprep.subr.bf16.mxu0 %v21531_v43  ;;  %v21610_v43 = vld [vmem:[#allocation8 + $0x23b0] ss:$24 sps:$4 sm:$0xff]  }
 0x9ce   :  { %17174 = vmatpush1.bf16.msra.mxu0 %v21529_v22 }
 0x9cf   :  { %17175 = vmatprep.subr.bf16.mxu0 %v21534_v13 }
 0x9d2   :  { %17176 = vmatpush1.bf16.msra.mxu0 %v21532_v41  ;;  %v21615_v41 = vld [vmem:[#allocation8 + $0x23e4] ss:$24 sps:$4 sm:$0xff]  }
 0x9d3   :  { %17177 = vmatprep.subr.bf16.mxu0 %v21537_v46 }
 0x9d6   :  { %17178 = vmatpush1.bf16.msra.mxu0 %v21535_v32 }
 0x9d7   :  { %17179 = vmatprep.subr.bf16.mxu0 %v21540_v33 }
 0x9da   :  { %17180 = vmatpush1.bf16.msra.mxu0 %v21538_v47 }
 0x9db   :  { %17181 = vmatprep.subr.bf16.mxu0 %v21543_v49 }
 0x9de   :  { %17182 = vmatpush1.bf16.msra.mxu0 %v21541_v14  ;;  %v21613_v14 = vld [vmem:[#allocation8 + $0x23e0] ss:$24 sps:$4 sm:$0xff]  }
 0x9df   :  { %17183 = vmatprep.subr.bf16.mxu0 %v21546_v23 }
 0x9e2   :  { %17184 = vmatpush1.bf16.msra.mxu0 %v21544_v59 }
 0x9e3   :  { %17185 = vmatprep.subr.bf16.mxu0 %v21549_v29 }
 0x9e6   :  { %17186 = vmatpush1.bf16.msra.mxu0 %v21547_v34 }
 0x9e7   :  { %17187 = vmatprep.subr.bf16.mxu0 %v21552_v53 }
 0x9ea   :  { %17188 = vmatpush1.bf16.msra.mxu0 %v21550_v61 }
 0x9eb   :  { %17189 = vmatprep.subr.bf16.mxu0 %v21555_v54 }
 0x9ee   :  { %17190 = vmatpush1.bf16.msra.mxu0 %v21553_v51 }
 0x9ef   :  { %17191 = vmatprep.subr.bf16.mxu0 %v21558_v57 }
 0x9f2   :  { %17192 = vmatpush1.bf16.msra.mxu0 %v21556_v62 }
 0x9f3   :  { %17193 = vmatprep.subr.bf16.mxu0 %v21561_v56 }
 0x9f6   :  { %17194 = vmatpush1.bf16.msra.mxu0 %v21559_v44 }
 0x9f7   :  { %17195 = vmatprep.subr.bf16.mxu0 %v21564_v48 }
 0x9fa   :  { %17196 = vmatpush1.bf16.msra.mxu0 %v21562_v30 }
 0x9fb   :  { %17197 = vmatprep.subr.bf16.mxu0 %v21567_v28 }
 0x9fe   :  { %17198 = vmatpush1.bf16.msra.mxu0 %v21565_v21 }
 0x9ff   :  { %17210 = vmatprep.subr.bf16.mxu0 %v21570_v6 }
 0xa01   :  { %17200 = vmatmul.mubr.bf16.vlgmr.msra.gmra.mrb[20].mxu0 %v22012_v55  ;;  %v21583_v55 = vld [vmem:[#allocation8 + $0x2200] ss:$24 sps:$4 sm:$0xff]  }
 0xa02   :  { %17211 = vmatpush1.bf16.msra.mxu0 %v21568_v60  ;;  %17242 = vmatprep.mubr.bf16.mxu0 %v22090_v45  ;;  %v21586_v45 = vld [vmem:[#allocation8 + $0x2230] ss:$24 sps:$4 sm:$0xff]  }
 0xa03   :  { %17212 = vmatprep.subr.bf16.mxu0 %v21573_v4 }
 0xa06   :  { %17213 = vmatpush1.bf16.msra.mxu0 %v21571_v7 }
 0xa07   :  { %17214 = vmatprep.subr.bf16.mxu0 %v21576_v37 }
 0xa0a   :  { %17215 = vmatpush1.bf16.msra.mxu0 %v21574_v39 }
 0xa0b   :  { %17216 = vmatprep.subr.bf16.mxu0 %v21579_v36 }
 0xa0e   :  { %17217 = vmatpush1.bf16.msra.mxu0 %v21577_v15 }
 0xa0f   :  { %17218 = vmatprep.subr.bf16.mxu0 %v21582_v58 }
 0xa12   :  { %17219 = vmatpush1.bf16.msra.mxu0 %v21580_v8 }
 0xa13   :  { %17220 = vmatprep.subr.bf16.mxu0 %v21585_v9 }
 0xa16   :  { %17221 = vmatpush1.bf16.msra.mxu0 %v21583_v55 }
 0xa17   :  { %17222 = vmatprep.subr.bf16.mxu0 %v21588_v2 }
 0xa1a   :  { %17223 = vmatpush1.bf16.msra.mxu0 %v21586_v45 }
 0xa1b   :  { %17224 = vmatprep.subr.bf16.mxu0 %v21591_v25 }
 0xa1e   :  { %17225 = vmatpush1.bf16.msra.mxu0 %v21589_v52 }
 0xa1f   :  { %17226 = vmatprep.subr.bf16.mxu0 %v21594_v24 }
 0xa22   :  { %17227 = vmatpush1.bf16.msra.mxu0 %v21592_v10 }
 0xa23   :  { %17228 = vmatprep.subr.bf16.mxu0 %v21597_v38 }
 0xa26   :  { %17229 = vmatpush1.bf16.msra.mxu0 %v21595_v12 }
 0xa27   :  { %17230 = vmatprep.subr.bf16.mxu0 %v21600_v50 }
 0xa2a   :  { %17231 = vmatpush1.bf16.msra.mxu0 %v21598_v16 }
 0xa2b   :  { %17232 = vmatprep.subr.bf16.mxu0 %v21603_v18 }
 0xa2e   :  { %17233 = vmatpush1.bf16.msra.mxu0 %v21601_v5 }
 0xa2f   :  { %17234 = vmatprep.subr.bf16.mxu0 %v21606_v19 }
 0xa32   :  { %17235 = vmatpush1.bf16.msra.mxu0 %v21604_v20 }
 0xa33   :  { %17236 = vmatprep.subr.bf16.mxu0 %v21609_v17 }
 0xa36   :  { %17237 = vmatpush1.bf16.msra.mxu0 %v21607_v27  ;;  %v16728_v42 = vpop.f32.mrb[32].mxu1 }
 0xa37   :  { %v19640_v22 = vadd.f32 %v16728_v42, %v9926_v31  ;;  %v16730_v13 = vpop.f32.mrb[33].mxu1  ;;  %17238 = vmatprep.subr.bf16.mxu0 %v21612_v35 }
 0xa38   :  { %v19641_v46 = vadd.f32 %v16730_v13, %v9930_v40  ;;  %v16732_v32 = vpop.f32.mrb[34].mxu1 }
 0xa39   :  { %17255 = vst [vmem:[#allocation11 + $0x10] sm:$0xff] %v19640_v22  ;;  %v19642_v33 = vadd.f32 %v16732_v32, %v9926_v31  ;;  %v16734_v47 = vpop.f32.mrb[35].mxu1 }
 0xa3a   :  { %17256 = vst [vmem:[#allocation11 + $0x18] sm:$0xff] %v19641_v46  ;;  %v19643_v49 = vadd.f32 %v16734_v47, %v9930_v40  ;;  %17239 = vmatpush1.bf16.msra.mxu0 %v21610_v43 }
 0xa3b   :  { %17261 = vst [vmem:[#allocation11 + $0x40] sm:$0xff] %v19642_v33  ;;  %17240 = vmatprep.subr.bf16.mxu0 %v21615_v41 }
 0xa3c   :  { %17262 = vst [vmem:[#allocation11 + $0x48] sm:$0xff] %v19643_v49 }
 0xa3e   :  { %17241 = vmatpush1.bf16.msra.mxu0 %v21613_v14 }
 0xa41   :  { %17243 = vmatmul.mubr.bf16.vlgmr.msra.gmra.mrb[20].mxu0 %v22088_v0 }
 0xb14   :  { %v17244_v23 = vpop.f32.mrb[20].mxu0 }
 0xb15   :  { %v19644_v59 = vadd.f32 %v17244_v23, %v9934_v63  ;;  %v17246_v29 = vpop.f32.mrb[21].mxu0 }
 0xb16   :  { %v19645_v34 = vadd.f32 %v17246_v29, %v9938_v1  ;;  %v17248_v53 = vpop.f32.mrb[22].mxu0 }
 0xb17   :  { %17257 = vst [vmem:[#allocation11 + $0x20] sm:$0xff] %v19644_v59  ;;  %v19646_v61 = vadd.f32 %v17248_v53, %v9934_v63  ;;  %v17250_v54 = vpop.f32.mrb[23].mxu0 }
 0xb18   :  { %17258 = vst [vmem:[#allocation11 + $0x28] sm:$0xff] %v19645_v34  ;;  %v19647_v51 = vadd.f32 %v17250_v54, %v9938_v1 }
 0xb19   :  { %17263 = vst [vmem:[#allocation11 + $0x50] sm:$0xff] %v19646_v61 }
 0xb1a   :  { %17264 = vst [vmem:[#allocation11 + $0x58] sm:$0xff] %v19647_v51 }
 0xb1b   :  { %21745 = shalt.err (!%p21742_p2)
}
 0xb1c   :  { %s21746_s9 = scalar_lea.hbm %s22161_s5, 1536 }
 0xb1d   :  { %p21747_p3 = scmp.ne.s32.totalorder %s22161_s5, %s21746_s9  ;;  %p21750_p4 = scmp.lt.u32.totalorder %s21746_s9, %s22161_s5 }
 0xb1f   :  { %p21752_p5 = pnand %p21750_p4, %p21747_p3 }
 0xb21   :  { %21755 = shalt.err (!%p21752_p5)
}
 0xb22   :  { %17276 = dma.vmem_to_hbm [thread:$0]  %s17271_s29, 1536, %s22161_s5, [#allocation4], %s21771_s3, %s21771_s3, %s21772_s30  }
 0xb23   :  { %21762 = dma.done.wait [#allocation4], 1536  }
 0xb24   :  { %21763 = vsyncadd [#allocation4], 4294965760 }
 0xb25   :  { %17280 = vsyncpa [#allocation3], 1 }
 0xb26   :  { %17281 = vsyncpa [#allocation6], 1 }
 0xb27   :  { %17282 = vsyncpa [#allocation9], 1 }
 0xb28   :  { %17283 = vsyncpa [#allocation4], 1 }

</bundles_post_ra>
